<compile_context>
chip_gen: v7x
topology: tpu7x:2x2x1
jax: 0.10.0
libtpu: 0.0.40
codegen_flags: <defaults>
</compile_context>

<pallas_src>
import jax
import jax.numpy as jnp
from jax import lax
from jax.experimental import pallas as pl
from jax.experimental.pallas import tpu as pltpu


def text_encoder_kernel(x_ref, wih_ref, whh_ref, b_ref, h_ref, gates_ref):
    # x_ref     : (S*TB, E)  bf16  time-major embedded tokens for this batch tile
    #                              (row = t*TB + b_within_tile)
    # wih_ref   : (E, 4H)    bf16  input->gates weights  (transpose of torch layout)
    # whh_ref   : (H, 4H)    bf16  hidden->gates weights (transpose of torch layout)
    # b_ref     : (1, 4H)    f32   b_ih + b_hh
    # h_ref     : (TB, H)    f32   output: final LSTM hidden state per sequence
    # gates_ref : (S*TB, 4H) f32   VMEM scratch holding the batched input projection
    TB, H = h_ref.shape
    S = x_ref.shape[0] // TB

    # ---- Input projection for ALL timesteps in one big MXU matmul ----------
    gates_ref[...] = (
        jnp.dot(x_ref[...], wih_ref[...], preferred_element_type=jnp.float32)
        + b_ref[...]
    )

    w_hh = whh_ref[...]  # (H, 4H) bf16, kept in vregs across the recurrence

    def sigmoid(z):
        # single EUP push per call (vs exp + divide)
        return 0.5 * (jnp.tanh(0.5 * z) + 1.0)

    # ---- Sequential LSTM recurrence (fori_loop: flat vreg pressure in S) ---
    def step(t, carry):
        h, c = carry
        row = pl.multiple_of(t * TB, TB)  # TB is a multiple of 8 -> aligned slice
        g = gates_ref[pl.ds(row, TB), :] + jnp.dot(
            h.astype(w_hh.dtype), w_hh, preferred_element_type=jnp.float32
        )
        # PyTorch gate order: i, f, g, o
        i_g = sigmoid(g[:, 0 * H:1 * H])
        f_g = sigmoid(g[:, 1 * H:2 * H])
        c_g = jnp.tanh(g[:, 2 * H:3 * H])
        o_g = sigmoid(g[:, 3 * H:4 * H])
        c_new = f_g * c + i_g * c_g
        h_new = o_g * jnp.tanh(c_new)
        return h_new, c_new

    h0 = jnp.zeros((TB, H), jnp.float32)
    c0 = jnp.zeros((TB, H), jnp.float32)
    h_fin, _ = lax.fori_loop(0, S, step, (h0, c0))

    h_ref[...] = h_fin.astype(h_ref.dtype)


def _const_spec(shape):
    """BlockSpec for a grid-constant operand, single-buffered when supported."""
    index_map = lambda i: (0,) * len(shape)
    try:
        return pl.BlockSpec(shape, index_map, pipeline_mode=pl.Buffered(1))
    except TypeError:  # older jax without pipeline_mode kwarg
        return pl.BlockSpec(shape, index_map)


def simple_text_encoder(input_ids, emb_table, w_ih, w_hh, b_ih, b_hh, *, tile_b=256):
    """input_ids: (B, S) int.  emb_table: (V, E).  w_ih: (E, 4H).  w_hh: (H, 4H).
    b_ih, b_hh: (4H,).  Returns the final LSTM hidden state, shape (B, H) f32."""
    B, S = input_ids.shape
    V, E = emb_table.shape
    H = w_hh.shape[0]
    G = 4 * H
    assert w_ih.shape == (E, G) and w_hh.shape == (H, G)

    # ---- Batch tile selection ----------------------------------------------
    # Multiples of 8 (sublane); big tiles for MXU row utilization on h@W_hh;
    # >= 2 grid steps when B allows (keeps both v7x TensorCores busy).
    if B <= 8:
        tb = 8
    else:
        half = (((B + 1) // 2) + 7) // 8 * 8
        tb = max(8, min((tile_b // 8) * 8, half))

    def _bytes_needed(tb_):
        return (
            2 * (S * tb_ * E * 2)      # embedded tile, double-buffered bf16
            + E * G * 2 + H * G * 2    # single-buffered weights (bf16)
            + G * 4                    # bias
            + 2 * (tb_ * H * 4)        # output tile, double-buffered f32
            + S * tb_ * G * 4          # gates scratch f32
        )

    # Shrink the tile until the budget fits comfortably on v7x (64 MiB VMEM).
    while tb > 8 and _bytes_needed(tb) > 48 * 1024 * 1024:
        tb -= 8

    n_tiles = (B + tb - 1) // tb
    Bp = n_tiles * tb

    ids = jnp.clip(input_ids.astype(jnp.int32), 0, V - 1)  # explicit bounds clamp

    # ---- Embedding gather in XLA (no one-hot, no resident vocab table) -----
    embedded = jnp.take(emb_table, ids, axis=0).astype(jnp.bfloat16)  # (B, S, E)
    if Bp != B:
        embedded = jnp.pad(embedded, ((0, Bp - B), (0, 0), (0, 0)))
    # Time-major within each batch tile: row = tile*(S*tb) + t*tb + b_in_tile.
    emb2d = (
        embedded.reshape(n_tiles, tb, S, E)
        .transpose(0, 2, 1, 3)
        .reshape(n_tiles * S * tb, E)
    )

    w_ih_b = w_ih.astype(jnp.bfloat16)
    w_hh_b = w_hh.astype(jnp.bfloat16)
    bias = (b_ih + b_hh).reshape(1, G).astype(jnp.float32)

    vmem_limit = int(min(max(_bytes_needed(tb) * 3 // 2, 16 * 1024 * 1024),
                         100 * 1024 * 1024))

    out = pl.pallas_call(
        text_encoder_kernel,
        out_shape=jax.ShapeDtypeStruct((Bp, H), jnp.float32),
        grid_spec=pltpu.PrefetchScalarGridSpec(
            num_scalar_prefetch=0,
            grid=(n_tiles,),
            in_specs=[
                pl.BlockSpec((S * tb, E), lambda i: (i, 0)),  # embedded (per tile)
                _const_spec((E, G)),                          # W_ih (resident, 1-buf)
                _const_spec((H, G)),                          # W_hh (resident, 1-buf)
                _const_spec((1, G)),                          # bias  (resident, 1-buf)
            ],
            out_specs=pl.BlockSpec((tb, H), lambda i: (i, 0)),
            scratch_shapes=[pltpu.VMEM((S * tb, G), jnp.float32)],
        ),
        compiler_params=pltpu.CompilerParams(
            dimension_semantics=("parallel",),
            vmem_limit_bytes=vmem_limit,
        ),
    )(emb2d, w_ih_b, w_hh_b, bias)

    return out[:B]


def reference_encoder(input_ids, emb_table, w_ih, w_hh, b_ih, b_hh):
    """Pure-JAX f32 reference with identical semantics (embedding + LSTM final h)."""
    emb = emb_table[input_ids]                      # (B, S, E)
    B, S, _ = emb.shape
    H = w_hh.shape[0]
    h = jnp.zeros((B, H), jnp.float32)
    c = jnp.zeros((B, H), jnp.float32)
    bias = b_ih + b_hh
    for t in range(S):
        g = emb[:, t, :] @ w_ih + h @ w_hh + bias
        i_g = 1.0 / (1.0 + jnp.exp(-g[:, 0 * H:1 * H]))
        f_g = 1.0 / (1.0 + jnp.exp(-g[:, 1 * H:2 * H]))
        c_g = jnp.tanh(g[:, 2 * H:3 * H])
        o_g = 1.0 / (1.0 + jnp.exp(-g[:, 3 * H:4 * H]))
        c = f_g * c + i_g * c_g
        h = o_g * jnp.tanh(c)
    return h


if __name__ == "__main__":
    # Small shapes consistent with the module (defaults: embedding/hidden = 512).
    vocab_size, embedding_dim, hidden_dim = 256, 512, 512
    batch, seq = 2, 8

    key = jax.random.PRNGKey(0)
    k_ids, k_emb, k_wih, k_whh, k_bih, k_bhh = jax.random.split(key, 6)

    # Pre-tokenized, padded token ids (tokenizer itself is host-side / untranslatable).
    input_ids = jax.random.randint(k_ids, (batch, seq), 0, vocab_size, dtype=jnp.int32)

    # Parameters. Weights are stored as (in, out), i.e. transpose of PyTorch's
    # (4H, in) LSTM layout, gate order [i, f, g, o] as in torch.nn.LSTM.
    emb_table = jax.random.normal(k_emb, (vocab_size, embedding_dim), jnp.float32) * 0.1
    w_ih = jax.random.normal(k_wih, (embedding_dim, 4 * hidden_dim), jnp.float32) * 0.05
    w_hh = jax.random.normal(k_whh, (hidden_dim, 4 * hidden_dim), jnp.float32) * 0.05
    b_ih = jax.random.normal(k_bih, (4 * hidden_dim,), jnp.float32) * 0.05
    b_hh = jax.random.normal(k_bhh, (4 * hidden_dim,), jnp.float32) * 0.05

    hidden = simple_text_encoder(input_ids, emb_table, w_ih, w_hh, b_ih, b_hh)
    jax.block_until_ready(hidden)

    ref = reference_encoder(input_ids, emb_table, w_ih, w_hh, b_ih, b_hh)
    assert hidden.shape == (batch, hidden_dim)
    # bf16 weights with f32 accumulation vs f32 reference -> loosened tolerance.
    assert jnp.allclose(hidden, ref, atol=2e-2, rtol=2e-2), "mismatch vs reference"

    print("KERNEL_OK")
</pallas_src>

<mosaic_0001>
module attributes {stable_mosaic.version = 11 : i64} {
  func.func @text_encoder_kernel(%arg0: i32, %arg1: memref<64x512xbf16, #tpu.memory_space<vmem>>, %arg2: memref<512x2048xbf16, #tpu.memory_space<vmem>>, %arg3: memref<512x2048xbf16, #tpu.memory_space<vmem>>, %arg4: memref<1x2048xf32, #tpu.memory_space<vmem>>, %arg5: memref<8x512xf32, #tpu.memory_space<vmem>>, %arg6: memref<64x2048xf32, #tpu.memory_space<vmem>>) attributes {dimension_semantics = [#tpu.dimension_semantics<parallel>], iteration_bounds = array<i64: 1>, scalar_prefetch = 0 : i64, scratch_operands = 1 : i64, tpu.core_type = #tpu.core_type<tc>, window_params = [{transform_indices = @transform_0, window_bounds = array<i64: 64, 512>}, {pipeline_mode = #tpu.pipeline_mode<synchronous>, transform_indices = @transform_1, window_bounds = array<i64: 512, 2048>}, {pipeline_mode = #tpu.pipeline_mode<synchronous>, transform_indices = @transform_2, window_bounds = array<i64: 512, 2048>}, {pipeline_mode = #tpu.pipeline_mode<synchronous>, transform_indices = @transform_3, window_bounds = array<i64: 1, 2048>}, {transform_indices = @transform_4, window_bounds = array<i64: 8, 512>}]} {
    %c0 = arith.constant 0 : index
    %c0_0 = arith.constant 0 : index
    %0 = vector.load %arg1[%c0, %c0_0] : memref<64x512xbf16, #tpu.memory_space<vmem>>, vector<64x512xbf16>
    %c0_1 = arith.constant 0 : index
    %c0_2 = arith.constant 0 : index
    %1 = vector.load %arg2[%c0_1, %c0_2] : memref<512x2048xbf16, #tpu.memory_space<vmem>>, vector<512x2048xbf16>
    %cst = arith.constant dense<0.000000e+00> : vector<64x2048xf32>
    %2 = tpu.matmul %0, %1, %cst {dimension_numbers = #tpu.dot_dimension_numbers<[1], [0], [0], [1], [0, 0, 1, 1], [], []>} : vector<64x512xbf16>, vector<512x2048xbf16>, vector<64x2048xf32> -> vector<64x2048xf32>
    %c0_3 = arith.constant 0 : index
    %c0_4 = arith.constant 0 : index
    %3 = vector.load %arg4[%c0_3, %c0_4] : memref<1x2048xf32, #tpu.memory_space<vmem>>, vector<1x2048xf32>
    %4 = vector.broadcast %3 : vector<1x2048xf32> to vector<64x2048xf32>
    %5 = arith.addf %2, %4 : vector<64x2048xf32>
    %c0_5 = arith.constant 0 : index
    %c0_6 = arith.constant 0 : index
    %6 = vector.load %arg6[%c0_5, %c0_6] : memref<64x2048xf32, #tpu.memory_space<vmem>>, vector<64x2048xf32>
    tpu.vector_store %arg6[%c0_5, %c0_6], %5 {strides = array<i32>} : memref<64x2048xf32, #tpu.memory_space<vmem>>, vector<64x2048xf32>,
    %c0_7 = arith.constant 0 : index
    %c0_8 = arith.constant 0 : index
    %7 = vector.load %arg3[%c0_7, %c0_8] : memref<512x2048xbf16, #tpu.memory_space<vmem>>, vector<512x2048xbf16>
    %cst_9 = arith.constant 0.000000e+00 : f32
    %8 = vector.broadcast %cst_9 : f32 to vector<8x512xf32>
    %cst_10 = arith.constant 0.000000e+00 : f32
    %9 = vector.broadcast %cst_10 : f32 to vector<8x512xf32>
    %c0_i32 = arith.constant 0 : i32
    %c8_i32 = arith.constant 8 : i32
    %10 = arith.addi %c0_i32, %c8_i32 : i32
    %c1_i32 = arith.constant 1 : i32
    %11:2 = scf.for %arg7 = %c0_i32 to %10 step %c1_i32 iter_args(%arg8 = %8, %arg9 = %9) -> (vector<8x512xf32>, vector<8x512xf32>)  : i32 {
      %c8_i32_14 = arith.constant 8 : i32
      %13 = arith.muli %arg7, %c8_i32_14 : i32
      %14 = tpu.assume_multiple %13, 8 : i32
      %15 = arith.index_cast %14 : i32 to index
      %c0_15 = arith.constant 0 : index
      %16 = vector.load %arg6[%15, %c0_15] : memref<64x2048xf32, #tpu.memory_space<vmem>>, vector<8x2048xf32>
      %17 = arith.truncf %arg8 : vector<8x512xf32> to vector<8x512xbf16>
      %cst_16 = arith.constant dense<0.000000e+00> : vector<8x2048xf32>
      %18 = tpu.matmul %17, %7, %cst_16 {dimension_numbers = #tpu.dot_dimension_numbers<[1], [0], [0], [1], [0, 0, 1, 1], [], []>} : vector<8x512xbf16>, vector<512x2048xbf16>, vector<8x2048xf32> -> vector<8x2048xf32>
      %19 = arith.addf %16, %18 : vector<8x2048xf32>
      %20 = vector.extract_strided_slice %19 {offsets = [0, 0], sizes = [8, 512], strides = [1, 1]} : vector<8x2048xf32> to vector<8x512xf32>
      %cst_17 = arith.constant 5.000000e-01 : f32
      %21 = vector.broadcast %cst_17 : f32 to vector<8x512xf32>
      %22 = arith.mulf %21, %20 : vector<8x512xf32>
      %23 = math.tanh %22 : vector<8x512xf32>
      %cst_18 = arith.constant 1.000000e+00 : f32
      %24 = vector.broadcast %cst_18 : f32 to vector<8x512xf32>
      %25 = arith.addf %23, %24 : vector<8x512xf32>
      %cst_19 = arith.constant 5.000000e-01 : f32
      %26 = vector.broadcast %cst_19 : f32 to vector<8x512xf32>
      %27 = arith.mulf %26, %25 : vector<8x512xf32>
      %28 = vector.extract_strided_slice %19 {offsets = [0, 512], sizes = [8, 512], strides = [1, 1]} : vector<8x2048xf32> to vector<8x512xf32>
      %cst_20 = arith.constant 5.000000e-01 : f32
      %29 = vector.broadcast %cst_20 : f32 to vector<8x512xf32>
      %30 = arith.mulf %29, %28 : vector<8x512xf32>
      %31 = math.tanh %30 : vector<8x512xf32>
      %cst_21 = arith.constant 1.000000e+00 : f32
      %32 = vector.broadcast %cst_21 : f32 to vector<8x512xf32>
      %33 = arith.addf %31, %32 : vector<8x512xf32>
      %cst_22 = arith.constant 5.000000e-01 : f32
      %34 = vector.broadcast %cst_22 : f32 to vector<8x512xf32>
      %35 = arith.mulf %34, %33 : vector<8x512xf32>
      %36 = vector.extract_strided_slice %19 {offsets = [0, 1024], sizes = [8, 512], strides = [1, 1]} : vector<8x2048xf32> to vector<8x512xf32>
      %37 = math.tanh %36 : vector<8x512xf32>
      %38 = vector.extract_strided_slice %19 {offsets = [0, 1536], sizes = [8, 512], strides = [1, 1]} : vector<8x2048xf32> to vector<8x512xf32>
      %cst_23 = arith.constant 5.000000e-01 : f32
      %39 = vector.broadcast %cst_23 : f32 to vector<8x512xf32>
      %40 = arith.mulf %39, %38 : vector<8x512xf32>
      %41 = math.tanh %40 : vector<8x512xf32>
      %cst_24 = arith.constant 1.000000e+00 : f32
      %42 = vector.broadcast %cst_24 : f32 to vector<8x512xf32>
      %43 = arith.addf %41, %42 : vector<8x512xf32>
      %cst_25 = arith.constant 5.000000e-01 : f32
      %44 = vector.broadcast %cst_25 : f32 to vector<8x512xf32>
      %45 = arith.mulf %44, %43 : vector<8x512xf32>
      %46 = arith.mulf %35, %arg9 : vector<8x512xf32>
      %47 = arith.mulf %27, %37 : vector<8x512xf32>
      %48 = arith.addf %46, %47 : vector<8x512xf32>
      %49 = math.tanh %48 : vector<8x512xf32>
      %50 = arith.mulf %45, %49 : vector<8x512xf32>
      scf.yield %50, %48 : vector<8x512xf32>, vector<8x512xf32>
    }
    %c8_i32_11 = arith.constant 8 : i32
    %c0_12 = arith.constant 0 : index
    %c0_13 = arith.constant 0 : index
    %12 = vector.load %arg5[%c0_12, %c0_13] : memref<8x512xf32, #tpu.memory_space<vmem>>, vector<8x512xf32>
    tpu.vector_store %arg5[%c0_12, %c0_13], %11#0 {strides = array<i32>} : memref<8x512xf32, #tpu.memory_space<vmem>>, vector<8x512xf32>,
    return
  }
  func.func @transform_0(%arg0: i32) -> (i32, i32) {
    %c0_i32 = arith.constant 0 : i32
    %c0_i32_0 = arith.constant 0 : i32
    return %arg0, %c0_i32 : i32, i32
  }
  func.func @transform_1(%arg0: i32) -> (i32, i32) {
    %c0_i32 = arith.constant 0 : i32
    %c0_i32_0 = arith.constant 0 : i32
    %c0_i32_1 = arith.constant 0 : i32
    return %c0_i32, %c0_i32_0 : i32, i32
  }
  func.func @transform_2(%arg0: i32) -> (i32, i32) {
    %c0_i32 = arith.constant 0 : i32
    %c0_i32_0 = arith.constant 0 : i32
    %c0_i32_1 = arith.constant 0 : i32
    return %c0_i32, %c0_i32_0 : i32, i32
  }
  func.func @transform_3(%arg0: i32) -> (i32, i32) {
    %c0_i32 = arith.constant 0 : i32
    %c0_i32_0 = arith.constant 0 : i32
    %c0_i32_1 = arith.constant 0 : i32
    return %c0_i32, %c0_i32_0 : i32, i32
  }
  func.func @transform_4(%arg0: i32) -> (i32, i32) {
    %c0_i32 = arith.constant 0 : i32
    %c0_i32_0 = arith.constant 0 : i32
    return %arg0, %c0_i32 : i32, i32
  }
}

</mosaic_0001>

<bundles_post_ra>
// kernel: tpu_custom_call.1
= control target key start
LH: loop header
LB: loop body
LE: loop exit
PB: predicated region body
PF: predicated region fallthrough
CT: control target
= control target key end

     0   :  { %9 = vsyncpa [#allocation4], 0  ;;  %s12969_s0 = inlined_call_operand.hbm [shape: bf16[64,512], index: 0, kind: input, shape index: {}]   ;;  %s12970_s1 = inlined_call_operand.hbm [shape: bf16[512,2048], index: 1, kind: input, shape index: {}]   ;;  %s12971_s2 = inlined_call_operand.hbm [shape: bf16[512,2048], index: 2, kind: input, shape index: {}]   ;;  %s12972_s3 = inlined_call_operand.hbm [shape: f32[1,2048], index: 3, kind: input, shape index: {}]   ;;  %s12973_s4 = inlined_call_operand.hbm [shape: f32[8,512], index: 4, kind: output, shape index: {}]  }
   0x1   :  { %10 = vsyncpa [#allocation7], 0 }
   0x2   :  { %11 = vsyncpa [#allocation10], 0 }
   0x3   :  { %12 = vsyncpa [#allocation5], 0  ;;  %s10188_s15 = smov [#allocation6]   ;;  %s9998_s19 = scalar_lea.hbm %s12970_s1, 65536 }
   0x4   :  { %s30_s16 = sshll.u32 %s10188_s15, 4  ;;  %p9999_p0 = scmp.ne.s32.totalorder %s12970_s1, %s9998_s19  ;;  %s31_s16 = int_to_ptr.vmem [resolvable:$true] %s30_s16 }
   0x5   :  { %p10002_p1 = scmp.lt.u32.totalorder %s9998_s19, %s12970_s1 }
   0x7   :  { %p10004_p2 = pnand %p10002_p1, %p9999_p0 }
   0x9   :  { %10007 = shalt.err (!%p10004_p2)
}
   0xa   :  { %s10008_s24 = scalar_lea.vmem %s31_s16, 65536  ;;  %p10013_p4 = scmp.lt.s32.totalorder %s31_s16, %s31_s16 }
   0xb   :  { %p10009_p3 = scmp.ne.s32.totalorder %s31_s16, %s10008_s24  ;;  %p10014_p5 = scmp.lt.s32.totalorder %s10008_s24, %s10008_s24 }
   0xd   :  { %p10015_p6 = por %p10014_p5, %p10013_p4 }
   0xf   :  { %p10016_p7 = pnand %p10015_p6, %p10009_p3 }
  0x11   :  { %10019 = shalt.err (!%p10016_p7)
}
  0x12   :  { %s10189_s25 = smov 1024   ;;  %s10190_s26 = smov 64  }
  0x13   :  { %36 = dma.hbm_to_vmem [thread:$0]  %s12970_s1, 65536, %s31_s16, [#allocation7], %s10189_s25, %s10189_s25, %s10190_s26  }
  0x14   :  { %s10191_s29 = smov [#allocation3]   ;;  %s10020_s7 = scalar_lea.hbm %s12969_s0, 2048 }
  0x15   :  { %s18_s30 = sshll.u32 %s10191_s29, 4  ;;  %p10021_p8 = scmp.ne.s32.totalorder %s12969_s0, %s10020_s7  ;;  %s19_s30 = int_to_ptr.vmem [resolvable:$true] %s18_s30 }
  0x16   :  { %p10024_p9 = scmp.lt.u32.totalorder %s10020_s7, %s12969_s0 }
  0x18   :  { %p10026_p10 = pnand %p10024_p9, %p10021_p8 }
  0x1a   :  { %10029 = shalt.err (!%p10026_p10)
}
  0x1b   :  { %s10030_s12 = scalar_lea.vmem %s19_s30, 2048  ;;  %p10035_p12 = scmp.lt.s32.totalorder %s19_s30, %s19_s30 }
  0x1c   :  { %p10031_p11 = scmp.ne.s32.totalorder %s19_s30, %s10030_s12  ;;  %p10036_p13 = scmp.lt.s32.totalorder %s10030_s12, %s10030_s12 }
  0x1e   :  { %p10037_p0 = por %p10036_p13, %p10035_p12 }
  0x20   :  { %p10038_p1 = pnand %p10037_p0, %p10031_p11 }
  0x22   :  { %10041 = shalt.err (!%p10038_p1)
}
  0x23   :  { %s10192_s1 = smov 256   ;;  %s10193_s13 = smov 16  }
  0x24   :  { %24 = dma.hbm_to_vmem [thread:$0]  %s12969_s0, 2048, %s19_s30, [#allocation4], %s10192_s1, %s10192_s1, %s10193_s13  }
  0x25   :  { %s10194_s16 = smov [#allocation8]   ;;  %s10195_s18 = smov [#allocation9]  }
  0x26   :  { %s42_s17 = sshll.u32 %s10194_s16, 4  ;;  %s55_s19 = sshll.u32 %s10195_s18, 4  ;;  %s43_s17 = int_to_ptr.vmem [resolvable:$true] %s42_s17  ;;  %s56_s19 = int_to_ptr.vmem [resolvable:$true] %s55_s19 }
  0x27   :  { %s10042_s22 = scalar_lea.hbm %s12971_s2, 65536 }
  0x28   :  { %p10043_p2 = scmp.ne.s32.totalorder %s12971_s2, %s10042_s22  ;;  %p10046_p3 = scmp.lt.u32.totalorder %s10042_s22, %s12971_s2 }
  0x2a   :  { %p10048_p4 = pnand %p10046_p3, %p10043_p2 }
  0x2c   :  { %10051 = shalt.err (!%p10048_p4)
}
  0x2d   :  { %s10052_s0 = scalar_lea.vmem %s43_s17, 65536  ;;  %p10057_p6 = scmp.lt.s32.totalorder %s43_s17, %s43_s17 }
  0x2e   :  { %p10053_p5 = scmp.ne.s32.totalorder %s43_s17, %s10052_s0  ;;  %p10058_p7 = scmp.lt.s32.totalorder %s10052_s0, %s10052_s0 }
  0x30   :  { %p10059_p8 = por %p10058_p7, %p10057_p6 }
  0x32   :  { %p10060_p9 = pnand %p10059_p8, %p10053_p5 }
  0x34   :  { %10063 = shalt.err (!%p10060_p9)
}
  0x35   :  { %48 = dma.hbm_to_vmem [thread:$0]  %s12971_s2, 65536, %s43_s17, [#allocation7], %s10189_s25, %s10189_s25, %s10190_s26  }
  0x36   :  { %s10064_s7 = scalar_lea.hbm %s12972_s3, 256 }
  0x37   :  { %p10065_p10 = scmp.ne.s32.totalorder %s12972_s3, %s10064_s7  ;;  %p10068_p11 = scmp.lt.u32.totalorder %s10064_s7, %s12972_s3 }
  0x39   :  { %p10070_p12 = pnand %p10068_p11, %p10065_p10 }
  0x3b   :  { %10073 = shalt.err (!%p10070_p12)
}
  0x3c   :  { %s10074_s12 = scalar_lea.vmem %s56_s19, 256  ;;  %p10079_p0 = scmp.lt.s32.totalorder %s56_s19, %s56_s19 }
  0x3d   :  { %p10075_p13 = scmp.ne.s32.totalorder %s56_s19, %s10074_s12  ;;  %p10080_p1 = scmp.lt.s32.totalorder %s10074_s12, %s10074_s12 }
  0x3f   :  { %p10081_p2 = por %p10080_p1, %p10079_p0 }
  0x41   :  { %p10082_p3 = pnand %p10081_p2, %p10075_p13 }
  0x43   :  { %10085 = shalt.err (!%p10082_p3)
}
  0x44   :  { %58 = dma.hbm_to_vmem [thread:$0]  %s12972_s3, 256, %s56_s19, [#allocation10]  }
  0x45   :  { %10144 = dma.done.wait [#allocation4], 2048  }
  0x46   :  { %10145 = vsyncadd [#allocation4], 4294965248 }
  0x47   :  { %10146 = dma.done.wait [#allocation7], 131072  }
  0x48   :  { %10147 = vsyncadd [#allocation7], 4294836224 }
  0x49   :  { %10148 = dma.done.wait [#allocation10], 256  }
  0x4a   :  { %10149 = vsyncadd [#allocation10], 4294967040  ;;  %v10276_v0 = vld [vmem:[#allocation8] sm:$0xff]  ;;  %v10278_v1 = vld [vmem:[#allocation8 + $0x8] sm:$0xff]  ;;  %s11786_s3 = smov 0  }
  0x4b   :  { %13946 = vst [vmem:[#allocation16_spill] sm:$0xff] %v10276_v0  ;;  %13947 = vst [vmem:[#allocation17_spill] sm:$0xff] %v10278_v1  ;;  %v10280_v2 = vld [vmem:[#allocation8 + $0x10] sm:$0xff]  ;;  %v10282_v3 = vld [vmem:[#allocation8 + $0x18] sm:$0xff] }
  0x4c   :  { %13948 = vst [vmem:[#allocation18_spill] sm:$0xff] %v10280_v2  ;;  %13949 = vst [vmem:[#allocation19_spill] sm:$0xff] %v10282_v3  ;;  %v10284_v4 = vld [vmem:[#allocation8 + $0x20] sm:$0xff]  ;;  %v10286_v5 = vld [vmem:[#allocation8 + $0x28] sm:$0xff] }
  0x4d   :  { %13950 = vst [vmem:[#allocation20_spill] sm:$0xff] %v10284_v4  ;;  %13951 = vst [vmem:[#allocation21_spill] sm:$0xff] %v10286_v5  ;;  %v10288_v6 = vld [vmem:[#allocation8 + $0x30] sm:$0xff]  ;;  %v10290_v7 = vld [vmem:[#allocation8 + $0x38] sm:$0xff] }
  0x4e   :  { %13952 = vst [vmem:[#allocation22_spill] sm:$0xff] %v10288_v6  ;;  %13953 = vst [vmem:[#allocation23_spill] sm:$0xff] %v10290_v7  ;;  %v10292_v8 = vld [vmem:[#allocation8 + $0x40] sm:$0xff]  ;;  %v10294_v9 = vld [vmem:[#allocation8 + $0x48] sm:$0xff] }
  0x4f   :  { %13954 = vst [vmem:[#allocation24_spill] sm:$0xff] %v10292_v8  ;;  %13955 = vst [vmem:[#allocation25_spill] sm:$0xff] %v10294_v9  ;;  %v10296_v10 = vld [vmem:[#allocation8 + $0x50] sm:$0xff]  ;;  %v10298_v11 = vld [vmem:[#allocation8 + $0x58] sm:$0xff] }
  0x50   :  { %13956 = vst [vmem:[#allocation26_spill] sm:$0xff] %v10296_v10  ;;  %13957 = vst [vmem:[#allocation27_spill] sm:$0xff] %v10298_v11  ;;  %v10300_v12 = vld [vmem:[#allocation8 + $0x60] sm:$0xff]  ;;  %v10302_v13 = vld [vmem:[#allocation8 + $0x68] sm:$0xff] }
  0x51   :  { %13958 = vst [vmem:[#allocation28_spill] sm:$0xff] %v10300_v12  ;;  %13959 = vst [vmem:[#allocation29_spill] sm:$0xff] %v10302_v13  ;;  %v10304_v14 = vld [vmem:[#allocation8 + $0x70] sm:$0xff]  ;;  %v10306_v15 = vld [vmem:[#allocation8 + $0x78] sm:$0xff] }
  0x52   :  { %13960 = vst [vmem:[#allocation30_spill] sm:$0xff] %v10304_v14  ;;  %13961 = vst [vmem:[#allocation31_spill] sm:$0xff] %v10306_v15  ;;  %v10308_v16 = vld [vmem:[#allocation8 + $0x80] sm:$0xff]  ;;  %v10310_v17 = vld [vmem:[#allocation8 + $0x88] sm:$0xff] }
  0x53   :  { %13962 = vst [vmem:[#allocation32_spill] sm:$0xff] %v10308_v16  ;;  %13963 = vst [vmem:[#allocation33_spill] sm:$0xff] %v10310_v17  ;;  %v10312_v18 = vld [vmem:[#allocation8 + $0x90] sm:$0xff]  ;;  %v10314_v19 = vld [vmem:[#allocation8 + $0x98] sm:$0xff] }
  0x54   :  { %13964 = vst [vmem:[#allocation34_spill] sm:$0xff] %v10312_v18  ;;  %13965 = vst [vmem:[#allocation35_spill] sm:$0xff] %v10314_v19  ;;  %v10316_v20 = vld [vmem:[#allocation8 + $0xa0] sm:$0xff]  ;;  %v10318_v21 = vld [vmem:[#allocation8 + $0xa8] sm:$0xff] }
  0x55   :  { %13966 = vst [vmem:[#allocation36_spill] sm:$0xff] %v10316_v20  ;;  %13967 = vst [vmem:[#allocation37_spill] sm:$0xff] %v10318_v21  ;;  %v10320_v22 = vld [vmem:[#allocation8 + $0xb0] sm:$0xff]  ;;  %v10322_v23 = vld [vmem:[#allocation8 + $0xb8] sm:$0xff] }
  0x56   :  { %13968 = vst [vmem:[#allocation38_spill] sm:$0xff] %v10320_v22  ;;  %13969 = vst [vmem:[#allocation39_spill] sm:$0xff] %v10322_v23  ;;  %v10324_v24 = vld [vmem:[#allocation8 + $0xc0] sm:$0xff]  ;;  %v10326_v25 = vld [vmem:[#allocation8 + $0xc8] sm:$0xff] }
  0x57   :  { %13970 = vst [vmem:[#allocation40_spill] sm:$0xff] %v10324_v24  ;;  %13971 = vst [vmem:[#allocation41_spill] sm:$0xff] %v10326_v25  ;;  %v10328_v26 = vld [vmem:[#allocation8 + $0xd0] sm:$0xff]  ;;  %v10330_v27 = vld [vmem:[#allocation8 + $0xd8] sm:$0xff] }
  0x58   :  { %13972 = vst [vmem:[#allocation42_spill] sm:$0xff] %v10328_v26  ;;  %13973 = vst [vmem:[#allocation43_spill] sm:$0xff] %v10330_v27  ;;  %v10332_v28 = vld [vmem:[#allocation8 + $0xe0] sm:$0xff]  ;;  %v10334_v29 = vld [vmem:[#allocation8 + $0xe8] sm:$0xff] }
  0x59   :  { %13974 = vst [vmem:[#allocation44_spill] sm:$0xff] %v10332_v28  ;;  %13975 = vst [vmem:[#allocation45_spill] sm:$0xff] %v10334_v29  ;;  %v10336_v30 = vld [vmem:[#allocation8 + $0xf0] sm:$0xff]  ;;  %v10338_v31 = vld [vmem:[#allocation8 + $0xf8] sm:$0xff] }
  0x5a   :  { %13976 = vst [vmem:[#allocation46_spill] sm:$0xff] %v10336_v30  ;;  %13977 = vst [vmem:[#allocation47_spill] sm:$0xff] %v10338_v31  ;;  %v10340_v32 = vld [vmem:[#allocation8 + $0x100] sm:$0xff]  ;;  %v10342_v33 = vld [vmem:[#allocation8 + $0x108] sm:$0xff] }
  0x5b   :  { %13978 = vst [vmem:[#allocation48_spill] sm:$0xff] %v10342_v33  ;;  %v10344_v34 = vld [vmem:[#allocation8 + $0x110] sm:$0xff]  ;;  %v10346_v35 = vld [vmem:[#allocation8 + $0x118] sm:$0xff]  ;;  %v10348_v36 = vld [vmem:[#allocation8 + $0x120] sm:$0xff] }
  0x5c   :  { %13979 = vst [vmem:[#allocation49_spill] sm:$0xff] %v10344_v34  ;;  %13980 = vst [vmem:[#allocation50_spill] sm:$0xff] %v10346_v35  ;;  %v10350_v37 = vld [vmem:[#allocation8 + $0x128] sm:$0xff]  ;;  %v10352_v38 = vld [vmem:[#allocation8 + $0x130] sm:$0xff] }
  0x5d   :  { %13981 = vst [vmem:[#allocation51_spill] sm:$0xff] %v10348_v36  ;;  %13982 = vst [vmem:[#allocation52_spill] sm:$0xff] %v10350_v37  ;;  %v10354_v39 = vld [vmem:[#allocation8 + $0x138] sm:$0xff]  ;;  %v10356_v40 = vld [vmem:[#allocation8 + $0x140] sm:$0xff] }
  0x5e   :  { %13983 = vst [vmem:[#allocation53_spill] sm:$0xff] %v10352_v38  ;;  %13984 = vst [vmem:[#allocation54_spill] sm:$0xff] %v10354_v39  ;;  %v10358_v41 = vld [vmem:[#allocation8 + $0x148] sm:$0xff]  ;;  %v10360_v42 = vld [vmem:[#allocation8 + $0x150] sm:$0xff] }
  0x5f   :  { %13985 = vst [vmem:[#allocation55_spill] sm:$0xff] %v10358_v41  ;;  %13986 = vst [vmem:[#allocation56_spill] sm:$0xff] %v10360_v42  ;;  %v10362_v43 = vld [vmem:[#allocation8 + $0x158] sm:$0xff]  ;;  %v10364_v44 = vld [vmem:[#allocation8 + $0x160] sm:$0xff] }
  0x60   :  { %13987 = vst [vmem:[#allocation57_spill] sm:$0xff] %v10362_v43  ;;  %13988 = vst [vmem:[#allocation58_spill] sm:$0xff] %v10364_v44  ;;  %v10366_v45 = vld [vmem:[#allocation8 + $0x168] sm:$0xff]  ;;  %v10368_v46 = vld [vmem:[#allocation8 + $0x170] sm:$0xff] }
  0x61   :  { %13989 = vst [vmem:[#allocation59_spill] sm:$0xff] %v10366_v45  ;;  %13990 = vst [vmem:[#allocation60_spill] sm:$0xff] %v10368_v46  ;;  %v10370_v47 = vld [vmem:[#allocation8 + $0x178] sm:$0xff]  ;;  %v10372_v48 = vld [vmem:[#allocation8 + $0x180] sm:$0xff] }
  0x62   :  { %13991 = vst [vmem:[#allocation61_spill] sm:$0xff] %v10370_v47  ;;  %v10374_v49 = vld [vmem:[#allocation8 + $0x188] sm:$0xff]  ;;  %v10376_v50 = vld [vmem:[#allocation8 + $0x190] sm:$0xff]  ;;  %v10378_v51 = vld [vmem:[#allocation8 + $0x198] sm:$0xff] }
  0x63   :  { %13992 = vst [vmem:[#allocation62_spill] sm:$0xff] %v10374_v49  ;;  %13993 = vst [vmem:[#allocation63_spill] sm:$0xff] %v10376_v50  ;;  %v10380_v52 = vld [vmem:[#allocation8 + $0x1a0] sm:$0xff]  ;;  %v10382_v53 = vld [vmem:[#allocation8 + $0x1a8] sm:$0xff] }
  0x64   :  { %13994 = vst [vmem:[#allocation64_spill] sm:$0xff] %v10378_v51  ;;  %13995 = vst [vmem:[#allocation65_spill] sm:$0xff] %v10380_v52  ;;  %v10384_v54 = vld [vmem:[#allocation8 + $0x1b0] sm:$0xff]  ;;  %v10386_v55 = vld [vmem:[#allocation8 + $0x1b8] sm:$0xff] }
  0x65   :  { %13996 = vst [vmem:[#allocation66_spill] sm:$0xff] %v10382_v53  ;;  %13997 = vst [vmem:[#allocation67_spill] sm:$0xff] %v10384_v54  ;;  %v10388_v56 = vld [vmem:[#allocation8 + $0x1c0] sm:$0xff]  ;;  %v10390_v57 = vld [vmem:[#allocation8 + $0x1c8] sm:$0xff] }
  0x66   :  { %13998 = vst [vmem:[#allocation68_spill] sm:$0xff] %v10386_v55  ;;  %13999 = vst [vmem:[#allocation69_spill] sm:$0xff] %v10390_v57  ;;  %v10392_v58 = vld [vmem:[#allocation8 + $0x1d0] sm:$0xff]  ;;  %v10394_v59 = vld [vmem:[#allocation8 + $0x1d8] sm:$0xff] }
  0x67   :  { %14000 = vst [vmem:[#allocation70_spill] sm:$0xff] %v10392_v58  ;;  %14001 = vst [vmem:[#allocation71_spill] sm:$0xff] %v10394_v59  ;;  %v10396_v60 = vld [vmem:[#allocation8 + $0x1e0] sm:$0xff]  ;;  %v10398_v61 = vld [vmem:[#allocation8 + $0x1e8] sm:$0xff] }
  0x68   :  { %14002 = vst [vmem:[#allocation72_spill] sm:$0xff] %v10396_v60  ;;  %14003 = vst [vmem:[#allocation73_spill] sm:$0xff] %v10398_v61  ;;  %v10400_v62 = vld [vmem:[#allocation8 + $0x1f0] sm:$0xff]  ;;  %v10402_v63 = vld [vmem:[#allocation8 + $0x1f8] sm:$0xff] }
  0x69   :  { %14004 = vst [vmem:[#allocation74_spill] sm:$0xff] %v10400_v62  ;;  %14005 = vst [vmem:[#allocation75_spill] sm:$0xff] %v10402_v63  ;;  %v10404_v39 = vld [vmem:[#allocation8 + $0x200] sm:$0xff]  ;;  %v10406_v47 = vld [vmem:[#allocation8 + $0x208] sm:$0xff] }
  0x6a   :  { %14006 = vst [vmem:[#allocation76_spill] sm:$0xff] %v10406_v47  ;;  %v10408_v55 = vld [vmem:[#allocation8 + $0x210] sm:$0xff]  ;;  %v10410_v23 = vld [vmem:[#allocation8 + $0x218] sm:$0xff]  ;;  %v10412_v31 = vld [vmem:[#allocation8 + $0x220] sm:$0xff] }
  0x6b   :  { %14007 = vst [vmem:[#allocation77_spill] sm:$0xff] %v10408_v55  ;;  %14008 = vst [vmem:[#allocation78_spill] sm:$0xff] %v10410_v23  ;;  %v10414_v7 = vld [vmem:[#allocation8 + $0x228] sm:$0xff]  ;;  %v10416_v15 = vld [vmem:[#allocation8 + $0x230] sm:$0xff] }
  0x6c   :  { %14009 = vst [vmem:[#allocation79_spill] sm:$0xff] %v10412_v31  ;;  %14010 = vst [vmem:[#allocation80_spill] sm:$0xff] %v10414_v7  ;;  %v10418_v54 = vld [vmem:[#allocation8 + $0x238] sm:$0xff]  ;;  %v10420_v38 = vld [vmem:[#allocation8 + $0x240] sm:$0xff] }
  0x6d   :  { %14011 = vst [vmem:[#allocation81_spill] sm:$0xff] %v10416_v15  ;;  %14012 = vst [vmem:[#allocation82_spill] sm:$0xff] %v10418_v54  ;;  %v10422_v62 = vld [vmem:[#allocation8 + $0x248] sm:$0xff]  ;;  %v10424_v63 = vld [vmem:[#allocation8 + $0x250] sm:$0xff] }
  0x6e   :  { %14013 = vst [vmem:[#allocation83_spill] sm:$0xff] %v10422_v62  ;;  %14014 = vst [vmem:[#allocation84_spill] sm:$0xff] %v10424_v63  ;;  %v10426_v46 = vld [vmem:[#allocation8 + $0x258] sm:$0xff]  ;;  %v10428_v22 = vld [vmem:[#allocation8 + $0x260] sm:$0xff] }
  0x6f   :  { %14015 = vst [vmem:[#allocation85_spill] sm:$0xff] %v10426_v46  ;;  %14016 = vst [vmem:[#allocation86_spill] sm:$0xff] %v10428_v22  ;;  %v10430_v30 = vld [vmem:[#allocation8 + $0x268] sm:$0xff]  ;;  %v10432_v6 = vld [vmem:[#allocation8 + $0x270] sm:$0xff] }
  0x70   :  { %14017 = vst [vmem:[#allocation87_spill] sm:$0xff] %v10430_v30  ;;  %14018 = vst [vmem:[#allocation88_spill] sm:$0xff] %v10432_v6  ;;  %v10434_v14 = vld [vmem:[#allocation8 + $0x278] sm:$0xff]  ;;  %v10436_v7 = vld [vmem:[#allocation8 + $0x280] sm:$0xff] }
  0x71   :  { %14019 = vst [vmem:[#allocation89_spill] sm:$0xff] %v10434_v14  ;;  %14020 = vst [vmem:[#allocation90_spill] sm:$0xff] %v10436_v7  ;;  %v10438_v15 = vld [vmem:[#allocation8 + $0x288] sm:$0xff]  ;;  %v10440_v54 = vld [vmem:[#allocation8 + $0x290] sm:$0xff] }
  0x72   :  { %14021 = vst [vmem:[#allocation91_spill] sm:$0xff] %v10438_v15  ;;  %14022 = vst [vmem:[#allocation92_spill] sm:$0xff] %v10440_v54  ;;  %v10442_v53 = vld [vmem:[#allocation8 + $0x298] sm:$0xff]  ;;  %v10444_v61 = vld [vmem:[#allocation8 + $0x2a0] sm:$0xff] }
  0x73   :  { %14023 = vst [vmem:[#allocation93_spill] sm:$0xff] %v10442_v53  ;;  %14024 = vst [vmem:[#allocation94_spill] sm:$0xff] %v10444_v61  ;;  %v10446_v37 = vld [vmem:[#allocation8 + $0x2a8] sm:$0xff]  ;;  %v10448_v45 = vld [vmem:[#allocation8 + $0x2b0] sm:$0xff] }
  0x74   :  { %14025 = vst [vmem:[#allocation95_spill] sm:$0xff] %v10446_v37  ;;  %14026 = vst [vmem:[#allocation96_spill] sm:$0xff] %v10448_v45  ;;  %v10450_v21 = vld [vmem:[#allocation8 + $0x2b8] sm:$0xff]  ;;  %v10452_v30 = vld [vmem:[#allocation8 + $0x2c0] sm:$0xff] }
  0x75   :  { %14027 = vst [vmem:[#allocation97_spill] sm:$0xff] %v10450_v21  ;;  %v10454_v6 = vld [vmem:[#allocation8 + $0x2c8] sm:$0xff]  ;;  %v10456_v14 = vld [vmem:[#allocation8 + $0x2d0] sm:$0xff]  ;;  %v10458_v29 = vld [vmem:[#allocation8 + $0x2d8] sm:$0xff] }
  0x76   :  { %14028 = vst [vmem:[#allocation98_spill] sm:$0xff] %v10454_v6  ;;  %14029 = vst [vmem:[#allocation99_spill] sm:$0xff] %v10456_v14  ;;  %v10460_v5 = vld [vmem:[#allocation8 + $0x2e0] sm:$0xff]  ;;  %v10462_v13 = vld [vmem:[#allocation8 + $0x2e8] sm:$0xff] }
  0x77   :  { %14030 = vst [vmem:[#allocation100_spill] sm:$0xff] %v10458_v29  ;;  %14031 = vst [vmem:[#allocation101_spill] sm:$0xff] %v10460_v5  ;;  %v10464_v31 = vld [vmem:[#allocation8 + $0x2f0] sm:$0xff]  ;;  %v10466_v61 = vld [vmem:[#allocation8 + $0x2f8] sm:$0xff] }
  0x78   :  { %14032 = vst [vmem:[#allocation102_spill] sm:$0xff] %v10462_v13  ;;  %14033 = vst [vmem:[#allocation103_spill] sm:$0xff] %v10464_v31  ;;  %v10468_v37 = vld [vmem:[#allocation8 + $0x300] sm:$0xff]  ;;  %v10470_v45 = vld [vmem:[#allocation8 + $0x308] sm:$0xff] }
  0x79   :  { %14034 = vst [vmem:[#allocation104_spill] sm:$0xff] %v10466_v61  ;;  %14035 = vst [vmem:[#allocation105_spill] sm:$0xff] %v10468_v37  ;;  %v10472_v21 = vld [vmem:[#allocation8 + $0x310] sm:$0xff]  ;;  %v10474_v22 = vld [vmem:[#allocation8 + $0x318] sm:$0xff] }
  0x7a   :  { %14036 = vst [vmem:[#allocation106_spill] sm:$0xff] %v10470_v45  ;;  %14037 = vst [vmem:[#allocation107_spill] sm:$0xff] %v10472_v21  ;;  %v10476_v52 = vld [vmem:[#allocation8 + $0x320] sm:$0xff]  ;;  %v10478_v60 = vld [vmem:[#allocation8 + $0x328] sm:$0xff] }
  0x7b   :  { %14038 = vst [vmem:[#allocation108_spill] sm:$0xff] %v10474_v22  ;;  %14039 = vst [vmem:[#allocation109_spill] sm:$0xff] %v10476_v52  ;;  %v10480_v36 = vld [vmem:[#allocation8 + $0x330] sm:$0xff]  ;;  %v10482_v5 = vld [vmem:[#allocation8 + $0x338] sm:$0xff] }
  0x7c   :  { %14040 = vst [vmem:[#allocation110_spill] sm:$0xff] %v10478_v60  ;;  %14041 = vst [vmem:[#allocation111_spill] sm:$0xff] %v10480_v36  ;;  %v10484_v13 = vld [vmem:[#allocation8 + $0x340] sm:$0xff]  ;;  %v10486_v31 = vld [vmem:[#allocation8 + $0x348] sm:$0xff] }
  0x7d   :  { %14042 = vst [vmem:[#allocation112_spill] sm:$0xff] %v10482_v5  ;;  %14043 = vst [vmem:[#allocation113_spill] sm:$0xff] %v10484_v13  ;;  %v10488_v61 = vld [vmem:[#allocation8 + $0x350] sm:$0xff]  ;;  %v10490_v44 = vld [vmem:[#allocation8 + $0x358] sm:$0xff] }
  0x7e   :  { %14044 = vst [vmem:[#allocation114_spill] sm:$0xff] %v10486_v31  ;;  %14045 = vst [vmem:[#allocation115_spill] sm:$0xff] %v10488_v61  ;;  %v10492_v20 = vld [vmem:[#allocation8 + $0x360] sm:$0xff]  ;;  %v10494_v28 = vld [vmem:[#allocation8 + $0x368] sm:$0xff] }
  0x7f   :  { %14046 = vst [vmem:[#allocation116_spill] sm:$0xff] %v10490_v44  ;;  %14047 = vst [vmem:[#allocation117_spill] sm:$0xff] %v10492_v20  ;;  %v10496_v4 = vld [vmem:[#allocation8 + $0x370] sm:$0xff]  ;;  %v10498_v52 = vld [vmem:[#allocation8 + $0x378] sm:$0xff] }
  0x80   :  { %14048 = vst [vmem:[#allocation118_spill] sm:$0xff] %v10494_v28  ;;  %14049 = vst [vmem:[#allocation119_spill] sm:$0xff] %v10496_v4  ;;  %v10500_v60 = vld [vmem:[#allocation8 + $0x380] sm:$0xff]  ;;  %v10502_v36 = vld [vmem:[#allocation8 + $0x388] sm:$0xff] }
  0x81   :  { %14050 = vst [vmem:[#allocation120_spill] sm:$0xff] %v10498_v52  ;;  %14051 = vst [vmem:[#allocation121_spill] sm:$0xff] %v10500_v60  ;;  %v10504_v5 = vld [vmem:[#allocation8 + $0x390] sm:$0xff]  ;;  %v10506_v12 = vld [vmem:[#allocation8 + $0x398] sm:$0xff] }
  0x82   :  { %14052 = vst [vmem:[#allocation122_spill] sm:$0xff] %v10502_v36  ;;  %14053 = vst [vmem:[#allocation123_spill] sm:$0xff] %v10504_v5  ;;  %v10508_v22 = vld [vmem:[#allocation8 + $0x3a0] sm:$0xff]  ;;  %v10510_v53 = vld [vmem:[#allocation8 + $0x3a8] sm:$0xff] }
  0x83   :  { %14054 = vst [vmem:[#allocation124_spill] sm:$0xff] %v10506_v12  ;;  %14055 = vst [vmem:[#allocation125_spill] sm:$0xff] %v10508_v22  ;;  %v10512_v44 = vld [vmem:[#allocation8 + $0x3b0] sm:$0xff]  ;;  %v10514_v20 = vld [vmem:[#allocation8 + $0x3b8] sm:$0xff] }
  0x84   :  { %14056 = vst [vmem:[#allocation126_spill] sm:$0xff] %v10510_v53  ;;  %14057 = vst [vmem:[#allocation127_spill] sm:$0xff] %v10512_v44  ;;  %v10516_v28 = vld [vmem:[#allocation8 + $0x3c0] sm:$0xff]  ;;  %v10518_v4 = vld [vmem:[#allocation8 + $0x3c8] sm:$0xff] }
  0x85   :  { %14058 = vst [vmem:[#allocation128_spill] sm:$0xff] %v10514_v20  ;;  %14059 = vst [vmem:[#allocation129_spill] sm:$0xff] %v10516_v28  ;;  %v10520_v52 = vld [vmem:[#allocation8 + $0x3d0] sm:$0xff]  ;;  %v10522_v29 = vld [vmem:[#allocation8 + $0x3d8] sm:$0xff] }
  0x86   :  { %14060 = vst [vmem:[#allocation130_spill] sm:$0xff] %v10518_v4  ;;  %14061 = vst [vmem:[#allocation131_spill] sm:$0xff] %v10520_v52  ;;  %v10524_v23 = vld [vmem:[#allocation8 + $0x3e0] sm:$0xff]  ;;  %v10526_v46 = vld [vmem:[#allocation8 + $0x3e8] sm:$0xff] }
  0x87   :  { %14062 = vst [vmem:[#allocation132_spill] sm:$0xff] %v10522_v29  ;;  %14063 = vst [vmem:[#allocation133_spill] sm:$0xff] %v10524_v23  ;;  %v10528_v12 = vld [vmem:[#allocation8 + $0x3f0] sm:$0xff]  ;;  %v10530_v22 = vld [vmem:[#allocation8 + $0x3f8] sm:$0xff] }
  0x88   :  { %14064 = vst [vmem:[#allocation134_spill] sm:$0xff] %v10526_v46  ;;  %14065 = vst [vmem:[#allocation135_spill] sm:$0xff] %v10528_v12  ;;  %v10532_v53 = vld [vmem:[#allocation8 + $0x400] sm:$0xff]  ;;  %v10534_v44 = vld [vmem:[#allocation8 + $0x408] sm:$0xff] }
  0x89   :  { %14066 = vst [vmem:[#allocation136_spill] sm:$0xff] %v10530_v22  ;;  %14067 = vst [vmem:[#allocation137_spill] sm:$0xff] %v10532_v53  ;;  %v10536_v20 = vld [vmem:[#allocation8 + $0x410] sm:$0xff]  ;;  %v10538_v51 = vld [vmem:[#allocation8 + $0x418] sm:$0xff] }
  0x8a   :  { %14068 = vst [vmem:[#allocation138_spill] sm:$0xff] %v10534_v44  ;;  %14069 = vst [vmem:[#allocation139_spill] sm:$0xff] %v10536_v20  ;;  %v10540_v59 = vld [vmem:[#allocation8 + $0x420] sm:$0xff]  ;;  %v10542_v35 = vld [vmem:[#allocation8 + $0x428] sm:$0xff] }
  0x8b   :  { %14070 = vst [vmem:[#allocation140_spill] sm:$0xff] %v10538_v51  ;;  %14071 = vst [vmem:[#allocation141_spill] sm:$0xff] %v10540_v59  ;;  %v10544_v29 = vld [vmem:[#allocation8 + $0x430] sm:$0xff]  ;;  %v10546_v23 = vld [vmem:[#allocation8 + $0x438] sm:$0xff] }
  0x8c   :  { %14072 = vst [vmem:[#allocation142_spill] sm:$0xff] %v10542_v35  ;;  %14073 = vst [vmem:[#allocation143_spill] sm:$0xff] %v10544_v29  ;;  %v10548_v46 = vld [vmem:[#allocation8 + $0x440] sm:$0xff]  ;;  %v10550_v12 = vld [vmem:[#allocation8 + $0x448] sm:$0xff] }
  0x8d   :  { %14074 = vst [vmem:[#allocation144_spill] sm:$0xff] %v10546_v23  ;;  %14075 = vst [vmem:[#allocation145_spill] sm:$0xff] %v10548_v46  ;;  %v10552_v22 = vld [vmem:[#allocation8 + $0x450] sm:$0xff]  ;;  %v10554_v43 = vld [vmem:[#allocation8 + $0x458] sm:$0xff] }
  0x8e   :  { %14076 = vst [vmem:[#allocation146_spill] sm:$0xff] %v10550_v12  ;;  %14077 = vst [vmem:[#allocation147_spill] sm:$0xff] %v10552_v22  ;;  %v10556_v19 = vld [vmem:[#allocation8 + $0x460] sm:$0xff]  ;;  %v10558_v27 = vld [vmem:[#allocation8 + $0x468] sm:$0xff] }
  0x8f   :  { %14078 = vst [vmem:[#allocation148_spill] sm:$0xff] %v10554_v43  ;;  %14079 = vst [vmem:[#allocation149_spill] sm:$0xff] %v10556_v19  ;;  %v10560_v51 = vld [vmem:[#allocation8 + $0x470] sm:$0xff]  ;;  %v10562_v59 = vld [vmem:[#allocation8 + $0x478] sm:$0xff] }
  0x90   :  { %14080 = vst [vmem:[#allocation150_spill] sm:$0xff] %v10558_v27  ;;  %14081 = vst [vmem:[#allocation151_spill] sm:$0xff] %v10560_v51  ;;  %v10564_v35 = vld [vmem:[#allocation8 + $0x480] sm:$0xff]  ;;  %v10566_v29 = vld [vmem:[#allocation8 + $0x488] sm:$0xff] }
  0x91   :  { %14082 = vst [vmem:[#allocation152_spill] sm:$0xff] %v10562_v59  ;;  %14083 = vst [vmem:[#allocation153_spill] sm:$0xff] %v10564_v35  ;;  %v10568_v23 = vld [vmem:[#allocation8 + $0x490] sm:$0xff]  ;;  %v10570_v3 = vld [vmem:[#allocation8 + $0x498] sm:$0xff] }
  0x92   :  { %14084 = vst [vmem:[#allocation154_spill] sm:$0xff] %v10566_v29  ;;  %14085 = vst [vmem:[#allocation155_spill] sm:$0xff] %v10568_v23  ;;  %v10572_v11 = vld [vmem:[#allocation8 + $0x4a0] sm:$0xff]  ;;  %v10574_v20 = vld [vmem:[#allocation8 + $0x4a8] sm:$0xff] }
  0x93   :  { %14086 = vst [vmem:[#allocation156_spill] sm:$0xff] %v10570_v3  ;;  %14087 = vst [vmem:[#allocation157_spill] sm:$0xff] %v10572_v11  ;;  %v10576_v43 = vld [vmem:[#allocation8 + $0x4b0] sm:$0xff]  ;;  %v10578_v19 = vld [vmem:[#allocation8 + $0x4b8] sm:$0xff] }
  0x94   :  { %14088 = vst [vmem:[#allocation158_spill] sm:$0xff] %v10574_v20  ;;  %14089 = vst [vmem:[#allocation159_spill] sm:$0xff] %v10576_v43  ;;  %v10580_v27 = vld [vmem:[#allocation8 + $0x4c0] sm:$0xff]  ;;  %v10582_v51 = vld [vmem:[#allocation8 + $0x4c8] sm:$0xff] }
  0x95   :  { %14090 = vst [vmem:[#allocation160_spill] sm:$0xff] %v10578_v19  ;;  %14091 = vst [vmem:[#allocation161_spill] sm:$0xff] %v10580_v27  ;;  %v10584_v59 = vld [vmem:[#allocation8 + $0x4d0] sm:$0xff]  ;;  %v10586_v22 = vld [vmem:[#allocation8 + $0x4d8] sm:$0xff] }
  0x96   :  { %14092 = vst [vmem:[#allocation162_spill] sm:$0xff] %v10582_v51  ;;  %14093 = vst [vmem:[#allocation163_spill] sm:$0xff] %v10584_v59  ;;  %v10588_v5 = vld [vmem:[#allocation8 + $0x4e0] sm:$0xff]  ;;  %v10590_v23 = vld [vmem:[#allocation8 + $0x4e8] sm:$0xff] }
  0x97   :  { %14094 = vst [vmem:[#allocation164_spill] sm:$0xff] %v10586_v22  ;;  %14095 = vst [vmem:[#allocation165_spill] sm:$0xff] %v10588_v5  ;;  %v10592_v3 = vld [vmem:[#allocation8 + $0x4f0] sm:$0xff]  ;;  %v10594_v11 = vld [vmem:[#allocation8 + $0x4f8] sm:$0xff] }
  0x98   :  { %14096 = vst [vmem:[#allocation166_spill] sm:$0xff] %v10590_v23  ;;  %14097 = vst [vmem:[#allocation167_spill] sm:$0xff] %v10592_v3  ;;  %v10596_v20 = vld [vmem:[#allocation8 + $0x500] sm:$0xff]  ;;  %v10598_v43 = vld [vmem:[#allocation8 + $0x508] sm:$0xff] }
  0x99   :  { %14098 = vst [vmem:[#allocation168_spill] sm:$0xff] %v10594_v11  ;;  %14099 = vst [vmem:[#allocation169_spill] sm:$0xff] %v10596_v20  ;;  %v10600_v19 = vld [vmem:[#allocation8 + $0x510] sm:$0xff]  ;;  %v10602_v52 = vld [vmem:[#allocation8 + $0x518] sm:$0xff] }
  0x9a   :  { %14100 = vst [vmem:[#allocation170_spill] sm:$0xff] %v10598_v43  ;;  %14101 = vst [vmem:[#allocation171_spill] sm:$0xff] %v10600_v19  ;;  %v10604_v21 = vld [vmem:[#allocation8 + $0x520] sm:$0xff]  ;;  %v10606_v59 = vld [vmem:[#allocation8 + $0x528] sm:$0xff] }
  0x9b   :  { %14102 = vst [vmem:[#allocation172_spill] sm:$0xff] %v10602_v52  ;;  %14103 = vst [vmem:[#allocation173_spill] sm:$0xff] %v10604_v21  ;;  %v10608_v22 = vld [vmem:[#allocation8 + $0x530] sm:$0xff]  ;;  %v10610_v5 = vld [vmem:[#allocation8 + $0x538] sm:$0xff] }
  0x9c   :  { %14104 = vst [vmem:[#allocation174_spill] sm:$0xff] %v10606_v59  ;;  %14105 = vst [vmem:[#allocation175_spill] sm:$0xff] %v10608_v22  ;;  %v10612_v23 = vld [vmem:[#allocation8 + $0x540] sm:$0xff]  ;;  %v10614_v3 = vld [vmem:[#allocation8 + $0x548] sm:$0xff] }
  0x9d   :  { %14106 = vst [vmem:[#allocation176_spill] sm:$0xff] %v10610_v5  ;;  %14107 = vst [vmem:[#allocation177_spill] sm:$0xff] %v10612_v23  ;;  %v10616_v11 = vld [vmem:[#allocation8 + $0x550] sm:$0xff]  ;;  %v10618_v61 = vld [vmem:[#allocation8 + $0x558] sm:$0xff] }
  0x9e   :  { %14108 = vst [vmem:[#allocation178_spill] sm:$0xff] %v10614_v3  ;;  %14109 = vst [vmem:[#allocation179_spill] sm:$0xff] %v10616_v11  ;;  %v10620_v54 = vld [vmem:[#allocation8 + $0x560] sm:$0xff]  ;;  %v10622_v19 = vld [vmem:[#allocation8 + $0x568] sm:$0xff] }
  0x9f   :  { %14110 = vst [vmem:[#allocation180_spill] sm:$0xff] %v10618_v61  ;;  %14111 = vst [vmem:[#allocation181_spill] sm:$0xff] %v10620_v54  ;;  %v10624_v52 = vld [vmem:[#allocation8 + $0x570] sm:$0xff]  ;;  %v10626_v21 = vld [vmem:[#allocation8 + $0x578] sm:$0xff] }
  0xa0   :  { %14112 = vst [vmem:[#allocation182_spill] sm:$0xff] %v10622_v19  ;;  %14113 = vst [vmem:[#allocation183_spill] sm:$0xff] %v10624_v52  ;;  %v10628_v59 = vld [vmem:[#allocation8 + $0x580] sm:$0xff]  ;;  %v10630_v22 = vld [vmem:[#allocation8 + $0x588] sm:$0xff] }
  0xa1   :  { %14114 = vst [vmem:[#allocation184_spill] sm:$0xff] %v10626_v21  ;;  %14115 = vst [vmem:[#allocation185_spill] sm:$0xff] %v10628_v59  ;;  %v10632_v5 = vld [vmem:[#allocation8 + $0x590] sm:$0xff]  ;;  %v10634_v14 = vld [vmem:[#allocation8 + $0x598] sm:$0xff] }
  0xa2   :  { %14116 = vst [vmem:[#allocation186_spill] sm:$0xff] %v10630_v22  ;;  %14117 = vst [vmem:[#allocation187_spill] sm:$0xff] %v10632_v5  ;;  %v10636_v55 = vld [vmem:[#allocation8 + $0x5a0] sm:$0xff]  ;;  %v10638_v11 = vld [vmem:[#allocation8 + $0x5a8] sm:$0xff] }
  0xa3   :  { %14118 = vst [vmem:[#allocation188_spill] sm:$0xff] %v10634_v14  ;;  %14119 = vst [vmem:[#allocation189_spill] sm:$0xff] %v10636_v55  ;;  %v10640_v61 = vld [vmem:[#allocation8 + $0x5b0] sm:$0xff]  ;;  %v10642_v54 = vld [vmem:[#allocation8 + $0x5b8] sm:$0xff] }
  0xa4   :  { %14120 = vst [vmem:[#allocation190_spill] sm:$0xff] %v10638_v11  ;;  %14121 = vst [vmem:[#allocation191_spill] sm:$0xff] %v10640_v61  ;;  %v10644_v19 = vld [vmem:[#allocation8 + $0x5c0] sm:$0xff]  ;;  %v10646_v52 = vld [vmem:[#allocation8 + $0x5c8] sm:$0xff] }
  0xa5   :  { %14122 = vst [vmem:[#allocation192_spill] sm:$0xff] %v10642_v54  ;;  %14123 = vst [vmem:[#allocation193_spill] sm:$0xff] %v10644_v19  ;;  %v10648_v21 = vld [vmem:[#allocation8 + $0x5d0] sm:$0xff]  ;;  %v10650_v63 = vld [vmem:[#allocation8 + $0x5d8] sm:$0xff] }
  0xa6   :  { %14124 = vst [vmem:[#allocation194_spill] sm:$0xff] %v10646_v52  ;;  %14125 = vst [vmem:[#allocation195_spill] sm:$0xff] %v10648_v21  ;;  %v10652_v50 = vld [vmem:[#allocation8 + $0x5e0] sm:$0xff]  ;;  %v10654_v5 = vld [vmem:[#allocation8 + $0x5e8] sm:$0xff] }
  0xa7   :  { %14126 = vst [vmem:[#allocation196_spill] sm:$0xff] %v10650_v63  ;;  %14127 = vst [vmem:[#allocation197_spill] sm:$0xff] %v10652_v50  ;;  %v10656_v14 = vld [vmem:[#allocation8 + $0x5f0] sm:$0xff]  ;;  %v10658_v55 = vld [vmem:[#allocation8 + $0x5f8] sm:$0xff] }
  0xa8   :  { %14128 = vst [vmem:[#allocation198_spill] sm:$0xff] %v10654_v5  ;;  %14129 = vst [vmem:[#allocation199_spill] sm:$0xff] %v10656_v14  ;;  %v10660_v11 = vld [vmem:[#allocation8 + $0x600] sm:$0xff]  ;;  %v10662_v61 = vld [vmem:[#allocation8 + $0x608] sm:$0xff] }
  0xa9   :  { %14130 = vst [vmem:[#allocation200_spill] sm:$0xff] %v10658_v55  ;;  %14131 = vst [vmem:[#allocation201_spill] sm:$0xff] %v10660_v11  ;;  %v10664_v54 = vld [vmem:[#allocation8 + $0x610] sm:$0xff]  ;;  %v10666_v58 = vld [vmem:[#allocation8 + $0x618] sm:$0xff] }
  0xaa   :  { %14132 = vst [vmem:[#allocation202_spill] sm:$0xff] %v10662_v61  ;;  %14133 = vst [vmem:[#allocation203_spill] sm:$0xff] %v10664_v54  ;;  %v10668_v34 = vld [vmem:[#allocation8 + $0x620] sm:$0xff]  ;;  %v10670_v21 = vld [vmem:[#allocation8 + $0x628] sm:$0xff] }
  0xab   :  { %14134 = vst [vmem:[#allocation204_spill] sm:$0xff] %v10666_v58  ;;  %14135 = vst [vmem:[#allocation205_spill] sm:$0xff] %v10668_v34  ;;  %v10672_v63 = vld [vmem:[#allocation8 + $0x630] sm:$0xff]  ;;  %v10674_v50 = vld [vmem:[#allocation8 + $0x638] sm:$0xff] }
  0xac   :  { %14136 = vst [vmem:[#allocation206_spill] sm:$0xff] %v10670_v21  ;;  %14137 = vst [vmem:[#allocation207_spill] sm:$0xff] %v10672_v63  ;;  %v10676_v5 = vld [vmem:[#allocation8 + $0x640] sm:$0xff]  ;;  %v10678_v14 = vld [vmem:[#allocation8 + $0x648] sm:$0xff] }
  0xad   :  { %14138 = vst [vmem:[#allocation208_spill] sm:$0xff] %v10674_v50  ;;  %14139 = vst [vmem:[#allocation209_spill] sm:$0xff] %v10676_v5  ;;  %v10680_v55 = vld [vmem:[#allocation8 + $0x650] sm:$0xff]  ;;  %v10682_v42 = vld [vmem:[#allocation8 + $0x658] sm:$0xff] }
  0xae   :  { %14140 = vst [vmem:[#allocation210_spill] sm:$0xff] %v10678_v14  ;;  %14141 = vst [vmem:[#allocation211_spill] sm:$0xff] %v10680_v55  ;;  %v10684_v18 = vld [vmem:[#allocation8 + $0x660] sm:$0xff]  ;;  %v10686_v54 = vld [vmem:[#allocation8 + $0x668] sm:$0xff] }
  0xaf   :  { %14142 = vst [vmem:[#allocation212_spill] sm:$0xff] %v10682_v42  ;;  %14143 = vst [vmem:[#allocation213_spill] sm:$0xff] %v10684_v18  ;;  %v10688_v58 = vld [vmem:[#allocation8 + $0x670] sm:$0xff]  ;;  %v10690_v34 = vld [vmem:[#allocation8 + $0x678] sm:$0xff] }
  0xb0   :  { %14144 = vst [vmem:[#allocation214_spill] sm:$0xff] %v10686_v54  ;;  %14145 = vst [vmem:[#allocation215_spill] sm:$0xff] %v10688_v58  ;;  %v10692_v21 = vld [vmem:[#allocation8 + $0x680] sm:$0xff]  ;;  %v10694_v63 = vld [vmem:[#allocation8 + $0x688] sm:$0xff] }
  0xb1   :  { %14146 = vst [vmem:[#allocation216_spill] sm:$0xff] %v10690_v34  ;;  %14147 = vst [vmem:[#allocation217_spill] sm:$0xff] %v10692_v21  ;;  %v10696_v50 = vld [vmem:[#allocation8 + $0x690] sm:$0xff]  ;;  %v10698_v26 = vld [vmem:[#allocation8 + $0x698] sm:$0xff] }
  0xb2   :  { %14148 = vst [vmem:[#allocation218_spill] sm:$0xff] %v10694_v63  ;;  %14149 = vst [vmem:[#allocation219_spill] sm:$0xff] %v10696_v50  ;;  %v10700_v2 = vld [vmem:[#allocation8 + $0x6a0] sm:$0xff]  ;;  %v10702_v55 = vld [vmem:[#allocation8 + $0x6a8] sm:$0xff] }
  0xb3   :  { %14150 = vst [vmem:[#allocation220_spill] sm:$0xff] %v10698_v26  ;;  %14151 = vst [vmem:[#allocation221_spill] sm:$0xff] %v10700_v2  ;;  %v10704_v42 = vld [vmem:[#allocation8 + $0x6b0] sm:$0xff]  ;;  %v10706_v18 = vld [vmem:[#allocation8 + $0x6b8] sm:$0xff] }
  0xb4   :  { %14152 = vst [vmem:[#allocation222_spill] sm:$0xff] %v10702_v55  ;;  %14153 = vst [vmem:[#allocation223_spill] sm:$0xff] %v10704_v42  ;;  %v10708_v54 = vld [vmem:[#allocation8 + $0x6c0] sm:$0xff]  ;;  %v10710_v58 = vld [vmem:[#allocation8 + $0x6c8] sm:$0xff] }
  0xb5   :  { %14154 = vst [vmem:[#allocation224_spill] sm:$0xff] %v10706_v18  ;;  %14155 = vst [vmem:[#allocation225_spill] sm:$0xff] %v10708_v54  ;;  %v10712_v34 = vld [vmem:[#allocation8 + $0x6d0] sm:$0xff]  ;;  %v10714_v10 = vld [vmem:[#allocation8 + $0x6d8] sm:$0xff] }
  0xb6   :  { %14156 = vst [vmem:[#allocation226_spill] sm:$0xff] %v10710_v58  ;;  %14157 = vst [vmem:[#allocation227_spill] sm:$0xff] %v10712_v34  ;;  %v10716_v63 = vld [vmem:[#allocation8 + $0x6e0] sm:$0xff]  ;;  %v10718_v50 = vld [vmem:[#allocation8 + $0x6e8] sm:$0xff] }
  0xb7   :  { %14158 = vst [vmem:[#allocation228_spill] sm:$0xff] %v10714_v10  ;;  %14159 = vst [vmem:[#allocation229_spill] sm:$0xff] %v10716_v63  ;;  %v10720_v26 = vld [vmem:[#allocation8 + $0x6f0] sm:$0xff]  ;;  %v10722_v2 = vld [vmem:[#allocation8 + $0x6f8] sm:$0xff] }
  0xb8   :  { %14160 = vst [vmem:[#allocation230_spill] sm:$0xff] %v10718_v50  ;;  %14161 = vst [vmem:[#allocation231_spill] sm:$0xff] %v10720_v26  ;;  %v10724_v55 = vld [vmem:[#allocation8 + $0x700] sm:$0xff]  ;;  %v10726_v42 = vld [vmem:[#allocation8 + $0x708] sm:$0xff] }
  0xb9   :  { %14162 = vst [vmem:[#allocation232_spill] sm:$0xff] %v10722_v2  ;;  %14163 = vst [vmem:[#allocation233_spill] sm:$0xff] %v10724_v55  ;;  %v10728_v18 = vld [vmem:[#allocation8 + $0x710] sm:$0xff]  ;;  %v10730_v61 = vld [vmem:[#allocation8 + $0x718] sm:$0xff] }
  0xba   :  { %14164 = vst [vmem:[#allocation234_spill] sm:$0xff] %v10726_v42  ;;  %14165 = vst [vmem:[#allocation235_spill] sm:$0xff] %v10728_v18  ;;  %v10732_v58 = vld [vmem:[#allocation8 + $0x720] sm:$0xff]  ;;  %v10734_v34 = vld [vmem:[#allocation8 + $0x728] sm:$0xff] }
  0xbb   :  { %14166 = vst [vmem:[#allocation236_spill] sm:$0xff] %v10730_v61  ;;  %14167 = vst [vmem:[#allocation237_spill] sm:$0xff] %v10732_v58  ;;  %v10736_v10 = vld [vmem:[#allocation8 + $0x730] sm:$0xff]  ;;  %v10738_v63 = vld [vmem:[#allocation8 + $0x738] sm:$0xff] }
  0xbc   :  { %14168 = vst [vmem:[#allocation238_spill] sm:$0xff] %v10734_v34  ;;  %14169 = vst [vmem:[#allocation239_spill] sm:$0xff] %v10736_v10  ;;  %v10740_v50 = vld [vmem:[#allocation8 + $0x740] sm:$0xff]  ;;  %v10742_v26 = vld [vmem:[#allocation8 + $0x748] sm:$0xff] }
  0xbd   :  { %14170 = vst [vmem:[#allocation240_spill] sm:$0xff] %v10738_v63  ;;  %14171 = vst [vmem:[#allocation241_spill] sm:$0xff] %v10740_v50  ;;  %v10744_v2 = vld [vmem:[#allocation8 + $0x750] sm:$0xff]  ;;  %v10746_v14 = vld [vmem:[#allocation8 + $0x758] sm:$0xff] }
  0xbe   :  { %14172 = vst [vmem:[#allocation242_spill] sm:$0xff] %v10742_v26  ;;  %14173 = vst [vmem:[#allocation243_spill] sm:$0xff] %v10744_v2  ;;  %v10748_v42 = vld [vmem:[#allocation8 + $0x760] sm:$0xff]  ;;  %v10750_v18 = vld [vmem:[#allocation8 + $0x768] sm:$0xff] }
  0xbf   :  { %14174 = vst [vmem:[#allocation244_spill] sm:$0xff] %v10746_v14  ;;  %14175 = vst [vmem:[#allocation245_spill] sm:$0xff] %v10748_v42  ;;  %v10752_v61 = vld [vmem:[#allocation8 + $0x770] sm:$0xff]  ;;  %v10754_v58 = vld [vmem:[#allocation8 + $0x778] sm:$0xff] }
  0xc0   :  { %14176 = vst [vmem:[#allocation246_spill] sm:$0xff] %v10750_v18  ;;  %14177 = vst [vmem:[#allocation247_spill] sm:$0xff] %v10752_v61  ;;  %v10756_v34 = vld [vmem:[#allocation8 + $0x780] sm:$0xff]  ;;  %v10758_v10 = vld [vmem:[#allocation8 + $0x788] sm:$0xff] }
  0xc1   :  { %14178 = vst [vmem:[#allocation248_spill] sm:$0xff] %v10754_v58  ;;  %14179 = vst [vmem:[#allocation249_spill] sm:$0xff] %v10756_v34  ;;  %v10760_v63 = vld [vmem:[#allocation8 + $0x790] sm:$0xff]  ;;  %v10762_v22 = vld [vmem:[#allocation8 + $0x798] sm:$0xff] }
  0xc2   :  { %14180 = vst [vmem:[#allocation250_spill] sm:$0xff] %v10758_v10  ;;  %14181 = vst [vmem:[#allocation251_spill] sm:$0xff] %v10760_v63  ;;  %v10764_v26 = vld [vmem:[#allocation8 + $0x7a0] sm:$0xff]  ;;  %v10766_v2 = vld [vmem:[#allocation8 + $0x7a8] sm:$0xff] }
  0xc3   :  { %14182 = vst [vmem:[#allocation252_spill] sm:$0xff] %v10762_v22  ;;  %14183 = vst [vmem:[#allocation253_spill] sm:$0xff] %v10764_v26  ;;  %v10768_v14 = vld [vmem:[#allocation8 + $0x7b0] sm:$0xff]  ;;  %v10770_v42 = vld [vmem:[#allocation8 + $0x7b8] sm:$0xff] }
  0xc4   :  { %14184 = vst [vmem:[#allocation254_spill] sm:$0xff] %v10766_v2  ;;  %14185 = vst [vmem:[#allocation255_spill] sm:$0xff] %v10768_v14  ;;  %v10772_v18 = vld [vmem:[#allocation8 + $0x7c0] sm:$0xff]  ;;  %v10774_v61 = vld [vmem:[#allocation8 + $0x7c8] sm:$0xff] }
  0xc5   :  { %14186 = vst [vmem:[#allocation256_spill] sm:$0xff] %v10770_v42  ;;  %14187 = vst [vmem:[#allocation257_spill] sm:$0xff] %v10772_v18  ;;  %v10776_v58 = vld [vmem:[#allocation8 + $0x7d0] sm:$0xff]  ;;  %v10778_v52 = vld [vmem:[#allocation8 + $0x7d8] sm:$0xff] }
  0xc6   :  { %14188 = vst [vmem:[#allocation258_spill] sm:$0xff] %v10774_v61  ;;  %14189 = vst [vmem:[#allocation259_spill] sm:$0xff] %v10776_v58  ;;  %v10780_v10 = vld [vmem:[#allocation8 + $0x7e0] sm:$0xff]  ;;  %v10782_v63 = vld [vmem:[#allocation8 + $0x7e8] sm:$0xff] }
  0xc7   :  { %14190 = vst [vmem:[#allocation260_spill] sm:$0xff] %v10778_v52  ;;  %14191 = vst [vmem:[#allocation261_spill] sm:$0xff] %v10780_v10  ;;  %v10784_v22 = vld [vmem:[#allocation8 + $0x7f0] sm:$0xff]  ;;  %v10786_v26 = vld [vmem:[#allocation8 + $0x7f8] sm:$0xff] }
  0xc8   :  { %14192 = vst [vmem:[#allocation262_spill] sm:$0xff] %v10782_v63  ;;  %14193 = vst [vmem:[#allocation263_spill] sm:$0xff] %v10784_v22  ;;  %v10788_v2 = vld [vmem:[#allocation8 + $0x800] sm:$0xff]  ;;  %v10790_v14 = vld [vmem:[#allocation8 + $0x808] sm:$0xff] }
  0xc9   :  { %14194 = vst [vmem:[#allocation264_spill] sm:$0xff] %v10786_v26  ;;  %14195 = vst [vmem:[#allocation265_spill] sm:$0xff] %v10788_v2  ;;  %v10792_v42 = vld [vmem:[#allocation8 + $0x810] sm:$0xff]  ;;  %v10794_v43 = vld [vmem:[#allocation8 + $0x818] sm:$0xff] }
  0xca   :  { %14196 = vst [vmem:[#allocation266_spill] sm:$0xff] %v10790_v14  ;;  %14197 = vst [vmem:[#allocation267_spill] sm:$0xff] %v10792_v42  ;;  %v10796_v61 = vld [vmem:[#allocation8 + $0x820] sm:$0xff]  ;;  %v10798_v58 = vld [vmem:[#allocation8 + $0x828] sm:$0xff] }
  0xcb   :  { %14198 = vst [vmem:[#allocation268_spill] sm:$0xff] %v10794_v43  ;;  %14199 = vst [vmem:[#allocation269_spill] sm:$0xff] %v10796_v61  ;;  %v10800_v52 = vld [vmem:[#allocation8 + $0x830] sm:$0xff]  ;;  %v10802_v10 = vld [vmem:[#allocation8 + $0x838] sm:$0xff] }
  0xcc   :  { %14200 = vst [vmem:[#allocation270_spill] sm:$0xff] %v10798_v58  ;;  %14201 = vst [vmem:[#allocation271_spill] sm:$0xff] %v10800_v52  ;;  %v10804_v63 = vld [vmem:[#allocation8 + $0x840] sm:$0xff]  ;;  %v10806_v22 = vld [vmem:[#allocation8 + $0x848] sm:$0xff] }
  0xcd   :  { %14202 = vst [vmem:[#allocation272_spill] sm:$0xff] %v10802_v10  ;;  %14203 = vst [vmem:[#allocation273_spill] sm:$0xff] %v10806_v22  ;;  %v10808_v26 = vld [vmem:[#allocation8 + $0x850] sm:$0xff]  ;;  %v10810_v3 = vld [vmem:[#allocation8 + $0x858] sm:$0xff] }
  0xce   :  { %14204 = vst [vmem:[#allocation274_spill] sm:$0xff] %v10808_v26  ;;  %14205 = vst [vmem:[#allocation275_spill] sm:$0xff] %v10810_v3  ;;  %v10812_v29 = vld [vmem:[#allocation8 + $0x860] sm:$0xff]  ;;  %v10814_v42 = vld [vmem:[#allocation8 + $0x868] sm:$0xff] }
  0xcf   :  { %14206 = vst [vmem:[#allocation276_spill] sm:$0xff] %v10812_v29  ;;  %14207 = vst [vmem:[#allocation277_spill] sm:$0xff] %v10814_v42  ;;  %v10816_v43 = vld [vmem:[#allocation8 + $0x870] sm:$0xff]  ;;  %v10818_v61 = vld [vmem:[#allocation8 + $0x878] sm:$0xff] }
  0xd0   :  { %14208 = vst [vmem:[#allocation278_spill] sm:$0xff] %v10816_v43  ;;  %14209 = vst [vmem:[#allocation279_spill] sm:$0xff] %v10818_v61  ;;  %v10820_v58 = vld [vmem:[#allocation8 + $0x880] sm:$0xff]  ;;  %v10822_v52 = vld [vmem:[#allocation8 + $0x888] sm:$0xff] }
  0xd1   :  { %14210 = vst [vmem:[#allocation280_spill] sm:$0xff] %v10822_v52  ;;  %v10824_v10 = vld [vmem:[#allocation8 + $0x890] sm:$0xff]  ;;  %v10826_v51 = vld [vmem:[#allocation8 + $0x898] sm:$0xff]  ;;  %v10828_v44 = vld [vmem:[#allocation8 + $0x8a0] sm:$0xff] }
  0xd2   :  { %14211 = vst [vmem:[#allocation281_spill] sm:$0xff] %v10824_v10  ;;  %14212 = vst [vmem:[#allocation282_spill] sm:$0xff] %v10826_v51  ;;  %v10830_v26 = vld [vmem:[#allocation8 + $0x8a8] sm:$0xff]  ;;  %v10832_v3 = vld [vmem:[#allocation8 + $0x8b0] sm:$0xff] }
  0xd3   :  { %14213 = vst [vmem:[#allocation283_spill] sm:$0xff] %v10828_v44  ;;  %14214 = vst [vmem:[#allocation284_spill] sm:$0xff] %v10830_v26  ;;  %v10834_v29 = vld [vmem:[#allocation8 + $0x8b8] sm:$0xff]  ;;  %v10836_v42 = vld [vmem:[#allocation8 + $0x8c0] sm:$0xff] }
  0xd4   :  { %14215 = vst [vmem:[#allocation285_spill] sm:$0xff] %v10832_v3  ;;  %14216 = vst [vmem:[#allocation286_spill] sm:$0xff] %v10834_v29  ;;  %v10838_v43 = vld [vmem:[#allocation8 + $0x8c8] sm:$0xff]  ;;  %v10840_v61 = vld [vmem:[#allocation8 + $0x8d0] sm:$0xff] }
  0xd5   :  { %14217 = vst [vmem:[#allocation287_spill] sm:$0xff] %v10838_v43  ;;  %14218 = vst [vmem:[#allocation288_spill] sm:$0xff] %v10840_v61  ;;  %v10842_v12 = vld [vmem:[#allocation8 + $0x8d8] sm:$0xff]  ;;  %v10844_v36 = vld [vmem:[#allocation8 + $0x8e0] sm:$0xff] }
  0xd6   :  { %14219 = vst [vmem:[#allocation289_spill] sm:$0xff] %v10842_v12  ;;  %14220 = vst [vmem:[#allocation290_spill] sm:$0xff] %v10844_v36  ;;  %v10846_v10 = vld [vmem:[#allocation8 + $0x8e8] sm:$0xff]  ;;  %v10848_v51 = vld [vmem:[#allocation8 + $0x8f0] sm:$0xff] }
  0xd7   :  { %14221 = vst [vmem:[#allocation291_spill] sm:$0xff] %v10846_v10  ;;  %14222 = vst [vmem:[#allocation292_spill] sm:$0xff] %v10848_v51  ;;  %v10850_v44 = vld [vmem:[#allocation8 + $0x8f8] sm:$0xff]  ;;  %v10852_v26 = vld [vmem:[#allocation8 + $0x900] sm:$0xff] }
  0xd8   :  { %14223 = vst [vmem:[#allocation293_spill] sm:$0xff] %v10850_v44  ;;  %v10854_v3 = vld [vmem:[#allocation8 + $0x908] sm:$0xff]  ;;  %v10856_v29 = vld [vmem:[#allocation8 + $0x910] sm:$0xff]  ;;  %v10858_v4 = vld [vmem:[#allocation8 + $0x918] sm:$0xff] }
  0xd9   :  { %14224 = vst [vmem:[#allocation294_spill] sm:$0xff] %v10854_v3  ;;  %14225 = vst [vmem:[#allocation295_spill] sm:$0xff] %v10856_v29  ;;  %v10860_v45 = vld [vmem:[#allocation8 + $0x920] sm:$0xff]  ;;  %v10862_v61 = vld [vmem:[#allocation8 + $0x928] sm:$0xff] }
  0xda   :  { %14226 = vst [vmem:[#allocation296_spill] sm:$0xff] %v10858_v4  ;;  %14227 = vst [vmem:[#allocation297_spill] sm:$0xff] %v10860_v45  ;;  %v10864_v12 = vld [vmem:[#allocation8 + $0x930] sm:$0xff]  ;;  %v10866_v36 = vld [vmem:[#allocation8 + $0x938] sm:$0xff] }
  0xdb   :  { %14228 = vst [vmem:[#allocation298_spill] sm:$0xff] %v10862_v61  ;;  %14229 = vst [vmem:[#allocation299_spill] sm:$0xff] %v10864_v12  ;;  %v10868_v10 = vld [vmem:[#allocation8 + $0x940] sm:$0xff]  ;;  %v10870_v51 = vld [vmem:[#allocation8 + $0x948] sm:$0xff] }
  0xdc   :  { %14230 = vst [vmem:[#allocation300_spill] sm:$0xff] %v10866_v36  ;;  %14231 = vst [vmem:[#allocation301_spill] sm:$0xff] %v10868_v10  ;;  %v10872_v44 = vld [vmem:[#allocation8 + $0x950] sm:$0xff]  ;;  %v10874_v31 = vld [vmem:[#allocation8 + $0x958] sm:$0xff] }
  0xdd   :  { %14232 = vst [vmem:[#allocation302_spill] sm:$0xff] %v10870_v51  ;;  %14233 = vst [vmem:[#allocation303_spill] sm:$0xff] %v10872_v44  ;;  %v10876_v15 = vld [vmem:[#allocation8 + $0x960] sm:$0xff]  ;;  %v10878_v29 = vld [vmem:[#allocation8 + $0x968] sm:$0xff] }
  0xde   :  { %14234 = vst [vmem:[#allocation304_spill] sm:$0xff] %v10874_v31  ;;  %14235 = vst [vmem:[#allocation305_spill] sm:$0xff] %v10876_v15  ;;  %v10880_v4 = vld [vmem:[#allocation8 + $0x970] sm:$0xff]  ;;  %v10882_v45 = vld [vmem:[#allocation8 + $0x978] sm:$0xff] }
  0xdf   :  { %14236 = vst [vmem:[#allocation306_spill] sm:$0xff] %v10878_v29  ;;  %14237 = vst [vmem:[#allocation307_spill] sm:$0xff] %v10880_v4  ;;  %v10884_v61 = vld [vmem:[#allocation8 + $0x980] sm:$0xff]  ;;  %v10886_v12 = vld [vmem:[#allocation8 + $0x988] sm:$0xff] }
  0xe0   :  { %14238 = vst [vmem:[#allocation308_spill] sm:$0xff] %v10882_v45  ;;  %14239 = vst [vmem:[#allocation309_spill] sm:$0xff] %v10886_v12  ;;  %v10888_v36 = vld [vmem:[#allocation8 + $0x990] sm:$0xff]  ;;  %v10890_v6 = vld [vmem:[#allocation8 + $0x998] sm:$0xff] }
  0xe1   :  { %14240 = vst [vmem:[#allocation310_spill] sm:$0xff] %v10888_v36  ;;  %14241 = vst [vmem:[#allocation311_spill] sm:$0xff] %v10890_v6  ;;  %v10892_v47 = vld [vmem:[#allocation8 + $0x9a0] sm:$0xff]  ;;  %v10894_v44 = vld [vmem:[#allocation8 + $0x9a8] sm:$0xff] }
  0xe2   :  { %14242 = vst [vmem:[#allocation312_spill] sm:$0xff] %v10892_v47  ;;  %14243 = vst [vmem:[#allocation313_spill] sm:$0xff] %v10894_v44  ;;  %v10896_v31 = vld [vmem:[#allocation8 + $0x9b0] sm:$0xff]  ;;  %v10898_v15 = vld [vmem:[#allocation8 + $0x9b8] sm:$0xff] }
  0xe3   :  { %14244 = vst [vmem:[#allocation314_spill] sm:$0xff] %v10896_v31  ;;  %14245 = vst [vmem:[#allocation315_spill] sm:$0xff] %v10898_v15  ;;  %v10900_v29 = vld [vmem:[#allocation8 + $0x9c0] sm:$0xff]  ;;  %v10902_v4 = vld [vmem:[#allocation8 + $0x9c8] sm:$0xff] }
  0xe4   :  { %14246 = vst [vmem:[#allocation316_spill] sm:$0xff] %v10902_v4  ;;  %v10904_v45 = vld [vmem:[#allocation8 + $0x9d0] sm:$0xff]  ;;  %v10906_v62 = vld [vmem:[#allocation8 + $0x9d8] sm:$0xff]  ;;  %v10908_v12 = vld [vmem:[#allocation8 + $0x9e0] sm:$0xff] }
  0xe5   :  { %14247 = vst [vmem:[#allocation317_spill] sm:$0xff] %v10904_v45  ;;  %14248 = vst [vmem:[#allocation318_spill] sm:$0xff] %v10906_v62  ;;  %v10910_v36 = vld [vmem:[#allocation8 + $0x9e8] sm:$0xff]  ;;  %v10912_v6 = vld [vmem:[#allocation8 + $0x9f0] sm:$0xff] }
  0xe6   :  { %14249 = vst [vmem:[#allocation319_spill] sm:$0xff] %v10908_v12  ;;  %14250 = vst [vmem:[#allocation320_spill] sm:$0xff] %v10910_v36  ;;  %v10914_v47 = vld [vmem:[#allocation8 + $0x9f8] sm:$0xff]  ;;  %v10916_v44 = vld [vmem:[#allocation8 + $0xa00] sm:$0xff] }
  0xe7   :  { %14251 = vst [vmem:[#allocation321_spill] sm:$0xff] %v10912_v6  ;;  %14252 = vst [vmem:[#allocation322_spill] sm:$0xff] %v10914_v47  ;;  %v10918_v31 = vld [vmem:[#allocation8 + $0xa08] sm:$0xff]  ;;  %v10920_v15 = vld [vmem:[#allocation8 + $0xa10] sm:$0xff] }
  0xe8   :  { %14253 = vst [vmem:[#allocation323_spill] sm:$0xff] %v10918_v31  ;;  %14254 = vst [vmem:[#allocation324_spill] sm:$0xff] %v10920_v15  ;;  %v10922_v49 = vld [vmem:[#allocation8 + $0xa18] sm:$0xff]  ;;  %v10924_v4 = vld [vmem:[#allocation8 + $0xa20] sm:$0xff] }
  0xe9   :  { %14255 = vst [vmem:[#allocation325_spill] sm:$0xff] %v10922_v49  ;;  %14256 = vst [vmem:[#allocation326_spill] sm:$0xff] %v10924_v4  ;;  %v10926_v45 = vld [vmem:[#allocation8 + $0xa28] sm:$0xff]  ;;  %v10928_v62 = vld [vmem:[#allocation8 + $0xa30] sm:$0xff] }
  0xea   :  { %14257 = vst [vmem:[#allocation327_spill] sm:$0xff] %v10926_v45  ;;  %14258 = vst [vmem:[#allocation328_spill] sm:$0xff] %v10928_v62  ;;  %v10930_v12 = vld [vmem:[#allocation8 + $0xa38] sm:$0xff]  ;;  %v10932_v36 = vld [vmem:[#allocation8 + $0xa40] sm:$0xff] }
  0xeb   :  { %14259 = vst [vmem:[#allocation329_spill] sm:$0xff] %v10930_v12  ;;  %v10934_v6 = vld [vmem:[#allocation8 + $0xa48] sm:$0xff]  ;;  %v10936_v47 = vld [vmem:[#allocation8 + $0xa50] sm:$0xff]  ;;  %v10938_v57 = vld [vmem:[#allocation8 + $0xa58] sm:$0xff] }
  0xec   :  { %14260 = vst [vmem:[#allocation330_spill] sm:$0xff] %v10934_v6  ;;  %14261 = vst [vmem:[#allocation331_spill] sm:$0xff] %v10936_v47  ;;  %v10940_v31 = vld [vmem:[#allocation8 + $0xa60] sm:$0xff]  ;;  %v10942_v15 = vld [vmem:[#allocation8 + $0xa68] sm:$0xff] }
  0xed   :  { %14262 = vst [vmem:[#allocation332_spill] sm:$0xff] %v10938_v57  ;;  %14263 = vst [vmem:[#allocation333_spill] sm:$0xff] %v10940_v31  ;;  %v10944_v49 = vld [vmem:[#allocation8 + $0xa70] sm:$0xff]  ;;  %v10946_v4 = vld [vmem:[#allocation8 + $0xa78] sm:$0xff] }
  0xee   :  { %14264 = vst [vmem:[#allocation334_spill] sm:$0xff] %v10942_v15  ;;  %14265 = vst [vmem:[#allocation335_spill] sm:$0xff] %v10944_v49  ;;  %v10948_v45 = vld [vmem:[#allocation8 + $0xa80] sm:$0xff]  ;;  %v10950_v62 = vld [vmem:[#allocation8 + $0xa88] sm:$0xff] }
  0xef   :  { %14266 = vst [vmem:[#allocation336_spill] sm:$0xff] %v10946_v4  ;;  %14267 = vst [vmem:[#allocation337_spill] sm:$0xff] %v10950_v62  ;;  %v10952_v12 = vld [vmem:[#allocation8 + $0xa90] sm:$0xff]  ;;  %v10954_v3 = vld [vmem:[#allocation8 + $0xa98] sm:$0xff] }
  0xf0   :  { %14268 = vst [vmem:[#allocation338_spill] sm:$0xff] %v10952_v12  ;;  %14269 = vst [vmem:[#allocation339_spill] sm:$0xff] %v10954_v3  ;;  %v10956_v6 = vld [vmem:[#allocation8 + $0xaa0] sm:$0xff]  ;;  %v10958_v47 = vld [vmem:[#allocation8 + $0xaa8] sm:$0xff] }
  0xf1   :  { %14270 = vst [vmem:[#allocation340_spill] sm:$0xff] %v10956_v6  ;;  %14271 = vst [vmem:[#allocation341_spill] sm:$0xff] %v10958_v47  ;;  %v10960_v57 = vld [vmem:[#allocation8 + $0xab0] sm:$0xff]  ;;  %v10962_v31 = vld [vmem:[#allocation8 + $0xab8] sm:$0xff] }
  0xf2   :  { %14272 = vst [vmem:[#allocation342_spill] sm:$0xff] %v10960_v57  ;;  %14273 = vst [vmem:[#allocation343_spill] sm:$0xff] %v10962_v31  ;;  %v10964_v15 = vld [vmem:[#allocation8 + $0xac0] sm:$0xff]  ;;  %v10966_v49 = vld [vmem:[#allocation8 + $0xac8] sm:$0xff] }
  0xf3   :  { %14274 = vst [vmem:[#allocation344_spill] sm:$0xff] %v10964_v15  ;;  %14275 = vst [vmem:[#allocation345_spill] sm:$0xff] %v10966_v49  ;;  %v10968_v4 = vld [vmem:[#allocation8 + $0xad0] sm:$0xff]  ;;  %v10970_v51 = vld [vmem:[#allocation8 + $0xad8] sm:$0xff] }
  0xf4   :  { %14276 = vst [vmem:[#allocation346_spill] sm:$0xff] %v10968_v4  ;;  %14277 = vst [vmem:[#allocation347_spill] sm:$0xff] %v10970_v51  ;;  %v10972_v62 = vld [vmem:[#allocation8 + $0xae0] sm:$0xff]  ;;  %v10974_v12 = vld [vmem:[#allocation8 + $0xae8] sm:$0xff] }
  0xf5   :  { %14278 = vst [vmem:[#allocation348_spill] sm:$0xff] %v10972_v62  ;;  %14279 = vst [vmem:[#allocation349_spill] sm:$0xff] %v10974_v12  ;;  %v10976_v3 = vld [vmem:[#allocation8 + $0xaf0] sm:$0xff]  ;;  %v10978_v6 = vld [vmem:[#allocation8 + $0xaf8] sm:$0xff] }
  0xf6   :  { %14280 = vst [vmem:[#allocation350_spill] sm:$0xff] %v10976_v3  ;;  %14281 = vst [vmem:[#allocation351_spill] sm:$0xff] %v10978_v6  ;;  %v10980_v47 = vld [vmem:[#allocation8 + $0xb00] sm:$0xff]  ;;  %v10982_v57 = vld [vmem:[#allocation8 + $0xb08] sm:$0xff] }
  0xf7   :  { %14282 = vst [vmem:[#allocation352_spill] sm:$0xff] %v10980_v47  ;;  %14283 = vst [vmem:[#allocation353_spill] sm:$0xff] %v10982_v57  ;;  %v10984_v31 = vld [vmem:[#allocation8 + $0xb10] sm:$0xff]  ;;  %v10986_v33 = vld [vmem:[#allocation8 + $0xb18] sm:$0xff] }
  0xf8   :  { %14284 = vst [vmem:[#allocation354_spill] sm:$0xff] %v10984_v31  ;;  %14285 = vst [vmem:[#allocation355_spill] sm:$0xff] %v10986_v33  ;;  %v10988_v49 = vld [vmem:[#allocation8 + $0xb20] sm:$0xff]  ;;  %v10990_v4 = vld [vmem:[#allocation8 + $0xb28] sm:$0xff] }
  0xf9   :  { %14286 = vst [vmem:[#allocation356_spill] sm:$0xff] %v10988_v49  ;;  %14287 = vst [vmem:[#allocation357_spill] sm:$0xff] %v10990_v4  ;;  %v10992_v51 = vld [vmem:[#allocation8 + $0xb30] sm:$0xff]  ;;  %v10994_v62 = vld [vmem:[#allocation8 + $0xb38] sm:$0xff] }
  0xfa   :  { %14288 = vst [vmem:[#allocation358_spill] sm:$0xff] %v10992_v51  ;;  %14289 = vst [vmem:[#allocation359_spill] sm:$0xff] %v10994_v62  ;;  %v10996_v12 = vld [vmem:[#allocation8 + $0xb40] sm:$0xff]  ;;  %v10998_v3 = vld [vmem:[#allocation8 + $0xb48] sm:$0xff] }
  0xfb   :  { %14290 = vst [vmem:[#allocation360_spill] sm:$0xff] %v10996_v12  ;;  %14291 = vst [vmem:[#allocation361_spill] sm:$0xff] %v10998_v3  ;;  %v11000_v6 = vld [vmem:[#allocation8 + $0xb50] sm:$0xff]  ;;  %v11002_v41 = vld [vmem:[#allocation8 + $0xb58] sm:$0xff] }
  0xfc   :  { %14292 = vst [vmem:[#allocation362_spill] sm:$0xff] %v11000_v6  ;;  %14293 = vst [vmem:[#allocation363_spill] sm:$0xff] %v11002_v41  ;;  %v11004_v57 = vld [vmem:[#allocation8 + $0xb60] sm:$0xff]  ;;  %v11006_v31 = vld [vmem:[#allocation8 + $0xb68] sm:$0xff] }
  0xfd   :  { %14294 = vst [vmem:[#allocation364_spill] sm:$0xff] %v11004_v57  ;;  %14295 = vst [vmem:[#allocation365_spill] sm:$0xff] %v11006_v31  ;;  %v11008_v33 = vld [vmem:[#allocation8 + $0xb70] sm:$0xff]  ;;  %v11010_v49 = vld [vmem:[#allocation8 + $0xb78] sm:$0xff] }
  0xfe   :  { %14296 = vst [vmem:[#allocation366_spill] sm:$0xff] %v11008_v33  ;;  %14297 = vst [vmem:[#allocation367_spill] sm:$0xff] %v11010_v49  ;;  %v11012_v4 = vld [vmem:[#allocation8 + $0xb80] sm:$0xff]  ;;  %v11014_v51 = vld [vmem:[#allocation8 + $0xb88] sm:$0xff] }
  0xff   :  { %14298 = vst [vmem:[#allocation368_spill] sm:$0xff] %v11012_v4  ;;  %14299 = vst [vmem:[#allocation369_spill] sm:$0xff] %v11014_v51  ;;  %v11016_v62 = vld [vmem:[#allocation8 + $0xb90] sm:$0xff]  ;;  %v11018_v52 = vld [vmem:[#allocation8 + $0xb98] sm:$0xff] }
 0x100   :  { %14300 = vst [vmem:[#allocation370_spill] sm:$0xff] %v11016_v62  ;;  %14301 = vst [vmem:[#allocation371_spill] sm:$0xff] %v11018_v52  ;;  %v11020_v3 = vld [vmem:[#allocation8 + $0xba0] sm:$0xff]  ;;  %v11022_v6 = vld [vmem:[#allocation8 + $0xba8] sm:$0xff] }
 0x101   :  { %14302 = vst [vmem:[#allocation372_spill] sm:$0xff] %v11020_v3  ;;  %14303 = vst [vmem:[#allocation373_spill] sm:$0xff] %v11022_v6  ;;  %v11024_v41 = vld [vmem:[#allocation8 + $0xbb0] sm:$0xff]  ;;  %v11026_v57 = vld [vmem:[#allocation8 + $0xbb8] sm:$0xff] }
 0x102   :  { %14304 = vst [vmem:[#allocation374_spill] sm:$0xff] %v11024_v41  ;;  %14305 = vst [vmem:[#allocation375_spill] sm:$0xff] %v11026_v57  ;;  %v11028_v31 = vld [vmem:[#allocation8 + $0xbc0] sm:$0xff]  ;;  %v11030_v33 = vld [vmem:[#allocation8 + $0xbc8] sm:$0xff] }
 0x103   :  { %14306 = vst [vmem:[#allocation376_spill] sm:$0xff] %v11028_v31  ;;  %14307 = vst [vmem:[#allocation377_spill] sm:$0xff] %v11030_v33  ;;  %v11032_v49 = vld [vmem:[#allocation8 + $0xbd0] sm:$0xff]  ;;  %v11034_v43 = vld [vmem:[#allocation8 + $0xbd8] sm:$0xff] }
 0x104   :  { %14308 = vst [vmem:[#allocation378_spill] sm:$0xff] %v11032_v49  ;;  %14309 = vst [vmem:[#allocation379_spill] sm:$0xff] %v11034_v43  ;;  %v11036_v51 = vld [vmem:[#allocation8 + $0xbe0] sm:$0xff]  ;;  %v11038_v62 = vld [vmem:[#allocation8 + $0xbe8] sm:$0xff] }
 0x105   :  { %14310 = vst [vmem:[#allocation380_spill] sm:$0xff] %v11036_v51  ;;  %14311 = vst [vmem:[#allocation381_spill] sm:$0xff] %v11038_v62  ;;  %v11040_v52 = vld [vmem:[#allocation8 + $0xbf0] sm:$0xff]  ;;  %v11042_v3 = vld [vmem:[#allocation8 + $0xbf8] sm:$0xff] }
 0x106   :  { %14312 = vst [vmem:[#allocation382_spill] sm:$0xff] %v11040_v52  ;;  %14313 = vst [vmem:[#allocation383_spill] sm:$0xff] %v11042_v3  ;;  %v11044_v6 = vld [vmem:[#allocation8 + $0xc00] sm:$0xff]  ;;  %v11046_v41 = vld [vmem:[#allocation8 + $0xc08] sm:$0xff] }
 0x107   :  { %14314 = vst [vmem:[#allocation384_spill] sm:$0xff] %v11044_v6  ;;  %14315 = vst [vmem:[#allocation385_spill] sm:$0xff] %v11046_v41  ;;  %v11048_v57 = vld [vmem:[#allocation8 + $0xc10] sm:$0xff]  ;;  %v11050_v17 = vld [vmem:[#allocation8 + $0xc18] sm:$0xff] }
 0x108   :  { %14316 = vst [vmem:[#allocation386_spill] sm:$0xff] %v11048_v57  ;;  %14317 = vst [vmem:[#allocation387_spill] sm:$0xff] %v11050_v17  ;;  %v11052_v33 = vld [vmem:[#allocation8 + $0xc20] sm:$0xff]  ;;  %v11054_v49 = vld [vmem:[#allocation8 + $0xc28] sm:$0xff] }
 0x109   :  { %14318 = vst [vmem:[#allocation388_spill] sm:$0xff] %v11052_v33  ;;  %14319 = vst [vmem:[#allocation389_spill] sm:$0xff] %v11054_v49  ;;  %v11056_v43 = vld [vmem:[#allocation8 + $0xc30] sm:$0xff]  ;;  %v11058_v51 = vld [vmem:[#allocation8 + $0xc38] sm:$0xff] }
 0x10a   :  { %14320 = vst [vmem:[#allocation390_spill] sm:$0xff] %v11056_v43  ;;  %14321 = vst [vmem:[#allocation391_spill] sm:$0xff] %v11058_v51  ;;  %v11060_v62 = vld [vmem:[#allocation8 + $0xc40] sm:$0xff]  ;;  %v11062_v52 = vld [vmem:[#allocation8 + $0xc48] sm:$0xff] }
 0x10b   :  { %14322 = vst [vmem:[#allocation392_spill] sm:$0xff] %v11060_v62  ;;  %14323 = vst [vmem:[#allocation393_spill] sm:$0xff] %v11062_v52  ;;  %v11064_v3 = vld [vmem:[#allocation8 + $0xc50] sm:$0xff]  ;;  %v11066_v25 = vld [vmem:[#allocation8 + $0xc58] sm:$0xff] }
 0x10c   :  { %14324 = vst [vmem:[#allocation394_spill] sm:$0xff] %v11064_v3  ;;  %14325 = vst [vmem:[#allocation395_spill] sm:$0xff] %v11066_v25  ;;  %v11068_v41 = vld [vmem:[#allocation8 + $0xc60] sm:$0xff]  ;;  %v11070_v57 = vld [vmem:[#allocation8 + $0xc68] sm:$0xff] }
 0x10d   :  { %14326 = vst [vmem:[#allocation396_spill] sm:$0xff] %v11068_v41  ;;  %14327 = vst [vmem:[#allocation397_spill] sm:$0xff] %v11070_v57  ;;  %v11072_v17 = vld [vmem:[#allocation8 + $0xc70] sm:$0xff]  ;;  %v11074_v33 = vld [vmem:[#allocation8 + $0xc78] sm:$0xff] }
 0x10e   :  { %14328 = vst [vmem:[#allocation398_spill] sm:$0xff] %v11072_v17  ;;  %14329 = vst [vmem:[#allocation399_spill] sm:$0xff] %v11074_v33  ;;  %v11076_v49 = vld [vmem:[#allocation8 + $0xc80] sm:$0xff]  ;;  %v11078_v43 = vld [vmem:[#allocation8 + $0xc88] sm:$0xff] }
 0x10f   :  { %14330 = vst [vmem:[#allocation400_spill] sm:$0xff] %v11076_v49  ;;  %14331 = vst [vmem:[#allocation401_spill] sm:$0xff] %v11078_v43  ;;  %v11080_v51 = vld [vmem:[#allocation8 + $0xc90] sm:$0xff]  ;;  %v11082_v14 = vld [vmem:[#allocation8 + $0xc98] sm:$0xff] }
 0x110   :  { %14332 = vst [vmem:[#allocation402_spill] sm:$0xff] %v11080_v51  ;;  %14333 = vst [vmem:[#allocation403_spill] sm:$0xff] %v11082_v14  ;;  %v11084_v52 = vld [vmem:[#allocation8 + $0xca0] sm:$0xff]  ;;  %v11086_v3 = vld [vmem:[#allocation8 + $0xca8] sm:$0xff] }
 0x111   :  { %14334 = vst [vmem:[#allocation404_spill] sm:$0xff] %v11084_v52  ;;  %14335 = vst [vmem:[#allocation405_spill] sm:$0xff] %v11086_v3  ;;  %v11088_v25 = vld [vmem:[#allocation8 + $0xcb0] sm:$0xff]  ;;  %v11090_v41 = vld [vmem:[#allocation8 + $0xcb8] sm:$0xff] }
 0x112   :  { %14336 = vst [vmem:[#allocation406_spill] sm:$0xff] %v11088_v25  ;;  %14337 = vst [vmem:[#allocation407_spill] sm:$0xff] %v11090_v41  ;;  %v11092_v57 = vld [vmem:[#allocation8 + $0xcc0] sm:$0xff]  ;;  %v11094_v17 = vld [vmem:[#allocation8 + $0xcc8] sm:$0xff] }
 0x113   :  { %14338 = vst [vmem:[#allocation408_spill] sm:$0xff] %v11092_v57  ;;  %14339 = vst [vmem:[#allocation409_spill] sm:$0xff] %v11094_v17  ;;  %v11096_v33 = vld [vmem:[#allocation8 + $0xcd0] sm:$0xff]  ;;  %v11098_v22 = vld [vmem:[#allocation8 + $0xcd8] sm:$0xff] }
 0x114   :  { %14340 = vst [vmem:[#allocation410_spill] sm:$0xff] %v11096_v33  ;;  %14341 = vst [vmem:[#allocation411_spill] sm:$0xff] %v11098_v22  ;;  %v11100_v43 = vld [vmem:[#allocation8 + $0xce0] sm:$0xff]  ;;  %v11102_v51 = vld [vmem:[#allocation8 + $0xce8] sm:$0xff] }
 0x115   :  { %14342 = vst [vmem:[#allocation412_spill] sm:$0xff] %v11100_v43  ;;  %14343 = vst [vmem:[#allocation413_spill] sm:$0xff] %v11102_v51  ;;  %v11104_v14 = vld [vmem:[#allocation8 + $0xcf0] sm:$0xff]  ;;  %v11106_v52 = vld [vmem:[#allocation8 + $0xcf8] sm:$0xff] }
 0x116   :  { %14344 = vst [vmem:[#allocation414_spill] sm:$0xff] %v11104_v14  ;;  %14345 = vst [vmem:[#allocation415_spill] sm:$0xff] %v11106_v52  ;;  %v11108_v3 = vld [vmem:[#allocation8 + $0xd00] sm:$0xff]  ;;  %v11110_v25 = vld [vmem:[#allocation8 + $0xd08] sm:$0xff] }
 0x117   :  { %14346 = vst [vmem:[#allocation416_spill] sm:$0xff] %v11108_v3  ;;  %14347 = vst [vmem:[#allocation417_spill] sm:$0xff] %v11110_v25  ;;  %v11112_v41 = vld [vmem:[#allocation8 + $0xd10] sm:$0xff]  ;;  %v11114_v1 = vld [vmem:[#allocation8 + $0xd18] sm:$0xff] }
 0x118   :  { %14348 = vst [vmem:[#allocation418_spill] sm:$0xff] %v11112_v41  ;;  %14349 = vst [vmem:[#allocation419_spill] sm:$0xff] %v11114_v1  ;;  %v11116_v17 = vld [vmem:[#allocation8 + $0xd20] sm:$0xff]  ;;  %v11118_v33 = vld [vmem:[#allocation8 + $0xd28] sm:$0xff] }
 0x119   :  { %14350 = vst [vmem:[#allocation420_spill] sm:$0xff] %v11116_v17  ;;  %14351 = vst [vmem:[#allocation421_spill] sm:$0xff] %v11118_v33  ;;  %v11120_v22 = vld [vmem:[#allocation8 + $0xd30] sm:$0xff]  ;;  %v11122_v43 = vld [vmem:[#allocation8 + $0xd38] sm:$0xff] }
 0x11a   :  { %14352 = vst [vmem:[#allocation422_spill] sm:$0xff] %v11120_v22  ;;  %14353 = vst [vmem:[#allocation423_spill] sm:$0xff] %v11122_v43  ;;  %v11124_v51 = vld [vmem:[#allocation8 + $0xd40] sm:$0xff]  ;;  %v11126_v14 = vld [vmem:[#allocation8 + $0xd48] sm:$0xff] }
 0x11b   :  { %14354 = vst [vmem:[#allocation424_spill] sm:$0xff] %v11124_v51  ;;  %14355 = vst [vmem:[#allocation425_spill] sm:$0xff] %v11126_v14  ;;  %v11128_v52 = vld [vmem:[#allocation8 + $0xd50] sm:$0xff]  ;;  %v11130_v9 = vld [vmem:[#allocation8 + $0xd58] sm:$0xff] }
 0x11c   :  { %14356 = vst [vmem:[#allocation426_spill] sm:$0xff] %v11128_v52  ;;  %14357 = vst [vmem:[#allocation427_spill] sm:$0xff] %v11130_v9  ;;  %v11132_v25 = vld [vmem:[#allocation8 + $0xd60] sm:$0xff]  ;;  %v11134_v41 = vld [vmem:[#allocation8 + $0xd68] sm:$0xff] }
 0x11d   :  { %14358 = vst [vmem:[#allocation428_spill] sm:$0xff] %v11132_v25  ;;  %14359 = vst [vmem:[#allocation429_spill] sm:$0xff] %v11134_v41  ;;  %v11136_v1 = vld [vmem:[#allocation8 + $0xd70] sm:$0xff]  ;;  %v11138_v17 = vld [vmem:[#allocation8 + $0xd78] sm:$0xff] }
 0x11e   :  { %14360 = vst [vmem:[#allocation430_spill] sm:$0xff] %v11136_v1  ;;  %14361 = vst [vmem:[#allocation431_spill] sm:$0xff] %v11138_v17  ;;  %v11140_v33 = vld [vmem:[#allocation8 + $0xd80] sm:$0xff]  ;;  %v11142_v22 = vld [vmem:[#allocation8 + $0xd88] sm:$0xff] }
 0x11f   :  { %14362 = vst [vmem:[#allocation432_spill] sm:$0xff] %v11140_v33  ;;  %14363 = vst [vmem:[#allocation433_spill] sm:$0xff] %v11142_v22  ;;  %v11144_v43 = vld [vmem:[#allocation8 + $0xd90] sm:$0xff]  ;;  %v11146_v34 = vld [vmem:[#allocation8 + $0xd98] sm:$0xff] }
 0x120   :  { %14364 = vst [vmem:[#allocation434_spill] sm:$0xff] %v11144_v43  ;;  %14365 = vst [vmem:[#allocation435_spill] sm:$0xff] %v11146_v34  ;;  %v11148_v14 = vld [vmem:[#allocation8 + $0xda0] sm:$0xff]  ;;  %v11150_v52 = vld [vmem:[#allocation8 + $0xda8] sm:$0xff] }
 0x121   :  { %14366 = vst [vmem:[#allocation436_spill] sm:$0xff] %v11148_v14  ;;  %14367 = vst [vmem:[#allocation437_spill] sm:$0xff] %v11150_v52  ;;  %v11152_v9 = vld [vmem:[#allocation8 + $0xdb0] sm:$0xff]  ;;  %v11154_v25 = vld [vmem:[#allocation8 + $0xdb8] sm:$0xff] }
 0x122   :  { %14368 = vst [vmem:[#allocation438_spill] sm:$0xff] %v11152_v9  ;;  %14369 = vst [vmem:[#allocation439_spill] sm:$0xff] %v11154_v25  ;;  %v11156_v41 = vld [vmem:[#allocation8 + $0xdc0] sm:$0xff]  ;;  %v11158_v1 = vld [vmem:[#allocation8 + $0xdc8] sm:$0xff] }
 0x123   :  { %14370 = vst [vmem:[#allocation440_spill] sm:$0xff] %v11156_v41  ;;  %14371 = vst [vmem:[#allocation441_spill] sm:$0xff] %v11158_v1  ;;  %v11160_v17 = vld [vmem:[#allocation8 + $0xdd0] sm:$0xff]  ;;  %v11162_v18 = vld [vmem:[#allocation8 + $0xdd8] sm:$0xff] }
 0x124   :  { %14372 = vst [vmem:[#allocation442_spill] sm:$0xff] %v11160_v17  ;;  %14373 = vst [vmem:[#allocation443_spill] sm:$0xff] %v11162_v18  ;;  %v11164_v22 = vld [vmem:[#allocation8 + $0xde0] sm:$0xff]  ;;  %v11166_v43 = vld [vmem:[#allocation8 + $0xde8] sm:$0xff] }
 0x125   :  { %14374 = vst [vmem:[#allocation444_spill] sm:$0xff] %v11164_v22  ;;  %14375 = vst [vmem:[#allocation445_spill] sm:$0xff] %v11166_v43  ;;  %v11168_v34 = vld [vmem:[#allocation8 + $0xdf0] sm:$0xff]  ;;  %v11170_v14 = vld [vmem:[#allocation8 + $0xdf8] sm:$0xff] }
 0x126   :  { %14376 = vst [vmem:[#allocation446_spill] sm:$0xff] %v11168_v34  ;;  %14377 = vst [vmem:[#allocation447_spill] sm:$0xff] %v11170_v14  ;;  %v11172_v52 = vld [vmem:[#allocation8 + $0xe00] sm:$0xff]  ;;  %v11174_v9 = vld [vmem:[#allocation8 + $0xe08] sm:$0xff] }
 0x127   :  { %14378 = vst [vmem:[#allocation448_spill] sm:$0xff] %v11172_v52  ;;  %14379 = vst [vmem:[#allocation449_spill] sm:$0xff] %v11174_v9  ;;  %v11176_v25 = vld [vmem:[#allocation8 + $0xe10] sm:$0xff]  ;;  %v11178_v55 = vld [vmem:[#allocation8 + $0xe18] sm:$0xff] }
 0x128   :  { %14380 = vst [vmem:[#allocation450_spill] sm:$0xff] %v11176_v25  ;;  %14381 = vst [vmem:[#allocation451_spill] sm:$0xff] %v11178_v55  ;;  %v11180_v1 = vld [vmem:[#allocation8 + $0xe20] sm:$0xff]  ;;  %v11182_v17 = vld [vmem:[#allocation8 + $0xe28] sm:$0xff] }
 0x129   :  { %14382 = vst [vmem:[#allocation452_spill] sm:$0xff] %v11180_v1  ;;  %14383 = vst [vmem:[#allocation453_spill] sm:$0xff] %v11182_v17  ;;  %v11184_v18 = vld [vmem:[#allocation8 + $0xe30] sm:$0xff]  ;;  %v11186_v22 = vld [vmem:[#allocation8 + $0xe38] sm:$0xff] }
 0x12a   :  { %14384 = vst [vmem:[#allocation454_spill] sm:$0xff] %v11184_v18  ;;  %14385 = vst [vmem:[#allocation455_spill] sm:$0xff] %v11186_v22  ;;  %v11188_v43 = vld [vmem:[#allocation8 + $0xe40] sm:$0xff]  ;;  %v11190_v34 = vld [vmem:[#allocation8 + $0xe48] sm:$0xff] }
 0x12b   :  { %14386 = vst [vmem:[#allocation456_spill] sm:$0xff] %v11188_v43  ;;  %14387 = vst [vmem:[#allocation457_spill] sm:$0xff] %v11190_v34  ;;  %v11192_v14 = vld [vmem:[#allocation8 + $0xe50] sm:$0xff]  ;;  %v11194_v50 = vld [vmem:[#allocation8 + $0xe58] sm:$0xff] }
 0x12c   :  { %14388 = vst [vmem:[#allocation458_spill] sm:$0xff] %v11192_v14  ;;  %14389 = vst [vmem:[#allocation459_spill] sm:$0xff] %v11194_v50  ;;  %v11196_v9 = vld [vmem:[#allocation8 + $0xe60] sm:$0xff]  ;;  %v11198_v25 = vld [vmem:[#allocation8 + $0xe68] sm:$0xff] }
 0x12d   :  { %14390 = vst [vmem:[#allocation460_spill] sm:$0xff] %v11196_v9  ;;  %14391 = vst [vmem:[#allocation461_spill] sm:$0xff] %v11198_v25  ;;  %v11200_v55 = vld [vmem:[#allocation8 + $0xe70] sm:$0xff]  ;;  %v11202_v1 = vld [vmem:[#allocation8 + $0xe78] sm:$0xff] }
 0x12e   :  { %14392 = vst [vmem:[#allocation462_spill] sm:$0xff] %v11200_v55  ;;  %14393 = vst [vmem:[#allocation463_spill] sm:$0xff] %v11202_v1  ;;  %v11204_v17 = vld [vmem:[#allocation8 + $0xe80] sm:$0xff]  ;;  %v11206_v18 = vld [vmem:[#allocation8 + $0xe88] sm:$0xff] }
 0x12f   :  { %14394 = vst [vmem:[#allocation464_spill] sm:$0xff] %v11204_v17  ;;  %14395 = vst [vmem:[#allocation465_spill] sm:$0xff] %v11206_v18  ;;  %v11208_v22 = vld [vmem:[#allocation8 + $0xe90] sm:$0xff]  ;;  %v11210_v21 = vld [vmem:[#allocation8 + $0xe98] sm:$0xff] }
 0x130   :  { %14396 = vst [vmem:[#allocation466_spill] sm:$0xff] %v11208_v22  ;;  %14397 = vst [vmem:[#allocation467_spill] sm:$0xff] %v11210_v21  ;;  %v11212_v34 = vld [vmem:[#allocation8 + $0xea0] sm:$0xff]  ;;  %v11214_v14 = vld [vmem:[#allocation8 + $0xea8] sm:$0xff] }
 0x131   :  { %14398 = vst [vmem:[#allocation468_spill] sm:$0xff] %v11212_v34  ;;  %14399 = vst [vmem:[#allocation469_spill] sm:$0xff] %v11214_v14  ;;  %v11216_v50 = vld [vmem:[#allocation8 + $0xeb0] sm:$0xff]  ;;  %v11218_v9 = vld [vmem:[#allocation8 + $0xeb8] sm:$0xff] }
 0x132   :  { %14400 = vst [vmem:[#allocation470_spill] sm:$0xff] %v11216_v50  ;;  %14401 = vst [vmem:[#allocation471_spill] sm:$0xff] %v11218_v9  ;;  %v11220_v25 = vld [vmem:[#allocation8 + $0xec0] sm:$0xff]  ;;  %v11222_v55 = vld [vmem:[#allocation8 + $0xec8] sm:$0xff] }
 0x133   :  { %14402 = vst [vmem:[#allocation472_spill] sm:$0xff] %v11220_v25  ;;  %14403 = vst [vmem:[#allocation473_spill] sm:$0xff] %v11222_v55  ;;  %v11224_v1 = vld [vmem:[#allocation8 + $0xed0] sm:$0xff]  ;;  %v11226_v17 = vld [vmem:[#allocation8 + $0xed8] sm:$0xff] }
 0x134   :  { %14404 = vst [vmem:[#allocation474_spill] sm:$0xff] %v11224_v1  ;;  %14405 = vst [vmem:[#allocation475_spill] sm:$0xff] %v11226_v17  ;;  %v11228_v18 = vld [vmem:[#allocation8 + $0xee0] sm:$0xff]  ;;  %v11230_v22 = vld [vmem:[#allocation8 + $0xee8] sm:$0xff] }
 0x135   :  { %14406 = vst [vmem:[#allocation476_spill] sm:$0xff] %v11228_v18  ;;  %14407 = vst [vmem:[#allocation477_spill] sm:$0xff] %v11230_v22  ;;  %v11232_v21 = vld [vmem:[#allocation8 + $0xef0] sm:$0xff]  ;;  %v11234_v34 = vld [vmem:[#allocation8 + $0xef8] sm:$0xff] }
 0x136   :  { %14408 = vst [vmem:[#allocation478_spill] sm:$0xff] %v11232_v21  ;;  %14409 = vst [vmem:[#allocation479_spill] sm:$0xff] %v11234_v34  ;;  %v11236_v14 = vld [vmem:[#allocation8 + $0xf00] sm:$0xff]  ;;  %v11238_v50 = vld [vmem:[#allocation8 + $0xf08] sm:$0xff] }
 0x137   :  { %14410 = vst [vmem:[#allocation480_spill] sm:$0xff] %v11236_v14  ;;  %14411 = vst [vmem:[#allocation481_spill] sm:$0xff] %v11238_v50  ;;  %v11240_v9 = vld [vmem:[#allocation8 + $0xf10] sm:$0xff]  ;;  %v11242_v25 = vld [vmem:[#allocation8 + $0xf18] sm:$0xff] }
 0x138   :  { %14412 = vst [vmem:[#allocation482_spill] sm:$0xff] %v11240_v9  ;;  %14413 = vst [vmem:[#allocation483_spill] sm:$0xff] %v11242_v25  ;;  %v11244_v55 = vld [vmem:[#allocation8 + $0xf20] sm:$0xff]  ;;  %v11246_v1 = vld [vmem:[#allocation8 + $0xf28] sm:$0xff] }
 0x139   :  { %14414 = vst [vmem:[#allocation484_spill] sm:$0xff] %v11244_v55  ;;  %14415 = vst [vmem:[#allocation485_spill] sm:$0xff] %v11246_v1  ;;  %v11248_v17 = vld [vmem:[#allocation8 + $0xf30] sm:$0xff]  ;;  %v11250_v18 = vld [vmem:[#allocation8 + $0xf38] sm:$0xff] }
 0x13a   :  { %14416 = vst [vmem:[#allocation486_spill] sm:$0xff] %v11248_v17  ;;  %14417 = vst [vmem:[#allocation487_spill] sm:$0xff] %v11250_v18  ;;  %v11252_v22 = vld [vmem:[#allocation8 + $0xf40] sm:$0xff]  ;;  %v11254_v21 = vld [vmem:[#allocation8 + $0xf48] sm:$0xff] }
 0x13b   :  { %14418 = vst [vmem:[#allocation488_spill] sm:$0xff] %v11252_v22  ;;  %14419 = vst [vmem:[#allocation489_spill] sm:$0xff] %v11254_v21  ;;  %v11256_v34 = vld [vmem:[#allocation8 + $0xf50] sm:$0xff]  ;;  %v11258_v14 = vld [vmem:[#allocation8 + $0xf58] sm:$0xff] }
 0x13c   :  { %14420 = vst [vmem:[#allocation490_spill] sm:$0xff] %v11256_v34  ;;  %14421 = vst [vmem:[#allocation491_spill] sm:$0xff] %v11258_v14  ;;  %v11260_v50 = vld [vmem:[#allocation8 + $0xf60] sm:$0xff]  ;;  %v11262_v9 = vld [vmem:[#allocation8 + $0xf68] sm:$0xff] }
 0x13d   :  { %14422 = vst [vmem:[#allocation492_spill] sm:$0xff] %v11260_v50  ;;  %14423 = vst [vmem:[#allocation493_spill] sm:$0xff] %v11262_v9  ;;  %v11264_v25 = vld [vmem:[#allocation8 + $0xf70] sm:$0xff]  ;;  %v11266_v55 = vld [vmem:[#allocation8 + $0xf78] sm:$0xff] }
 0x13e   :  { %14424 = vst [vmem:[#allocation494_spill] sm:$0xff] %v11264_v25  ;;  %14425 = vst [vmem:[#allocation495_spill] sm:$0xff] %v11266_v55  ;;  %v11268_v1 = vld [vmem:[#allocation8 + $0xf80] sm:$0xff]  ;;  %v11270_v17 = vld [vmem:[#allocation8 + $0xf88] sm:$0xff] }
 0x13f   :  { %14426 = vst [vmem:[#allocation496_spill] sm:$0xff] %v11268_v1  ;;  %14427 = vst [vmem:[#allocation497_spill] sm:$0xff] %v11270_v17  ;;  %v11272_v18 = vld [vmem:[#allocation8 + $0xf90] sm:$0xff]  ;;  %v11274_v22 = vld [vmem:[#allocation8 + $0xf98] sm:$0xff] }
 0x140   :  { %14428 = vst [vmem:[#allocation498_spill] sm:$0xff] %v11272_v18  ;;  %14429 = vst [vmem:[#allocation499_spill] sm:$0xff] %v11274_v22  ;;  %v11276_v21 = vld [vmem:[#allocation8 + $0xfa0] sm:$0xff]  ;;  %v11278_v34 = vld [vmem:[#allocation8 + $0xfa8] sm:$0xff] }
 0x141   :  { %14430 = vst [vmem:[#allocation500_spill] sm:$0xff] %v11276_v21  ;;  %14431 = vst [vmem:[#allocation501_spill] sm:$0xff] %v11278_v34  ;;  %v11280_v14 = vld [vmem:[#allocation8 + $0xfb0] sm:$0xff]  ;;  %v11282_v50 = vld [vmem:[#allocation8 + $0xfb8] sm:$0xff] }
 0x142   :  { %14432 = vst [vmem:[#allocation502_spill] sm:$0xff] %v11280_v14  ;;  %14433 = vst [vmem:[#allocation503_spill] sm:$0xff] %v11282_v50  ;;  %v11284_v9 = vld [vmem:[#allocation8 + $0xfc0] sm:$0xff]  ;;  %v11286_v25 = vld [vmem:[#allocation8 + $0xfc8] sm:$0xff] }
 0x143   :  { %14434 = vst [vmem:[#allocation504_spill] sm:$0xff] %v11284_v9  ;;  %14435 = vst [vmem:[#allocation505_spill] sm:$0xff] %v11286_v25  ;;  %v11288_v55 = vld [vmem:[#allocation8 + $0xfd0] sm:$0xff]  ;;  %v11290_v1 = vld [vmem:[#allocation8 + $0xfd8] sm:$0xff] }
 0x144   :  { %14436 = vst [vmem:[#allocation506_spill] sm:$0xff] %v11288_v55  ;;  %14437 = vst [vmem:[#allocation507_spill] sm:$0xff] %v11290_v1  ;;  %v11292_v17 = vld [vmem:[#allocation8 + $0xfe0] sm:$0xff]  ;;  %v11294_v18 = vld [vmem:[#allocation8 + $0xfe8] sm:$0xff] }
 0x145   :  { %14438 = vst [vmem:[#allocation508_spill] sm:$0xff] %v11292_v17  ;;  %14439 = vst [vmem:[#allocation509_spill] sm:$0xff] %v11294_v18  ;;  %v11296_v22 = vld [vmem:[#allocation8 + $0xff0] sm:$0xff]  ;;  %v11298_v21 = vld [vmem:[#allocation8 + $0xff8] sm:$0xff] }
 0x146   :  { %14440 = vst [vmem:[#allocation510_spill] sm:$0xff] %v11296_v22  ;;  %14441 = vst [vmem:[#allocation511_spill] sm:$0xff] %v11298_v21  ;;  %v87_v34 = vld [vmem:[#allocation6] sm:$0xff]  ;;  %v88_v54 = vld [vmem:[#allocation6 + $0x8] sm:$0xff] }
 0x147   :  { %v95_v14 = vld [vmem:[#allocation6 + $0x40] sm:$0xff]  ;;  %v96_v50 = vld [vmem:[#allocation6 + $0x48] sm:$0xff]  ;;  %v194_v60 = vld [vmem:[#allocation6 + $0x358] sm:$0xff] }
 0x148   :  { %v8544_v52 = vcombine.high %v87_v34, %v95_v14  ;;  %v8546_v9 = vcombine.high %v88_v54, %v96_v50  ;;  %v8543_v43 = vcombine.low %v87_v34, %v95_v14  ;;  %v8545_v25 = vcombine.low %v88_v54, %v96_v50  ;;  %v103_v11 = vld [vmem:[#allocation6 + $0x80] sm:$0xff]  ;;  %v104_v5 = vld [vmem:[#allocation6 + $0x88] sm:$0xff] }
 0x149   :  { %v111_v55 = vld [vmem:[#allocation6 + $0xc0] sm:$0xff]  ;;  %v112_v33 = vld [vmem:[#allocation6 + $0xc8] sm:$0xff] }
 0x14a   :  { %v8560_v1 = vcombine.high %v103_v11, %v111_v55  ;;  %v119_v17 = vld [vmem:[#allocation6 + $0x100] sm:$0xff]  ;;  %3323 = vmatprep.subr.bf16.mxu0 %v8544_v52  ;;  %3469 = vmatprep.subr.bf16.mxu1 %v8546_v9  ;;  %v8562_v22 = vcombine.high %v104_v5, %v112_v33  ;;  %v120_v18 = vld [vmem:[#allocation6 + $0x108] sm:$0xff]  ;;  %v8559_v59 = vcombine.low %v103_v11, %v111_v55 }
 0x14b   :  { %v127_v41 = vld [vmem:[#allocation6 + $0x140] sm:$0xff]  ;;  %v128_v21 = vld [vmem:[#allocation6 + $0x148] sm:$0xff]  ;;  %3324 = vmatpush1.bf16.msra.mxu0 %v8543_v43  ;;  %3470 = vmatpush1.bf16.msra.mxu1 %v8545_v25  ;;  %v8561_v19 = vcombine.low %v104_v5, %v112_v33 }
 0x14c   :  { %3325 = vmatprep.subr.bf16.mxu0 %v8560_v1  ;;  %3471 = vmatprep.subr.bf16.mxu1 %v8562_v22  ;;  %v8576_v14 = vcombine.high %v119_v17, %v127_v41  ;;  %v8578_v34 = vcombine.high %v120_v18, %v128_v21  ;;  %v135_v50 = vld [vmem:[#allocation6 + $0x180] sm:$0xff]  ;;  %v136_v3 = vld [vmem:[#allocation6 + $0x188] sm:$0xff]  ;;  %v8575_v20 = vcombine.low %v119_v17, %v127_v41 }
 0x14d   :  { %v143_v54 = vld [vmem:[#allocation6 + $0x1c0] sm:$0xff]  ;;  %v144_v51 = vld [vmem:[#allocation6 + $0x1c8] sm:$0xff]  ;;  %v8577_v52 = vcombine.low %v120_v18, %v128_v21 }
 0x14e   :  { %v8592_v9 = vcombine.high %v135_v50, %v143_v54  ;;  %v8594_v23 = vcombine.high %v136_v3, %v144_v51  ;;  %v151_v43 = vld [vmem:[#allocation6 + $0x200] sm:$0xff]  ;;  %v152_v11 = vld [vmem:[#allocation6 + $0x208] sm:$0xff]  ;;  %v8591_v1 = vcombine.low %v135_v50, %v143_v54  ;;  %v8593_v22 = vcombine.low %v136_v3, %v144_v51 }
 0x14f   :  { %3326 = vmatpush1.bf16.msra.mxu0 %v8559_v59  ;;  %3472 = vmatpush1.bf16.msra.mxu1 %v8561_v19  ;;  %v159_v25 = vld [vmem:[#allocation6 + $0x240] sm:$0xff]  ;;  %v160_v5 = vld [vmem:[#allocation6 + $0x248] sm:$0xff] }
 0x150   :  { %3327 = vmatprep.subr.bf16.mxu0 %v8576_v14  ;;  %3473 = vmatprep.subr.bf16.mxu1 %v8578_v34  ;;  %v8608_v33 = vcombine.high %v151_v43, %v159_v25  ;;  %v8610_v55 = vcombine.high %v152_v11, %v160_v5  ;;  %v167_v59 = vld [vmem:[#allocation6 + $0x280] sm:$0xff]  ;;  %v168_v17 = vld [vmem:[#allocation6 + $0x288] sm:$0xff]  ;;  %v8607_v21 = vcombine.low %v151_v43, %v159_v25 }
 0x151   :  { %v175_v19 = vld [vmem:[#allocation6 + $0x2c0] sm:$0xff]  ;;  %v176_v18 = vld [vmem:[#allocation6 + $0x2c8] sm:$0xff]  ;;  %v8609_v41 = vcombine.low %v152_v11, %v160_v5 }
 0x152   :  { %v8624_v14 = vcombine.high %v167_v59, %v175_v19  ;;  %v8626_v34 = vcombine.high %v168_v17, %v176_v18  ;;  %v184_v50 = vld [vmem:[#allocation6 + $0x308] sm:$0xff]  ;;  %v8625_v51 = vcombine.low %v168_v17, %v176_v18  ;;  %v199_v54 = vld [vmem:[#allocation6 + $0x380] sm:$0xff] }
 0x153   :  { %3328 = vmatpush1.bf16.msra.mxu0 %v8575_v20  ;;  %3474 = vmatpush1.bf16.msra.mxu1 %v8577_v52  ;;  %v183_v20 = vld [vmem:[#allocation6 + $0x300] sm:$0xff]  ;;  %v192_v3 = vld [vmem:[#allocation6 + $0x348] sm:$0xff] }
 0x154   :  { %3329 = vmatprep.subr.bf16.mxu0 %v8592_v9  ;;  %3475 = vmatprep.subr.bf16.mxu1 %v8594_v23  ;;  %v191_v52 = vld [vmem:[#allocation6 + $0x340] sm:$0xff]  ;;  %v8623_v23 = vcombine.low %v167_v59, %v175_v19  ;;  %v200_v25 = vld [vmem:[#allocation6 + $0x388] sm:$0xff] }
 0x155   :  { %v8640_v9 = vcombine.high %v183_v20, %v191_v52  ;;  %v207_v43 = vld [vmem:[#allocation6 + $0x3c0] sm:$0xff]  ;;  %v208_v11 = vld [vmem:[#allocation6 + $0x3c8] sm:$0xff]  ;;  %v8639_v5 = vcombine.low %v183_v20, %v191_v52 }
 0x156   :  { %v8658_v59 = vcombine.high %v200_v25, %v208_v11  ;;  %v215_v19 = vld [vmem:[#allocation6 + $0x400] sm:$0xff]  ;;  %v216_v18 = vld [vmem:[#allocation6 + $0x408] sm:$0xff] }
 0x157   :  { %3330 = vmatpush1.bf16.msra.mxu0 %v8591_v1  ;;  %3476 = vmatpush1.bf16.msra.mxu1 %v8593_v22  ;;  %v8642_v1 = vcombine.high %v184_v50, %v192_v3  ;;  %v11300_v22 = vld [vmem:[#allocation3 + $0x4] ss:$16 sps:$4 sm:$0xff]   ;;  %v232_v20 = vld [vmem:[#allocation6 + $0x488] sm:$0xff]  ;;  %v11320_v57 = vld [vmem:[#allocation3 + $0x40] ss:$16 sps:$4 sm:$0xff]  }
 0x158   :  { %3331 = vmatprep.subr.bf16.mxu0 %v8608_v33  ;;  %3477 = vmatprep.subr.bf16.mxu1 %v8610_v55  ;;  %v8641_v33 = vcombine.low %v184_v50, %v192_v3  ;;  %v8656_v55 = vcombine.high %v199_v54, %v207_v43  ;;  %v223_v17 = vld [vmem:[#allocation6 + $0x440] sm:$0xff]  ;;  %v240_v52 = vld [vmem:[#allocation6 + $0x4c8] sm:$0xff] }
 0x159   :  { %3355 = vmatprep.mubr.bf16.mxu0 %v11300_v22  ;;  %3501 = vmatprep.mubr.bf16.mxu1 %v11300_v22  ;;  %v8671_v50 = vcombine.low %v215_v19, %v223_v17  ;;  %v11322_v35 = vld [vmem:[#allocation3 + $0x64] ss:$16 sps:$4 sm:$0xff]   ;;  %v11328_v27 = vld [vmem:[#allocation3 + $0x60] ss:$16 sps:$4 sm:$0xff]   ;;  %v11330_v6 = vld [vmem:[#allocation3 + $0xc] ss:$16 sps:$4 sm:$0xff]  }
 0x15a   :  { %v11352_v31 = vld [vmem:[#allocation3 + $0x48] ss:$16 sps:$4 sm:$0xff]  }
 0x15b   :  { %3332 = vmatpush1.bf16.msra.mxu0 %v8607_v21  ;;  %3478 = vmatpush1.bf16.msra.mxu1 %v8609_v41  ;;  %v224_v21 = vld [vmem:[#allocation6 + $0x448] sm:$0xff]  ;;  %v8655_v41 = vcombine.low %v199_v54, %v207_v43 }
 0x15c   :  { %3333 = vmatprep.subr.bf16.mxu0 %v8624_v14  ;;  %3479 = vmatprep.subr.bf16.mxu1 %v8626_v34  ;;  %v8657_v14 = vcombine.low %v200_v25, %v208_v11  ;;  %v8672_v34 = vcombine.high %v215_v19, %v223_v17  ;;  %v8674_v49 = vcombine.high %v216_v18, %v224_v21  ;;  %v248_v54 = vld [vmem:[#allocation6 + $0x508] sm:$0xff] }
 0x15d   :  { %v8673_v3 = vcombine.low %v216_v18, %v224_v21  ;;  %v256_v43 = vld [vmem:[#allocation6 + $0x548] sm:$0xff]  ;;  %v8689_v11 = vcombine.low %v232_v20, %v240_v52 }
 0x15e   :  { %v264_v19 = vld [vmem:[#allocation6 + $0x588] sm:$0xff]  ;;  %v8705_v18 = vcombine.low %v248_v54, %v256_v43 }
 0x15f   :  { %3334 = vmatpush1.bf16.msra.mxu0 %v8623_v23  ;;  %3480 = vmatpush1.bf16.msra.mxu1 %v8625_v51  ;;  %v231_v23 = vld [vmem:[#allocation6 + $0x480] sm:$0xff]  ;;  %v272_v17 = vld [vmem:[#allocation6 + $0x5c8] sm:$0xff] }
 0x160   :  { %3335 = vmatprep.subr.bf16.mxu0 %v8640_v9  ;;  %3481 = vmatprep.subr.bf16.mxu1 %v8642_v1  ;;  %v239_v51 = vld [vmem:[#allocation6 + $0x4c0] sm:$0xff]  ;;  %v8690_v1 = vcombine.high %v232_v20, %v240_v52  ;;  %v8721_v52 = vcombine.low %v264_v19, %v272_v17  ;;  %v11360_v28 = vld [vmem:[#allocation3 + $0x68] ss:$16 sps:$4 sm:$0xff]  }
 0x161   :  { %v8688_v9 = vcombine.high %v231_v23, %v239_v51  ;;  %v8687_v25 = vcombine.low %v231_v23, %v239_v51  ;;  %v280_v23 = vld [vmem:[#allocation6 + $0x608] sm:$0xff] }
 0x162   :  { %v288_v51 = vld [vmem:[#allocation6 + $0x648] sm:$0xff] }
 0x163   :  { %3336 = vmatpush1.bf16.msra.mxu0 %v8639_v5  ;;  %3482 = vmatpush1.bf16.msra.mxu1 %v8641_v33  ;;  %v247_v5 = vld [vmem:[#allocation6 + $0x500] sm:$0xff] }
 0x164   :  { %3337 = vmatprep.subr.bf16.mxu0 %v8656_v55  ;;  %3483 = vmatprep.subr.bf16.mxu1 %v8658_v59  ;;  %v255_v33 = vld [vmem:[#allocation6 + $0x540] sm:$0xff]  ;;  %v8706_v59 = vcombine.high %v248_v54, %v256_v43  ;;  %v8737_v43 = vcombine.low %v280_v23, %v288_v51 }
 0x165   :  { %v8704_v55 = vcombine.high %v247_v5, %v255_v33 }
 0x167   :  { %3338 = vmatpush1.bf16.msra.mxu0 %v8655_v41  ;;  %3484 = vmatpush1.bf16.msra.mxu1 %v8657_v14  ;;  %v263_v41 = vld [vmem:[#allocation6 + $0x580] sm:$0xff] }
 0x168   :  { %3339 = vmatprep.subr.bf16.mxu0 %v8672_v34  ;;  %3485 = vmatprep.subr.bf16.mxu1 %v8674_v49  ;;  %v271_v14 = vld [vmem:[#allocation6 + $0x5c0] sm:$0xff]  ;;  %v8703_v49 = vcombine.low %v247_v5, %v255_v33  ;;  %v8722_v34 = vcombine.high %v264_v19, %v272_v17  ;;  %v296_v5 = vld [vmem:[#allocation6 + $0x688] sm:$0xff] }
 0x169   :  { %v8720_v21 = vcombine.high %v263_v41, %v271_v14  ;;  %v8719_v20 = vcombine.low %v263_v41, %v271_v14  ;;  %v304_v33 = vld [vmem:[#allocation6 + $0x6c8] sm:$0xff] }
 0x16a   :  { %v312_v41 = vld [vmem:[#allocation6 + $0x708] sm:$0xff]  ;;  %v8753_v17 = vcombine.low %v296_v5, %v304_v33 }
 0x16b   :  { %3340 = vmatpush1.bf16.msra.mxu0 %v8671_v50  ;;  %3486 = vmatpush1.bf16.msra.mxu1 %v8673_v3  ;;  %v279_v50 = vld [vmem:[#allocation6 + $0x600] sm:$0xff]  ;;  %v320_v14 = vld [vmem:[#allocation6 + $0x748] sm:$0xff] }
 0x16c   :  { %3341 = vmatprep.subr.bf16.mxu0 %v8688_v9  ;;  %3487 = vmatprep.subr.bf16.mxu1 %v8690_v1  ;;  %v287_v3 = vld [vmem:[#allocation6 + $0x640] sm:$0xff]  ;;  %v8738_v1 = vcombine.high %v280_v23, %v288_v51  ;;  %v8769_v51 = vcombine.low %v312_v41, %v320_v14 }
 0x16d   :  { %v8736_v9 = vcombine.high %v279_v50, %v287_v3  ;;  %v8735_v54 = vcombine.low %v279_v50, %v287_v3  ;;  %v328_v50 = vld [vmem:[#allocation6 + $0x788] sm:$0xff] }
 0x16e   :  { %v336_v3 = vld [vmem:[#allocation6 + $0x7c8] sm:$0xff] }
 0x16f   :  { %3342 = vmatpush1.bf16.msra.mxu0 %v8687_v25  ;;  %3488 = vmatpush1.bf16.msra.mxu1 %v8689_v11  ;;  %v295_v25 = vld [vmem:[#allocation6 + $0x680] sm:$0xff] }
 0x170   :  { %3343 = vmatprep.subr.bf16.mxu0 %v8704_v55  ;;  %3489 = vmatprep.subr.bf16.mxu1 %v8706_v59  ;;  %v303_v11 = vld [vmem:[#allocation6 + $0x6c0] sm:$0xff]  ;;  %v8754_v59 = vcombine.high %v296_v5, %v304_v33  ;;  %v8785_v33 = vcombine.low %v328_v50, %v336_v3 }
 0x171   :  { %v8752_v55 = vcombine.high %v295_v25, %v303_v11  ;;  %v8751_v19 = vcombine.low %v295_v25, %v303_v11  ;;  %v344_v25 = vld [vmem:[#allocation6 + $0x808] sm:$0xff] }
 0x172   :  { %v352_v11 = vld [vmem:[#allocation6 + $0x848] sm:$0xff] }
 0x173   :  { %3344 = vmatpush1.bf16.msra.mxu0 %v8703_v49  ;;  %3490 = vmatpush1.bf16.msra.mxu1 %v8705_v18  ;;  %v311_v49 = vld [vmem:[#allocation6 + $0x700] sm:$0xff] }
 0x174   :  { %3345 = vmatprep.subr.bf16.mxu0 %v8720_v21  ;;  %3491 = vmatprep.subr.bf16.mxu1 %v8722_v34  ;;  %v319_v18 = vld [vmem:[#allocation6 + $0x740] sm:$0xff]  ;;  %v8770_v34 = vcombine.high %v312_v41, %v320_v14 }
 0x175   :  { %v8768_v21 = vcombine.high %v311_v49, %v319_v18  ;;  %v8767_v23 = vcombine.low %v311_v49, %v319_v18  ;;  %v360_v49 = vld [vmem:[#allocation6 + $0x888] sm:$0xff]  ;;  %v11304_v41 = vld [vmem:[#allocation3] ss:$16 sps:$4 sm:$0xff]  }
 0x176   :  { %v368_v18 = vld [vmem:[#allocation6 + $0x8c8] sm:$0xff] }
 0x177   :  { %3346 = vmatpush1.bf16.msra.mxu0 %v8719_v20  ;;  %3492 = vmatpush1.bf16.msra.mxu1 %v8721_v52  ;;  %v327_v20 = vld [vmem:[#allocation6 + $0x780] sm:$0xff] }
 0x178   :  { %3347 = vmatprep.subr.bf16.mxu0 %v8736_v9  ;;  %3493 = vmatprep.subr.bf16.mxu1 %v8738_v1  ;;  %v335_v52 = vld [vmem:[#allocation6 + $0x7c0] sm:$0xff]  ;;  %v8786_v1 = vcombine.high %v328_v50, %v336_v3  ;;  %v376_v50 = vld [vmem:[#allocation6 + $0x908] sm:$0xff] }
 0x179   :  { %v8784_v9 = vcombine.high %v327_v20, %v335_v52  ;;  %v8783_v5 = vcombine.low %v327_v20, %v335_v52  ;;  %v375_v20 = vld [vmem:[#allocation6 + $0x900] sm:$0xff]  ;;  %v384_v3 = vld [vmem:[#allocation6 + $0x948] sm:$0xff] }
 0x17a   :  { %v383_v52 = vld [vmem:[#allocation6 + $0x940] sm:$0xff] }
 0x17b   :  { %3348 = vmatpush1.bf16.msra.mxu0 %v8735_v54  ;;  %3494 = vmatpush1.bf16.msra.mxu1 %v8737_v43  ;;  %v343_v54 = vld [vmem:[#allocation6 + $0x800] sm:$0xff] }
 0x17c   :  { %3349 = vmatprep.subr.bf16.mxu0 %v8752_v55  ;;  %3495 = vmatprep.subr.bf16.mxu1 %v8754_v59  ;;  %v351_v43 = vld [vmem:[#allocation6 + $0x840] sm:$0xff]  ;;  %v8802_v59 = vcombine.high %v344_v25, %v352_v11 }
 0x17d   :  { %v8800_v55 = vcombine.high %v343_v54, %v351_v43  ;;  %v8799_v14 = vcombine.low %v343_v54, %v351_v43  ;;  %v8832_v54 = vcombine.high %v375_v20, %v383_v52  ;;  %v8834_v43 = vcombine.high %v376_v50, %v384_v3 }
 0x17f   :  { %3350 = vmatpush1.bf16.msra.mxu0 %v8751_v19  ;;  %3496 = vmatpush1.bf16.msra.mxu1 %v8753_v17  ;;  %v359_v19 = vld [vmem:[#allocation6 + $0x880] sm:$0xff] }
 0x180   :  { %3351 = vmatprep.subr.bf16.mxu0 %v8768_v21  ;;  %3497 = vmatprep.subr.bf16.mxu1 %v8770_v34  ;;  %v367_v17 = vld [vmem:[#allocation6 + $0x8c0] sm:$0xff]  ;;  %v8801_v21 = vcombine.low %v344_v25, %v352_v11 }
 0x181   :  { %v8816_v34 = vcombine.high %v359_v19, %v367_v17  ;;  %v391_v25 = vld [vmem:[#allocation6 + $0x980] sm:$0xff] }
 0x182   :  { %v399_v11 = vld [vmem:[#allocation6 + $0x9c0] sm:$0xff] }
 0x183   :  { %3352 = vmatpush1.bf16.msra.mxu0 %v8767_v23  ;;  %3498 = vmatpush1.bf16.msra.mxu1 %v8769_v51  ;;  %v8818_v23 = vcombine.high %v360_v49, %v368_v18  ;;  %v11306_v51 = vld [vmem:[#allocation3 + $0x24] ss:$16 sps:$4 sm:$0xff]  }
 0x184   :  { %3353 = vmatprep.subr.bf16.mxu0 %v8784_v9  ;;  %3499 = vmatprep.subr.bf16.mxu1 %v8786_v1  ;;  %v8815_v9 = vcombine.low %v359_v19, %v367_v17  ;;  %v8817_v1 = vcombine.low %v360_v49, %v368_v18  ;;  %v8848_v19 = vcombine.high %v391_v25, %v399_v11  ;;  %v407_v49 = vld [vmem:[#allocation6 + $0xa00] sm:$0xff] }
 0x185   :  { %v415_v18 = vld [vmem:[#allocation6 + $0xa40] sm:$0xff] }
 0x187   :  { %3354 = vmatpush1.bf16.msra.mxu0 %v8783_v5  ;;  %3500 = vmatpush1.bf16.msra.mxu1 %v8785_v33  ;;  %v392_v5 = vld [vmem:[#allocation6 + $0x988] sm:$0xff] }
 0x188   :  { %3396 = vmatprep.subr.bf16.mxu0 %v8800_v55  ;;  %3542 = vmatprep.subr.bf16.mxu1 %v8802_v59  ;;  %v400_v33 = vld [vmem:[#allocation6 + $0x9c8] sm:$0xff]  ;;  %v11312_v55 = vld [vmem:[#allocation3 + $0x20] ss:$16 sps:$4 sm:$0xff]   ;;  %v8831_v59 = vcombine.low %v375_v20, %v383_v52  ;;  %v8864_v20 = vcombine.high %v407_v49, %v415_v18 }
 0x189   :  { %v8850_v17 = vcombine.high %v392_v5, %v400_v33 }
 0x18a   :  { %3356 = vmatmul.mubr.bf16.vlgmr.msra.gmra.mrb[0].mxu0 %v11304_v41  ;;  %3502 = vmatmul.mubr.bf16.vlgmr.msra.gmra.mrb[0].mxu1 %v11304_v41 }
 0x18b   :  { %3397 = vmatpush1.bf16.msra.mxu0 %v8799_v14  ;;  %3543 = vmatpush1.bf16.msra.mxu1 %v8801_v21  ;;  %v8833_v14 = vcombine.low %v376_v50, %v384_v3  ;;  %v408_v21 = vld [vmem:[#allocation6 + $0xa08] sm:$0xff]  ;;  %v423_v50 = vld [vmem:[#allocation6 + $0xa80] sm:$0xff] }
 0x18c   :  { %3398 = vmatprep.subr.bf16.mxu0 %v8816_v34  ;;  %3544 = vmatprep.subr.bf16.mxu1 %v8818_v23  ;;  %v416_v34 = vld [vmem:[#allocation6 + $0xa48] sm:$0xff]  ;;  %v11314_v23 = vld [vmem:[#allocation3 + $0x44] ss:$16 sps:$4 sm:$0xff]  }
 0x18d   :  { %3365 = vmatprep.mubr.bf16.mxu0 %v11306_v51  ;;  %3511 = vmatprep.mubr.bf16.mxu1 %v11306_v51  ;;  %v8866_v52 = vcombine.high %v408_v21, %v416_v34  ;;  %v431_v3 = vld [vmem:[#allocation6 + $0xac0] sm:$0xff] }
 0x18f   :  { %3399 = vmatpush1.bf16.msra.mxu0 %v8815_v9  ;;  %3545 = vmatpush1.bf16.msra.mxu1 %v8817_v1  ;;  %v8847_v9 = vcombine.low %v391_v25, %v399_v11  ;;  %v8849_v1 = vcombine.low %v392_v5, %v400_v33  ;;  %v8880_v25 = vcombine.high %v423_v50, %v431_v3  ;;  %v439_v5 = vld [vmem:[#allocation6 + $0xb00] sm:$0xff] }
 0x190   :  { %3400 = vmatprep.subr.bf16.mxu0 %v8832_v54  ;;  %3546 = vmatprep.subr.bf16.mxu1 %v8834_v43  ;;  %v424_v54 = vld [vmem:[#allocation6 + $0xa88] sm:$0xff]  ;;  %v447_v33 = vld [vmem:[#allocation6 + $0xb40] sm:$0xff] }
 0x191   :  { %v432_v43 = vld [vmem:[#allocation6 + $0xac8] sm:$0xff] }
 0x192   :  { %3366 = vmatmul.mubr.bf16.gmra.mrb[4].mxu0 %v11312_v55  ;;  %3512 = vmatmul.mubr.bf16.gmra.mrb[4].mxu1 %v11312_v55  ;;  %v8882_v11 = vcombine.high %v424_v54, %v432_v43 }
 0x193   :  { %3401 = vmatpush1.bf16.msra.mxu0 %v8831_v59  ;;  %3547 = vmatpush1.bf16.msra.mxu1 %v8833_v14  ;;  %v8863_v59 = vcombine.low %v407_v49, %v415_v18  ;;  %v8865_v14 = vcombine.low %v408_v21, %v416_v34  ;;  %v8896_v49 = vcombine.high %v439_v5, %v447_v33  ;;  %v455_v21 = vld [vmem:[#allocation6 + $0xb80] sm:$0xff] }
 0x194   :  { %3402 = vmatprep.subr.bf16.mxu0 %v8848_v19  ;;  %3548 = vmatprep.subr.bf16.mxu1 %v8850_v17  ;;  %v440_v19 = vld [vmem:[#allocation6 + $0xb08] sm:$0xff]  ;;  %v463_v34 = vld [vmem:[#allocation6 + $0xbc0] sm:$0xff] }
 0x195   :  { %3375 = vmatprep.mubr.bf16.mxu0 %v11314_v23  ;;  %3521 = vmatprep.mubr.bf16.mxu1 %v11314_v23  ;;  %v448_v17 = vld [vmem:[#allocation6 + $0xb48] sm:$0xff] }
 0x196   :  { %v8898_v18 = vcombine.high %v440_v19, %v448_v17 }
 0x197   :  { %3403 = vmatpush1.bf16.msra.mxu0 %v8847_v9  ;;  %3549 = vmatpush1.bf16.msra.mxu1 %v8849_v1  ;;  %v8879_v9 = vcombine.low %v423_v50, %v431_v3  ;;  %v8881_v1 = vcombine.low %v424_v54, %v432_v43  ;;  %v8912_v50 = vcombine.high %v455_v21, %v463_v34  ;;  %v471_v54 = vld [vmem:[#allocation6 + $0xc00] sm:$0xff] }
 0x198   :  { %3404 = vmatprep.subr.bf16.mxu0 %v8864_v20  ;;  %3550 = vmatprep.subr.bf16.mxu1 %v8866_v52  ;;  %v456_v20 = vld [vmem:[#allocation6 + $0xb88] sm:$0xff]  ;;  %v479_v43 = vld [vmem:[#allocation6 + $0xc40] sm:$0xff] }
 0x199   :  { %v464_v52 = vld [vmem:[#allocation6 + $0xbc8] sm:$0xff]  ;;  %v8927_v62 = vcombine.low %v471_v54, %v479_v43 }
 0x19a   :  { %3376 = vmatmul.mubr.bf16.gmra.mrb[8].mxu0 %v11320_v57  ;;  %3522 = vmatmul.mubr.bf16.gmra.mrb[8].mxu1 %v11320_v57  ;;  %v8914_v3 = vcombine.high %v456_v20, %v464_v52 }
 0x19b   :  { %3405 = vmatpush1.bf16.msra.mxu0 %v8863_v59  ;;  %3551 = vmatpush1.bf16.msra.mxu1 %v8865_v14  ;;  %v8895_v59 = vcombine.low %v439_v5, %v447_v33  ;;  %v8897_v14 = vcombine.low %v440_v19, %v448_v17  ;;  %v8928_v5 = vcombine.high %v471_v54, %v479_v43  ;;  %v487_v19 = vld [vmem:[#allocation6 + $0xc80] sm:$0xff]  ;;  %v520_v54 = vld [vmem:[#allocation6 + $0xd88] sm:$0xff] }
 0x19c   :  { %3406 = vmatprep.subr.bf16.mxu0 %v8880_v25  ;;  %3552 = vmatprep.subr.bf16.mxu1 %v8882_v11  ;;  %v472_v25 = vld [vmem:[#allocation6 + $0xc08] sm:$0xff]  ;;  %v495_v17 = vld [vmem:[#allocation6 + $0xcc0] sm:$0xff] }
 0x19d   :  { %3385 = vmatprep.mubr.bf16.mxu0 %v11322_v35  ;;  %3531 = vmatprep.mubr.bf16.mxu1 %v11322_v35  ;;  %v480_v11 = vld [vmem:[#allocation6 + $0xc48] sm:$0xff] }
 0x19e   :  { %v8930_v33 = vcombine.high %v472_v25, %v480_v11  ;;  %v8929_v53 = vcombine.low %v472_v25, %v480_v11  ;;  %v528_v43 = vld [vmem:[#allocation6 + $0xdc8] sm:$0xff] }
 0x19f   :  { %3407 = vmatpush1.bf16.msra.mxu0 %v8879_v9  ;;  %3553 = vmatpush1.bf16.msra.mxu1 %v8881_v1  ;;  %v8911_v9 = vcombine.low %v455_v21, %v463_v34  ;;  %v8913_v1 = vcombine.low %v456_v20, %v464_v52  ;;  %v8944_v21 = vcombine.high %v487_v19, %v495_v17  ;;  %v503_v20 = vld [vmem:[#allocation6 + $0xd00] sm:$0xff] }
 0x1a0   :  { %3408 = vmatprep.subr.bf16.mxu0 %v8896_v49  ;;  %3554 = vmatprep.subr.bf16.mxu1 %v8898_v18  ;;  %v488_v49 = vld [vmem:[#allocation6 + $0xc88] sm:$0xff]  ;;  %v511_v52 = vld [vmem:[#allocation6 + $0xd40] sm:$0xff] }
 0x1a1   :  { %v496_v18 = vld [vmem:[#allocation6 + $0xcc8] sm:$0xff]  ;;  %v8960_v46 = vcombine.high %v503_v20, %v511_v52  ;;  %v8959_v25 = vcombine.low %v503_v20, %v511_v52 }
 0x1a2   :  { %3386 = vmatmul.mubr.bf16.gmra.mrb[12].mxu0 %v11328_v27  ;;  %3532 = vmatmul.mubr.bf16.gmra.mrb[12].mxu1 %v11328_v27  ;;  %v8946_v34 = vcombine.high %v488_v49, %v496_v18  ;;  %v552_v20 = vld [vmem:[#allocation6 + $0xe88] sm:$0xff] }
 0x1a3   :  { %3409 = vmatpush1.bf16.msra.mxu0 %v8895_v59  ;;  %3555 = vmatpush1.bf16.msra.mxu1 %v8897_v14  ;;  %v504_v59 = vld [vmem:[#allocation6 + $0xd08] sm:$0xff] }
 0x1a4   :  { %3410 = vmatprep.subr.bf16.mxu0 %v8912_v50  ;;  %3556 = vmatprep.subr.bf16.mxu1 %v8914_v3  ;;  %v512_v14 = vld [vmem:[#allocation6 + $0xd48] sm:$0xff]  ;;  %v8943_v50 = vcombine.low %v487_v19, %v495_v17  ;;  %v8945_v3 = vcombine.low %v488_v49, %v496_v18  ;;  %v8977_v18 = vcombine.low %v520_v54, %v528_v43 }
 0x1a5   :  { %3428 = vmatprep.mubr.bf16.mxu0 %v11330_v6  ;;  %3574 = vmatprep.mubr.bf16.mxu1 %v11330_v6  ;;  %v8962_v4 = vcombine.high %v504_v59, %v512_v14  ;;  %v8961_v11 = vcombine.low %v504_v59, %v512_v14  ;;  %v536_v19 = vld [vmem:[#allocation6 + $0xe08] sm:$0xff] }
 0x1a6   :  { %v544_v17 = vld [vmem:[#allocation6 + $0xe48] sm:$0xff] }
 0x1a7   :  { %3411 = vmatpush1.bf16.msra.mxu0 %v8911_v9  ;;  %3557 = vmatpush1.bf16.msra.mxu1 %v8913_v1  ;;  %v519_v9 = vld [vmem:[#allocation6 + $0xd80] sm:$0xff]  ;;  %v560_v52 = vld [vmem:[#allocation6 + $0xec8] sm:$0xff] }
 0x1a8   :  { %3412 = vmatprep.subr.bf16.mxu0 %v8928_v5  ;;  %3558 = vmatprep.subr.bf16.mxu1 %v8930_v33  ;;  %v527_v1 = vld [vmem:[#allocation6 + $0xdc0] sm:$0xff]  ;;  %v8978_v33 = vcombine.high %v520_v54, %v528_v43  ;;  %v9010_v14 = vcombine.high %v552_v20, %v560_v52  ;;  %v9009_v43 = vcombine.low %v552_v20, %v560_v52 }
 0x1a9   :  { %v8976_v5 = vcombine.high %v519_v9, %v527_v1  ;;  %v8975_v49 = vcombine.low %v519_v9, %v527_v1  ;;  %v568_v9 = vld [vmem:[#allocation6 + $0xf08] sm:$0xff] }
 0x1aa   :  { %v576_v1 = vld [vmem:[#allocation6 + $0xf48] sm:$0xff] }
 0x1ab   :  { %3413 = vmatpush1.bf16.msra.mxu0 %v8927_v62  ;;  %3559 = vmatpush1.bf16.msra.mxu1 %v8929_v53  ;;  %v535_v62 = vld [vmem:[#allocation6 + $0xe00] sm:$0xff] }
 0x1ac   :  { %3414 = vmatprep.subr.bf16.mxu0 %v8944_v21  ;;  %3560 = vmatprep.subr.bf16.mxu1 %v8946_v34  ;;  %v543_v53 = vld [vmem:[#allocation6 + $0xe40] sm:$0xff]  ;;  %v8994_v34 = vcombine.high %v536_v19, %v544_v17 }
 0x1ad   :  { %v8992_v21 = vcombine.high %v535_v62, %v543_v53 }
 0x1af   :  { %3415 = vmatpush1.bf16.msra.mxu0 %v8943_v50  ;;  %3561 = vmatpush1.bf16.msra.mxu1 %v8945_v3  ;;  %v551_v50 = vld [vmem:[#allocation6 + $0xe80] sm:$0xff] }
 0x1b0   :  { %3416 = vmatprep.subr.bf16.mxu0 %v8960_v46  ;;  %3562 = vmatprep.subr.bf16.mxu1 %v8962_v4  ;;  %v559_v3 = vld [vmem:[#allocation6 + $0xec0] sm:$0xff]  ;;  %v8991_v4 = vcombine.low %v535_v62, %v543_v53  ;;  %v8993_v46 = vcombine.low %v536_v19, %v544_v17  ;;  %v584_v62 = vld [vmem:[#allocation6 + $0xf88] sm:$0xff]  ;;  %v9025_v17 = vcombine.low %v568_v9, %v576_v1 }
 0x1b1   :  { %v9008_v59 = vcombine.high %v551_v50, %v559_v3  ;;  %v9007_v54 = vcombine.low %v551_v50, %v559_v3  ;;  %v592_v53 = vld [vmem:[#allocation6 + $0xfc8] sm:$0xff]  ;;  %v90_v50 = vld [vmem:[#allocation6 + $0x18] sm:$0xff] }
 0x1b2   :  { %v98_v3 = vld [vmem:[#allocation6 + $0x58] sm:$0xff]  ;;  %v9041_v52 = vcombine.low %v584_v62, %v592_v53 }
 0x1b3   :  { %3417 = vmatpush1.bf16.msra.mxu0 %v8959_v25  ;;  %3563 = vmatpush1.bf16.msra.mxu1 %v8961_v11  ;;  %v567_v25 = vld [vmem:[#allocation6 + $0xf00] sm:$0xff] }
 0x1b4   :  { %3418 = vmatprep.subr.bf16.mxu0 %v8976_v5  ;;  %3564 = vmatprep.subr.bf16.mxu1 %v8978_v33  ;;  %v575_v11 = vld [vmem:[#allocation6 + $0xf40] sm:$0xff]  ;;  %v9026_v33 = vcombine.high %v568_v9, %v576_v1  ;;  %v11336_v9 = vld [vmem:[#allocation3 + $0x8] ss:$16 sps:$4 sm:$0xff]  }
 0x1b5   :  { %v9024_v5 = vcombine.high %v567_v25, %v575_v11  ;;  %v9023_v19 = vcombine.low %v567_v25, %v575_v11  ;;  %v106_v25 = vld [vmem:[#allocation6 + $0x98] sm:$0xff] }
 0x1b6   :  { %v114_v11 = vld [vmem:[#allocation6 + $0xd8] sm:$0xff] }
 0x1b7   :  { %3419 = vmatpush1.bf16.msra.mxu0 %v8975_v49  ;;  %3565 = vmatpush1.bf16.msra.mxu1 %v8977_v18  ;;  %v583_v49 = vld [vmem:[#allocation6 + $0xf80] sm:$0xff] }
 0x1b8   :  { %3420 = vmatprep.subr.bf16.mxu0 %v8992_v21  ;;  %3566 = vmatprep.subr.bf16.mxu1 %v8994_v34  ;;  %v591_v18 = vld [vmem:[#allocation6 + $0xfc0] sm:$0xff]  ;;  %v9042_v34 = vcombine.high %v584_v62, %v592_v53  ;;  %v129_v62 = vld [vmem:[#allocation6 + $0x150] sm:$0xff]  ;;  %v122_v53 = vld [vmem:[#allocation6 + $0x118] sm:$0xff] }
 0x1b9   :  { %v9040_v21 = vcombine.high %v583_v49, %v591_v18  ;;  %v9039_v20 = vcombine.low %v583_v49, %v591_v18  ;;  %v11338_v49 = vld [vmem:[#allocation3 + $0x2c] ss:$16 sps:$4 sm:$0xff]   ;;  %v121_v18 = vld [vmem:[#allocation6 + $0x110] sm:$0xff] }
 0x1bb   :  { %3421 = vmatpush1.bf16.msra.mxu0 %v8991_v4  ;;  %3567 = vmatpush1.bf16.msra.mxu1 %v8993_v46  ;;  %v89_v4 = vld [vmem:[#allocation6 + $0x10] sm:$0xff] }
 0x1bc   :  { %3422 = vmatprep.subr.bf16.mxu0 %v9008_v59  ;;  %3568 = vmatprep.subr.bf16.mxu1 %v9010_v14  ;;  %v97_v46 = vld [vmem:[#allocation6 + $0x50] sm:$0xff]  ;;  %v8550_v14 = vcombine.high %v90_v50, %v98_v3 }
 0x1bd   :  { %v8548_v59 = vcombine.high %v89_v4, %v97_v46  ;;  %v8547_v1 = vcombine.low %v89_v4, %v97_v46  ;;  %v8580_v4 = vcombine.high %v121_v18, %v129_v62 }
 0x1bf   :  { %3423 = vmatpush1.bf16.msra.mxu0 %v9007_v54  ;;  %3569 = vmatpush1.bf16.msra.mxu1 %v9009_v43  ;;  %v105_v54 = vld [vmem:[#allocation6 + $0x90] sm:$0xff] }
 0x1c0   :  { %3424 = vmatprep.subr.bf16.mxu0 %v9024_v5  ;;  %3570 = vmatprep.subr.bf16.mxu1 %v9026_v33  ;;  %v113_v43 = vld [vmem:[#allocation6 + $0xd0] sm:$0xff]  ;;  %v8549_v5 = vcombine.low %v90_v50, %v98_v3 }
 0x1c1   :  { %v8564_v33 = vcombine.high %v105_v54, %v113_v43  ;;  %v137_v50 = vld [vmem:[#allocation6 + $0x190] sm:$0xff] }
 0x1c2   :  { %v145_v3 = vld [vmem:[#allocation6 + $0x1d0] sm:$0xff] }
 0x1c3   :  { %3425 = vmatpush1.bf16.msra.mxu0 %v9023_v19  ;;  %3571 = vmatpush1.bf16.msra.mxu1 %v9025_v17  ;;  %v8566_v19 = vcombine.high %v106_v25, %v114_v11  ;;  %v130_v17 = vld [vmem:[#allocation6 + $0x158] sm:$0xff] }
 0x1c4   :  { %3426 = vmatprep.subr.bf16.mxu0 %v9040_v21  ;;  %3572 = vmatprep.subr.bf16.mxu1 %v9042_v34  ;;  %v8563_v21 = vcombine.low %v105_v54, %v113_v43  ;;  %v8565_v34 = vcombine.low %v106_v25, %v114_v11  ;;  %v8582_v46 = vcombine.high %v122_v53, %v130_v17  ;;  %v11346_v25 = vld [vmem:[#allocation3 + $0x4c] ss:$16 sps:$4 sm:$0xff]   ;;  %v153_v11 = vld [vmem:[#allocation6 + $0x210] sm:$0xff] }
 0x1c5   :  { %v8596_v54 = vcombine.high %v137_v50, %v145_v3 }
 0x1c7   :  { %3427 = vmatpush1.bf16.msra.mxu0 %v9039_v20  ;;  %3573 = vmatpush1.bf16.msra.mxu1 %v9041_v52  ;;  %v138_v20 = vld [vmem:[#allocation6 + $0x198] sm:$0xff] }
 0x1c8   :  { %3615 = vmatprep.subr.bf16.mxu0 %v8548_v59  ;;  %3761 = vmatprep.subr.bf16.mxu1 %v8550_v14  ;;  %v146_v52 = vld [vmem:[#allocation6 + $0x1d8] sm:$0xff]  ;;  %v8579_v14 = vcombine.low %v121_v18, %v129_v62 }
 0x1c9   :  { %v11344_v59 = vld [vmem:[#allocation3 + $0x28] ss:$16 sps:$4 sm:$0xff]   ;;  %v8598_v43 = vcombine.high %v138_v20, %v146_v52 }
 0x1ca   :  { %3429 = vmatmul.mubr.bf16.vlgmr.msra.gmra.mrb[0].mxu0 %v11336_v9  ;;  %3575 = vmatmul.mubr.bf16.vlgmr.msra.gmra.mrb[0].mxu1 %v11336_v9 }
 0x1cb   :  { %3616 = vmatpush1.bf16.msra.mxu0 %v8547_v1  ;;  %3762 = vmatpush1.bf16.msra.mxu1 %v8549_v5  ;;  %v8581_v1 = vcombine.low %v122_v53, %v130_v17  ;;  %v161_v5 = vld [vmem:[#allocation6 + $0x250] sm:$0xff] }
 0x1cc   :  { %3617 = vmatprep.subr.bf16.mxu0 %v8564_v33  ;;  %3763 = vmatprep.subr.bf16.mxu1 %v8566_v19  ;;  %v154_v33 = vld [vmem:[#allocation6 + $0x218] sm:$0xff]  ;;  %v8612_v18 = vcombine.high %v153_v11, %v161_v5  ;;  %v169_v53 = vld [vmem:[#allocation6 + $0x290] sm:$0xff] }
 0x1cd   :  { %3438 = vmatprep.mubr.bf16.mxu0 %v11338_v49  ;;  %3584 = vmatprep.mubr.bf16.mxu1 %v11338_v49  ;;  %v162_v19 = vld [vmem:[#allocation6 + $0x258] sm:$0xff]  ;;  %v177_v17 = vld [vmem:[#allocation6 + $0x2d0] sm:$0xff] }
 0x1ce   :  { %v8614_v62 = vcombine.high %v154_v33, %v162_v19 }
 0x1cf   :  { %3618 = vmatpush1.bf16.msra.mxu0 %v8563_v21  ;;  %3764 = vmatpush1.bf16.msra.mxu1 %v8565_v34  ;;  %v8595_v21 = vcombine.low %v137_v50, %v145_v3  ;;  %v8597_v34 = vcombine.low %v138_v20, %v146_v52  ;;  %v8628_v50 = vcombine.high %v169_v53, %v177_v17  ;;  %v11354_v20 = vld [vmem:[#allocation3 + $0x6c] ss:$16 sps:$4 sm:$0xff]   ;;  %v185_v52 = vld [vmem:[#allocation6 + $0x310] sm:$0xff] }
 0x1d0   :  { %3619 = vmatprep.subr.bf16.mxu0 %v8580_v4  ;;  %3765 = vmatprep.subr.bf16.mxu1 %v8582_v46  ;;  %v170_v4 = vld [vmem:[#allocation6 + $0x298] sm:$0xff] }
 0x1d1   :  { %v178_v46 = vld [vmem:[#allocation6 + $0x2d8] sm:$0xff] }
 0x1d2   :  { %3439 = vmatmul.mubr.bf16.gmra.mrb[4].mxu0 %v11344_v59  ;;  %3585 = vmatmul.mubr.bf16.gmra.mrb[4].mxu1 %v11344_v59  ;;  %v8630_v3 = vcombine.high %v170_v4, %v178_v46 }
 0x1d3   :  { %3620 = vmatpush1.bf16.msra.mxu0 %v8579_v14  ;;  %3766 = vmatpush1.bf16.msra.mxu1 %v8581_v1  ;;  %v8611_v14 = vcombine.low %v153_v11, %v161_v5  ;;  %v8613_v1 = vcombine.low %v154_v33, %v162_v19  ;;  %v201_v33 = vld [vmem:[#allocation6 + $0x390] sm:$0xff] }
 0x1d4   :  { %3621 = vmatprep.subr.bf16.mxu0 %v8596_v54  ;;  %3767 = vmatprep.subr.bf16.mxu1 %v8598_v43  ;;  %v193_v54 = vld [vmem:[#allocation6 + $0x350] sm:$0xff]  ;;  %v186_v43 = vld [vmem:[#allocation6 + $0x318] sm:$0xff] }
 0x1d5   :  { %3448 = vmatprep.mubr.bf16.mxu0 %v11346_v25  ;;  %3594 = vmatprep.mubr.bf16.mxu1 %v11346_v25  ;;  %v8644_v11 = vcombine.high %v185_v52, %v193_v54  ;;  %v8646_v5 = vcombine.high %v186_v43, %v194_v60  ;;  %v209_v19 = vld [vmem:[#allocation6 + $0x3d0] sm:$0xff] }
 0x1d6   :  { %v8659_v47 = vcombine.low %v201_v33, %v209_v19 }
 0x1d7   :  { %3622 = vmatpush1.bf16.msra.mxu0 %v8595_v21  ;;  %3768 = vmatpush1.bf16.msra.mxu1 %v8597_v34  ;;  %v8627_v21 = vcombine.low %v169_v53, %v177_v17  ;;  %v8629_v34 = vcombine.low %v170_v4, %v178_v46  ;;  %v8660_v53 = vcombine.high %v201_v33, %v209_v19  ;;  %v217_v4 = vld [vmem:[#allocation6 + $0x410] sm:$0xff] }
 0x1d8   :  { %3623 = vmatprep.subr.bf16.mxu0 %v8612_v18  ;;  %3769 = vmatprep.subr.bf16.mxu1 %v8614_v62  ;;  %v202_v18 = vld [vmem:[#allocation6 + $0x398] sm:$0xff]  ;;  %v225_v46 = vld [vmem:[#allocation6 + $0x450] sm:$0xff] }
 0x1d9   :  { %v210_v62 = vld [vmem:[#allocation6 + $0x3d8] sm:$0xff] }
 0x1da   :  { %3449 = vmatmul.mubr.bf16.gmra.mrb[8].mxu0 %v11352_v31  ;;  %3595 = vmatmul.mubr.bf16.gmra.mrb[8].mxu1 %v11352_v31  ;;  %v8662_v17 = vcombine.high %v202_v18, %v210_v62  ;;  %v8661_v12 = vcombine.low %v202_v18, %v210_v62  ;;  %v249_v18 = vld [vmem:[#allocation6 + $0x510] sm:$0xff] }
 0x1db   :  { %3624 = vmatpush1.bf16.msra.mxu0 %v8611_v14  ;;  %3770 = vmatpush1.bf16.msra.mxu1 %v8613_v1  ;;  %v8643_v14 = vcombine.low %v185_v52, %v193_v54  ;;  %v8645_v1 = vcombine.low %v186_v43, %v194_v60  ;;  %v8676_v52 = vcombine.high %v217_v4, %v225_v46  ;;  %v233_v54 = vld [vmem:[#allocation6 + $0x490] sm:$0xff] }
 0x1dc   :  { %3625 = vmatprep.subr.bf16.mxu0 %v8628_v50  ;;  %3771 = vmatprep.subr.bf16.mxu1 %v8630_v3  ;;  %v218_v50 = vld [vmem:[#allocation6 + $0x418] sm:$0xff]  ;;  %v241_v43 = vld [vmem:[#allocation6 + $0x4d0] sm:$0xff] }
 0x1dd   :  { %3458 = vmatprep.mubr.bf16.mxu0 %v11354_v20  ;;  %3604 = vmatprep.mubr.bf16.mxu1 %v11354_v20  ;;  %v226_v3 = vld [vmem:[#allocation6 + $0x458] sm:$0xff]  ;;  %v8692_v33 = vcombine.high %v233_v54, %v241_v43  ;;  %v257_v62 = vld [vmem:[#allocation6 + $0x550] sm:$0xff] }
 0x1de   :  { %v8678_v60 = vcombine.high %v218_v50, %v226_v3  ;;  %v8708_v37 = vcombine.high %v249_v18, %v257_v62 }
 0x1df   :  { %3626 = vmatpush1.bf16.msra.mxu0 %v8627_v21  ;;  %3772 = vmatpush1.bf16.msra.mxu1 %v8629_v34  ;;  %v234_v21 = vld [vmem:[#allocation6 + $0x498] sm:$0xff] }
 0x1e0   :  { %3627 = vmatprep.subr.bf16.mxu0 %v8644_v11  ;;  %3773 = vmatprep.subr.bf16.mxu1 %v8646_v5  ;;  %v242_v34 = vld [vmem:[#allocation6 + $0x4d8] sm:$0xff]  ;;  %v8675_v11 = vcombine.low %v217_v4, %v225_v46  ;;  %v8677_v5 = vcombine.low %v218_v50, %v226_v3  ;;  %v8707_v50 = vcombine.low %v249_v18, %v257_v62 }
 0x1e1   :  { %v8694_v19 = vcombine.high %v234_v21, %v242_v34  ;;  %v266_v4 = vld [vmem:[#allocation6 + $0x598] sm:$0xff] }
 0x1e2   :  { %3459 = vmatmul.mubr.bf16.gmra.mrb[12].mxu0 %v11360_v28  ;;  %3605 = vmatmul.mubr.bf16.gmra.mrb[12].mxu1 %v11360_v28  ;;  %v274_v46 = vld [vmem:[#allocation6 + $0x5d8] sm:$0xff] }
 0x1e3   :  { %3628 = vmatpush1.bf16.msra.mxu0 %v8643_v14  ;;  %3774 = vmatpush1.bf16.msra.mxu1 %v8645_v1  ;;  %v250_v14 = vld [vmem:[#allocation6 + $0x518] sm:$0xff] }
 0x1e4   :  { %3629 = vmatprep.subr.bf16.mxu0 %v8660_v53  ;;  %3775 = vmatprep.subr.bf16.mxu1 %v8662_v17  ;;  %v258_v1 = vld [vmem:[#allocation6 + $0x558] sm:$0xff]  ;;  %v8691_v53 = vcombine.low %v233_v54, %v241_v43  ;;  %v8693_v17 = vcombine.low %v234_v21, %v242_v34  ;;  %v8725_v34 = vcombine.low %v266_v4, %v274_v46 }
 0x1e5   :  { %3647 = vmatprep.mubr.bf16.mxu0 %v11300_v22  ;;  %3793 = vmatprep.mubr.bf16.mxu1 %v11300_v22  ;;  %v8710_v22 = vcombine.high %v250_v14, %v258_v1  ;;  %v8709_v3 = vcombine.low %v250_v14, %v258_v1  ;;  %v282_v54 = vld [vmem:[#allocation6 + $0x618] sm:$0xff] }
 0x1e6   :  { %v290_v43 = vld [vmem:[#allocation6 + $0x658] sm:$0xff] }
 0x1e7   :  { %3630 = vmatpush1.bf16.msra.mxu0 %v8659_v47  ;;  %3776 = vmatpush1.bf16.msra.mxu1 %v8661_v12  ;;  %v265_v47 = vld [vmem:[#allocation6 + $0x590] sm:$0xff]  ;;  %v298_v18 = vld [vmem:[#allocation6 + $0x698] sm:$0xff]  ;;  %v8741_v14 = vcombine.low %v282_v54, %v290_v43 }
 0x1e8   :  { %3631 = vmatprep.subr.bf16.mxu0 %v8676_v52  ;;  %3777 = vmatprep.subr.bf16.mxu1 %v8678_v60  ;;  %v273_v12 = vld [vmem:[#allocation6 + $0x5d0] sm:$0xff]  ;;  %v8726_v60 = vcombine.high %v266_v4, %v274_v46  ;;  %v306_v62 = vld [vmem:[#allocation6 + $0x6d8] sm:$0xff] }
 0x1e9   :  { %v8724_v52 = vcombine.high %v265_v47, %v273_v12  ;;  %v8723_v21 = vcombine.low %v265_v47, %v273_v12  ;;  %v314_v47 = vld [vmem:[#allocation6 + $0x718] sm:$0xff]  ;;  %v8757_v46 = vcombine.low %v298_v18, %v306_v62 }
 0x1ea   :  { %v322_v12 = vld [vmem:[#allocation6 + $0x758] sm:$0xff] }
 0x1eb   :  { %3632 = vmatpush1.bf16.msra.mxu0 %v8675_v11  ;;  %3778 = vmatpush1.bf16.msra.mxu1 %v8677_v5  ;;  %v281_v11 = vld [vmem:[#allocation6 + $0x610] sm:$0xff] }
 0x1ec   :  { %3633 = vmatprep.subr.bf16.mxu0 %v8692_v33  ;;  %3779 = vmatprep.subr.bf16.mxu1 %v8694_v19  ;;  %v289_v5 = vld [vmem:[#allocation6 + $0x650] sm:$0xff]  ;;  %v8742_v19 = vcombine.high %v282_v54, %v290_v43  ;;  %v8773_v43 = vcombine.low %v314_v47, %v322_v12 }
 0x1ed   :  { %v8740_v33 = vcombine.high %v281_v11, %v289_v5 }
 0x1ef   :  { %3634 = vmatpush1.bf16.msra.mxu0 %v8691_v53  ;;  %3780 = vmatpush1.bf16.msra.mxu1 %v8693_v17  ;;  %v297_v53 = vld [vmem:[#allocation6 + $0x690] sm:$0xff] }
 0x1f0   :  { %3635 = vmatprep.subr.bf16.mxu0 %v8708_v37  ;;  %3781 = vmatprep.subr.bf16.mxu1 %v8710_v22  ;;  %v305_v17 = vld [vmem:[#allocation6 + $0x6d0] sm:$0xff]  ;;  %v8739_v37 = vcombine.low %v281_v11, %v289_v5  ;;  %v8758_v22 = vcombine.high %v298_v18, %v306_v62  ;;  %v330_v11 = vld [vmem:[#allocation6 + $0x798] sm:$0xff] }
 0x1f1   :  { %v8756_v1 = vcombine.high %v297_v53, %v305_v17  ;;  %v8755_v4 = vcombine.low %v297_v53, %v305_v17  ;;  %v338_v5 = vld [vmem:[#allocation6 + $0x7d8] sm:$0xff] }
 0x1f2   :  { %v346_v53 = vld [vmem:[#allocation6 + $0x818] sm:$0xff]  ;;  %v8789_v62 = vcombine.low %v330_v11, %v338_v5 }
 0x1f3   :  { %3636 = vmatpush1.bf16.msra.mxu0 %v8707_v50  ;;  %3782 = vmatpush1.bf16.msra.mxu1 %v8709_v3  ;;  %v313_v50 = vld [vmem:[#allocation6 + $0x710] sm:$0xff]  ;;  %v354_v17 = vld [vmem:[#allocation6 + $0x858] sm:$0xff] }
 0x1f4   :  { %3637 = vmatprep.subr.bf16.mxu0 %v8724_v52  ;;  %3783 = vmatprep.subr.bf16.mxu1 %v8726_v60  ;;  %v321_v3 = vld [vmem:[#allocation6 + $0x750] sm:$0xff]  ;;  %v8774_v60 = vcombine.high %v314_v47, %v322_v12  ;;  %v8805_v12 = vcombine.low %v346_v53, %v354_v17 }
 0x1f5   :  { %v8772_v52 = vcombine.high %v313_v50, %v321_v3  ;;  %v8771_v54 = vcombine.low %v313_v50, %v321_v3  ;;  %v362_v50 = vld [vmem:[#allocation6 + $0x898] sm:$0xff] }
 0x1f6   :  { %v370_v3 = vld [vmem:[#allocation6 + $0x8d8] sm:$0xff] }
 0x1f7   :  { %3638 = vmatpush1.bf16.msra.mxu0 %v8723_v21  ;;  %3784 = vmatpush1.bf16.msra.mxu1 %v8725_v34  ;;  %v329_v21 = vld [vmem:[#allocation6 + $0x790] sm:$0xff] }
 0x1f8   :  { %3639 = vmatprep.subr.bf16.mxu0 %v8740_v33  ;;  %3785 = vmatprep.subr.bf16.mxu1 %v8742_v19  ;;  %v337_v34 = vld [vmem:[#allocation6 + $0x7d0] sm:$0xff]  ;;  %v8790_v19 = vcombine.high %v330_v11, %v338_v5  ;;  %v8821_v5 = vcombine.low %v362_v50, %v370_v3 }
 0x1f9   :  { %v8788_v33 = vcombine.high %v329_v21, %v337_v34  ;;  %v8787_v18 = vcombine.low %v329_v21, %v337_v34  ;;  %v378_v21 = vld [vmem:[#allocation6 + $0x918] sm:$0xff] }
 0x1fa   :  { %v386_v34 = vld [vmem:[#allocation6 + $0x958] sm:$0xff] }
 0x1fb   :  { %3640 = vmatpush1.bf16.msra.mxu0 %v8739_v37  ;;  %3786 = vmatpush1.bf16.msra.mxu1 %v8741_v14  ;;  %v345_v37 = vld [vmem:[#allocation6 + $0x810] sm:$0xff] }
 0x1fc   :  { %3641 = vmatprep.subr.bf16.mxu0 %v8756_v1  ;;  %3787 = vmatprep.subr.bf16.mxu1 %v8758_v22  ;;  %v353_v14 = vld [vmem:[#allocation6 + $0x850] sm:$0xff]  ;;  %v8806_v22 = vcombine.high %v346_v53, %v354_v17  ;;  %v394_v53 = vld [vmem:[#allocation6 + $0x998] sm:$0xff] }
 0x1fd   :  { %v8804_v1 = vcombine.high %v345_v37, %v353_v14  ;;  %v8803_v47 = vcombine.low %v345_v37, %v353_v14  ;;  %v393_v37 = vld [vmem:[#allocation6 + $0x990] sm:$0xff]  ;;  %v402_v17 = vld [vmem:[#allocation6 + $0x9d8] sm:$0xff] }
 0x1fe   :  { %v401_v14 = vld [vmem:[#allocation6 + $0x9d0] sm:$0xff] }
 0x1ff   :  { %3642 = vmatpush1.bf16.msra.mxu0 %v8755_v4  ;;  %3788 = vmatpush1.bf16.msra.mxu1 %v8757_v46  ;;  %v361_v4 = vld [vmem:[#allocation6 + $0x890] sm:$0xff] }
 0x200   :  { %3643 = vmatprep.subr.bf16.mxu0 %v8772_v52  ;;  %3789 = vmatprep.subr.bf16.mxu1 %v8774_v60  ;;  %v369_v46 = vld [vmem:[#allocation6 + $0x8d0] sm:$0xff]  ;;  %v8822_v60 = vcombine.high %v362_v50, %v370_v3  ;;  %v418_v50 = vld [vmem:[#allocation6 + $0xa58] sm:$0xff]  ;;  %v8851_v3 = vcombine.low %v393_v37, %v401_v14 }
 0x201   :  { %v8820_v52 = vcombine.high %v361_v4, %v369_v46  ;;  %v8819_v11 = vcombine.low %v361_v4, %v369_v46  ;;  %v417_v4 = vld [vmem:[#allocation6 + $0xa50] sm:$0xff]  ;;  %v410_v46 = vld [vmem:[#allocation6 + $0xa18] sm:$0xff] }
 0x203   :  { %3644 = vmatpush1.bf16.msra.mxu0 %v8771_v54  ;;  %3790 = vmatpush1.bf16.msra.mxu1 %v8773_v43  ;;  %v377_v54 = vld [vmem:[#allocation6 + $0x910] sm:$0xff] }
 0x204   :  { %3645 = vmatprep.subr.bf16.mxu0 %v8788_v33  ;;  %3791 = vmatprep.subr.bf16.mxu1 %v8790_v19  ;;  %v385_v43 = vld [vmem:[#allocation6 + $0x950] sm:$0xff]  ;;  %v8838_v19 = vcombine.high %v378_v21, %v386_v34 }
 0x205   :  { %v8836_v33 = vcombine.high %v377_v54, %v385_v43 }
 0x207   :  { %3646 = vmatpush1.bf16.msra.mxu0 %v8787_v18  ;;  %3792 = vmatpush1.bf16.msra.mxu1 %v8789_v62  ;;  %v8835_v18 = vcombine.low %v377_v54, %v385_v43  ;;  %v8852_v62 = vcombine.high %v393_v37, %v401_v14  ;;  %v426_v54 = vld [vmem:[#allocation6 + $0xa98] sm:$0xff] }
 0x208   :  { %3688 = vmatprep.subr.bf16.mxu0 %v8804_v1  ;;  %3834 = vmatprep.subr.bf16.mxu1 %v8806_v22  ;;  %v8854_v1 = vcombine.high %v394_v53, %v402_v17  ;;  %v409_v22 = vld [vmem:[#allocation6 + $0xa10] sm:$0xff]  ;;  %v434_v43 = vld [vmem:[#allocation6 + $0xad8] sm:$0xff] }
 0x209   :  { %v450_v37 = vld [vmem:[#allocation6 + $0xb58] sm:$0xff] }
 0x20a   :  { %3648 = vmatmul.mubr.bf16.vlgmr.msra.gmra.mrb[16].mxu0 %v11304_v41  ;;  %3794 = vmatmul.mubr.bf16.vlgmr.msra.gmra.mrb[16].mxu1 %v11304_v41  ;;  %v8837_v41 = vcombine.low %v378_v21, %v386_v34  ;;  %v8867_v21 = vcombine.low %v409_v22, %v417_v4 }
 0x20b   :  { %3689 = vmatpush1.bf16.msra.mxu0 %v8803_v47  ;;  %3835 = vmatpush1.bf16.msra.mxu1 %v8805_v12  ;;  %v8868_v47 = vcombine.high %v409_v22, %v417_v4  ;;  %v8870_v12 = vcombine.high %v410_v46, %v418_v50 }
 0x20c   :  { %3690 = vmatprep.subr.bf16.mxu0 %v8820_v52  ;;  %3836 = vmatprep.subr.bf16.mxu1 %v8822_v60  ;;  %v425_v52 = vld [vmem:[#allocation6 + $0xa90] sm:$0xff] }
 0x20d   :  { %3657 = vmatprep.mubr.bf16.mxu0 %v11306_v51  ;;  %3803 = vmatprep.mubr.bf16.mxu1 %v11306_v51  ;;  %v8853_v51 = vcombine.low %v394_v53, %v402_v17  ;;  %v433_v60 = vld [vmem:[#allocation6 + $0xad0] sm:$0xff] }
 0x20e   :  { %v8884_v34 = vcombine.high %v425_v52, %v433_v60  ;;  %v8883_v14 = vcombine.low %v425_v52, %v433_v60 }
 0x20f   :  { %3691 = vmatpush1.bf16.msra.mxu0 %v8819_v11  ;;  %3837 = vmatpush1.bf16.msra.mxu1 %v8821_v5  ;;  %v8886_v11 = vcombine.high %v426_v54, %v434_v43  ;;  %v441_v5 = vld [vmem:[#allocation6 + $0xb10] sm:$0xff] }
 0x210   :  { %3692 = vmatprep.subr.bf16.mxu0 %v8836_v33  ;;  %3838 = vmatprep.subr.bf16.mxu1 %v8838_v19  ;;  %v449_v33 = vld [vmem:[#allocation6 + $0xb50] sm:$0xff]  ;;  %v442_v19 = vld [vmem:[#allocation6 + $0xb18] sm:$0xff] }
 0x211   :  { %v8900_v53 = vcombine.high %v441_v5, %v449_v33  ;;  %v8902_v17 = vcombine.high %v442_v19, %v450_v37  ;;  %v8899_v22 = vcombine.low %v441_v5, %v449_v33  ;;  %v505_v33 = vld [vmem:[#allocation6 + $0xd10] sm:$0xff] }
 0x212   :  { %3658 = vmatmul.mubr.bf16.gmra.mrb[20].mxu0 %v11312_v55  ;;  %3804 = vmatmul.mubr.bf16.gmra.mrb[20].mxu1 %v11312_v55  ;;  %v8869_v55 = vcombine.low %v410_v46, %v418_v50  ;;  %v473_v50 = vld [vmem:[#allocation6 + $0xc10] sm:$0xff] }
 0x213   :  { %3693 = vmatpush1.bf16.msra.mxu0 %v8835_v18  ;;  %3839 = vmatpush1.bf16.msra.mxu1 %v8837_v41  ;;  %v457_v18 = vld [vmem:[#allocation6 + $0xb90] sm:$0xff] }
 0x214   :  { %3694 = vmatprep.subr.bf16.mxu0 %v8852_v62  ;;  %3840 = vmatprep.subr.bf16.mxu1 %v8854_v1  ;;  %v465_v41 = vld [vmem:[#allocation6 + $0xbd0] sm:$0xff]  ;;  %v458_v62 = vld [vmem:[#allocation6 + $0xb98] sm:$0xff] }
 0x215   :  { %3667 = vmatprep.mubr.bf16.mxu0 %v11314_v23  ;;  %3813 = vmatprep.mubr.bf16.mxu1 %v11314_v23  ;;  %v8885_v23 = vcombine.low %v426_v54, %v434_v43  ;;  %v466_v1 = vld [vmem:[#allocation6 + $0xbd8] sm:$0xff]  ;;  %v8916_v4 = vcombine.high %v457_v18, %v465_v41  ;;  %v489_v54 = vld [vmem:[#allocation6 + $0xc90] sm:$0xff] }
 0x216   :  { %v8918_v46 = vcombine.high %v458_v62, %v466_v1  ;;  %v497_v43 = vld [vmem:[#allocation6 + $0xcd0] sm:$0xff] }
 0x217   :  { %3695 = vmatpush1.bf16.msra.mxu0 %v8851_v3  ;;  %3841 = vmatpush1.bf16.msra.mxu1 %v8853_v51  ;;  %v481_v3 = vld [vmem:[#allocation6 + $0xc50] sm:$0xff]  ;;  %v474_v51 = vld [vmem:[#allocation6 + $0xc18] sm:$0xff] }
 0x218   :  { %3696 = vmatprep.subr.bf16.mxu0 %v8868_v47  ;;  %3842 = vmatprep.subr.bf16.mxu1 %v8870_v12  ;;  %v482_v47 = vld [vmem:[#allocation6 + $0xc58] sm:$0xff]  ;;  %v8915_v12 = vcombine.low %v457_v18, %v465_v41  ;;  %v8932_v52 = vcombine.high %v473_v50, %v481_v3  ;;  %v521_v18 = vld [vmem:[#allocation6 + $0xd90] sm:$0xff] }
 0x219   :  { %v8934_v60 = vcombine.high %v474_v51, %v482_v47  ;;  %v529_v41 = vld [vmem:[#allocation6 + $0xdd0] sm:$0xff] }
 0x21a   :  { %3668 = vmatmul.mubr.bf16.gmra.mrb[24].mxu0 %v11320_v57  ;;  %3814 = vmatmul.mubr.bf16.gmra.mrb[24].mxu1 %v11320_v57  ;;  %v8901_v57 = vcombine.low %v442_v19, %v450_v37  ;;  %v513_v19 = vld [vmem:[#allocation6 + $0xd50] sm:$0xff]  ;;  %v506_v37 = vld [vmem:[#allocation6 + $0xd18] sm:$0xff] }
 0x21b   :  { %3697 = vmatpush1.bf16.msra.mxu0 %v8867_v21  ;;  %3843 = vmatpush1.bf16.msra.mxu1 %v8869_v55  ;;  %v490_v21 = vld [vmem:[#allocation6 + $0xc98] sm:$0xff] }
 0x21c   :  { %3698 = vmatprep.subr.bf16.mxu0 %v8884_v34  ;;  %3844 = vmatprep.subr.bf16.mxu1 %v8886_v11  ;;  %v498_v55 = vld [vmem:[#allocation6 + $0xcd8] sm:$0xff]  ;;  %v8931_v34 = vcombine.low %v473_v50, %v481_v3  ;;  %v8948_v11 = vcombine.high %v489_v54, %v497_v43  ;;  %v537_v50 = vld [vmem:[#allocation6 + $0xe10] sm:$0xff] }
 0x21d   :  { %3677 = vmatprep.mubr.bf16.mxu0 %v11322_v35  ;;  %3823 = vmatprep.mubr.bf16.mxu1 %v11322_v35  ;;  %v8917_v35 = vcombine.low %v458_v62, %v466_v1  ;;  %v8950_v5 = vcombine.high %v490_v21, %v498_v55  ;;  %v522_v62 = vld [vmem:[#allocation6 + $0xd98] sm:$0xff]  ;;  %v545_v3 = vld [vmem:[#allocation6 + $0xe50] sm:$0xff] }
 0x21e   :  { %v530_v1 = vld [vmem:[#allocation6 + $0xdd8] sm:$0xff] }
 0x21f   :  { %3699 = vmatpush1.bf16.msra.mxu0 %v8883_v14  ;;  %3845 = vmatpush1.bf16.msra.mxu1 %v8885_v23  ;;  %v514_v14 = vld [vmem:[#allocation6 + $0xd58] sm:$0xff]  ;;  %v8947_v23 = vcombine.low %v489_v54, %v497_v43  ;;  %v553_v54 = vld [vmem:[#allocation6 + $0xe90] sm:$0xff] }
 0x220   :  { %3700 = vmatprep.subr.bf16.mxu0 %v8900_v53  ;;  %3846 = vmatprep.subr.bf16.mxu1 %v8902_v17  ;;  %v8949_v53 = vcombine.low %v490_v21, %v498_v55  ;;  %v8964_v17 = vcombine.high %v505_v33, %v513_v19  ;;  %v561_v43 = vld [vmem:[#allocation6 + $0xed0] sm:$0xff]  ;;  %v554_v21 = vld [vmem:[#allocation6 + $0xe98] sm:$0xff] }
 0x221   :  { %v562_v55 = vld [vmem:[#allocation6 + $0xed8] sm:$0xff] }
 0x222   :  { %3678 = vmatmul.mubr.bf16.gmra.mrb[28].mxu0 %v11328_v27  ;;  %3824 = vmatmul.mubr.bf16.gmra.mrb[28].mxu1 %v11328_v27  ;;  %v8933_v27 = vcombine.low %v474_v51, %v482_v47  ;;  %v538_v51 = vld [vmem:[#allocation6 + $0xe18] sm:$0xff] }
 0x223   :  { %3701 = vmatpush1.bf16.msra.mxu0 %v8899_v22  ;;  %3847 = vmatpush1.bf16.msra.mxu1 %v8901_v57  ;;  %v8963_v22 = vcombine.low %v505_v33, %v513_v19  ;;  %v8965_v57 = vcombine.low %v506_v37, %v514_v14  ;;  %v546_v47 = vld [vmem:[#allocation6 + $0xe58] sm:$0xff]  ;;  %v569_v33 = vld [vmem:[#allocation6 + $0xf10] sm:$0xff] }
 0x224   :  { %3702 = vmatprep.subr.bf16.mxu0 %v8916_v4  ;;  %3848 = vmatprep.subr.bf16.mxu1 %v8918_v46  ;;  %v8980_v4 = vcombine.high %v521_v18, %v529_v41  ;;  %v8982_v46 = vcombine.high %v522_v62, %v530_v1  ;;  %v577_v19 = vld [vmem:[#allocation6 + $0xf50] sm:$0xff] }
 0x225   :  { %3720 = vmatprep.mubr.bf16.mxu0 %v11330_v6  ;;  %3866 = vmatprep.mubr.bf16.mxu1 %v11330_v6  ;;  %v8966_v6 = vcombine.high %v506_v37, %v514_v14  ;;  %v570_v37 = vld [vmem:[#allocation6 + $0xf18] sm:$0xff] }
 0x226   :  { %v578_v14 = vld [vmem:[#allocation6 + $0xf58] sm:$0xff] }
 0x227   :  { %3703 = vmatpush1.bf16.msra.mxu0 %v8915_v12  ;;  %3849 = vmatpush1.bf16.msra.mxu1 %v8917_v35  ;;  %v8979_v12 = vcombine.low %v521_v18, %v529_v41  ;;  %v8981_v35 = vcombine.low %v522_v62, %v530_v1  ;;  %v585_v18 = vld [vmem:[#allocation6 + $0xf90] sm:$0xff]  ;;  %v586_v62 = vld [vmem:[#allocation6 + $0xf98] sm:$0xff] }
 0x228   :  { %3704 = vmatprep.subr.bf16.mxu0 %v8932_v52  ;;  %3850 = vmatprep.subr.bf16.mxu1 %v8934_v60  ;;  %v8996_v52 = vcombine.high %v537_v50, %v545_v3  ;;  %v8998_v60 = vcombine.high %v538_v51, %v546_v47  ;;  %v593_v41 = vld [vmem:[#allocation6 + $0xfd0] sm:$0xff]  ;;  %v594_v1 = vld [vmem:[#allocation6 + $0xfd8] sm:$0xff] }
 0x22b   :  { %3705 = vmatpush1.bf16.msra.mxu0 %v8931_v34  ;;  %3851 = vmatpush1.bf16.msra.mxu1 %v8933_v27  ;;  %v8995_v34 = vcombine.low %v537_v50, %v545_v3  ;;  %v8997_v27 = vcombine.low %v538_v51, %v546_v47  ;;  %v91_v50 = vld [vmem:[#allocation6 + $0x20] sm:$0xff]  ;;  %v92_v51 = vld [vmem:[#allocation6 + $0x28] sm:$0xff] }
 0x22c   :  { %3706 = vmatprep.subr.bf16.mxu0 %v8948_v11  ;;  %3852 = vmatprep.subr.bf16.mxu1 %v8950_v5  ;;  %v9012_v11 = vcombine.high %v553_v54, %v561_v43  ;;  %v9014_v5 = vcombine.high %v554_v21, %v562_v55  ;;  %v99_v3 = vld [vmem:[#allocation6 + $0x60] sm:$0xff]  ;;  %v100_v47 = vld [vmem:[#allocation6 + $0x68] sm:$0xff] }
 0x22f   :  { %3707 = vmatpush1.bf16.msra.mxu0 %v8947_v23  ;;  %3853 = vmatpush1.bf16.msra.mxu1 %v8949_v53  ;;  %v9011_v23 = vcombine.low %v553_v54, %v561_v43  ;;  %v9013_v53 = vcombine.low %v554_v21, %v562_v55  ;;  %v107_v54 = vld [vmem:[#allocation6 + $0xa0] sm:$0xff]  ;;  %v108_v21 = vld [vmem:[#allocation6 + $0xa8] sm:$0xff] }
 0x230   :  { %3708 = vmatprep.subr.bf16.mxu0 %v8964_v17  ;;  %3854 = vmatprep.subr.bf16.mxu1 %v8966_v6  ;;  %v9028_v17 = vcombine.high %v569_v33, %v577_v19  ;;  %v9030_v6 = vcombine.high %v570_v37, %v578_v14  ;;  %v115_v43 = vld [vmem:[#allocation6 + $0xe0] sm:$0xff]  ;;  %v116_v55 = vld [vmem:[#allocation6 + $0xe8] sm:$0xff] }
 0x233   :  { %3709 = vmatpush1.bf16.msra.mxu0 %v8963_v22  ;;  %3855 = vmatpush1.bf16.msra.mxu1 %v8965_v57  ;;  %v9027_v22 = vcombine.low %v569_v33, %v577_v19  ;;  %v9029_v57 = vcombine.low %v570_v37, %v578_v14  ;;  %v123_v33 = vld [vmem:[#allocation6 + $0x120] sm:$0xff]  ;;  %v124_v37 = vld [vmem:[#allocation6 + $0x128] sm:$0xff] }
 0x234   :  { %3710 = vmatprep.subr.bf16.mxu0 %v8980_v4  ;;  %3856 = vmatprep.subr.bf16.mxu1 %v8982_v46  ;;  %v9044_v4 = vcombine.high %v585_v18, %v593_v41  ;;  %v9046_v46 = vcombine.high %v586_v62, %v594_v1  ;;  %v131_v19 = vld [vmem:[#allocation6 + $0x160] sm:$0xff]  ;;  %v132_v14 = vld [vmem:[#allocation6 + $0x168] sm:$0xff] }
 0x237   :  { %3711 = vmatpush1.bf16.msra.mxu0 %v8979_v12  ;;  %3857 = vmatpush1.bf16.msra.mxu1 %v8981_v35  ;;  %v9043_v12 = vcombine.low %v585_v18, %v593_v41  ;;  %v9045_v35 = vcombine.low %v586_v62, %v594_v1  ;;  %v139_v18 = vld [vmem:[#allocation6 + $0x1a0] sm:$0xff]  ;;  %v140_v62 = vld [vmem:[#allocation6 + $0x1a8] sm:$0xff] }
 0x238   :  { %3712 = vmatprep.subr.bf16.mxu0 %v8996_v52  ;;  %3858 = vmatprep.subr.bf16.mxu1 %v8998_v60  ;;  %v8552_v52 = vcombine.high %v91_v50, %v99_v3  ;;  %v8554_v60 = vcombine.high %v92_v51, %v100_v47  ;;  %v147_v41 = vld [vmem:[#allocation6 + $0x1e0] sm:$0xff]  ;;  %v148_v1 = vld [vmem:[#allocation6 + $0x1e8] sm:$0xff] }
 0x23b   :  { %3713 = vmatpush1.bf16.msra.mxu0 %v8995_v34  ;;  %3859 = vmatpush1.bf16.msra.mxu1 %v8997_v27  ;;  %v8551_v34 = vcombine.low %v91_v50, %v99_v3  ;;  %v8553_v27 = vcombine.low %v92_v51, %v100_v47  ;;  %v163_v50 = vld [vmem:[#allocation6 + $0x260] sm:$0xff]  ;;  %v156_v3 = vld [vmem:[#allocation6 + $0x228] sm:$0xff]  ;;  %v8601_v47 = vcombine.low %v140_v62, %v148_v1 }
 0x23c   :  { %3714 = vmatprep.subr.bf16.mxu0 %v9012_v11  ;;  %3860 = vmatprep.subr.bf16.mxu1 %v9014_v5  ;;  %v8568_v11 = vcombine.high %v107_v54, %v115_v43  ;;  %v8570_v5 = vcombine.high %v108_v21, %v116_v55  ;;  %v164_v51 = vld [vmem:[#allocation6 + $0x268] sm:$0xff] }
 0x23f   :  { %3715 = vmatpush1.bf16.msra.mxu0 %v9011_v23  ;;  %3861 = vmatpush1.bf16.msra.mxu1 %v9013_v53  ;;  %v8567_v23 = vcombine.low %v107_v54, %v115_v43  ;;  %v8569_v53 = vcombine.low %v108_v21, %v116_v55  ;;  %v172_v54 = vld [vmem:[#allocation6 + $0x2a8] sm:$0xff] }
 0x240   :  { %3716 = vmatprep.subr.bf16.mxu0 %v9028_v17  ;;  %3862 = vmatprep.subr.bf16.mxu1 %v9030_v6  ;;  %v8584_v17 = vcombine.high %v123_v33, %v131_v19  ;;  %v8586_v6 = vcombine.high %v124_v37, %v132_v14  ;;  %v180_v43 = vld [vmem:[#allocation6 + $0x2e8] sm:$0xff] }
 0x243   :  { %3717 = vmatpush1.bf16.msra.mxu0 %v9027_v22  ;;  %3863 = vmatpush1.bf16.msra.mxu1 %v9029_v57  ;;  %v8583_v22 = vcombine.low %v123_v33, %v131_v19  ;;  %v8600_v57 = vcombine.high %v139_v18, %v147_v41  ;;  %v196_v33 = vld [vmem:[#allocation6 + $0x368] sm:$0xff]  ;;  %v8633_v19 = vcombine.low %v172_v54, %v180_v43 }
 0x244   :  { %3718 = vmatprep.subr.bf16.mxu0 %v9044_v4  ;;  %3864 = vmatprep.subr.bf16.mxu1 %v9046_v46  ;;  %v8602_v4 = vcombine.high %v140_v62, %v148_v1  ;;  %v155_v46 = vld [vmem:[#allocation6 + $0x220] sm:$0xff] }
 0x245   :  { %v8615_v21 = vcombine.low %v155_v46, %v163_v50  ;;  %v219_v1 = vld [vmem:[#allocation6 + $0x420] sm:$0xff] }
 0x247   :  { %3719 = vmatpush1.bf16.msra.mxu0 %v9043_v12  ;;  %3865 = vmatpush1.bf16.msra.mxu1 %v9045_v35  ;;  %v8616_v12 = vcombine.high %v155_v46, %v163_v50  ;;  %v8618_v35 = vcombine.high %v156_v3, %v164_v51 }
 0x248   :  { %3907 = vmatprep.subr.bf16.mxu0 %v8552_v52  ;;  %4053 = vmatprep.subr.bf16.mxu1 %v8554_v60  ;;  %v171_v52 = vld [vmem:[#allocation6 + $0x2a0] sm:$0xff] }
 0x249   :  { %v179_v60 = vld [vmem:[#allocation6 + $0x2e0] sm:$0xff] }
 0x24a   :  { %3721 = vmatmul.mubr.bf16.vlgmr.msra.gmra.mrb[16].mxu0 %v11336_v9  ;;  %3867 = vmatmul.mubr.bf16.vlgmr.msra.gmra.mrb[16].mxu1 %v11336_v9  ;;  %v8585_v9 = vcombine.low %v124_v37, %v132_v14  ;;  %v8632_v55 = vcombine.high %v171_v52, %v179_v60 }
 0x24b   :  { %3908 = vmatpush1.bf16.msra.mxu0 %v8551_v34  ;;  %4054 = vmatpush1.bf16.msra.mxu1 %v8553_v27  ;;  %v8634_v34 = vcombine.high %v172_v54, %v180_v43  ;;  %v187_v27 = vld [vmem:[#allocation6 + $0x320] sm:$0xff] }
 0x24c   :  { %3909 = vmatprep.subr.bf16.mxu0 %v8568_v11  ;;  %4055 = vmatprep.subr.bf16.mxu1 %v8570_v5  ;;  %v195_v11 = vld [vmem:[#allocation6 + $0x360] sm:$0xff]  ;;  %v188_v5 = vld [vmem:[#allocation6 + $0x328] sm:$0xff] }
 0x24d   :  { %3730 = vmatprep.mubr.bf16.mxu0 %v11338_v49  ;;  %3876 = vmatprep.mubr.bf16.mxu1 %v11338_v49  ;;  %v8599_v49 = vcombine.low %v139_v18, %v147_v41  ;;  %v8648_v37 = vcombine.high %v187_v27, %v195_v11  ;;  %v8650_v14 = vcombine.high %v188_v5, %v196_v33  ;;  %v251_v54 = vld [vmem:[#allocation6 + $0x520] sm:$0xff] }
 0x24e   :  { %v8647_v18 = vcombine.low %v187_v27, %v195_v11  ;;  %v259_v43 = vld [vmem:[#allocation6 + $0x560] sm:$0xff] }
 0x24f   :  { %3910 = vmatpush1.bf16.msra.mxu0 %v8567_v23  ;;  %4056 = vmatpush1.bf16.msra.mxu1 %v8569_v53  ;;  %v203_v23 = vld [vmem:[#allocation6 + $0x3a0] sm:$0xff]  ;;  %v8712_v27 = vcombine.high %v251_v54, %v259_v43 }
 0x250   :  { %3911 = vmatprep.subr.bf16.mxu0 %v8584_v17  ;;  %4057 = vmatprep.subr.bf16.mxu1 %v8586_v6  ;;  %v211_v53 = vld [vmem:[#allocation6 + $0x3e0] sm:$0xff]  ;;  %v204_v17 = vld [vmem:[#allocation6 + $0x3a8] sm:$0xff] }
 0x251   :  { %v212_v6 = vld [vmem:[#allocation6 + $0x3e8] sm:$0xff]  ;;  %v8664_v41 = vcombine.high %v203_v23, %v211_v53 }
 0x252   :  { %3731 = vmatmul.mubr.bf16.gmra.mrb[20].mxu0 %v11344_v59  ;;  %3877 = vmatmul.mubr.bf16.gmra.mrb[20].mxu1 %v11344_v59  ;;  %v8617_v59 = vcombine.low %v156_v3, %v164_v51  ;;  %v8666_v62 = vcombine.high %v204_v17, %v212_v6  ;;  %v235_v3 = vld [vmem:[#allocation6 + $0x4a0] sm:$0xff] }
 0x253   :  { %3912 = vmatpush1.bf16.msra.mxu0 %v8583_v22  ;;  %4058 = vmatpush1.bf16.msra.mxu1 %v8585_v9  ;;  %v227_v22 = vld [vmem:[#allocation6 + $0x460] sm:$0xff]  ;;  %v220_v9 = vld [vmem:[#allocation6 + $0x428] sm:$0xff] }
 0x254   :  { %3913 = vmatprep.subr.bf16.mxu0 %v8600_v57  ;;  %4059 = vmatprep.subr.bf16.mxu1 %v8602_v4  ;;  %v228_v57 = vld [vmem:[#allocation6 + $0x468] sm:$0xff]  ;;  %v8665_v4 = vcombine.low %v204_v17, %v212_v6  ;;  %v8680_v46 = vcombine.high %v219_v1, %v227_v22  ;;  %v243_v51 = vld [vmem:[#allocation6 + $0x4e0] sm:$0xff] }
 0x255   :  { %3740 = vmatprep.mubr.bf16.mxu0 %v11346_v25  ;;  %3886 = vmatprep.mubr.bf16.mxu1 %v11346_v25  ;;  %v8631_v25 = vcombine.low %v171_v52, %v179_v60  ;;  %v8682_v50 = vcombine.high %v220_v9, %v228_v57  ;;  %v8681_v52 = vcombine.low %v220_v9, %v228_v57  ;;  %v283_v17 = vld [vmem:[#allocation6 + $0x620] sm:$0xff] }
 0x256   :  { %v291_v6 = vld [vmem:[#allocation6 + $0x660] sm:$0xff] }
 0x257   :  { %3914 = vmatpush1.bf16.msra.mxu0 %v8599_v49  ;;  %4060 = vmatpush1.bf16.msra.mxu1 %v8601_v47  ;;  %v236_v49 = vld [vmem:[#allocation6 + $0x4a8] sm:$0xff]  ;;  %v299_v9 = vld [vmem:[#allocation6 + $0x6a0] sm:$0xff] }
 0x258   :  { %3915 = vmatprep.subr.bf16.mxu0 %v8616_v12  ;;  %4061 = vmatprep.subr.bf16.mxu1 %v8618_v35  ;;  %v244_v47 = vld [vmem:[#allocation6 + $0x4e8] sm:$0xff]  ;;  %v9932_v12 = vld [vmem:[#allocation3 + $0x4] ss:$16 sps:$4 sm:$0xff]   ;;  %v8679_v35 = vcombine.low %v219_v1, %v227_v22  ;;  %v8744_v1 = vcombine.high %v283_v17, %v291_v6 }
 0x259   :  { %v8698_v60 = vcombine.high %v236_v49, %v244_v47  ;;  %v307_v57 = vld [vmem:[#allocation6 + $0x6e0] sm:$0xff] }
 0x25a   :  { %3741 = vmatmul.mubr.bf16.gmra.mrb[24].mxu0 %v11352_v31  ;;  %3887 = vmatmul.mubr.bf16.gmra.mrb[24].mxu1 %v11352_v31  ;;  %v8649_v31 = vcombine.low %v188_v5, %v196_v33  ;;  %v267_v5 = vld [vmem:[#allocation6 + $0x5a0] sm:$0xff] }
 0x25b   :  { %3916 = vmatpush1.bf16.msra.mxu0 %v8615_v21  ;;  %4062 = vmatpush1.bf16.msra.mxu1 %v8617_v59  ;;  %v252_v21 = vld [vmem:[#allocation6 + $0x528] sm:$0xff]  ;;  %v275_v33 = vld [vmem:[#allocation6 + $0x5e0] sm:$0xff] }
 0x25c   :  { %3917 = vmatprep.subr.bf16.mxu0 %v8632_v55  ;;  %4063 = vmatprep.subr.bf16.mxu1 %v8634_v34  ;;  %v260_v59 = vld [vmem:[#allocation6 + $0x568] sm:$0xff]  ;;  %v8695_v55 = vcombine.low %v235_v3, %v243_v51  ;;  %v8697_v34 = vcombine.low %v236_v49, %v244_v47  ;;  %v315_v49 = vld [vmem:[#allocation6 + $0x720] sm:$0xff] }
 0x25d   :  { %3750 = vmatprep.mubr.bf16.mxu0 %v11354_v20  ;;  %3896 = vmatprep.mubr.bf16.mxu1 %v11354_v20  ;;  %v8663_v20 = vcombine.low %v203_v23, %v211_v53  ;;  %v8714_v11 = vcombine.high %v252_v21, %v260_v59  ;;  %v8728_v23 = vcombine.high %v267_v5, %v275_v33  ;;  %v323_v47 = vld [vmem:[#allocation6 + $0x760] sm:$0xff] }
 0x25f   :  { %3918 = vmatpush1.bf16.msra.mxu0 %v8631_v25  ;;  %4064 = vmatpush1.bf16.msra.mxu1 %v8633_v19  ;;  %v268_v25 = vld [vmem:[#allocation6 + $0x5a8] sm:$0xff] }
 0x260   :  { %3919 = vmatprep.subr.bf16.mxu0 %v8648_v37  ;;  %4065 = vmatprep.subr.bf16.mxu1 %v8650_v14  ;;  %v276_v19 = vld [vmem:[#allocation6 + $0x5e8] sm:$0xff]  ;;  %v8711_v37 = vcombine.low %v251_v54, %v259_v43  ;;  %v8713_v14 = vcombine.low %v252_v21, %v260_v59  ;;  %v331_v43 = vld [vmem:[#allocation6 + $0x7a0] sm:$0xff] }
 0x261   :  { %v8730_v53 = vcombine.high %v268_v25, %v276_v19  ;;  %v339_v21 = vld [vmem:[#allocation6 + $0x7e0] sm:$0xff]  ;;  %v332_v59 = vld [vmem:[#allocation6 + $0x7a8] sm:$0xff] }
 0x262   :  { %3751 = vmatmul.mubr.bf16.gmra.mrb[28].mxu0 %v11360_v28  ;;  %3897 = vmatmul.mubr.bf16.gmra.mrb[28].mxu1 %v11360_v28  ;;  %v8696_v28 = vcombine.high %v235_v3, %v243_v51  ;;  %v8760_v3 = vcombine.high %v299_v9, %v307_v57 }
 0x263   :  { %3920 = vmatpush1.bf16.msra.mxu0 %v8647_v18  ;;  %4066 = vmatpush1.bf16.msra.mxu1 %v8649_v31  ;;  %v284_v18 = vld [vmem:[#allocation6 + $0x628] sm:$0xff] }
 0x264   :  { %3921 = vmatprep.subr.bf16.mxu0 %v8664_v41  ;;  %4067 = vmatprep.subr.bf16.mxu1 %v8666_v62  ;;  %v292_v31 = vld [vmem:[#allocation6 + $0x668] sm:$0xff]  ;;  %v8727_v41 = vcombine.low %v267_v5, %v275_v33  ;;  %v8729_v62 = vcombine.low %v268_v25, %v276_v19  ;;  %v347_v33 = vld [vmem:[#allocation6 + $0x820] sm:$0xff] }
 0x265   :  { %3939 = vmatprep.mubr.bf16.mxu0 %v9932_v12  ;;  %4085 = vmatprep.mubr.bf16.mxu1 %v9932_v12  ;;  %v8746_v22 = vcombine.high %v284_v18, %v292_v31  ;;  %v316_v12 = vld [vmem:[#allocation6 + $0x728] sm:$0xff]  ;;  %v355_v25 = vld [vmem:[#allocation6 + $0x860] sm:$0xff] }
 0x266   :  { %v348_v19 = vld [vmem:[#allocation6 + $0x828] sm:$0xff] }
 0x267   :  { %3922 = vmatpush1.bf16.msra.mxu0 %v8663_v20  ;;  %4068 = vmatpush1.bf16.msra.mxu1 %v8665_v4  ;;  %v300_v20 = vld [vmem:[#allocation6 + $0x6a8] sm:$0xff] }
 0x268   :  { %3923 = vmatprep.subr.bf16.mxu0 %v8680_v46  ;;  %4069 = vmatprep.subr.bf16.mxu1 %v8682_v50  ;;  %v308_v4 = vld [vmem:[#allocation6 + $0x6e8] sm:$0xff]  ;;  %v8743_v46 = vcombine.low %v283_v17, %v291_v6  ;;  %v8745_v50 = vcombine.low %v284_v18, %v292_v31  ;;  %v363_v6 = vld [vmem:[#allocation6 + $0x8a0] sm:$0xff] }
 0x269   :  { %v8762_v51 = vcombine.high %v300_v20, %v308_v4  ;;  %v371_v18 = vld [vmem:[#allocation6 + $0x8e0] sm:$0xff]  ;;  %v364_v31 = vld [vmem:[#allocation6 + $0x8a8] sm:$0xff] }
 0x26b   :  { %3924 = vmatpush1.bf16.msra.mxu0 %v8679_v35  ;;  %4070 = vmatpush1.bf16.msra.mxu1 %v8681_v52  ;;  %v324_v35 = vld [vmem:[#allocation6 + $0x768] sm:$0xff]  ;;  %v8759_v52 = vcombine.low %v299_v9, %v307_v57  ;;  %v379_v57 = vld [vmem:[#allocation6 + $0x920] sm:$0xff] }
 0x26c   :  { %3925 = vmatprep.subr.bf16.mxu0 %v8696_v28  ;;  %4071 = vmatprep.subr.bf16.mxu1 %v8698_v60  ;;  %v8761_v28 = vcombine.low %v300_v20, %v308_v4  ;;  %v8776_v60 = vcombine.high %v315_v49, %v323_v47  ;;  %v8778_v54 = vcombine.high %v316_v12, %v324_v35  ;;  %v387_v20 = vld [vmem:[#allocation6 + $0x960] sm:$0xff]  ;;  %v380_v4 = vld [vmem:[#allocation6 + $0x928] sm:$0xff] }
 0x26f   :  { %3926 = vmatpush1.bf16.msra.mxu0 %v8695_v55  ;;  %4072 = vmatpush1.bf16.msra.mxu1 %v8697_v34  ;;  %v340_v55 = vld [vmem:[#allocation6 + $0x7e8] sm:$0xff]  ;;  %v8775_v34 = vcombine.low %v315_v49, %v323_v47  ;;  %v8840_v49 = vcombine.high %v379_v57, %v387_v20 }
 0x270   :  { %3927 = vmatprep.subr.bf16.mxu0 %v8712_v27  ;;  %4073 = vmatprep.subr.bf16.mxu1 %v8714_v11  ;;  %v8777_v27 = vcombine.low %v316_v12, %v324_v35  ;;  %v8792_v11 = vcombine.high %v331_v43, %v339_v21  ;;  %v8794_v5 = vcombine.high %v332_v59, %v340_v55  ;;  %v395_v12 = vld [vmem:[#allocation6 + $0x9a0] sm:$0xff] }
 0x271   :  { %v403_v35 = vld [vmem:[#allocation6 + $0x9e0] sm:$0xff] }
 0x273   :  { %3928 = vmatpush1.bf16.msra.mxu0 %v8711_v37  ;;  %4074 = vmatpush1.bf16.msra.mxu1 %v8713_v14  ;;  %v356_v37 = vld [vmem:[#allocation6 + $0x868] sm:$0xff]  ;;  %v8791_v14 = vcombine.low %v331_v43, %v339_v21  ;;  %v8839_v43 = vcombine.low %v379_v57, %v387_v20  ;;  %v599_v57 = vld [vmem:[#allocation9] sm:$0xff] }
 0x274   :  { %3929 = vmatprep.subr.bf16.mxu0 %v8728_v23  ;;  %4075 = vmatprep.subr.bf16.mxu1 %v8730_v53  ;;  %v8793_v23 = vcombine.low %v332_v59, %v340_v55  ;;  %v8808_v53 = vcombine.high %v347_v33, %v355_v25  ;;  %v8810_v17 = vcombine.high %v348_v19, %v356_v37 }
 0x275   :  { %v8856_v59 = vcombine.high %v395_v12, %v403_v35 }
 0x277   :  { %3930 = vmatpush1.bf16.msra.mxu0 %v8727_v41  ;;  %4076 = vmatpush1.bf16.msra.mxu1 %v8729_v62  ;;  %v372_v41 = vld [vmem:[#allocation6 + $0x8e8] sm:$0xff]  ;;  %v8807_v62 = vcombine.low %v347_v33, %v355_v25  ;;  %v9935_v25 = vld [vmem:[#allocation3 + $0x20] ss:$16 sps:$4 sm:$0xff]  }
 0x278   :  { %3931 = vmatprep.subr.bf16.mxu0 %v8744_v1  ;;  %4077 = vmatprep.subr.bf16.mxu1 %v8746_v22  ;;  %v8809_v1 = vcombine.low %v348_v19, %v356_v37  ;;  %v8824_v22 = vcombine.high %v363_v6, %v371_v18  ;;  %v8826_v9 = vcombine.high %v364_v31, %v372_v41 }
 0x279   :  { %v8855_v19 = vcombine.low %v395_v12, %v403_v35 }
 0x27b   :  { %3932 = vmatpush1.bf16.msra.mxu0 %v8743_v46  ;;  %4078 = vmatpush1.bf16.msra.mxu1 %v8745_v50  ;;  %v388_v46 = vld [vmem:[#allocation6 + $0x968] sm:$0xff]  ;;  %v9933_v50 = vld [vmem:[#allocation3] ss:$16 sps:$4 sm:$0xff]  }
 0x27c   :  { %3933 = vmatprep.subr.bf16.mxu0 %v8760_v3  ;;  %4079 = vmatprep.subr.bf16.mxu1 %v8762_v51  ;;  %v8823_v3 = vcombine.low %v363_v6, %v371_v18  ;;  %v8825_v51 = vcombine.low %v364_v31, %v372_v41  ;;  %v8842_v47 = vcombine.high %v380_v4, %v388_v46  ;;  %v428_v6 = vld [vmem:[#allocation6 + $0xaa8] sm:$0xff]  ;;  %v9936_v31 = vld [vmem:[#allocation3 + $0x44] ss:$16 sps:$4 sm:$0xff]  }
 0x27d   :  { %v8841_v21 = vcombine.low %v380_v4, %v388_v46  ;;  %v436_v18 = vld [vmem:[#allocation6 + $0xae8] sm:$0xff] }
 0x27e   :  { %v8890_v46 = vcombine.high %v428_v6, %v436_v18 }
 0x27f   :  { %3934 = vmatpush1.bf16.msra.mxu0 %v8759_v52  ;;  %4080 = vmatpush1.bf16.msra.mxu1 %v8761_v28  ;;  %v396_v52 = vld [vmem:[#allocation6 + $0x9a8] sm:$0xff] }
 0x280   :  { %3935 = vmatprep.subr.bf16.mxu0 %v8776_v60  ;;  %4081 = vmatprep.subr.bf16.mxu1 %v8778_v54  ;;  %v404_v28 = vld [vmem:[#allocation6 + $0x9e8] sm:$0xff]  ;;  %v9934_v60 = vld [vmem:[#allocation3 + $0x24] ss:$16 sps:$4 sm:$0xff]   ;;  %v603_v54 = vlaneseq }
 0x281   :  { %v8858_v55 = vcombine.high %v396_v52, %v404_v28  ;;  %v8857_v37 = vcombine.low %v396_v52, %v404_v28  ;;  %v9937_v52 = vld [vmem:[#allocation3 + $0x40] ss:$16 sps:$4 sm:$0xff]  }
 0x282   :  { %v11396_v33 = vshrl.u32 %v603_v54, 7  ;;  %v8889_v54 = vcombine.low %v428_v6, %v436_v18 }
 0x283   :  { %3936 = vmatpush1.bf16.msra.mxu0 %v8775_v34  ;;  %4082 = vmatpush1.bf16.msra.mxu1 %v8777_v27  ;;  %v411_v34 = vld [vmem:[#allocation6 + $0xa20] sm:$0xff] }
 0x284   :  { %3937 = vmatprep.subr.bf16.mxu0 %v8792_v11  ;;  %4083 = vmatprep.subr.bf16.mxu1 %v8794_v5  ;;  %v419_v27 = vld [vmem:[#allocation6 + $0xa60] sm:$0xff]  ;;  %v412_v11 = vld [vmem:[#allocation6 + $0xa28] sm:$0xff]  ;;  %v13468_v41 = vsub.s32 0, %v11396_v33  ;;  %v13465_v20 = vsub.s32 3, %v11396_v33 }
 0x285   :  { %v420_v5 = vld [vmem:[#allocation6 + $0xa68] sm:$0xff] }
 0x286   :  { %v11424_v28 = vrot.slane %v599_v57, %v13465_v20 }
 0x287   :  { %3938 = vmatpush1.bf16.msra.mxu0 %v8791_v14  ;;  %4084 = vmatpush1.bf16.msra.mxu1 %v8793_v23  ;;  %v8872_v14 = vcombine.high %v411_v34, %v419_v27  ;;  %v8874_v23 = vcombine.high %v412_v11, %v420_v5 }
 0x288   :  { %3980 = vmatprep.subr.bf16.mxu0 %v8808_v53  ;;  %4126 = vmatprep.subr.bf16.mxu1 %v8810_v17  ;;  %v427_v53 = vld [vmem:[#allocation6 + $0xaa0] sm:$0xff] }
 0x289   :  { %v435_v17 = vld [vmem:[#allocation6 + $0xae0] sm:$0xff] }
 0x28a   :  { %3940 = vmatmul.mubr.bf16.vlgmr.msra.gmra.mrb[32].mxu0 %v9933_v50  ;;  %4086 = vmatmul.mubr.bf16.vlgmr.msra.gmra.mrb[32].mxu1 %v9933_v50  ;;  %v8888_v4 = vcombine.high %v427_v53, %v435_v17  ;;  %v11402_v50 = vld [vmem:[#allocation6 + $0xb20] sm:$0xff] }
 0x28b   :  { %3981 = vmatpush1.bf16.msra.mxu0 %v8807_v62  ;;  %4127 = vmatpush1.bf16.msra.mxu1 %v8809_v1  ;;  %v13467_v62 = vsub.s32 2, %v11396_v33  ;;  %v13466_v1 = vsub.s32 1, %v11396_v33 }
 0x28c   :  { %3982 = vmatprep.subr.bf16.mxu0 %v8824_v22  ;;  %4128 = vmatprep.subr.bf16.mxu1 %v8826_v9  ;;  %v8871_v22 = vcombine.low %v411_v34, %v419_v27  ;;  %v8873_v9 = vcombine.low %v412_v11, %v420_v5  ;;  %v11434_v11 = vld [vmem:[#allocation6 + $0xba8] sm:$0xff] }
 0x28d   :  { %3949 = vmatprep.mubr.bf16.mxu0 %v9934_v60  ;;  %4095 = vmatprep.mubr.bf16.mxu1 %v9934_v60  ;;  %v11416_v12 = vrot.slane %v599_v57, %v13467_v62  ;;  %v11420_v35 = vrot.slane %v599_v57, %v13466_v1  ;;  %v8887_v60 = vcombine.low %v427_v53, %v435_v17  ;;  %v11436_v5 = vld [vmem:[#allocation6 + $0xbe8] sm:$0xff] }
 0x28f   :  { %3983 = vmatpush1.bf16.msra.mxu0 %v8823_v3  ;;  %4129 = vmatpush1.bf16.msra.mxu1 %v8825_v51  ;;  %v11404_v3 = vld [vmem:[#allocation6 + $0xb60] sm:$0xff]  ;;  %v11406_v51 = vld [vmem:[#allocation6 + $0xb28] sm:$0xff] }
 0x290   :  { %3984 = vmatprep.subr.bf16.mxu0 %v8840_v49  ;;  %4130 = vmatprep.subr.bf16.mxu1 %v8842_v47  ;;  %v11408_v49 = vld [vmem:[#allocation6 + $0xb68] sm:$0xff]  ;;  %v11412_v47 = vrot.slane %v599_v57, %v13468_v41  ;;  %v8903_v53 = vcombine.low %v11402_v50, %v11404_v3 }
 0x291   :  { %v8905_v17 = vcombine.low %v11406_v51, %v11408_v49 }
 0x292   :  { %3950 = vmatmul.mubr.bf16.gmra.mrb[36].mxu0 %v9935_v25  ;;  %4096 = vmatmul.mubr.bf16.gmra.mrb[36].mxu1 %v9935_v25  ;;  %v9938_v25 = vld [vmem:[#allocation3 + $0x64] ss:$16 sps:$4 sm:$0xff]  }
 0x293   :  { %3985 = vmatpush1.bf16.msra.mxu0 %v8839_v43  ;;  %4131 = vmatpush1.bf16.msra.mxu1 %v8841_v21  ;;  %v8904_v43 = vcombine.high %v11402_v50, %v11404_v3  ;;  %v8906_v21 = vcombine.high %v11406_v51, %v11408_v49  ;;  %v8922_v3 = vcombine.high %v11434_v11, %v11436_v5  ;;  %v11452_v51 = vld [vmem:[#allocation6 + $0xc20] sm:$0xff] }
 0x294   :  { %3986 = vmatprep.subr.bf16.mxu0 %v8856_v59  ;;  %4132 = vmatprep.subr.bf16.mxu1 %v8858_v55  ;;  %v11430_v59 = vld [vmem:[#allocation6 + $0xba0] sm:$0xff] }
 0x295   :  { %3959 = vmatprep.mubr.bf16.mxu0 %v9936_v31  ;;  %4105 = vmatprep.mubr.bf16.mxu1 %v9936_v31  ;;  %v11432_v55 = vld [vmem:[#allocation6 + $0xbe0] sm:$0xff] }
 0x297   :  { %3987 = vmatpush1.bf16.msra.mxu0 %v8855_v19  ;;  %4133 = vmatpush1.bf16.msra.mxu1 %v8857_v37 }
 0x298   :  { %3988 = vmatprep.subr.bf16.mxu0 %v8872_v14  ;;  %4134 = vmatprep.subr.bf16.mxu1 %v8874_v23 }
 0x29a   :  { %3960 = vmatmul.mubr.bf16.gmra.mrb[40].mxu0 %v9937_v52  ;;  %4106 = vmatmul.mubr.bf16.gmra.mrb[40].mxu1 %v9937_v52 }
 0x29b   :  { %3989 = vmatpush1.bf16.msra.mxu0 %v8871_v22  ;;  %4135 = vmatpush1.bf16.msra.mxu1 %v8873_v9  ;;  %v8920_v9 = vcombine.high %v11430_v59, %v11432_v55 }
 0x29c   :  { %3990 = vmatprep.subr.bf16.mxu0 %v8888_v4  ;;  %4136 = vmatprep.subr.bf16.mxu1 %v8890_v46 }
 0x29d   :  { %v3430_v34 = vpop.f32.mrb[0].mxu0  ;;  %v3576_v27 = vpop.f32.mrb[0].mxu1  ;;  %3969 = vmatprep.mubr.bf16.mxu0 %v9938_v25  ;;  %4115 = vmatprep.mubr.bf16.mxu1 %v9938_v25 }
 0x29e   :  { %v9571_v19 = vadd.f32 %v3430_v34, %v11412_v47  ;;  %v9587_v37 = vadd.f32 %v3576_v27, %v11416_v12  ;;  %v3432_v14 = vpop.f32.mrb[1].mxu0  ;;  %v3578_v23 = vpop.f32.mrb[1].mxu1  ;;  %v484_v34 = vld [vmem:[#allocation6 + $0xc68] sm:$0xff]  ;;  %v9939_v27 = vld [vmem:[#allocation3 + $0x60] ss:$16 sps:$4 sm:$0xff]  }
 0x29f   :  { %v9572_v6 = vadd.f32 %v3432_v14, %v11420_v35  ;;  %v9588_v18 = vadd.f32 %v3578_v23, %v11424_v28  ;;  %v3434_v31 = vpop.f32.mrb[2].mxu0  ;;  %v3580_v22 = vpop.f32.mrb[2].mxu1  ;;  %3991 = vmatpush1.bf16.msra.mxu0 %v8887_v60  ;;  %4137 = vmatpush1.bf16.msra.mxu1 %v8889_v54  ;;  %v483_v60 = vld [vmem:[#allocation6 + $0xc60] sm:$0xff]  ;;  %v476_v54 = vld [vmem:[#allocation6 + $0xc28] sm:$0xff] }
 0x2a0   :  { %4491 = vst [vmem:[#allocation2] sm:$0xff] %v9571_v19  ;;  %4493 = vst [vmem:[#allocation2 + $0x10] sm:$0xff] %v9587_v37  ;;  %v9573_v57 = vadd.f32 %v3434_v31, %v11412_v47  ;;  %v9589_v4 = vadd.f32 %v3580_v22, %v11416_v12  ;;  %v3436_v46 = vpop.f32.mrb[3].mxu0  ;;  %v3582_v50 = vpop.f32.mrb[3].mxu1  ;;  %3992 = vmatprep.subr.bf16.mxu0 %v8904_v43  ;;  %4138 = vmatprep.subr.bf16.mxu1 %v8906_v21  ;;  %v11461_v37 = vld [vmem:[#allocation6 + $0xca0] sm:$0xff] }
 0x2a1   :  { %4492 = vst [vmem:[#allocation2 + $0x8] sm:$0xff] %v9572_v6  ;;  %4494 = vst [vmem:[#allocation2 + $0x18] sm:$0xff] %v9588_v18  ;;  %v9574_v49 = vadd.f32 %v3436_v46, %v11420_v35  ;;  %v9590_v52 = vadd.f32 %v3582_v50, %v11424_v28  ;;  %v8919_v43 = vcombine.low %v11430_v59, %v11432_v55  ;;  %v11463_v14 = vld [vmem:[#allocation6 + $0xce0] sm:$0xff]  ;;  %v11465_v18 = vld [vmem:[#allocation6 + $0xca8] sm:$0xff] }
 0x2a2   :  { %4507 = vst [vmem:[#allocation2 + $0x80] sm:$0xff] %v9573_v57  ;;  %4509 = vst [vmem:[#allocation2 + $0x90] sm:$0xff] %v9589_v4  ;;  %3970 = vmatmul.mubr.bf16.gmra.mrb[44].mxu0 %v9939_v27  ;;  %4116 = vmatmul.mubr.bf16.gmra.mrb[44].mxu1 %v9939_v27  ;;  %v8921_v21 = vcombine.low %v11434_v11, %v11436_v5  ;;  %v8936_v25 = vcombine.high %v11452_v51, %v483_v60 }
 0x2a3   :  { %4508 = vst [vmem:[#allocation2 + $0x88] sm:$0xff] %v9574_v49  ;;  %4510 = vst [vmem:[#allocation2 + $0x98] sm:$0xff] %v9590_v52  ;;  %3993 = vmatpush1.bf16.msra.mxu0 %v8903_v53  ;;  %4139 = vmatpush1.bf16.msra.mxu1 %v8905_v17  ;;  %v8938_v19 = vcombine.high %v476_v54, %v484_v34  ;;  %v11467_v53 = vld [vmem:[#allocation6 + $0xce8] sm:$0xff]  ;;  %v8935_v31 = vcombine.low %v11452_v51, %v483_v60 }
 0x2a4   :  { %3994 = vmatprep.subr.bf16.mxu0 %v8920_v9  ;;  %4140 = vmatprep.subr.bf16.mxu1 %v8922_v3  ;;  %v9940_v17 = vld [vmem:[#allocation3 + $0xc] ss:$16 sps:$4 sm:$0xff]   ;;  %v8937_v22 = vcombine.low %v476_v54, %v484_v34  ;;  %v8952_v50 = vcombine.high %v11461_v37, %v11463_v14  ;;  %v8954_v60 = vcombine.high %v11465_v18, %v11467_v53  ;;  %v507_v54 = vld [vmem:[#allocation6 + $0xd20] sm:$0xff] }
 0x2a5   :  { %v3440_v23 = vpop.f32.mrb[4].mxu0  ;;  %v3586_v6 = vpop.f32.mrb[4].mxu1  ;;  %4012 = vmatprep.mubr.bf16.mxu0 %v9940_v17  ;;  %4158 = vmatprep.mubr.bf16.mxu1 %v9940_v17 }
 0x2a6   :  { %v9575_v59 = vadd.f32 %v3440_v23, %v11412_v47  ;;  %v9591_v55 = vadd.f32 %v3586_v6, %v11416_v12  ;;  %v3442_v11 = vpop.f32.mrb[5].mxu0  ;;  %v3588_v5 = vpop.f32.mrb[5].mxu1  ;;  %v516_v23 = vld [vmem:[#allocation6 + $0xd68] sm:$0xff] }
 0x2a7   :  { %v9576_v9 = vadd.f32 %v3442_v11, %v11420_v35  ;;  %v9592_v57 = vadd.f32 %v3588_v5, %v11424_v28  ;;  %v3444_v4 = vpop.f32.mrb[6].mxu0  ;;  %v3590_v46 = vpop.f32.mrb[6].mxu1  ;;  %3995 = vmatpush1.bf16.msra.mxu0 %v8919_v43  ;;  %4141 = vmatpush1.bf16.msra.mxu1 %v8921_v21  ;;  %v515_v43 = vld [vmem:[#allocation6 + $0xd60] sm:$0xff]  ;;  %v508_v21 = vld [vmem:[#allocation6 + $0xd28] sm:$0xff] }
 0x2a8   :  { %4523 = vst [vmem:[#allocation2 + $0x100] sm:$0xff] %v9575_v59  ;;  %4525 = vst [vmem:[#allocation2 + $0x110] sm:$0xff] %v9591_v55  ;;  %v9577_v3 = vadd.f32 %v3444_v4, %v11412_v47  ;;  %v9593_v49 = vadd.f32 %v3590_v46, %v11416_v12  ;;  %v3446_v52 = vpop.f32.mrb[7].mxu0  ;;  %v3592_v51 = vpop.f32.mrb[7].mxu1  ;;  %3996 = vmatprep.subr.bf16.mxu0 %v8936_v25  ;;  %4142 = vmatprep.subr.bf16.mxu1 %v8938_v19  ;;  %v11486_v59 = vld [vmem:[#allocation6 + $0xda0] sm:$0xff] }
 0x2a9   :  { %4524 = vst [vmem:[#allocation2 + $0x108] sm:$0xff] %v9576_v9  ;;  %4526 = vst [vmem:[#allocation2 + $0x118] sm:$0xff] %v9592_v57  ;;  %v9578_v34 = vadd.f32 %v3446_v52, %v11420_v35  ;;  %v9594_v27 = vadd.f32 %v3592_v51, %v11424_v28  ;;  %v8951_v25 = vcombine.low %v11461_v37, %v11463_v14  ;;  %v11488_v55 = vld [vmem:[#allocation6 + $0xde0] sm:$0xff]  ;;  %v524_v9 = vld [vmem:[#allocation6 + $0xda8] sm:$0xff] }
 0x2aa   :  { %4539 = vst [vmem:[#allocation2 + $0x180] sm:$0xff] %v9577_v3  ;;  %4541 = vst [vmem:[#allocation2 + $0x190] sm:$0xff] %v9593_v49  ;;  %v8953_v19 = vcombine.low %v11465_v18, %v11467_v53  ;;  %v8968_v6 = vcombine.high %v507_v54, %v515_v43  ;;  %v8970_v17 = vcombine.high %v508_v21, %v516_v23  ;;  %v532_v57 = vld [vmem:[#allocation6 + $0xde8] sm:$0xff] }
 0x2ab   :  { %4540 = vst [vmem:[#allocation2 + $0x188] sm:$0xff] %v9578_v34  ;;  %4542 = vst [vmem:[#allocation2 + $0x198] sm:$0xff] %v9594_v27  ;;  %3997 = vmatpush1.bf16.msra.mxu0 %v8935_v31  ;;  %4143 = vmatpush1.bf16.msra.mxu1 %v8937_v22  ;;  %v8967_v4 = vcombine.low %v507_v54, %v515_v43  ;;  %v8969_v18 = vcombine.low %v508_v21, %v516_v23  ;;  %v539_v27 = vld [vmem:[#allocation6 + $0xe20] sm:$0xff] }
 0x2ac   :  { %3998 = vmatprep.subr.bf16.mxu0 %v8952_v50  ;;  %4144 = vmatprep.subr.bf16.mxu1 %v8954_v60  ;;  %v8984_v49 = vcombine.high %v11486_v59, %v11488_v55  ;;  %v8986_v34 = vcombine.high %v524_v9, %v532_v57  ;;  %v547_v23 = vld [vmem:[#allocation6 + $0xe60] sm:$0xff] }
 0x2ad   :  { %v3450_v11 = vpop.f32.mrb[8].mxu0  ;;  %v3596_v5 = vpop.f32.mrb[8].mxu1 }
 0x2ae   :  { %v9579_v31 = vadd.f32 %v3450_v11, %v11412_v47  ;;  %v9595_v22 = vadd.f32 %v3596_v5, %v11416_v12  ;;  %v3452_v37 = vpop.f32.mrb[9].mxu0  ;;  %v3598_v14 = vpop.f32.mrb[9].mxu1  ;;  %v9000_v11 = vcombine.high %v539_v27, %v547_v23 }
 0x2af   :  { %v9580_v53 = vadd.f32 %v3452_v37, %v11420_v35  ;;  %v9596_v46 = vadd.f32 %v3598_v14, %v11424_v28  ;;  %v3454_v50 = vpop.f32.mrb[10].mxu0  ;;  %v3600_v3 = vpop.f32.mrb[10].mxu1  ;;  %3999 = vmatpush1.bf16.msra.mxu0 %v8951_v25  ;;  %4145 = vmatpush1.bf16.msra.mxu1 %v8953_v19  ;;  %v540_v25 = vld [vmem:[#allocation6 + $0xe28] sm:$0xff] }
 0x2b0   :  { %4555 = vst [vmem:[#allocation2 + $0x200] sm:$0xff] %v9579_v31  ;;  %4557 = vst [vmem:[#allocation2 + $0x210] sm:$0xff] %v9595_v22  ;;  %v9581_v52 = vadd.f32 %v3454_v50, %v11412_v47  ;;  %v9597_v51 = vadd.f32 %v3600_v3, %v11416_v12  ;;  %v3456_v60 = vpop.f32.mrb[11].mxu0  ;;  %v3602_v54 = vpop.f32.mrb[11].mxu1  ;;  %4000 = vmatprep.subr.bf16.mxu0 %v8968_v6  ;;  %4146 = vmatprep.subr.bf16.mxu1 %v8970_v17  ;;  %v548_v19 = vld [vmem:[#allocation6 + $0xe68] sm:$0xff]  ;;  %v555_v31 = vld [vmem:[#allocation6 + $0xea0] sm:$0xff] }
 0x2b1   :  { %4556 = vst [vmem:[#allocation2 + $0x208] sm:$0xff] %v9580_v53  ;;  %4558 = vst [vmem:[#allocation2 + $0x218] sm:$0xff] %v9596_v46  ;;  %v9582_v43 = vadd.f32 %v3456_v60, %v11420_v35  ;;  %v9598_v21 = vadd.f32 %v3602_v54, %v11424_v28  ;;  %v8983_v6 = vcombine.low %v11486_v59, %v11488_v55  ;;  %v563_v22 = vld [vmem:[#allocation6 + $0xee0] sm:$0xff]  ;;  %v556_v53 = vld [vmem:[#allocation6 + $0xea8] sm:$0xff] }
 0x2b2   :  { %4571 = vst [vmem:[#allocation2 + $0x280] sm:$0xff] %v9581_v52  ;;  %4573 = vst [vmem:[#allocation2 + $0x290] sm:$0xff] %v9597_v51  ;;  %v8985_v17 = vcombine.low %v524_v9, %v532_v57  ;;  %v9002_v5 = vcombine.high %v540_v25, %v548_v19  ;;  %v564_v46 = vld [vmem:[#allocation6 + $0xee8] sm:$0xff]  ;;  %v8999_v52 = vcombine.low %v539_v27, %v547_v23 }
 0x2b3   :  { %4572 = vst [vmem:[#allocation2 + $0x288] sm:$0xff] %v9582_v43  ;;  %4574 = vst [vmem:[#allocation2 + $0x298] sm:$0xff] %v9598_v21  ;;  %4001 = vmatpush1.bf16.msra.mxu0 %v8967_v4  ;;  %4147 = vmatpush1.bf16.msra.mxu1 %v8969_v18  ;;  %v9001_v51 = vcombine.low %v540_v25, %v548_v19  ;;  %v9018_v27 = vcombine.high %v556_v53, %v564_v46  ;;  %v571_v21 = vld [vmem:[#allocation6 + $0xf20] sm:$0xff] }
 0x2b4   :  { %4002 = vmatprep.subr.bf16.mxu0 %v8984_v49  ;;  %4148 = vmatprep.subr.bf16.mxu1 %v8986_v34  ;;  %v9016_v49 = vcombine.high %v555_v31, %v563_v22  ;;  %v579_v19 = vld [vmem:[#allocation6 + $0xf60] sm:$0xff] }
 0x2b5   :  { %v3460_v37 = vpop.f32.mrb[12].mxu0  ;;  %v3606_v14 = vpop.f32.mrb[12].mxu1 }
 0x2b6   :  { %v9583_v50 = vadd.f32 %v3460_v37, %v11412_v47  ;;  %v9599_v3 = vadd.f32 %v3606_v14, %v11416_v12  ;;  %v3462_v4 = vpop.f32.mrb[13].mxu0  ;;  %v3608_v18 = vpop.f32.mrb[13].mxu1  ;;  %v587_v37 = vld [vmem:[#allocation6 + $0xfa0] sm:$0xff] }
 0x2b7   :  { %v9584_v59 = vadd.f32 %v3462_v4, %v11420_v35  ;;  %v9600_v55 = vadd.f32 %v3608_v18, %v11424_v28  ;;  %v3464_v9 = vpop.f32.mrb[14].mxu0  ;;  %v3610_v57 = vpop.f32.mrb[14].mxu1  ;;  %4003 = vmatpush1.bf16.msra.mxu0 %v8983_v6  ;;  %4149 = vmatpush1.bf16.msra.mxu1 %v8985_v17  ;;  %v572_v6 = vld [vmem:[#allocation6 + $0xf28] sm:$0xff]  ;;  %v595_v14 = vld [vmem:[#allocation6 + $0xfe0] sm:$0xff] }
 0x2b8   :  { %4587 = vst [vmem:[#allocation2 + $0x300] sm:$0xff] %v9583_v50  ;;  %4589 = vst [vmem:[#allocation2 + $0x310] sm:$0xff] %v9599_v3  ;;  %v9585_v60 = vadd.f32 %v3464_v9, %v11412_v47  ;;  %v9601_v54 = vadd.f32 %v3610_v57, %v11416_v12  ;;  %v3466_v34 = vpop.f32.mrb[15].mxu0  ;;  %v3612_v43 = vpop.f32.mrb[15].mxu1  ;;  %4004 = vmatprep.subr.bf16.mxu0 %v9000_v11  ;;  %4150 = vmatprep.subr.bf16.mxu1 %v9002_v5  ;;  %v580_v17 = vld [vmem:[#allocation6 + $0xf68] sm:$0xff]  ;;  %v109_v9 = vld [vmem:[#allocation6 + $0xb0] sm:$0xff] }
 0x2b9   :  { %4588 = vst [vmem:[#allocation2 + $0x308] sm:$0xff] %v9584_v59  ;;  %4590 = vst [vmem:[#allocation2 + $0x318] sm:$0xff] %v9600_v55  ;;  %v9586_v23 = vadd.f32 %v3466_v34, %v11420_v35  ;;  %v9602_v25 = vadd.f32 %v3612_v43, %v11424_v28  ;;  %v9015_v47 = vcombine.low %v555_v31, %v563_v22  ;;  %v588_v35 = vld [vmem:[#allocation6 + $0xfa8] sm:$0xff]  ;;  %v94_v31 = vld [vmem:[#allocation6 + $0x38] sm:$0xff] }
 0x2ba   :  { %4603 = vst [vmem:[#allocation2 + $0x380] sm:$0xff] %v9585_v60  ;;  %4605 = vst [vmem:[#allocation2 + $0x390] sm:$0xff] %v9601_v54  ;;  %v9017_v12 = vcombine.low %v556_v53, %v564_v46  ;;  %v9032_v11 = vcombine.high %v571_v21, %v579_v19  ;;  %v9034_v5 = vcombine.high %v572_v6, %v580_v17  ;;  %v596_v50 = vld [vmem:[#allocation6 + $0xfe8] sm:$0xff]  ;;  %v102_v22 = vld [vmem:[#allocation6 + $0x78] sm:$0xff] }
 0x2bb   :  { %4604 = vst [vmem:[#allocation2 + $0x388] sm:$0xff] %v9586_v23  ;;  %4606 = vst [vmem:[#allocation2 + $0x398] sm:$0xff] %v9602_v25  ;;  %4005 = vmatpush1.bf16.msra.mxu0 %v8999_v52  ;;  %4151 = vmatpush1.bf16.msra.mxu1 %v9001_v51  ;;  %v9031_v28 = vcombine.low %v571_v21, %v579_v19  ;;  %v9033_v3 = vcombine.low %v572_v6, %v580_v17  ;;  %v93_v52 = vld [vmem:[#allocation6 + $0x30] sm:$0xff]  ;;  %v118_v60 = vld [vmem:[#allocation6 + $0xf8] sm:$0xff] }
 0x2bc   :  { %4006 = vmatprep.subr.bf16.mxu0 %v9016_v49  ;;  %4152 = vmatprep.subr.bf16.mxu1 %v9018_v27  ;;  %v9048_v4 = vcombine.high %v587_v37, %v595_v14  ;;  %v9050_v18 = vcombine.high %v588_v35, %v596_v50  ;;  %v101_v51 = vld [vmem:[#allocation6 + $0x70] sm:$0xff]  ;;  %v9047_v53 = vcombine.low %v587_v37, %v595_v14  ;;  %v110_v49 = vld [vmem:[#allocation6 + $0xb8] sm:$0xff] }
 0x2bd   :  { %v9049_v46 = vcombine.low %v588_v35, %v596_v50  ;;  %v8556_v59 = vcombine.high %v93_v52, %v101_v51  ;;  %v8558_v55 = vcombine.high %v94_v31, %v102_v22  ;;  %v117_v57 = vld [vmem:[#allocation6 + $0xf0] sm:$0xff]  ;;  %v8555_v54 = vcombine.low %v93_v52, %v101_v51  ;;  %v126_v25 = vld [vmem:[#allocation6 + $0x138] sm:$0xff] }
 0x2be   :  { %v8557_v34 = vcombine.low %v94_v31, %v102_v22  ;;  %v8572_v43 = vcombine.high %v109_v9, %v117_v57  ;;  %v8574_v27 = vcombine.high %v110_v49, %v118_v60  ;;  %v125_v21 = vld [vmem:[#allocation6 + $0x130] sm:$0xff]  ;;  %v134_v19 = vld [vmem:[#allocation6 + $0x178] sm:$0xff]  ;;  %v8571_v17 = vcombine.low %v109_v9, %v117_v57 }
 0x2bf   :  { %4007 = vmatpush1.bf16.msra.mxu0 %v9015_v47  ;;  %4153 = vmatpush1.bf16.msra.mxu1 %v9017_v12  ;;  %v133_v23 = vld [vmem:[#allocation6 + $0x170] sm:$0xff]  ;;  %v11510_v6 = vld [vmem:[#allocation3 + $0x8] ss:$16 sps:$4 sm:$0xff]   ;;  %v8573_v47 = vcombine.low %v110_v49, %v118_v60  ;;  %v11514_v37 = vld [vmem:[#allocation3 + $0x2c] ss:$16 sps:$4 sm:$0xff]  }
 0x2c0   :  { %4008 = vmatprep.subr.bf16.mxu0 %v9032_v11  ;;  %4154 = vmatprep.subr.bf16.mxu1 %v9034_v5  ;;  %v8588_v12 = vcombine.high %v125_v21, %v133_v23  ;;  %v8590_v11 = vcombine.high %v126_v25, %v134_v19  ;;  %v141_v5 = vld [vmem:[#allocation6 + $0x1b0] sm:$0xff]  ;;  %v142_v35 = vld [vmem:[#allocation6 + $0x1b8] sm:$0xff] }
 0x2c1   :  { %v149_v14 = vld [vmem:[#allocation6 + $0x1f0] sm:$0xff]  ;;  %v150_v50 = vld [vmem:[#allocation6 + $0x1f8] sm:$0xff] }
 0x2c2   :  { %v157_v52 = vld [vmem:[#allocation6 + $0x230] sm:$0xff]  ;;  %v158_v31 = vld [vmem:[#allocation6 + $0x238] sm:$0xff] }
 0x2c3   :  { %4009 = vmatpush1.bf16.msra.mxu0 %v9031_v28  ;;  %4155 = vmatpush1.bf16.msra.mxu1 %v9033_v3  ;;  %v8587_v28 = vcombine.low %v125_v21, %v133_v23  ;;  %v8589_v3 = vcombine.low %v126_v25, %v134_v19  ;;  %v165_v51 = vld [vmem:[#allocation6 + $0x270] sm:$0xff]  ;;  %v166_v22 = vld [vmem:[#allocation6 + $0x278] sm:$0xff] }
 0x2c4   :  { %4010 = vmatprep.subr.bf16.mxu0 %v9048_v4  ;;  %4156 = vmatprep.subr.bf16.mxu1 %v9050_v18  ;;  %v8604_v4 = vcombine.high %v141_v5, %v149_v14  ;;  %v8606_v18 = vcombine.high %v142_v35, %v150_v50  ;;  %v8622_v9 = vcombine.high %v158_v31, %v166_v22  ;;  %v173_v57 = vld [vmem:[#allocation6 + $0x2b0] sm:$0xff]  ;;  %v11522_v49 = vld [vmem:[#allocation3 + $0x4c] ss:$16 sps:$4 sm:$0xff]  }
 0x2c5   :  { %v181_v60 = vld [vmem:[#allocation6 + $0x2f0] sm:$0xff] }
 0x2c6   :  { %v8636_v21 = vcombine.high %v173_v57, %v181_v60  ;;  %v189_v25 = vld [vmem:[#allocation6 + $0x330] sm:$0xff] }
 0x2c7   :  { %4011 = vmatpush1.bf16.msra.mxu0 %v9047_v53  ;;  %4157 = vmatpush1.bf16.msra.mxu1 %v9049_v46  ;;  %v11518_v53 = vld [vmem:[#allocation3 + $0x28] ss:$16 sps:$4 sm:$0xff]   ;;  %v8603_v46 = vcombine.low %v141_v5, %v149_v14  ;;  %v197_v19 = vld [vmem:[#allocation6 + $0x370] sm:$0xff] }
 0x2c8   :  { %4199 = vmatprep.subr.bf16.mxu0 %v8556_v59  ;;  %4345 = vmatprep.subr.bf16.mxu1 %v8558_v55  ;;  %v8605_v59 = vcombine.low %v142_v35, %v150_v50  ;;  %v8620_v55 = vcombine.high %v157_v52, %v165_v51  ;;  %v8652_v14 = vcombine.high %v189_v25, %v197_v19  ;;  %v205_v50 = vld [vmem:[#allocation6 + $0x3b0] sm:$0xff] }
 0x2ca   :  { %4013 = vmatmul.mubr.bf16.vlgmr.msra.gmra.mrb[32].mxu0 %v11510_v6  ;;  %4159 = vmatmul.mubr.bf16.vlgmr.msra.gmra.mrb[32].mxu1 %v11510_v6 }
 0x2cb   :  { %4200 = vmatpush1.bf16.msra.mxu0 %v8555_v54  ;;  %4346 = vmatpush1.bf16.msra.mxu1 %v8557_v34  ;;  %v174_v54 = vld [vmem:[#allocation6 + $0x2b8] sm:$0xff] }
 0x2cc   :  { %4201 = vmatprep.subr.bf16.mxu0 %v8572_v43  ;;  %4347 = vmatprep.subr.bf16.mxu1 %v8574_v27  ;;  %v182_v34 = vld [vmem:[#allocation6 + $0x2f8] sm:$0xff]  ;;  %v8619_v43 = vcombine.low %v157_v52, %v165_v51  ;;  %v8621_v27 = vcombine.low %v158_v31, %v166_v22  ;;  %v8651_v52 = vcombine.low %v189_v25, %v197_v19  ;;  %v9948_v19 = vld [vmem:[#allocation3 + $0x4] ss:$16 sps:$4 sm:$0xff]  }
 0x2cd   :  { %4022 = vmatprep.mubr.bf16.mxu0 %v11514_v37  ;;  %4168 = vmatprep.mubr.bf16.mxu1 %v11514_v37  ;;  %v8638_v23 = vcombine.high %v174_v54, %v182_v34  ;;  %v8637_v5 = vcombine.low %v174_v54, %v182_v34  ;;  %v246_v25 = vld [vmem:[#allocation6 + $0x4f8] sm:$0xff] }
 0x2cf   :  { %4202 = vmatpush1.bf16.msra.mxu0 %v8571_v17  ;;  %4348 = vmatpush1.bf16.msra.mxu1 %v8573_v47  ;;  %v190_v17 = vld [vmem:[#allocation6 + $0x338] sm:$0xff] }
 0x2d0   :  { %4203 = vmatprep.subr.bf16.mxu0 %v8588_v12  ;;  %4349 = vmatprep.subr.bf16.mxu1 %v8590_v11  ;;  %v198_v47 = vld [vmem:[#allocation6 + $0x378] sm:$0xff]  ;;  %v8635_v11 = vcombine.low %v173_v57, %v181_v60 }
 0x2d1   :  { %v11526_v12 = vld [vmem:[#allocation3 + $0x48] ss:$16 sps:$4 sm:$0xff]   ;;  %v8654_v35 = vcombine.high %v190_v17, %v198_v47  ;;  %v8653_v51 = vcombine.low %v190_v17, %v198_v47 }
 0x2d2   :  { %4023 = vmatmul.mubr.bf16.gmra.mrb[36].mxu0 %v11518_v53  ;;  %4169 = vmatmul.mubr.bf16.gmra.mrb[36].mxu1 %v11518_v53  ;;  %v11534_v57 = vld [vmem:[#allocation3 + $0x68] ss:$16 sps:$4 sm:$0xff]  }
 0x2d3   :  { %4204 = vmatpush1.bf16.msra.mxu0 %v8587_v28  ;;  %4350 = vmatpush1.bf16.msra.mxu1 %v8589_v3  ;;  %v11530_v28 = vld [vmem:[#allocation3 + $0x6c] ss:$16 sps:$4 sm:$0xff]   ;;  %v213_v3 = vld [vmem:[#allocation6 + $0x3f0] sm:$0xff] }
 0x2d4   :  { %4205 = vmatprep.subr.bf16.mxu0 %v8604_v4  ;;  %4351 = vmatprep.subr.bf16.mxu1 %v8606_v18  ;;  %v206_v4 = vld [vmem:[#allocation6 + $0x3b8] sm:$0xff]  ;;  %v8668_v31 = vcombine.high %v205_v50, %v213_v3  ;;  %v8667_v60 = vcombine.low %v205_v50, %v213_v3 }
 0x2d5   :  { %4032 = vmatprep.mubr.bf16.mxu0 %v11522_v49  ;;  %4178 = vmatprep.mubr.bf16.mxu1 %v11522_v49  ;;  %v214_v18 = vld [vmem:[#allocation6 + $0x3f8] sm:$0xff] }
 0x2d6   :  { %v8670_v22 = vcombine.high %v206_v4, %v214_v18  ;;  %v8669_v54 = vcombine.low %v206_v4, %v214_v18  ;;  %v254_v50 = vld [vmem:[#allocation6 + $0x538] sm:$0xff] }
 0x2d7   :  { %4206 = vmatpush1.bf16.msra.mxu0 %v8603_v46  ;;  %4352 = vmatpush1.bf16.msra.mxu1 %v8605_v59  ;;  %v221_v46 = vld [vmem:[#allocation6 + $0x430] sm:$0xff]  ;;  %v262_v3 = vld [vmem:[#allocation6 + $0x578] sm:$0xff] }
 0x2d8   :  { %4207 = vmatprep.subr.bf16.mxu0 %v8620_v55  ;;  %4353 = vmatprep.subr.bf16.mxu1 %v8622_v9  ;;  %v229_v59 = vld [vmem:[#allocation6 + $0x470] sm:$0xff]  ;;  %v222_v55 = vld [vmem:[#allocation6 + $0x438] sm:$0xff] }
 0x2d9   :  { %v230_v9 = vld [vmem:[#allocation6 + $0x478] sm:$0xff]  ;;  %v8684_v34 = vcombine.high %v221_v46, %v229_v59  ;;  %v8683_v17 = vcombine.low %v221_v46, %v229_v59 }
 0x2da   :  { %4033 = vmatmul.mubr.bf16.gmra.mrb[40].mxu0 %v11526_v12  ;;  %4179 = vmatmul.mubr.bf16.gmra.mrb[40].mxu1 %v11526_v12  ;;  %v8685_v47 = vcombine.low %v222_v55, %v230_v9  ;;  %v270_v46 = vld [vmem:[#allocation6 + $0x5b8] sm:$0xff] }
 0x2db   :  { %4208 = vmatpush1.bf16.msra.mxu0 %v8619_v43  ;;  %4354 = vmatpush1.bf16.msra.mxu1 %v8621_v27  ;;  %v8686_v43 = vcombine.high %v222_v55, %v230_v9  ;;  %v237_v27 = vld [vmem:[#allocation6 + $0x4b0] sm:$0xff]  ;;  %v278_v59 = vld [vmem:[#allocation6 + $0x5f8] sm:$0xff]  ;;  %v8717_v9 = vcombine.low %v254_v50, %v262_v3 }
 0x2dc   :  { %4209 = vmatprep.subr.bf16.mxu0 %v8636_v21  ;;  %4355 = vmatprep.subr.bf16.mxu1 %v8638_v23  ;;  %v245_v21 = vld [vmem:[#allocation6 + $0x4f0] sm:$0xff]  ;;  %v238_v23 = vld [vmem:[#allocation6 + $0x4b8] sm:$0xff] }
 0x2dd   :  { %4042 = vmatprep.mubr.bf16.mxu0 %v11530_v28  ;;  %4188 = vmatprep.mubr.bf16.mxu1 %v11530_v28  ;;  %v8699_v4 = vcombine.low %v237_v27, %v245_v21  ;;  %v8701_v18 = vcombine.low %v238_v23, %v246_v25 }
 0x2df   :  { %4210 = vmatpush1.bf16.msra.mxu0 %v8635_v11  ;;  %4356 = vmatpush1.bf16.msra.mxu1 %v8637_v5  ;;  %v8700_v11 = vcombine.high %v237_v27, %v245_v21  ;;  %v8702_v5 = vcombine.high %v238_v23, %v246_v25  ;;  %v286_v27 = vld [vmem:[#allocation6 + $0x638] sm:$0xff]  ;;  %v8733_v25 = vcombine.low %v270_v46, %v278_v59 }
 0x2e0   :  { %4211 = vmatprep.subr.bf16.mxu0 %v8652_v14  ;;  %4357 = vmatprep.subr.bf16.mxu1 %v8654_v35  ;;  %v253_v14 = vld [vmem:[#allocation6 + $0x530] sm:$0xff]  ;;  %v294_v21 = vld [vmem:[#allocation6 + $0x678] sm:$0xff] }
 0x2e1   :  { %v261_v35 = vld [vmem:[#allocation6 + $0x570] sm:$0xff] }
 0x2e2   :  { %4043 = vmatmul.mubr.bf16.gmra.mrb[44].mxu0 %v11534_v57  ;;  %4189 = vmatmul.mubr.bf16.gmra.mrb[44].mxu1 %v11534_v57  ;;  %v8715_v55 = vcombine.low %v253_v14, %v261_v35 }
 0x2e3   :  { %4212 = vmatpush1.bf16.msra.mxu0 %v8651_v52  ;;  %4358 = vmatpush1.bf16.msra.mxu1 %v8653_v51  ;;  %v8716_v52 = vcombine.high %v253_v14, %v261_v35  ;;  %v8718_v51 = vcombine.high %v254_v50, %v262_v3  ;;  %v310_v14 = vld [vmem:[#allocation6 + $0x6f8] sm:$0xff]  ;;  %v8749_v50 = vcombine.low %v286_v27, %v294_v21 }
 0x2e4   :  { %4213 = vmatprep.subr.bf16.mxu0 %v8668_v31  ;;  %4359 = vmatprep.subr.bf16.mxu1 %v8670_v22  ;;  %v269_v31 = vld [vmem:[#allocation6 + $0x5b0] sm:$0xff] }
 0x2e5   :  { %4231 = vmatprep.mubr.bf16.mxu0 %v9948_v19  ;;  %4377 = vmatprep.mubr.bf16.mxu1 %v9948_v19  ;;  %v277_v22 = vld [vmem:[#allocation6 + $0x5f0] sm:$0xff] }
 0x2e6   :  { %v8731_v23 = vcombine.low %v269_v31, %v277_v22 }
 0x2e7   :  { %4214 = vmatpush1.bf16.msra.mxu0 %v8667_v60  ;;  %4360 = vmatpush1.bf16.msra.mxu1 %v8669_v54  ;;  %v8732_v60 = vcombine.high %v269_v31, %v277_v22  ;;  %v8734_v54 = vcombine.high %v270_v46, %v278_v59  ;;  %v326_v31 = vld [vmem:[#allocation6 + $0x778] sm:$0xff] }
 0x2e8   :  { %4215 = vmatprep.subr.bf16.mxu0 %v8684_v34  ;;  %4361 = vmatprep.subr.bf16.mxu1 %v8686_v43  ;;  %v285_v34 = vld [vmem:[#allocation6 + $0x630] sm:$0xff] }
 0x2e9   :  { %v293_v43 = vld [vmem:[#allocation6 + $0x670] sm:$0xff] }
 0x2ea   :  { %v8748_v19 = vcombine.high %v285_v34, %v293_v43  ;;  %v8747_v35 = vcombine.low %v285_v34, %v293_v43  ;;  %v342_v34 = vld [vmem:[#allocation6 + $0x7f8] sm:$0xff] }
 0x2eb   :  { %4216 = vmatpush1.bf16.msra.mxu0 %v8683_v17  ;;  %4362 = vmatpush1.bf16.msra.mxu1 %v8685_v47  ;;  %v8750_v17 = vcombine.high %v286_v27, %v294_v21  ;;  %v301_v47 = vld [vmem:[#allocation6 + $0x6b0] sm:$0xff] }
 0x2ec   :  { %4217 = vmatprep.subr.bf16.mxu0 %v8700_v11  ;;  %4363 = vmatprep.subr.bf16.mxu1 %v8702_v5  ;;  %v309_v11 = vld [vmem:[#allocation6 + $0x6f0] sm:$0xff]  ;;  %v302_v5 = vld [vmem:[#allocation6 + $0x6b8] sm:$0xff] }
 0x2ed   :  { %v8764_v3 = vcombine.high %v301_v47, %v309_v11  ;;  %v8763_v22 = vcombine.low %v301_v47, %v309_v11  ;;  %v8765_v46 = vcombine.low %v302_v5, %v310_v14  ;;  %v358_v47 = vld [vmem:[#allocation6 + $0x878] sm:$0xff] }
 0x2ef   :  { %4218 = vmatpush1.bf16.msra.mxu0 %v8699_v4  ;;  %4364 = vmatpush1.bf16.msra.mxu1 %v8701_v18  ;;  %v8766_v4 = vcombine.high %v302_v5, %v310_v14  ;;  %v317_v18 = vld [vmem:[#allocation6 + $0x730] sm:$0xff] }
 0x2f0   :  { %4219 = vmatprep.subr.bf16.mxu0 %v8716_v52  ;;  %4365 = vmatprep.subr.bf16.mxu1 %v8718_v51  ;;  %v325_v52 = vld [vmem:[#allocation6 + $0x770] sm:$0xff]  ;;  %v318_v51 = vld [vmem:[#allocation6 + $0x738] sm:$0xff] }
 0x2f1   :  { %v8780_v59 = vcombine.high %v317_v18, %v325_v52  ;;  %v8779_v43 = vcombine.low %v317_v18, %v325_v52  ;;  %v8781_v27 = vcombine.low %v318_v51, %v326_v31  ;;  %v374_v18 = vld [vmem:[#allocation6 + $0x8f8] sm:$0xff] }
 0x2f3   :  { %4220 = vmatpush1.bf16.msra.mxu0 %v8715_v55  ;;  %4366 = vmatpush1.bf16.msra.mxu1 %v8717_v9  ;;  %v8782_v55 = vcombine.high %v318_v51, %v326_v31  ;;  %v333_v9 = vld [vmem:[#allocation6 + $0x7b0] sm:$0xff] }
 0x2f4   :  { %4221 = vmatprep.subr.bf16.mxu0 %v8732_v60  ;;  %4367 = vmatprep.subr.bf16.mxu1 %v8734_v54  ;;  %v341_v60 = vld [vmem:[#allocation6 + $0x7f0] sm:$0xff]  ;;  %v334_v54 = vld [vmem:[#allocation6 + $0x7b8] sm:$0xff] }
 0x2f5   :  { %v8796_v21 = vcombine.high %v333_v9, %v341_v60  ;;  %v8795_v11 = vcombine.low %v333_v9, %v341_v60  ;;  %v8797_v5 = vcombine.low %v334_v54, %v342_v34  ;;  %v390_v9 = vld [vmem:[#allocation6 + $0x978] sm:$0xff]  ;;  %v9949_v60 = vld [vmem:[#allocation3] ss:$16 sps:$4 sm:$0xff]  }
 0x2f7   :  { %4222 = vmatpush1.bf16.msra.mxu0 %v8731_v23  ;;  %4368 = vmatpush1.bf16.msra.mxu1 %v8733_v25  ;;  %v8798_v23 = vcombine.high %v334_v54, %v342_v34  ;;  %v349_v25 = vld [vmem:[#allocation6 + $0x830] sm:$0xff] }
 0x2f8   :  { %4223 = vmatprep.subr.bf16.mxu0 %v8748_v19  ;;  %4369 = vmatprep.subr.bf16.mxu1 %v8750_v17  ;;  %v357_v19 = vld [vmem:[#allocation6 + $0x870] sm:$0xff]  ;;  %v350_v17 = vld [vmem:[#allocation6 + $0x838] sm:$0xff] }
 0x2f9   :  { %v8812_v14 = vcombine.high %v349_v25, %v357_v19  ;;  %v8811_v52 = vcombine.low %v349_v25, %v357_v19  ;;  %v8813_v51 = vcombine.low %v350_v17, %v358_v47  ;;  %v398_v25 = vld [vmem:[#allocation6 + $0x9b8] sm:$0xff] }
 0x2fa   :  { %v406_v19 = vld [vmem:[#allocation6 + $0x9f8] sm:$0xff] }
 0x2fb   :  { %4224 = vmatpush1.bf16.msra.mxu0 %v8747_v35  ;;  %4370 = vmatpush1.bf16.msra.mxu1 %v8749_v50  ;;  %v8814_v35 = vcombine.high %v350_v17, %v358_v47  ;;  %v365_v50 = vld [vmem:[#allocation6 + $0x8b0] sm:$0xff] }
 0x2fc   :  { %4225 = vmatprep.subr.bf16.mxu0 %v8764_v3  ;;  %4371 = vmatprep.subr.bf16.mxu1 %v8766_v4  ;;  %v373_v3 = vld [vmem:[#allocation6 + $0x8f0] sm:$0xff]  ;;  %v366_v4 = vld [vmem:[#allocation6 + $0x8b8] sm:$0xff] }
 0x2fd   :  { %v8828_v31 = vcombine.high %v365_v50, %v373_v3  ;;  %v8827_v54 = vcombine.low %v365_v50, %v373_v3  ;;  %v8829_v34 = vcombine.low %v366_v4, %v374_v18  ;;  %v9950_v17 = vld [vmem:[#allocation3 + $0x24] ss:$16 sps:$4 sm:$0xff]   ;;  %v414_v3 = vld [vmem:[#allocation6 + $0xa38] sm:$0xff] }
 0x2fe   :  { %v421_v50 = vld [vmem:[#allocation6 + $0xa70] sm:$0xff] }
 0x2ff   :  { %4226 = vmatpush1.bf16.msra.mxu0 %v8763_v22  ;;  %4372 = vmatpush1.bf16.msra.mxu1 %v8765_v46  ;;  %v8830_v22 = vcombine.high %v366_v4, %v374_v18  ;;  %v381_v46 = vld [vmem:[#allocation6 + $0x930] sm:$0xff]  ;;  %v422_v4 = vld [vmem:[#allocation6 + $0xa78] sm:$0xff] }
 0x300   :  { %4227 = vmatprep.subr.bf16.mxu0 %v8780_v59  ;;  %4373 = vmatprep.subr.bf16.mxu1 %v8782_v55  ;;  %v389_v59 = vld [vmem:[#allocation6 + $0x970] sm:$0xff]  ;;  %v382_v55 = vld [vmem:[#allocation6 + $0x938] sm:$0xff] }
 0x301   :  { %v8843_v47 = vcombine.low %v381_v46, %v389_v59  ;;  %v9951_v18 = vld [vmem:[#allocation3 + $0x20] ss:$16 sps:$4 sm:$0xff]  }
 0x303   :  { %4228 = vmatpush1.bf16.msra.mxu0 %v8779_v43  ;;  %4374 = vmatpush1.bf16.msra.mxu1 %v8781_v27  ;;  %v8844_v43 = vcombine.high %v381_v46, %v389_v59  ;;  %v8846_v27 = vcombine.high %v382_v55, %v390_v9  ;;  %v429_v46 = vld [vmem:[#allocation6 + $0xab0] sm:$0xff] }
 0x304   :  { %4229 = vmatprep.subr.bf16.mxu0 %v8796_v21  ;;  %4375 = vmatprep.subr.bf16.mxu1 %v8798_v23  ;;  %v397_v21 = vld [vmem:[#allocation6 + $0x9b0] sm:$0xff] }
 0x305   :  { %v405_v23 = vld [vmem:[#allocation6 + $0x9f0] sm:$0xff] }
 0x306   :  { %v437_v59 = vld [vmem:[#allocation6 + $0xaf0] sm:$0xff] }
 0x307   :  { %4230 = vmatpush1.bf16.msra.mxu0 %v8795_v11  ;;  %4376 = vmatpush1.bf16.msra.mxu1 %v8797_v5  ;;  %v8845_v11 = vcombine.low %v382_v55, %v390_v9  ;;  %v8860_v5 = vcombine.high %v397_v21, %v405_v23  ;;  %v430_v55 = vld [vmem:[#allocation6 + $0xab8] sm:$0xff] }
 0x308   :  { %4272 = vmatprep.subr.bf16.mxu0 %v8812_v14  ;;  %4418 = vmatprep.subr.bf16.mxu1 %v8814_v35  ;;  %v8862_v14 = vcombine.high %v398_v25, %v406_v19  ;;  %v413_v35 = vld [vmem:[#allocation6 + $0xa30] sm:$0xff]  ;;  %v438_v9 = vld [vmem:[#allocation6 + $0xaf8] sm:$0xff] }
 0x30a   :  { %4232 = vmatmul.mubr.bf16.vlgmr.msra.gmra.mrb[48].mxu0 %v9949_v60  ;;  %4378 = vmatmul.mubr.bf16.vlgmr.msra.gmra.mrb[48].mxu1 %v9949_v60  ;;  %v9952_v60 = vld [vmem:[#allocation3 + $0x44] ss:$16 sps:$4 sm:$0xff]  }
 0x30b   :  { %4273 = vmatpush1.bf16.msra.mxu0 %v8811_v52  ;;  %4419 = vmatpush1.bf16.msra.mxu1 %v8813_v51  ;;  %v8859_v52 = vcombine.low %v397_v21, %v405_v23  ;;  %v8861_v51 = vcombine.low %v398_v25, %v406_v19  ;;  %v8877_v21 = vcombine.low %v414_v3, %v422_v4  ;;  %v13462_v23 = vsub.s32 7, %v11396_v33 }
 0x30c   :  { %4274 = vmatprep.subr.bf16.mxu0 %v8828_v31  ;;  %4420 = vmatprep.subr.bf16.mxu1 %v8830_v22  ;;  %v8876_v31 = vcombine.high %v413_v35, %v421_v50  ;;  %v8878_v22 = vcombine.high %v414_v3, %v422_v4  ;;  %v8892_v25 = vcombine.high %v429_v46, %v437_v59  ;;  %v9954_v3 = vld [vmem:[#allocation3 + $0x40] ss:$16 sps:$4 sm:$0xff]  }
 0x30d   :  { %4241 = vmatprep.mubr.bf16.mxu0 %v9950_v17  ;;  %4387 = vmatprep.mubr.bf16.mxu1 %v9950_v17  ;;  %v8894_v19 = vcombine.high %v430_v55, %v438_v9  ;;  %v11542_v17 = vld [vmem:[#allocation6 + $0xb30] sm:$0xff] }
 0x30f   :  { %4275 = vmatpush1.bf16.msra.mxu0 %v8827_v54  ;;  %4421 = vmatpush1.bf16.msra.mxu1 %v8829_v34  ;;  %v13464_v54 = vsub.s32 4, %v11396_v33  ;;  %v13463_v34 = vsub.s32 6, %v11396_v33 }
 0x310   :  { %4276 = vmatprep.subr.bf16.mxu0 %v8844_v43  ;;  %4422 = vmatprep.subr.bf16.mxu1 %v8846_v27  ;;  %v13461_v43 = vsub.s32 5, %v11396_v33  ;;  %v8875_v27 = vcombine.low %v413_v35, %v421_v50 }
 0x312   :  { %4242 = vmatmul.mubr.bf16.gmra.mrb[52].mxu0 %v9951_v18  ;;  %4388 = vmatmul.mubr.bf16.gmra.mrb[52].mxu1 %v9951_v18 }
 0x313   :  { %4277 = vmatpush1.bf16.msra.mxu0 %v8843_v47  ;;  %4423 = vmatpush1.bf16.msra.mxu1 %v8845_v11  ;;  %v11544_v47 = vld [vmem:[#allocation6 + $0xb70] sm:$0xff]  ;;  %v11546_v11 = vld [vmem:[#allocation6 + $0xb38] sm:$0xff] }
 0x314   :  { %4278 = vmatprep.subr.bf16.mxu0 %v8860_v5  ;;  %4424 = vmatprep.subr.bf16.mxu1 %v8862_v14  ;;  %v11548_v5 = vld [vmem:[#allocation6 + $0xb78] sm:$0xff]  ;;  %v9953_v14 = vld [vmem:[#allocation9] sm:$0xff] }
 0x315   :  { %4251 = vmatprep.mubr.bf16.mxu0 %v9952_v60  ;;  %4397 = vmatprep.mubr.bf16.mxu1 %v9952_v60  ;;  %v11552_v18 = vrot.slane %v9953_v14, %v13464_v54  ;;  %v11556_v35 = vrot.slane %v9953_v14, %v13463_v34  ;;  %v11560_v50 = vrot.slane %v9953_v14, %v13461_v43  ;;  %v11570_v60 = vld [vmem:[#allocation6 + $0xbb0] sm:$0xff] }
 0x316   :  { %v11564_v4 = vrot.slane %v9953_v14, %v13462_v23  ;;  %v11572_v43 = vld [vmem:[#allocation6 + $0xbf0] sm:$0xff]  ;;  %v11576_v14 = vld [vmem:[#allocation6 + $0xbf8] sm:$0xff]  ;;  %v8909_v23 = vcombine.low %v11546_v11, %v11548_v5 }
 0x317   :  { %4279 = vmatpush1.bf16.msra.mxu0 %v8859_v52  ;;  %4425 = vmatpush1.bf16.msra.mxu1 %v8861_v51  ;;  %v8891_v52 = vcombine.low %v429_v46, %v437_v59  ;;  %v8893_v51 = vcombine.low %v430_v55, %v438_v9  ;;  %v9955_v46 = vld [vmem:[#allocation3 + $0x64] ss:$16 sps:$4 sm:$0xff]  }
 0x318   :  { %4280 = vmatprep.subr.bf16.mxu0 %v8876_v31  ;;  %4426 = vmatprep.subr.bf16.mxu1 %v8878_v22  ;;  %v8908_v31 = vcombine.high %v11542_v17, %v11544_v47  ;;  %v8910_v22 = vcombine.high %v11546_v11, %v11548_v5  ;;  %v11592_v5 = vld [vmem:[#allocation6 + $0xc30] sm:$0xff] }
 0x31a   :  { %4252 = vmatmul.mubr.bf16.gmra.mrb[56].mxu0 %v9954_v3  ;;  %4398 = vmatmul.mubr.bf16.gmra.mrb[56].mxu1 %v9954_v3  ;;  %v11574_v3 = vld [vmem:[#allocation6 + $0xbb8] sm:$0xff] }
 0x31b   :  { %4281 = vmatpush1.bf16.msra.mxu0 %v8875_v27  ;;  %4427 = vmatpush1.bf16.msra.mxu1 %v8877_v21  ;;  %v8926_v11 = vcombine.high %v11574_v3, %v11576_v14 }
 0x31c   :  { %4282 = vmatprep.subr.bf16.mxu0 %v8892_v25  ;;  %4428 = vmatprep.subr.bf16.mxu1 %v8894_v19  ;;  %v8907_v19 = vcombine.low %v11542_v17, %v11544_v47 }
 0x31d   :  { %v3722_v27 = vpop.f32.mrb[16].mxu0  ;;  %v3868_v21 = vpop.f32.mrb[16].mxu1  ;;  %4261 = vmatprep.mubr.bf16.mxu0 %v9955_v46  ;;  %4407 = vmatprep.mubr.bf16.mxu1 %v9955_v46 }
 0x31e   :  { %v9603_v59 = vadd.f32 %v3722_v27, %v11552_v18  ;;  %v9619_v55 = vadd.f32 %v3868_v21, %v11556_v35  ;;  %v3724_v9 = vpop.f32.mrb[17].mxu0  ;;  %v3870_v25 = vpop.f32.mrb[17].mxu1  ;;  %v8924_v27 = vcombine.high %v11570_v60, %v11572_v43 }
 0x31f   :  { %v9604_v34 = vadd.f32 %v3724_v9, %v11560_v50  ;;  %v9620_v54 = vadd.f32 %v3870_v25, %v11564_v4  ;;  %v3726_v20 = vpop.f32.mrb[18].mxu0  ;;  %v3872_v1 = vpop.f32.mrb[18].mxu1  ;;  %4283 = vmatpush1.bf16.msra.mxu0 %v8891_v52  ;;  %4429 = vmatpush1.bf16.msra.mxu1 %v8893_v51  ;;  %v11601_v9 = vld [vmem:[#allocation6 + $0xcb0] sm:$0xff] }
 0x320   :  { %4495 = vst [vmem:[#allocation2 + $0x20] sm:$0xff] %v9603_v59  ;;  %4497 = vst [vmem:[#allocation2 + $0x30] sm:$0xff] %v9619_v55  ;;  %v9605_v21 = vadd.f32 %v3726_v20, %v11552_v18  ;;  %v9621_v17 = vadd.f32 %v3872_v1, %v11556_v35  ;;  %v3728_v47 = vpop.f32.mrb[19].mxu0  ;;  %v3874_v46 = vpop.f32.mrb[19].mxu1  ;;  %4284 = vmatprep.subr.bf16.mxu0 %v8908_v31  ;;  %4430 = vmatprep.subr.bf16.mxu1 %v8910_v22  ;;  %v485_v59 = vld [vmem:[#allocation6 + $0xc70] sm:$0xff]  ;;  %v478_v55 = vld [vmem:[#allocation6 + $0xc38] sm:$0xff] }
 0x321   :  { %4496 = vst [vmem:[#allocation2 + $0x28] sm:$0xff] %v9604_v34  ;;  %4498 = vst [vmem:[#allocation2 + $0x38] sm:$0xff] %v9620_v54  ;;  %v9606_v52 = vadd.f32 %v3728_v47, %v11560_v50  ;;  %v9622_v51 = vadd.f32 %v3874_v46, %v11564_v4  ;;  %v486_v20 = vld [vmem:[#allocation6 + $0xc78] sm:$0xff]  ;;  %v9956_v1 = vld [vmem:[#allocation3 + $0x60] ss:$16 sps:$4 sm:$0xff]   ;;  %v8923_v34 = vcombine.low %v11570_v60, %v11572_v43 }
 0x322   :  { %4511 = vst [vmem:[#allocation2 + $0xa0] sm:$0xff] %v9605_v21  ;;  %4513 = vst [vmem:[#allocation2 + $0xb0] sm:$0xff] %v9621_v17  ;;  %4262 = vmatmul.mubr.bf16.gmra.mrb[60].mxu0 %v9956_v1  ;;  %4408 = vmatmul.mubr.bf16.gmra.mrb[60].mxu1 %v9956_v1  ;;  %v8925_v54 = vcombine.low %v11574_v3, %v11576_v14  ;;  %v8940_v31 = vcombine.high %v11592_v5, %v485_v59  ;;  %v11603_v25 = vld [vmem:[#allocation6 + $0xcf0] sm:$0xff]  ;;  %v11605_v47 = vld [vmem:[#allocation6 + $0xcb8] sm:$0xff] }
 0x323   :  { %4512 = vst [vmem:[#allocation2 + $0xa8] sm:$0xff] %v9606_v52  ;;  %4514 = vst [vmem:[#allocation2 + $0xb8] sm:$0xff] %v9622_v51  ;;  %4285 = vmatpush1.bf16.msra.mxu0 %v8907_v19  ;;  %4431 = vmatpush1.bf16.msra.mxu1 %v8909_v23  ;;  %v8942_v22 = vcombine.high %v478_v55, %v486_v20  ;;  %v11607_v23 = vld [vmem:[#allocation6 + $0xcf8] sm:$0xff]  ;;  %v8941_v46 = vcombine.low %v478_v55, %v486_v20  ;;  %v509_v55 = vld [vmem:[#allocation6 + $0xd30] sm:$0xff] }
 0x324   :  { %4286 = vmatprep.subr.bf16.mxu0 %v8924_v27  ;;  %4432 = vmatprep.subr.bf16.mxu1 %v8926_v11  ;;  %v9957_v19 = vld [vmem:[#allocation3 + $0xc] ss:$16 sps:$4 sm:$0xff]   ;;  %v8939_v27 = vcombine.low %v11592_v5, %v485_v59  ;;  %v8958_v59 = vcombine.high %v11605_v47, %v11607_v23 }
 0x325   :  { %v3732_v21 = vpop.f32.mrb[20].mxu0  ;;  %v3878_v17 = vpop.f32.mrb[20].mxu1  ;;  %4304 = vmatprep.mubr.bf16.mxu0 %v9957_v19  ;;  %4450 = vmatprep.mubr.bf16.mxu1 %v9957_v19  ;;  %v8956_v19 = vcombine.high %v11601_v9, %v11603_v25 }
 0x326   :  { %v9607_v43 = vadd.f32 %v3732_v21, %v11552_v18  ;;  %v9623_v60 = vadd.f32 %v3878_v17, %v11556_v35  ;;  %v3734_v3 = vpop.f32.mrb[21].mxu0  ;;  %v3880_v14 = vpop.f32.mrb[21].mxu1 }
 0x327   :  { %v9608_v11 = vadd.f32 %v3734_v3, %v11560_v50  ;;  %v9624_v52 = vadd.f32 %v3880_v14, %v11564_v4  ;;  %v3736_v51 = vpop.f32.mrb[22].mxu0  ;;  %v3882_v1 = vpop.f32.mrb[22].mxu1  ;;  %4287 = vmatpush1.bf16.msra.mxu0 %v8923_v34  ;;  %4433 = vmatpush1.bf16.msra.mxu1 %v8925_v54  ;;  %v517_v54 = vld [vmem:[#allocation6 + $0xd70] sm:$0xff] }
 0x328   :  { %4527 = vst [vmem:[#allocation2 + $0x120] sm:$0xff] %v9607_v43  ;;  %4529 = vst [vmem:[#allocation2 + $0x130] sm:$0xff] %v9623_v60  ;;  %v9609_v21 = vadd.f32 %v3736_v51, %v11552_v18  ;;  %v9625_v17 = vadd.f32 %v3882_v1, %v11556_v35  ;;  %v3738_v62 = vpop.f32.mrb[23].mxu0  ;;  %v3884_v5 = vpop.f32.mrb[23].mxu1  ;;  %4288 = vmatprep.subr.bf16.mxu0 %v8940_v31  ;;  %4434 = vmatprep.subr.bf16.mxu1 %v8942_v22  ;;  %v510_v43 = vld [vmem:[#allocation6 + $0xd38] sm:$0xff]  ;;  %v11626_v14 = vld [vmem:[#allocation6 + $0xdb0] sm:$0xff] }
 0x329   :  { %4528 = vst [vmem:[#allocation2 + $0x128] sm:$0xff] %v9608_v11  ;;  %4530 = vst [vmem:[#allocation2 + $0x138] sm:$0xff] %v9624_v52  ;;  %v9610_v20 = vadd.f32 %v3738_v62, %v11560_v50  ;;  %v9626_v34 = vadd.f32 %v3884_v5, %v11564_v4  ;;  %v518_v60 = vld [vmem:[#allocation6 + $0xd78] sm:$0xff]  ;;  %v8955_v31 = vcombine.low %v11601_v9, %v11603_v25  ;;  %v11628_v11 = vld [vmem:[#allocation6 + $0xdf0] sm:$0xff] }
 0x32a   :  { %4543 = vst [vmem:[#allocation2 + $0x1a0] sm:$0xff] %v9609_v21  ;;  %4545 = vst [vmem:[#allocation2 + $0x1b0] sm:$0xff] %v9625_v17  ;;  %v8957_v22 = vcombine.low %v11605_v47, %v11607_v23  ;;  %v8972_v62 = vcombine.high %v509_v55, %v517_v54  ;;  %v8974_v3 = vcombine.high %v510_v43, %v518_v60  ;;  %v526_v1 = vld [vmem:[#allocation6 + $0xdb8] sm:$0xff] }
 0x32b   :  { %4544 = vst [vmem:[#allocation2 + $0x1a8] sm:$0xff] %v9610_v20  ;;  %4546 = vst [vmem:[#allocation2 + $0x1b8] sm:$0xff] %v9626_v34  ;;  %4289 = vmatpush1.bf16.msra.mxu0 %v8939_v27  ;;  %4435 = vmatpush1.bf16.msra.mxu1 %v8941_v46  ;;  %v534_v21 = vld [vmem:[#allocation6 + $0xdf8] sm:$0xff]  ;;  %v8971_v17 = vcombine.low %v509_v55, %v517_v54  ;;  %v8973_v47 = vcombine.low %v510_v43, %v518_v60  ;;  %v541_v43 = vld [vmem:[#allocation6 + $0xe30] sm:$0xff] }
 0x32c   :  { %4290 = vmatprep.subr.bf16.mxu0 %v8956_v19  ;;  %4436 = vmatprep.subr.bf16.mxu1 %v8958_v59  ;;  %v8988_v20 = vcombine.high %v11626_v14, %v11628_v11  ;;  %v8990_v54 = vcombine.high %v526_v1, %v534_v21 }
 0x32d   :  { %v3742_v52 = vpop.f32.mrb[24].mxu0  ;;  %v3888_v51 = vpop.f32.mrb[24].mxu1 }
 0x32e   :  { %v9611_v27 = vadd.f32 %v3742_v52, %v11552_v18  ;;  %v9627_v46 = vadd.f32 %v3888_v51, %v11556_v35  ;;  %v3744_v9 = vpop.f32.mrb[25].mxu0  ;;  %v3890_v25 = vpop.f32.mrb[25].mxu1 }
 0x32f   :  { %v9612_v23 = vadd.f32 %v3744_v9, %v11560_v50  ;;  %v9628_v19 = vadd.f32 %v3890_v25, %v11564_v4  ;;  %v3746_v5 = vpop.f32.mrb[26].mxu0  ;;  %v3892_v59 = vpop.f32.mrb[26].mxu1  ;;  %4291 = vmatpush1.bf16.msra.mxu0 %v8955_v31  ;;  %4437 = vmatpush1.bf16.msra.mxu1 %v8957_v22  ;;  %v549_v22 = vld [vmem:[#allocation6 + $0xe70] sm:$0xff]  ;;  %v542_v9 = vld [vmem:[#allocation6 + $0xe38] sm:$0xff] }
 0x330   :  { %4559 = vst [vmem:[#allocation2 + $0x220] sm:$0xff] %v9611_v27  ;;  %4561 = vst [vmem:[#allocation2 + $0x230] sm:$0xff] %v9627_v46  ;;  %v9613_v34 = vadd.f32 %v3746_v5, %v11552_v18  ;;  %v9629_v52 = vadd.f32 %v3892_v59, %v11556_v35  ;;  %v3748_v51 = vpop.f32.mrb[27].mxu0  ;;  %v3894_v55 = vpop.f32.mrb[27].mxu1  ;;  %4292 = vmatprep.subr.bf16.mxu0 %v8972_v62  ;;  %4438 = vmatprep.subr.bf16.mxu1 %v8974_v3  ;;  %v550_v27 = vld [vmem:[#allocation6 + $0xe78] sm:$0xff] }
 0x331   :  { %4560 = vst [vmem:[#allocation2 + $0x228] sm:$0xff] %v9612_v23  ;;  %4562 = vst [vmem:[#allocation2 + $0x238] sm:$0xff] %v9628_v19  ;;  %v9614_v60 = vadd.f32 %v3748_v51, %v11560_v50  ;;  %v9630_v31 = vadd.f32 %v3894_v55, %v11564_v4  ;;  %v8987_v62 = vcombine.low %v11626_v14, %v11628_v11  ;;  %v557_v23 = vld [vmem:[#allocation6 + $0xeb0] sm:$0xff]  ;;  %v558_v51 = vld [vmem:[#allocation6 + $0xeb8] sm:$0xff] }
 0x332   :  { %4575 = vst [vmem:[#allocation2 + $0x2a0] sm:$0xff] %v9613_v34  ;;  %4577 = vst [vmem:[#allocation2 + $0x2b0] sm:$0xff] %v9629_v52  ;;  %v8989_v3 = vcombine.low %v526_v1, %v534_v21  ;;  %v9004_v46 = vcombine.high %v541_v43, %v549_v22  ;;  %v9006_v25 = vcombine.high %v542_v9, %v550_v27  ;;  %v565_v19 = vld [vmem:[#allocation6 + $0xef0] sm:$0xff]  ;;  %v566_v55 = vld [vmem:[#allocation6 + $0xef8] sm:$0xff] }
 0x333   :  { %4576 = vst [vmem:[#allocation2 + $0x2a8] sm:$0xff] %v9614_v60  ;;  %4578 = vst [vmem:[#allocation2 + $0x2b8] sm:$0xff] %v9630_v31  ;;  %4293 = vmatpush1.bf16.msra.mxu0 %v8971_v17  ;;  %4439 = vmatpush1.bf16.msra.mxu1 %v8973_v47  ;;  %v9003_v60 = vcombine.low %v541_v43, %v549_v22  ;;  %v9005_v31 = vcombine.low %v542_v9, %v550_v27  ;;  %v573_v22 = vld [vmem:[#allocation6 + $0xf30] sm:$0xff] }
 0x334   :  { %4294 = vmatprep.subr.bf16.mxu0 %v8988_v20  ;;  %4440 = vmatprep.subr.bf16.mxu1 %v8990_v54  ;;  %v9020_v20 = vcombine.high %v557_v23, %v565_v19  ;;  %v9022_v43 = vcombine.high %v558_v51, %v566_v55 }
 0x335   :  { %v3752_v5 = vpop.f32.mrb[28].mxu0  ;;  %v3898_v59 = vpop.f32.mrb[28].mxu1 }
 0x336   :  { %v9615_v34 = vadd.f32 %v3752_v5, %v11552_v18  ;;  %v9631_v52 = vadd.f32 %v3898_v59, %v11556_v35  ;;  %v3754_v17 = vpop.f32.mrb[29].mxu0  ;;  %v3900_v47 = vpop.f32.mrb[29].mxu1 }
 0x337   :  { %v9616_v14 = vadd.f32 %v3754_v17, %v11560_v50  ;;  %v9632_v11 = vadd.f32 %v3900_v47, %v11564_v4  ;;  %v3756_v1 = vpop.f32.mrb[30].mxu0  ;;  %v3902_v21 = vpop.f32.mrb[30].mxu1  ;;  %4295 = vmatpush1.bf16.msra.mxu0 %v8987_v62  ;;  %4441 = vmatpush1.bf16.msra.mxu1 %v8989_v3  ;;  %v581_v62 = vld [vmem:[#allocation6 + $0xf70] sm:$0xff]  ;;  %v574_v3 = vld [vmem:[#allocation6 + $0xf38] sm:$0xff] }
 0x338   :  { %4591 = vst [vmem:[#allocation2 + $0x320] sm:$0xff] %v9615_v34  ;;  %4593 = vst [vmem:[#allocation2 + $0x330] sm:$0xff] %v9631_v52  ;;  %v9617_v54 = vadd.f32 %v3756_v1, %v11552_v18  ;;  %v9633_v5 = vadd.f32 %v3902_v21, %v11556_v35  ;;  %v3758_v59 = vpop.f32.mrb[31].mxu0  ;;  %v3904_v41 = vpop.f32.mrb[31].mxu1  ;;  %4296 = vmatprep.subr.bf16.mxu0 %v9004_v46  ;;  %4442 = vmatprep.subr.bf16.mxu1 %v9006_v25  ;;  %v582_v34 = vld [vmem:[#allocation6 + $0xf78] sm:$0xff]  ;;  %v589_v52 = vld [vmem:[#allocation6 + $0xfb0] sm:$0xff] }
 0x339   :  { %4592 = vst [vmem:[#allocation2 + $0x328] sm:$0xff] %v9616_v14  ;;  %4594 = vst [vmem:[#allocation2 + $0x338] sm:$0xff] %v9632_v11  ;;  %v9618_v9 = vadd.f32 %v3758_v59, %v11560_v50  ;;  %v9634_v27 = vadd.f32 %v3904_v41, %v11564_v4  ;;  %v9019_v18 = vcombine.low %v557_v23, %v565_v19  ;;  %v597_v17 = vld [vmem:[#allocation6 + $0xff0] sm:$0xff]  ;;  %v590_v50 = vld [vmem:[#allocation6 + $0xfb8] sm:$0xff] }
 0x33a   :  { %4607 = vst [vmem:[#allocation2 + $0x3a0] sm:$0xff] %v9617_v54  ;;  %4609 = vst [vmem:[#allocation2 + $0x3b0] sm:$0xff] %v9633_v5  ;;  %v9021_v35 = vcombine.low %v558_v51, %v566_v55  ;;  %v9036_v46 = vcombine.high %v573_v22, %v581_v62  ;;  %v9038_v25 = vcombine.high %v574_v3, %v582_v34  ;;  %v598_v47 = vld [vmem:[#allocation6 + $0xff8] sm:$0xff]  ;;  %v14445_v55 = vsub.s32 3, %v11396_v33 }
 0x33b   :  { %4608 = vst [vmem:[#allocation2 + $0x3a8] sm:$0xff] %v9618_v9  ;;  %4610 = vst [vmem:[#allocation2 + $0x3b8] sm:$0xff] %v9634_v27  ;;  %4297 = vmatpush1.bf16.msra.mxu0 %v9003_v60  ;;  %4443 = vmatpush1.bf16.msra.mxu1 %v9005_v31  ;;  %v9035_v41 = vcombine.low %v573_v22, %v581_v62  ;;  %v9037_v4 = vcombine.low %v574_v3, %v582_v34 }
 0x33c   :  { %4298 = vmatprep.subr.bf16.mxu0 %v9020_v20  ;;  %4444 = vmatprep.subr.bf16.mxu1 %v9022_v43  ;;  %v9052_v14 = vcombine.high %v589_v52, %v597_v17  ;;  %v9054_v11 = vcombine.high %v590_v50, %v598_v47  ;;  %v9051_v23 = vcombine.low %v589_v52, %v597_v17 }
 0x33d   :  { %v9053_v19 = vcombine.low %v590_v50, %v598_v47 }
 0x33f   :  { %4299 = vmatpush1.bf16.msra.mxu0 %v9019_v18  ;;  %4445 = vmatpush1.bf16.msra.mxu1 %v9021_v35 }
 0x340   :  { %4300 = vmatprep.subr.bf16.mxu0 %v9036_v46  ;;  %4446 = vmatprep.subr.bf16.mxu1 %v9038_v25 }
 0x343   :  { %4301 = vmatpush1.bf16.msra.mxu0 %v9035_v41  ;;  %4447 = vmatpush1.bf16.msra.mxu1 %v9037_v4 }
 0x344   :  { %4302 = vmatprep.subr.bf16.mxu0 %v9052_v14  ;;  %4448 = vmatprep.subr.bf16.mxu1 %v9054_v11 }
 0x347   :  { %4303 = vmatpush1.bf16.msra.mxu0 %v9051_v23  ;;  %4449 = vmatpush1.bf16.msra.mxu1 %v9053_v19 }
 0x34a   :  { %4305 = vmatmul.mubr.bf16.vlgmr.msra.gmra.mrb[48].mxu0 %v11510_v6  ;;  %4451 = vmatmul.mubr.bf16.vlgmr.msra.gmra.mrb[48].mxu1 %v11510_v6  ;;  %v11664_v6 = vld [vmem:[#allocation9 + $0x8] sm:$0xff] }
 0x34b   :  { %4314 = vmatprep.mubr.bf16.mxu0 %v11514_v37  ;;  %4460 = vmatprep.mubr.bf16.mxu1 %v11514_v37  ;;  %v14442_v37 = vsub.s32 0, %v11396_v33 }
 0x352   :  { %4315 = vmatmul.mubr.bf16.gmra.mrb[52].mxu0 %v11518_v53  ;;  %4461 = vmatmul.mubr.bf16.gmra.mrb[52].mxu1 %v11518_v53  ;;  %v11669_v53 = vrot.slane %v11664_v6, %v14442_v37 }
 0x353   :  { %4324 = vmatprep.mubr.bf16.mxu0 %v11522_v49  ;;  %4470 = vmatprep.mubr.bf16.mxu1 %v11522_v49  ;;  %v14443_v49 = vsub.s32 2, %v11396_v33 }
 0x355   :  { %v11674_v51 = vrot.slane %v11664_v6, %v14443_v49 }
 0x35a   :  { %4325 = vmatmul.mubr.bf16.gmra.mrb[56].mxu0 %v11526_v12  ;;  %4471 = vmatmul.mubr.bf16.gmra.mrb[56].mxu1 %v11526_v12  ;;  %v14444_v12 = vsub.s32 1, %v11396_v33 }
 0x35b   :  { %4334 = vmatprep.mubr.bf16.mxu0 %v11530_v28  ;;  %4480 = vmatprep.mubr.bf16.mxu1 %v11530_v28 }
 0x35c   :  { %v11679_v28 = vrot.slane %v11664_v6, %v14444_v12 }
 0x362   :  { %4335 = vmatmul.mubr.bf16.gmra.mrb[60].mxu0 %v11534_v57  ;;  %4481 = vmatmul.mubr.bf16.gmra.mrb[60].mxu1 %v11534_v57  ;;  %v11684_v57 = vrot.slane %v11664_v6, %v14445_v55 }
 0x39d   :  { %v4014_v60 = vpop.f32.mrb[32].mxu0  ;;  %v4160_v31 = vpop.f32.mrb[32].mxu1 }
 0x39e   :  { %v9635_v1 = vadd.f32 %v4014_v60, %v11669_v53  ;;  %v9651_v21 = vadd.f32 %v4160_v31, %v11674_v51  ;;  %v4016_v20 = vpop.f32.mrb[33].mxu0  ;;  %v4162_v54 = vpop.f32.mrb[33].mxu1 }
 0x39f   :  { %v9636_v5 = vadd.f32 %v4016_v20, %v11679_v28  ;;  %v9652_v59 = vadd.f32 %v4162_v54, %v11684_v57  ;;  %v4018_v43 = vpop.f32.mrb[34].mxu0  ;;  %v4164_v22 = vpop.f32.mrb[34].mxu1 }
 0x3a0   :  { %4499 = vst [vmem:[#allocation2 + $0x40] sm:$0xff] %v9635_v1  ;;  %4501 = vst [vmem:[#allocation2 + $0x50] sm:$0xff] %v9651_v21  ;;  %v9637_v9 = vadd.f32 %v4018_v43, %v11669_v53  ;;  %v9653_v27 = vadd.f32 %v4164_v22, %v11674_v51  ;;  %v4020_v62 = vpop.f32.mrb[35].mxu0  ;;  %v4166_v3 = vpop.f32.mrb[35].mxu1 }
 0x3a1   :  { %4500 = vst [vmem:[#allocation2 + $0x48] sm:$0xff] %v9636_v5  ;;  %4502 = vst [vmem:[#allocation2 + $0x58] sm:$0xff] %v9652_v59  ;;  %v9638_v34 = vadd.f32 %v4020_v62, %v11679_v28  ;;  %v9654_v18 = vadd.f32 %v4166_v3, %v11684_v57 }
 0x3a2   :  { %4515 = vst [vmem:[#allocation2 + $0xc0] sm:$0xff] %v9637_v9  ;;  %4517 = vst [vmem:[#allocation2 + $0xd0] sm:$0xff] %v9653_v27 }
 0x3a3   :  { %4516 = vst [vmem:[#allocation2 + $0xc8] sm:$0xff] %v9638_v34  ;;  %4518 = vst [vmem:[#allocation2 + $0xd8] sm:$0xff] %v9654_v18 }
 0x3a5   :  { %v4024_v35 = vpop.f32.mrb[36].mxu0  ;;  %v4170_v46 = vpop.f32.mrb[36].mxu1 }
 0x3a6   :  { %v9639_v25 = vadd.f32 %v4024_v35, %v11669_v53  ;;  %v9655_v52 = vadd.f32 %v4170_v46, %v11674_v51  ;;  %v4026_v17 = vpop.f32.mrb[37].mxu0  ;;  %v4172_v50 = vpop.f32.mrb[37].mxu1 }
 0x3a7   :  { %v9640_v47 = vadd.f32 %v4026_v17, %v11679_v28  ;;  %v9656_v41 = vadd.f32 %v4172_v50, %v11684_v57  ;;  %v4028_v4 = vpop.f32.mrb[38].mxu0  ;;  %v4174_v14 = vpop.f32.mrb[38].mxu1 }
 0x3a8   :  { %4531 = vst [vmem:[#allocation2 + $0x140] sm:$0xff] %v9639_v25  ;;  %4533 = vst [vmem:[#allocation2 + $0x150] sm:$0xff] %v9655_v52  ;;  %v9641_v11 = vadd.f32 %v4028_v4, %v11669_v53  ;;  %v9657_v23 = vadd.f32 %v4174_v14, %v11674_v51  ;;  %v4030_v19 = vpop.f32.mrb[39].mxu0  ;;  %v4176_v37 = vpop.f32.mrb[39].mxu1 }
 0x3a9   :  { %4532 = vst [vmem:[#allocation2 + $0x148] sm:$0xff] %v9640_v47  ;;  %4534 = vst [vmem:[#allocation2 + $0x158] sm:$0xff] %v9656_v41  ;;  %v9642_v49 = vadd.f32 %v4030_v19, %v11679_v28  ;;  %v9658_v12 = vadd.f32 %v4176_v37, %v11684_v57 }
 0x3aa   :  { %4547 = vst [vmem:[#allocation2 + $0x1c0] sm:$0xff] %v9641_v11  ;;  %4549 = vst [vmem:[#allocation2 + $0x1d0] sm:$0xff] %v9657_v23 }
 0x3ab   :  { %4548 = vst [vmem:[#allocation2 + $0x1c8] sm:$0xff] %v9642_v49  ;;  %4550 = vst [vmem:[#allocation2 + $0x1d8] sm:$0xff] %v9658_v12  ;;  %v14446_v12 = vsub.s32 4, %v11396_v33 }
 0x3ad   :  { %v4034_v55 = vpop.f32.mrb[40].mxu0  ;;  %v4180_v60 = vpop.f32.mrb[40].mxu1 }
 0x3ae   :  { %v9643_v31 = vadd.f32 %v4034_v55, %v11669_v53  ;;  %v9659_v1 = vadd.f32 %v4180_v60, %v11674_v51  ;;  %v4036_v21 = vpop.f32.mrb[41].mxu0  ;;  %v4182_v20 = vpop.f32.mrb[41].mxu1  ;;  %v11721_v55 = vrot.slane %v11664_v6, %v14446_v12  ;;  %v14448_v60 = vsub.s32 5, %v11396_v33 }
 0x3af   :  { %v9644_v54 = vadd.f32 %v4036_v21, %v11679_v28  ;;  %v9660_v5 = vadd.f32 %v4182_v20, %v11684_v57  ;;  %v4038_v59 = vpop.f32.mrb[42].mxu0  ;;  %v4184_v43 = vpop.f32.mrb[42].mxu1 }
 0x3b0   :  { %4563 = vst [vmem:[#allocation2 + $0x240] sm:$0xff] %v9643_v31  ;;  %4565 = vst [vmem:[#allocation2 + $0x250] sm:$0xff] %v9659_v1  ;;  %v9645_v22 = vadd.f32 %v4038_v59, %v11669_v53  ;;  %v9661_v9 = vadd.f32 %v4184_v43, %v11674_v51  ;;  %v4040_v27 = vpop.f32.mrb[43].mxu0  ;;  %v4186_v62 = vpop.f32.mrb[43].mxu1 }
 0x3b1   :  { %4564 = vst [vmem:[#allocation2 + $0x248] sm:$0xff] %v9644_v54  ;;  %4566 = vst [vmem:[#allocation2 + $0x258] sm:$0xff] %v9660_v5  ;;  %v9646_v3 = vadd.f32 %v4040_v27, %v11679_v28  ;;  %v9662_v34 = vadd.f32 %v4186_v62, %v11684_v57 }
 0x3b2   :  { %4579 = vst [vmem:[#allocation2 + $0x2c0] sm:$0xff] %v9645_v22  ;;  %4581 = vst [vmem:[#allocation2 + $0x2d0] sm:$0xff] %v9661_v9 }
 0x3b3   :  { %4580 = vst [vmem:[#allocation2 + $0x2c8] sm:$0xff] %v9646_v3  ;;  %4582 = vst [vmem:[#allocation2 + $0x2d8] sm:$0xff] %v9662_v34 }
 0x3b5   :  { %v4044_v18 = vpop.f32.mrb[44].mxu0  ;;  %v4190_v35 = vpop.f32.mrb[44].mxu1 }
 0x3b6   :  { %v9647_v46 = vadd.f32 %v4044_v18, %v11669_v53  ;;  %v9663_v25 = vadd.f32 %v4190_v35, %v11674_v51  ;;  %v4046_v52 = vpop.f32.mrb[45].mxu0  ;;  %v4192_v17 = vpop.f32.mrb[45].mxu1 }
 0x3b7   :  { %v9648_v50 = vadd.f32 %v4046_v52, %v11679_v28  ;;  %v9664_v47 = vadd.f32 %v4192_v17, %v11684_v57  ;;  %v4048_v41 = vpop.f32.mrb[46].mxu0  ;;  %v4194_v4 = vpop.f32.mrb[46].mxu1 }
 0x3b8   :  { %4595 = vst [vmem:[#allocation2 + $0x340] sm:$0xff] %v9647_v46  ;;  %4597 = vst [vmem:[#allocation2 + $0x350] sm:$0xff] %v9663_v25  ;;  %v9649_v14 = vadd.f32 %v4048_v41, %v11669_v53  ;;  %v9665_v11 = vadd.f32 %v4194_v4, %v11674_v51  ;;  %v4050_v23 = vpop.f32.mrb[47].mxu0  ;;  %v4196_v19 = vpop.f32.mrb[47].mxu1  ;;  %v14447_v53 = vsub.s32 6, %v11396_v33 }
 0x3b9   :  { %4596 = vst [vmem:[#allocation2 + $0x348] sm:$0xff] %v9648_v50  ;;  %4598 = vst [vmem:[#allocation2 + $0x358] sm:$0xff] %v9664_v47  ;;  %v9650_v37 = vadd.f32 %v4050_v23, %v11679_v28  ;;  %v9666_v49 = vadd.f32 %v4196_v19, %v11684_v57  ;;  %v11731_v28 = vrot.slane %v11664_v6, %v14448_v60  ;;  %v14449_v57 = vsub.s32 7, %v11396_v33 }
 0x3ba   :  { %4611 = vst [vmem:[#allocation2 + $0x3c0] sm:$0xff] %v9649_v14  ;;  %4613 = vst [vmem:[#allocation2 + $0x3d0] sm:$0xff] %v9665_v11  ;;  %v11726_v51 = vrot.slane %v11664_v6, %v14447_v53 }
 0x3bb   :  { %4612 = vst [vmem:[#allocation2 + $0x3c8] sm:$0xff] %v9650_v37  ;;  %4614 = vst [vmem:[#allocation2 + $0x3d8] sm:$0xff] %v9666_v49  ;;  %v11736_v31 = vrot.slane %v11664_v6, %v14449_v57 }
 0x41d   :  { %v4306_v1 = vpop.f32.mrb[48].mxu0  ;;  %v4452_v21 = vpop.f32.mrb[48].mxu1 }
 0x41e   :  { %v9667_v20 = vadd.f32 %v4306_v1, %v11721_v55  ;;  %v9683_v54 = vadd.f32 %v4452_v21, %v11726_v51  ;;  %v4308_v5 = vpop.f32.mrb[49].mxu0  ;;  %v4454_v59 = vpop.f32.mrb[49].mxu1 }
 0x41f   :  { %v9668_v43 = vadd.f32 %v4308_v5, %v11731_v28  ;;  %v9684_v22 = vadd.f32 %v4454_v59, %v11736_v31  ;;  %v4310_v9 = vpop.f32.mrb[50].mxu0  ;;  %v4456_v27 = vpop.f32.mrb[50].mxu1 }
 0x420   :  { %4503 = vst [vmem:[#allocation2 + $0x60] sm:$0xff] %v9667_v20  ;;  %4505 = vst [vmem:[#allocation2 + $0x70] sm:$0xff] %v9683_v54  ;;  %v9669_v33 = vadd.f32 %v4310_v9, %v11721_v55  ;;  %v9685_v6 = vadd.f32 %v4456_v27, %v11726_v51  ;;  %v4312_v62 = vpop.f32.mrb[51].mxu0  ;;  %v4458_v3 = vpop.f32.mrb[51].mxu1 }
 0x421   :  { %4504 = vst [vmem:[#allocation2 + $0x68] sm:$0xff] %v9668_v43  ;;  %4506 = vst [vmem:[#allocation2 + $0x78] sm:$0xff] %v9684_v22  ;;  %v9670_v34 = vadd.f32 %v4312_v62, %v11731_v28  ;;  %v9686_v18 = vadd.f32 %v4458_v3, %v11736_v31 }
 0x422   :  { %4519 = vst [vmem:[#allocation2 + $0xe0] sm:$0xff] %v9669_v33  ;;  %4521 = vst [vmem:[#allocation2 + $0xf0] sm:$0xff] %v9685_v6 }
 0x423   :  { %4520 = vst [vmem:[#allocation2 + $0xe8] sm:$0xff] %v9670_v34  ;;  %4522 = vst [vmem:[#allocation2 + $0xf8] sm:$0xff] %v9686_v18 }
 0x425   :  { %v4316_v35 = vpop.f32.mrb[52].mxu0  ;;  %v4462_v46 = vpop.f32.mrb[52].mxu1 }
 0x426   :  { %v9671_v25 = vadd.f32 %v4316_v35, %v11721_v55  ;;  %v9687_v52 = vadd.f32 %v4462_v46, %v11726_v51  ;;  %v4318_v17 = vpop.f32.mrb[53].mxu0  ;;  %v4464_v50 = vpop.f32.mrb[53].mxu1 }
 0x427   :  { %v9672_v47 = vadd.f32 %v4318_v17, %v11731_v28  ;;  %v9688_v41 = vadd.f32 %v4464_v50, %v11736_v31  ;;  %v4320_v4 = vpop.f32.mrb[54].mxu0  ;;  %v4466_v14 = vpop.f32.mrb[54].mxu1 }
 0x428   :  { %4535 = vst [vmem:[#allocation2 + $0x160] sm:$0xff] %v9671_v25  ;;  %4537 = vst [vmem:[#allocation2 + $0x170] sm:$0xff] %v9687_v52  ;;  %v9673_v11 = vadd.f32 %v4320_v4, %v11721_v55  ;;  %v9689_v23 = vadd.f32 %v4466_v14, %v11726_v51  ;;  %v4322_v19 = vpop.f32.mrb[55].mxu0  ;;  %v4468_v37 = vpop.f32.mrb[55].mxu1 }
 0x429   :  { %4536 = vst [vmem:[#allocation2 + $0x168] sm:$0xff] %v9672_v47  ;;  %4538 = vst [vmem:[#allocation2 + $0x178] sm:$0xff] %v9688_v41  ;;  %v9674_v49 = vadd.f32 %v4322_v19, %v11731_v28  ;;  %v9690_v12 = vadd.f32 %v4468_v37, %v11736_v31  ;;  %v11770_v37 = vmov 0.0  }
 0x42a   :  { %4551 = vst [vmem:[#allocation2 + $0x1e0] sm:$0xff] %v9673_v11  ;;  %4553 = vst [vmem:[#allocation2 + $0x1f0] sm:$0xff] %v9689_v23 }
 0x42b   :  { %4552 = vst [vmem:[#allocation2 + $0x1e8] sm:$0xff] %v9674_v49  ;;  %4554 = vst [vmem:[#allocation2 + $0x1f8] sm:$0xff] %v9690_v12  ;;  %v11772_v49 = vmov 0.0   ;;  %v11774_v12 = vmov 0.0  }
 0x42d   :  { %v4326_v53 = vpop.f32.mrb[56].mxu0  ;;  %v4472_v60 = vpop.f32.mrb[56].mxu1 }
 0x42e   :  { %v9675_v57 = vadd.f32 %v4326_v53, %v11721_v55  ;;  %v9691_v1 = vadd.f32 %v4472_v60, %v11726_v51  ;;  %v4328_v21 = vpop.f32.mrb[57].mxu0  ;;  %v4474_v20 = vpop.f32.mrb[57].mxu1  ;;  %v11780_v53 = vmov 0.0   ;;  %v11782_v60 = vmov 0.0  }
 0x42f   :  { %v9676_v54 = vadd.f32 %v4328_v21, %v11731_v28  ;;  %v9692_v5 = vadd.f32 %v4474_v20, %v11736_v31  ;;  %v4330_v59 = vpop.f32.mrb[58].mxu0  ;;  %v4476_v43 = vpop.f32.mrb[58].mxu1 }
 0x430   :  { %4567 = vst [vmem:[#allocation2 + $0x260] sm:$0xff] %v9675_v57  ;;  %4569 = vst [vmem:[#allocation2 + $0x270] sm:$0xff] %v9691_v1  ;;  %v9677_v22 = vadd.f32 %v4330_v59, %v11721_v55  ;;  %v9693_v9 = vadd.f32 %v4476_v43, %v11726_v51  ;;  %v4332_v27 = vpop.f32.mrb[59].mxu0  ;;  %v4478_v33 = vpop.f32.mrb[59].mxu1 }
 0x431   :  { %4568 = vst [vmem:[#allocation2 + $0x268] sm:$0xff] %v9676_v54  ;;  %4570 = vst [vmem:[#allocation2 + $0x278] sm:$0xff] %v9692_v5  ;;  %v9678_v6 = vadd.f32 %v4332_v27, %v11731_v28  ;;  %v9694_v62 = vadd.f32 %v4478_v33, %v11736_v31 }
 0x432   :  { %4583 = vst [vmem:[#allocation2 + $0x2e0] sm:$0xff] %v9677_v22  ;;  %4585 = vst [vmem:[#allocation2 + $0x2f0] sm:$0xff] %v9693_v9 }
 0x433   :  { %4584 = vst [vmem:[#allocation2 + $0x2e8] sm:$0xff] %v9678_v6  ;;  %4586 = vst [vmem:[#allocation2 + $0x2f8] sm:$0xff] %v9694_v62 }
 0x435   :  { %v4336_v3 = vpop.f32.mrb[60].mxu0  ;;  %v4482_v34 = vpop.f32.mrb[60].mxu1 }
 0x436   :  { %v9679_v18 = vadd.f32 %v4336_v3, %v11721_v55  ;;  %v9695_v35 = vadd.f32 %v4482_v34, %v11726_v51  ;;  %v4338_v46 = vpop.f32.mrb[61].mxu0  ;;  %v4484_v25 = vpop.f32.mrb[61].mxu1 }
 0x437   :  { %v9680_v52 = vadd.f32 %v4338_v46, %v11731_v28  ;;  %v9696_v17 = vadd.f32 %v4484_v25, %v11736_v31  ;;  %v4340_v50 = vpop.f32.mrb[62].mxu0  ;;  %v4486_v47 = vpop.f32.mrb[62].mxu1 }
 0x438   :  { %4599 = vst [vmem:[#allocation2 + $0x360] sm:$0xff] %v9679_v18  ;;  %4601 = vst [vmem:[#allocation2 + $0x370] sm:$0xff] %v9695_v35  ;;  %v9681_v41 = vadd.f32 %v4340_v50, %v11721_v55  ;;  %v9697_v4 = vadd.f32 %v4486_v47, %v11726_v51  ;;  %v4342_v14 = vpop.f32.mrb[63].mxu0  ;;  %v4488_v11 = vpop.f32.mrb[63].mxu1  ;;  %v11776_v55 = vmov 0.0   ;;  %v11778_v51 = vmov 0.0  }
 0x439   :  { %4600 = vst [vmem:[#allocation2 + $0x368] sm:$0xff] %v9680_v52  ;;  %4602 = vst [vmem:[#allocation2 + $0x378] sm:$0xff] %v9696_v17  ;;  %v9682_v23 = vadd.f32 %v4342_v14, %v11731_v28  ;;  %v9698_v19 = vadd.f32 %v4488_v11, %v11736_v31  ;;  %v11784_v28 = vmov 0.0  }
 0x43a   :  { %4615 = vst [vmem:[#allocation2 + $0x3e0] sm:$0xff] %v9681_v41  ;;  %4617 = vst [vmem:[#allocation2 + $0x3f0] sm:$0xff] %v9697_v4 }
 0x43b   :  { %4616 = vst [vmem:[#allocation2 + $0x3e8] sm:$0xff] %v9682_v23  ;;  %4618 = vst [vmem:[#allocation2 + $0x3f8] sm:$0xff] %v9698_v19 }
 0x43c LB: > { %v14450_v24 = vld [vmem:[#allocation40_spill] sm:$0xff]  ;;  %v14453_v13 = vld [vmem:[#allocation113_spill] sm:$0xff]  ;;  %v14456_v7 = vld [vmem:[#allocation90_spill] sm:$0xff]  ;;  %v9331_v54 = vcombine.high %v10820_v58, %v10836_v42  ;;  %v9330_v59 = vcombine.low %v10820_v58, %v10836_v42  ;;  %v9091_v43 = vcombine.high %v10340_v32, %v10356_v40  ;;  %v9090_v9 = vcombine.low %v10340_v32, %v10356_v40  ;;  %s9055_s26 = sshll.u32 %s10186_s3, 3  ;;  %s5136_s3 = sadd.s32 1, %s10186_s3   ;;  %s10186_s3 = sphi %s11786_s3, %s5136_s3   ;;  %v10182_v28 = vphi %v11784_v28, %v15030_v28   ;;  %v10178_v60 = vphi %v11782_v60, %v15029_v60   ;;  %v10174_v53 = vphi %v11780_v53, %v15028_v53   ;;  %v10170_v51 = vphi %v11778_v51, %v15027_v51   ;;  %v10166_v55 = vphi %v11776_v55, %v12910_v55   ;;  %v10162_v12 = vphi %v11774_v12, %v12912_v12   ;;  %v10158_v49 = vphi %v11772_v49, %v12926_v49   ;;  %v10154_v37 = vphi %v11770_v37, %v8466_v37  }
 0x43d   : > { %v14451_v16 = vld [vmem:[#allocation32_spill] sm:$0xff]  ;;  %v14454_v10 = vld [vmem:[#allocation301_spill] sm:$0xff]  ;;  %v9107_v33 = vcombine.high %v10372_v48, %v10388_v56  ;;  %v9363_v6 = vcombine.high %v10884_v61, %v10900_v29  ;;  %v9106_v62 = vcombine.low %v10372_v48, %v10388_v56  ;;  %v9362_v3 = vcombine.low %v10884_v61, %v10900_v29  ;;  %s5146_s1 = sshra.s32 %s9055_s26, 3  ;;  %p5133_p4 = scmp.ge.s32.totalorder %s5136_s3, 8  }
 0x43e   : > { %v14452_v15 = vld [vmem:[#allocation344_spill] sm:$0xff]  ;;  %v14457_v2 = vld [vmem:[#allocation265_spill] sm:$0xff]  ;;  %v9075_v20 = vcombine.high %v14451_v16, %v14450_v24  ;;  %v9074_v5 = vcombine.low %v14451_v16, %v14450_v24  ;;  %v9347_v22 = vcombine.high %v10852_v26, %v14454_v10  ;;  %v9346_v27 = vcombine.low %v10852_v26, %v14454_v10  ;;  %v14913_v24 = vld [vmem:[#allocation382_spill] sm:$0xff]  ;;  %s9570_s13 = sshll.u32 %s5146_s1, 7  ;;  %s10196_s15 = smov (%p5133_p4), [#allocation11]  }
 0x43f   : > { %v14455_v8 = vld [vmem:[#allocation24_spill] sm:$0xff]  ;;  %v9315_v57 = vcombine.high %v14457_v2, %v10804_v63  ;;  %v9314_v21 = vcombine.low %v14457_v2, %v10804_v63  ;;  %v9123_v34 = vcombine.high %v10404_v39, %v10420_v38  ;;  %v9379_v18 = vcombine.high %v10916_v44, %v10932_v36  ;;  %v14459_v4 = vld [vmem:[#allocation105_spill] sm:$0xff]  ;;  %s12896_s14 = scalar_lea.vmem [#allocation2], %s9570_s13  ;;  %s8485_s16 = sshll.u32 (%p5133_p4), %s10196_s15, 4  ;;  %s8486_s16 = int_to_ptr.vmem [resolvable:$true] %s8485_s16 }
 0x440   : > { %v14458_v0 = vld [vmem:[#allocation16_spill] sm:$0xff]  ;;  %v9122_v35 = vcombine.low %v10404_v39, %v10420_v38  ;;  %v9378_v46 = vcombine.low %v10916_v44, %v10932_v36  ;;  %v9139_v25 = vcombine.high %v14456_v7, %v10452_v30  ;;  %v9395_v52 = vcombine.high %v10948_v45, %v14452_v15  ;;  %s10086_s17 = scalar_lea.vmem (%p5133_p4), %s8486_s16, 512  ;;  %p10091_p6 = scmp.lt.s32.totalorder (%p5133_p4), %s8486_s16, %s8486_s16 }
 0x441   : > { %v9059_v31 = vcombine.high %v14458_v0, %v14455_v8  ;;  %v9058_v1 = vcombine.low %v14458_v0, %v14455_v8  ;;  %7772 = vmatprep.subr.bf16.mxu1 %v9315_v57  ;;  %v11855_v17 = vpack.c.bf16 %v10178_v60, %v10178_v60  ;;  %v11857_v50 = vpack.c.bf16 %v10170_v51, %v10170_v51  ;;  %v14460_v11 = vld [vmem:[#allocation360_spill] sm:$0xff]  ;;  %v14463_v57 = vld [vmem:[#allocation121_spill] sm:$0xff]  ;;  %p10087_p5 = scmp.ne.s32.totalorder (%p5133_p4), %s8486_s16, %s10086_s17  ;;  %p10092_p7 = scmp.lt.s32.totalorder (%p5133_p4), %s10086_s17, %s10086_s17 }
 0x442   : > { %7773 = vmatpush1.bf16.msra.mxu1 %v9314_v21  ;;  %v9138_v47 = vcombine.low %v14456_v7, %v10452_v30  ;;  %v9394_v41 = vcombine.low %v10948_v45, %v14452_v15  ;;  %v9155_v14 = vcombine.high %v14459_v4, %v14453_v13  ;;  %v14461_v23 = vld [vmem:[#allocation352_spill] sm:$0xff]  ;;  %v9154_v51 = vcombine.low %v14459_v4, %v14453_v13  ;;  %v14489_v8 = vld [vmem:[#allocation217_spill] sm:$0xff] }
 0x443   : > { %7731 = vmatprep.subr.bf16.mxu0 %v9059_v31  ;;  %7774 = vmatprep.subr.bf16.mxu1 %v9331_v54  ;;  %v9411_v19 = vcombine.high %v14461_v23, %v14460_v11  ;;  %v9410_v60 = vcombine.low %v14461_v23, %v14460_v11  ;;  %v14462_v31 = vld [vmem:[#allocation129_spill] sm:$0xff]  ;;  %v14464_v21 = vld [vmem:[#allocation376_spill] sm:$0xff]  ;;  %v11951_v13 = vpack.c.bf16 %v10182_v28, %v10182_v28  ;;  %p10093_p8 = por (%p5133_p4), %p10092_p7, %p10091_p6 }
 0x444   : > { %7732 = vmatpush1.bf16.msra.mxu0 %v9058_v1  ;;  %7763 = vmatprep.mubr.bf16.mxu0 %v11855_v17  ;;  %v9171_v1 = vcombine.high %v14463_v57, %v14462_v31  ;;  %v14487_v4 = vld [vmem:[#allocation448_spill] sm:$0xff] }
 0x445   : > { %7733 = vmatprep.subr.bf16.mxu0 %v9075_v20  ;;  %7804 = vmatprep.mubr.bf16.mxu1 %v11857_v50  ;;  %v14465_v20 = vld [vmem:[#allocation368_spill] sm:$0xff]  ;;  %p10094_p9 = pnand (%p5133_p4), %p10093_p8, %p10087_p5 }
 0x446   : > { %7775 = vmatpush1.bf16.msra.mxu1 %v9330_v59  ;;  %v9427_v54 = vcombine.high %v14465_v20, %v14464_v21  ;;  %v9426_v59 = vcombine.low %v14465_v20, %v14464_v21  ;;  %v14491_v10 = vld [vmem:[#allocation464_spill] sm:$0xff] }
 0x447   : > { %7776 = vmatprep.subr.bf16.mxu1 %v9347_v22  ;;  %v14467_v22 = vld [vmem:[#allocation137_spill] sm:$0xff]  ;;  %v14510_v28 = vld [vmem:[#allocation280_spill] sm:$0xff] }
 0x448   : > { %7734 = vmatpush1.bf16.msra.mxu0 %v9074_v5  ;;  %v9170_v5 = vcombine.low %v14463_v57, %v14462_v31  ;;  %v14763_v20 = vld [vmem:[#allocation380_spill] sm:$0xff] }
 0x449   : > { %7735 = vmatprep.subr.bf16.mxu0 %v9091_v43  ;;  %v14466_v43 = vld [vmem:[#allocation145_spill] sm:$0xff] }
 0x44a   : > { %7777 = vmatpush1.bf16.msra.mxu1 %v9346_v27  ;;  %v14468_v27 = vld [vmem:[#allocation392_spill] sm:$0xff] }
 0x44b   : > { %7778 = vmatprep.subr.bf16.mxu1 %v9363_v6 }
 0x44c   : > { %7736 = vmatpush1.bf16.msra.mxu0 %v9090_v9  ;;  %v9187_v9 = vcombine.high %v14467_v22, %v14466_v43 }
 0x44d   : > { %7737 = vmatprep.subr.bf16.mxu0 %v9107_v33  ;;  %v14469_v33 = vld [vmem:[#allocation384_spill] sm:$0xff] }
 0x44e   : > { %7779 = vmatpush1.bf16.msra.mxu1 %v9362_v3  ;;  %v9443_v6 = vcombine.high %v14469_v33, %v14468_v27  ;;  %v9442_v3 = vcombine.low %v14469_v33, %v14468_v27 }
 0x44f   : > { %7780 = vmatprep.subr.bf16.mxu1 %v9379_v18  ;;  %v14471_v18 = vld [vmem:[#allocation153_spill] sm:$0xff] }
 0x450   : > { %7738 = vmatpush1.bf16.msra.mxu0 %v9106_v62  ;;  %v9186_v62 = vcombine.low %v14467_v22, %v14466_v43  ;;  %v14839_v22 = vld [vmem:[#allocation381_spill] sm:$0xff] }
 0x451   : > { %7739 = vmatprep.subr.bf16.mxu0 %v9123_v34  ;;  %v14470_v34 = vld [vmem:[#allocation161_spill] sm:$0xff] }
 0x452   : > { %7781 = vmatpush1.bf16.msra.mxu1 %v9378_v46  ;;  %v14472_v46 = vld [vmem:[#allocation408_spill] sm:$0xff] }
 0x453   : > { %7782 = vmatprep.subr.bf16.mxu1 %v9395_v52 }
 0x454   : > { %7740 = vmatpush1.bf16.msra.mxu0 %v9122_v35  ;;  %v9203_v35 = vcombine.high %v14471_v18, %v14470_v34 }
 0x455   : > { %7741 = vmatprep.subr.bf16.mxu0 %v9139_v25  ;;  %v14473_v25 = vld [vmem:[#allocation400_spill] sm:$0xff] }
 0x456   : > { %7783 = vmatpush1.bf16.msra.mxu1 %v9394_v41  ;;  %v9459_v52 = vcombine.high %v14473_v25, %v14472_v46  ;;  %v9458_v41 = vcombine.low %v14473_v25, %v14472_v46 }
 0x457   : > { %7784 = vmatprep.subr.bf16.mxu1 %v9411_v19  ;;  %v14475_v19 = vld [vmem:[#allocation169_spill] sm:$0xff] }
 0x458   : > { %7742 = vmatpush1.bf16.msra.mxu0 %v9138_v47  ;;  %v9202_v47 = vcombine.low %v14471_v18, %v14470_v34 }
 0x459   : > { %7743 = vmatprep.subr.bf16.mxu0 %v9155_v14  ;;  %v14474_v14 = vld [vmem:[#allocation177_spill] sm:$0xff] }
 0x45a   : > { %7785 = vmatpush1.bf16.msra.mxu1 %v9410_v60  ;;  %v14476_v60 = vld [vmem:[#allocation424_spill] sm:$0xff] }
 0x45b   : > { %7786 = vmatprep.subr.bf16.mxu1 %v9427_v54  ;;  %v14478_v54 = vld [vmem:[#allocation416_spill] sm:$0xff] }
 0x45c   : > { %7744 = vmatpush1.bf16.msra.mxu0 %v9154_v51  ;;  %v9219_v51 = vcombine.high %v14475_v19, %v14474_v14 }
 0x45d   : > { %7745 = vmatprep.subr.bf16.mxu0 %v9171_v1  ;;  %v14477_v1 = vmov %v14476_v60 }
 0x45e   : > { %7787 = vmatpush1.bf16.msra.mxu1 %v9426_v59  ;;  %v9218_v59 = vcombine.low %v14475_v19, %v14474_v14 }
 0x45f   : > { %7788 = vmatprep.subr.bf16.mxu1 %v9443_v6  ;;  %v14479_v6 = vld [vmem:[#allocation193_spill] sm:$0xff] }
 0x460   : > { %7746 = vmatpush1.bf16.msra.mxu0 %v9170_v5  ;;  %v9475_v5 = vcombine.high %v14478_v54, %v14476_v60  ;;  %v14483_v60 = vld [vmem:[#allocation209_spill] sm:$0xff] }
 0x461   : > { %7747 = vmatprep.subr.bf16.mxu0 %v9187_v9  ;;  %v9474_v9 = vcombine.low %v14478_v54, %v14477_v1  ;;  %v14484_v2 = vmov %v14483_v60  ;;  %v14485_v1 = vld [vmem:[#allocation201_spill] sm:$0xff] }
 0x462   : > { %7789 = vmatpush1.bf16.msra.mxu1 %v9442_v3 }
 0x463   : > { %7790 = vmatprep.subr.bf16.mxu1 %v9459_v52  ;;  %v14482_v52 = vld [vmem:[#allocation432_spill] sm:$0xff] }
 0x464   : > { %7748 = vmatpush1.bf16.msra.mxu0 %v9186_v62  ;;  %v14480_v62 = vld [vmem:[#allocation185_spill] sm:$0xff] }
 0x465   : > { %7749 = vmatprep.subr.bf16.mxu0 %v9203_v35  ;;  %v9235_v3 = vcombine.high %v14480_v62, %v14479_v6  ;;  %v14481_v35 = vld [vmem:[#allocation440_spill] sm:$0xff] }
 0x466   : > { %7791 = vmatpush1.bf16.msra.mxu1 %v9458_v41  ;;  %v9491_v0 = vcombine.high %v14482_v52, %v14481_v35  ;;  %v9490_v41 = vcombine.low %v14482_v52, %v14481_v35 }
 0x467   : > { %7792 = vmatprep.subr.bf16.mxu1 %v9475_v5  ;;  %v14486_v5 = vld [vmem:[#allocation456_spill] sm:$0xff] }
 0x468   : > { %7750 = vmatpush1.bf16.msra.mxu0 %v9202_v47  ;;  %v9234_v47 = vcombine.low %v14480_v62, %v14479_v6  ;;  %v9507_v7 = vcombine.high %v14487_v4, %v14486_v5  ;;  %v14488_v6 = vld [vmem:[#allocation225_spill] sm:$0xff] }
 0x469   : > { %7751 = vmatprep.subr.bf16.mxu0 %v9219_v51  ;;  %v9251_v51 = vcombine.high %v14485_v1, %v14483_v60  ;;  %v14492_v60 = vld [vmem:[#allocation241_spill] sm:$0xff] }
 0x46a   : > { %7793 = vmatpush1.bf16.msra.mxu1 %v9474_v9  ;;  %v9506_v9 = vcombine.low %v14487_v4, %v14486_v5  ;;  %v14496_v4 = vld [vmem:[#allocation480_spill] sm:$0xff] }
 0x46b   : > { %7794 = vmatprep.subr.bf16.mxu1 %v9491_v0  ;;  %v14490_v0 = vld [vmem:[#allocation472_spill] sm:$0xff] }
 0x46c   : > { %7752 = vmatpush1.bf16.msra.mxu0 %v9218_v59  ;;  %v9250_v59 = vcombine.low %v14485_v1, %v14484_v2  ;;  %v9523_v11 = vcombine.high %v14491_v10, %v14490_v0  ;;  %v14493_v1 = vmov %v14492_v60  ;;  %v14494_v2 = vld [vmem:[#allocation233_spill] sm:$0xff] }
 0x46d   : > { %7753 = vmatprep.subr.bf16.mxu0 %v9235_v3  ;;  %v9267_v3 = vcombine.high %v14489_v8, %v14488_v6 }
 0x46e   : > { %7795 = vmatpush1.bf16.msra.mxu1 %v9490_v41  ;;  %v9522_v41 = vcombine.low %v14491_v10, %v14490_v0  ;;  %v14498_v0 = vld [vmem:[#allocation249_spill] sm:$0xff] }
 0x46f   : > { %7796 = vmatprep.subr.bf16.mxu1 %v9507_v7  ;;  %v14495_v7 = vld [vmem:[#allocation488_spill] sm:$0xff] }
 0x470   : > { %7754 = vmatpush1.bf16.msra.mxu0 %v9234_v47  ;;  %v9266_v47 = vcombine.low %v14489_v8, %v14488_v6  ;;  %v9539_v5 = vcombine.high %v14496_v4, %v14495_v7  ;;  %v14497_v6 = vld [vmem:[#allocation257_spill] sm:$0xff]  ;;  %v14500_v8 = vld [vmem:[#allocation496_spill] sm:$0xff] }
 0x471   : > { %7755 = vmatprep.subr.bf16.mxu0 %v9251_v51  ;;  %v9283_v51 = vcombine.high %v14494_v2, %v14492_v60  ;;  %v14501_v60 = vld [vmem:[#allocation25_spill] sm:$0xff] }
 0x472   : > { %7797 = vmatpush1.bf16.msra.mxu1 %v9506_v9  ;;  %v9538_v9 = vcombine.low %v14496_v4, %v14495_v7  ;;  %v14505_v4 = vld [vmem:[#allocation266_spill] sm:$0xff] }
 0x473   : > { %7798 = vmatprep.subr.bf16.mxu1 %v9523_v11  ;;  %v14499_v11 = vld [vmem:[#allocation504_spill] sm:$0xff] }
 0x474   : > { %7756 = vmatpush1.bf16.msra.mxu0 %v9250_v59  ;;  %v9282_v59 = vcombine.low %v14494_v2, %v14493_v1  ;;  %v9555_v10 = vcombine.high %v14500_v8, %v14499_v11  ;;  %v14502_v1 = vmov %v14501_v60  ;;  %v14503_v2 = vld [vmem:[#allocation17_spill] sm:$0xff] }
 0x475   : > { %7757 = vmatprep.subr.bf16.mxu0 %v9267_v3  ;;  %v9299_v3 = vcombine.high %v14498_v0, %v14497_v6 }
 0x476   : > { %7799 = vmatpush1.bf16.msra.mxu1 %v9522_v41  ;;  %v9554_v41 = vcombine.low %v14500_v8, %v14499_v11  ;;  %v14509_v8 = vld [vmem:[#allocation287_spill] sm:$0xff]  ;;  %v14511_v11 = vmov %v14510_v28 }
 0x477   : > { %7800 = vmatprep.subr.bf16.mxu1 %v9539_v5  ;;  %v14504_v5 = vld [vmem:[#allocation273_spill] sm:$0xff]  ;;  %v9333_v14 = vcombine.high %v14510_v28, %v14509_v8 }
 0x478   : > { %7758 = vmatpush1.bf16.msra.mxu0 %v9266_v47  ;;  %v9298_v47 = vcombine.low %v14498_v0, %v14497_v6  ;;  %v9317_v7 = vcombine.high %v14505_v4, %v14504_v5 }
 0x479   : > { %7759 = vmatprep.subr.bf16.mxu0 %v9283_v51  ;;  %v9061_v51 = vcombine.high %v14503_v2, %v14501_v60  ;;  %v14507_v60 = vld [vmem:[#allocation33_spill] sm:$0xff] }
 0x47a   : > { %7801 = vmatpush1.bf16.msra.mxu1 %v9538_v9  ;;  %v9060_v9 = vcombine.low %v14503_v2, %v14502_v1  ;;  %v14508_v0 = vmov %v14507_v60  ;;  %v14516_v2 = vld [vmem:[#allocation294_spill] sm:$0xff] }
 0x47b   : > { %7802 = vmatprep.subr.bf16.mxu1 %v9555_v10  ;;  %v9316_v10 = vcombine.low %v14505_v4, %v14504_v5  ;;  %v14520_v4 = vld [vmem:[#allocation309_spill] sm:$0xff]  ;;  %v14521_v5 = vld [vmem:[#allocation83_spill] sm:$0xff] }
 0x47c   : > { %7760 = vmatpush1.bf16.msra.mxu0 %v9282_v59  ;;  %v11955_v59 = vpack.c.bf16 %v10174_v53, %v10174_v53 }
 0x47d   : > { %7761 = vmatprep.subr.bf16.mxu0 %v9299_v3  ;;  %v14506_v3 = vld [vmem:[#allocation41_spill] sm:$0xff] }
 0x47e   : > { %7803 = vmatpush1.bf16.msra.mxu1 %v9554_v41  ;;  %v9077_v6 = vcombine.high %v14507_v60, %v14506_v3  ;;  %v9076_v53 = vcombine.low %v14508_v0, %v14506_v3  ;;  %v14513_v41 = vld [vmem:[#allocation48_spill] sm:$0xff]  ;;  %v14514_v60 = vld [vmem:[#allocation302_spill] sm:$0xff] }
 0x47f   : > { %7854 = vmatprep.subr.bf16.mxu1 %v9317_v7  ;;  %v14512_v7 = vld [vmem:[#allocation55_spill] sm:$0xff]  ;;  %v14515_v1 = vmov %v14514_v60  ;;  %v9349_v28 = vcombine.high %v14516_v2, %v14514_v60  ;;  %v14519_v3 = vld [vmem:[#allocation316_spill] sm:$0xff] }
 0x480   : > { %7762 = vmatpush1.bf16.msra.mxu0 %v9298_v47  ;;  %v9332_v47 = vcombine.low %v14511_v11, %v14509_v8  ;;  %v9365_v60 = vcombine.high %v14520_v4, %v14519_v3  ;;  %v14530_v11 = vld [vmem:[#allocation337_spill] sm:$0xff] }
 0x481   : > { %7813 = vmatprep.subr.bf16.mxu0 %v9061_v51  ;;  %7805 = vmatmul.mubr.bf16.vlgmr.msra.gmra.mrb[0].mxu1 %v11955_v59  ;;  %v9093_v51 = vcombine.high %v14513_v41, %v14512_v7 }
 0x482   : > { %7855 = vmatpush1.bf16.msra.mxu1 %v9316_v10  ;;  %7886 = vmatprep.mubr.bf16.mxu1 %v11857_v50  ;;  %v9348_v10 = vcombine.low %v14516_v2, %v14515_v1  ;;  %v14522_v1 = vld [vmem:[#allocation76_spill] sm:$0xff] }
 0x483   : > { %7764 = vmatmul.mubr.bf16.vlgmr.msra.gmra.mrb[0].mxu0 %v11951_v13  ;;  %7856 = vmatprep.subr.bf16.mxu1 %v9333_v14  ;;  %v14517_v14 = vld [vmem:[#allocation69_spill] sm:$0xff] }
 0x484   : > { %7814 = vmatpush1.bf16.msra.mxu0 %v9060_v9  ;;  %7845 = vmatprep.mubr.bf16.mxu0 %v11855_v17  ;;  %v9092_v9 = vcombine.low %v14513_v41, %v14512_v7  ;;  %v14525_v7 = vld [vmem:[#allocation323_spill] sm:$0xff] }
 0x485   : > { %7815 = vmatprep.subr.bf16.mxu0 %v9077_v6  ;;  %v14518_v6 = vld [vmem:[#allocation62_spill] sm:$0xff] }
 0x486   : > { %7857 = vmatpush1.bf16.msra.mxu1 %v9332_v47  ;;  %v9109_v0 = vcombine.high %v14518_v6, %v14517_v14  ;;  %v9364_v47 = vcombine.low %v14520_v4, %v14519_v3  ;;  %v14527_v3 = vld [vmem:[#allocation91_spill] sm:$0xff] }
 0x487   : > { %7858 = vmatprep.subr.bf16.mxu1 %v9349_v28  ;;  %v14523_v28 = vld [vmem:[#allocation330_spill] sm:$0xff] }
 0x488   : > { %7816 = vmatpush1.bf16.msra.mxu0 %v9076_v53  ;;  %v9108_v53 = vcombine.low %v14518_v6, %v14517_v14  ;;  %v14524_v2 = vmov %v14523_v28  ;;  %v9381_v8 = vcombine.high %v14525_v7, %v14523_v28  ;;  %v14526_v6 = vld [vmem:[#allocation98_spill] sm:$0xff] }
 0x489   : > { %7817 = vmatprep.subr.bf16.mxu0 %v9093_v51  ;;  %v9125_v51 = vcombine.high %v14522_v1, %v14521_v5  ;;  %v14531_v28 = vld [vmem:[#allocation114_spill] sm:$0xff] }
 0x48a   : > { %7859 = vmatpush1.bf16.msra.mxu1 %v9348_v10  ;;  %v9380_v10 = vcombine.low %v14525_v7, %v14524_v2  ;;  %v14533_v2 = vld [vmem:[#allocation106_spill] sm:$0xff] }
 0x48b   : > { %7860 = vmatprep.subr.bf16.mxu1 %v9365_v60  ;;  %v14528_v60 = vld [vmem:[#allocation345_spill] sm:$0xff] }
 0x48c   : > { %7818 = vmatpush1.bf16.msra.mxu0 %v9092_v9  ;;  %v9124_v9 = vcombine.low %v14522_v1, %v14521_v5  ;;  %v14529_v4 = vmov %v14528_v60  ;;  %v9397_v14 = vcombine.high %v14530_v11, %v14528_v60  ;;  %v14532_v1 = vmov %v14531_v28  ;;  %v14535_v5 = vld [vmem:[#allocation353_spill] sm:$0xff]  ;;  %v14536_v60 = vld [vmem:[#allocation130_spill] sm:$0xff] }
 0x48d   : > { %7819 = vmatprep.subr.bf16.mxu0 %v9109_v0  ;;  %v9141_v0 = vcombine.high %v14527_v3, %v14526_v6 }
 0x48e   : > { %7861 = vmatpush1.bf16.msra.mxu1 %v9364_v47  ;;  %v9396_v47 = vcombine.low %v14530_v11, %v14529_v4  ;;  %v14538_v4 = vld [vmem:[#allocation122_spill] sm:$0xff] }
 0x48f   : > { %7862 = vmatprep.subr.bf16.mxu1 %v9381_v8  ;;  %v14534_v8 = vld [vmem:[#allocation361_spill] sm:$0xff] }
 0x490   : > { %7820 = vmatpush1.bf16.msra.mxu0 %v9108_v53  ;;  %v9140_v53 = vcombine.low %v14527_v3, %v14526_v6  ;;  %v9413_v7 = vcombine.high %v14535_v5, %v14534_v8  ;;  %v14537_v3 = vmov %v14536_v60  ;;  %v14540_v6 = vld [vmem:[#allocation369_spill] sm:$0xff] }
 0x491   : > { %7821 = vmatprep.subr.bf16.mxu0 %v9125_v51  ;;  %v9157_v51 = vcombine.high %v14533_v2, %v14531_v28  ;;  %v14541_v28 = vld [vmem:[#allocation146_spill] sm:$0xff] }
 0x492   : > { %7863 = vmatpush1.bf16.msra.mxu1 %v9380_v10  ;;  %v9412_v10 = vcombine.low %v14535_v5, %v14534_v8  ;;  %v14545_v5 = vld [vmem:[#allocation385_spill] sm:$0xff] }
 0x493   : > { %7864 = vmatprep.subr.bf16.mxu1 %v9397_v14  ;;  %v14539_v14 = vld [vmem:[#allocation377_spill] sm:$0xff] }
 0x494   : > { %7822 = vmatpush1.bf16.msra.mxu0 %v9124_v9  ;;  %v9156_v9 = vcombine.low %v14533_v2, %v14532_v1  ;;  %v9429_v11 = vcombine.high %v14540_v6, %v14539_v14  ;;  %v14542_v1 = vmov %v14541_v28  ;;  %v14543_v2 = vld [vmem:[#allocation138_spill] sm:$0xff] }
 0x495   : > { %7823 = vmatprep.subr.bf16.mxu0 %v9141_v0  ;;  %v9173_v0 = vcombine.high %v14538_v4, %v14536_v60  ;;  %v14546_v60 = vld [vmem:[#allocation162_spill] sm:$0xff] }
 0x496   : > { %7865 = vmatpush1.bf16.msra.mxu1 %v9396_v47  ;;  %v9428_v47 = vcombine.low %v14540_v6, %v14539_v14  ;;  %v14550_v6 = vld [vmem:[#allocation401_spill] sm:$0xff] }
 0x497   : > { %7866 = vmatprep.subr.bf16.mxu1 %v9413_v7  ;;  %v14544_v7 = vld [vmem:[#allocation393_spill] sm:$0xff] }
 0x498   : > { %7824 = vmatpush1.bf16.msra.mxu0 %v9140_v53  ;;  %v9172_v53 = vcombine.low %v14538_v4, %v14537_v3  ;;  %v9445_v8 = vcombine.high %v14545_v5, %v14544_v7  ;;  %v14547_v3 = vmov %v14546_v60  ;;  %v14548_v4 = vld [vmem:[#allocation154_spill] sm:$0xff] }
 0x499   : > { %7825 = vmatprep.subr.bf16.mxu0 %v9157_v51  ;;  %v9189_v51 = vcombine.high %v14543_v2, %v14541_v28  ;;  %v14551_v28 = vld [vmem:[#allocation178_spill] sm:$0xff] }
 0x49a   : > { %7867 = vmatpush1.bf16.msra.mxu1 %v9412_v10  ;;  %v9444_v10 = vcombine.low %v14545_v5, %v14544_v7  ;;  %v14555_v5 = vld [vmem:[#allocation417_spill] sm:$0xff] }
 0x49b   : > { %7868 = vmatprep.subr.bf16.mxu1 %v9429_v11  ;;  %v14549_v11 = vld [vmem:[#allocation409_spill] sm:$0xff] }
 0x49c   : > { %7826 = vmatpush1.bf16.msra.mxu0 %v9156_v9  ;;  %v9188_v9 = vcombine.low %v14543_v2, %v14542_v1  ;;  %v9461_v14 = vcombine.high %v14550_v6, %v14549_v11  ;;  %v14552_v1 = vmov %v14551_v28  ;;  %v14553_v2 = vld [vmem:[#allocation170_spill] sm:$0xff] }
 0x49d   : > { %7827 = vmatprep.subr.bf16.mxu0 %v9173_v0  ;;  %v9205_v0 = vcombine.high %v14548_v4, %v14546_v60  ;;  %v14556_v60 = vld [vmem:[#allocation194_spill] sm:$0xff] }
 0x49e   : > { %7869 = vmatpush1.bf16.msra.mxu1 %v9428_v47  ;;  %v9460_v47 = vcombine.low %v14550_v6, %v14549_v11  ;;  %v14560_v6 = vld [vmem:[#allocation433_spill] sm:$0xff] }
 0x49f   : > { %7870 = vmatprep.subr.bf16.mxu1 %v9445_v8  ;;  %v14554_v8 = vld [vmem:[#allocation425_spill] sm:$0xff] }
 0x4a0   : > { %7828 = vmatpush1.bf16.msra.mxu0 %v9172_v53  ;;  %v9204_v53 = vcombine.low %v14548_v4, %v14547_v3  ;;  %v9477_v7 = vcombine.high %v14555_v5, %v14554_v8  ;;  %v14557_v3 = vmov %v14556_v60  ;;  %v14558_v4 = vld [vmem:[#allocation186_spill] sm:$0xff] }
 0x4a1   : > { %7829 = vmatprep.subr.bf16.mxu0 %v9189_v51  ;;  %v9221_v51 = vcombine.high %v14553_v2, %v14551_v28  ;;  %v14561_v28 = vld [vmem:[#allocation210_spill] sm:$0xff] }
 0x4a2   : > { %7871 = vmatpush1.bf16.msra.mxu1 %v9444_v10  ;;  %v9476_v10 = vcombine.low %v14555_v5, %v14554_v8  ;;  %v14565_v5 = vld [vmem:[#allocation449_spill] sm:$0xff] }
 0x4a3   : > { %7872 = vmatprep.subr.bf16.mxu1 %v9461_v14  ;;  %v14559_v14 = vld [vmem:[#allocation441_spill] sm:$0xff] }
 0x4a4   : > { %7830 = vmatpush1.bf16.msra.mxu0 %v9188_v9  ;;  %v9220_v9 = vcombine.low %v14553_v2, %v14552_v1  ;;  %v9493_v11 = vcombine.high %v14560_v6, %v14559_v14  ;;  %v14562_v1 = vmov %v14561_v28  ;;  %v14563_v2 = vld [vmem:[#allocation202_spill] sm:$0xff] }
 0x4a5   : > { %7831 = vmatprep.subr.bf16.mxu0 %v9205_v0  ;;  %v9237_v0 = vcombine.high %v14558_v4, %v14556_v60  ;;  %v14566_v60 = vld [vmem:[#allocation226_spill] sm:$0xff] }
 0x4a6   : > { %7873 = vmatpush1.bf16.msra.mxu1 %v9460_v47  ;;  %v9492_v47 = vcombine.low %v14560_v6, %v14559_v14  ;;  %v14570_v6 = vld [vmem:[#allocation465_spill] sm:$0xff] }
 0x4a7   : > { %7874 = vmatprep.subr.bf16.mxu1 %v9477_v7  ;;  %v14564_v7 = vld [vmem:[#allocation457_spill] sm:$0xff] }
 0x4a8   : > { %7832 = vmatpush1.bf16.msra.mxu0 %v9204_v53  ;;  %v9236_v53 = vcombine.low %v14558_v4, %v14557_v3  ;;  %v9509_v8 = vcombine.high %v14565_v5, %v14564_v7  ;;  %v14567_v3 = vmov %v14566_v60  ;;  %v14568_v4 = vld [vmem:[#allocation218_spill] sm:$0xff] }
 0x4a9   : > { %7833 = vmatprep.subr.bf16.mxu0 %v9221_v51  ;;  %v9253_v51 = vcombine.high %v14563_v2, %v14561_v28  ;;  %v14571_v28 = vld [vmem:[#allocation242_spill] sm:$0xff] }
 0x4aa   : > { %7875 = vmatpush1.bf16.msra.mxu1 %v9476_v10  ;;  %v9508_v10 = vcombine.low %v14565_v5, %v14564_v7  ;;  %v14575_v5 = vld [vmem:[#allocation481_spill] sm:$0xff] }
 0x4ab   : > { %7876 = vmatprep.subr.bf16.mxu1 %v9493_v11  ;;  %v14569_v11 = vld [vmem:[#allocation473_spill] sm:$0xff] }
 0x4ac   : > { %7834 = vmatpush1.bf16.msra.mxu0 %v9220_v9  ;;  %v9252_v9 = vcombine.low %v14563_v2, %v14562_v1  ;;  %v9525_v14 = vcombine.high %v14570_v6, %v14569_v11  ;;  %v14572_v1 = vmov %v14571_v28  ;;  %v14573_v2 = vld [vmem:[#allocation234_spill] sm:$0xff] }
 0x4ad   : > { %7835 = vmatprep.subr.bf16.mxu0 %v9237_v0  ;;  %v9269_v0 = vcombine.high %v14568_v4, %v14566_v60  ;;  %v14576_v60 = vld [vmem:[#allocation258_spill] sm:$0xff] }
 0x4ae   : > { %7877 = vmatpush1.bf16.msra.mxu1 %v9492_v47  ;;  %v9524_v47 = vcombine.low %v14570_v6, %v14569_v11  ;;  %v14580_v6 = vld [vmem:[#allocation497_spill] sm:$0xff] }
 0x4af   : > { %7878 = vmatprep.subr.bf16.mxu1 %v9509_v8  ;;  %v14574_v8 = vld [vmem:[#allocation489_spill] sm:$0xff] }
 0x4b0   : > { %7836 = vmatpush1.bf16.msra.mxu0 %v9236_v53  ;;  %v9268_v53 = vcombine.low %v14568_v4, %v14567_v3  ;;  %v9541_v7 = vcombine.high %v14575_v5, %v14574_v8  ;;  %v14577_v3 = vmov %v14576_v60  ;;  %v14578_v4 = vld [vmem:[#allocation250_spill] sm:$0xff] }
 0x4b1   : > { %7837 = vmatprep.subr.bf16.mxu0 %v9253_v51  ;;  %v9285_v51 = vcombine.high %v14573_v2, %v14571_v28  ;;  %v14581_v28 = vld [vmem:[#allocation26_spill] sm:$0xff] }
 0x4b2   : > { %7879 = vmatpush1.bf16.msra.mxu1 %v9508_v10  ;;  %v9540_v10 = vcombine.low %v14575_v5, %v14574_v8  ;;  %v14585_v5 = vld [vmem:[#allocation267_spill] sm:$0xff] }
 0x4b3   : > { %7880 = vmatprep.subr.bf16.mxu1 %v9525_v14  ;;  %v14579_v14 = vld [vmem:[#allocation505_spill] sm:$0xff] }
 0x4b4   : > { %7838 = vmatpush1.bf16.msra.mxu0 %v9252_v9  ;;  %v9284_v9 = vcombine.low %v14573_v2, %v14572_v1  ;;  %v9557_v11 = vcombine.high %v14580_v6, %v14579_v14  ;;  %v14582_v1 = vmov %v14581_v28  ;;  %v14583_v2 = vld [vmem:[#allocation18_spill] sm:$0xff] }
 0x4b5   : > { %7839 = vmatprep.subr.bf16.mxu0 %v9269_v0  ;;  %v9301_v0 = vcombine.high %v14578_v4, %v14576_v60  ;;  %v14586_v60 = vld [vmem:[#allocation42_spill] sm:$0xff] }
 0x4b6   : > { %7881 = vmatpush1.bf16.msra.mxu1 %v9524_v47  ;;  %v9556_v47 = vcombine.low %v14580_v6, %v14579_v14  ;;  %v14590_v6 = vld [vmem:[#allocation281_spill] sm:$0xff] }
 0x4b7   : > { %7882 = vmatprep.subr.bf16.mxu1 %v9541_v7  ;;  %v14584_v7 = vld [vmem:[#allocation274_spill] sm:$0xff] }
 0x4b8   : > { %7840 = vmatpush1.bf16.msra.mxu0 %v9268_v53  ;;  %v9300_v53 = vcombine.low %v14578_v4, %v14577_v3  ;;  %v9319_v8 = vcombine.high %v14585_v5, %v14584_v7  ;;  %v14587_v3 = vmov %v14586_v60  ;;  %v14588_v4 = vld [vmem:[#allocation34_spill] sm:$0xff] }
 0x4b9   : > { %7841 = vmatprep.subr.bf16.mxu0 %v9285_v51  ;;  %v9063_v51 = vcombine.high %v14583_v2, %v14581_v28  ;;  %v14592_v28 = vld [vmem:[#allocation49_spill] sm:$0xff] }
 0x4ba   : > { %7883 = vmatpush1.bf16.msra.mxu1 %v9540_v10  ;;  %v9318_v10 = vcombine.low %v14585_v5, %v14584_v7  ;;  %v14596_v5 = vld [vmem:[#allocation295_spill] sm:$0xff] }
 0x4bb   : > { %7884 = vmatprep.subr.bf16.mxu1 %v9557_v11  ;;  %v14589_v11 = vld [vmem:[#allocation288_spill] sm:$0xff] }
 0x4bc   : > { %7842 = vmatpush1.bf16.msra.mxu0 %v9284_v9  ;;  %v9062_v9 = vcombine.low %v14583_v2, %v14582_v1  ;;  %v9335_v14 = vcombine.high %v14590_v6, %v14589_v11  ;;  %v14593_v1 = vmov %v14592_v28 }
 0x4bd   : > { %7843 = vmatprep.subr.bf16.mxu0 %v9301_v0  ;;  %v9079_v0 = vcombine.high %v14588_v4, %v14586_v60  ;;  %v14594_v60 = vld [vmem:[#allocation303_spill] sm:$0xff] }
 0x4be   : > { %7885 = vmatpush1.bf16.msra.mxu1 %v9556_v47  ;;  %v9334_v47 = vcombine.low %v14590_v6, %v14589_v11  ;;  %v14595_v2 = vmov %v14594_v60  ;;  %v9351_v7 = vcombine.high %v14596_v5, %v14594_v60 }
 0x4bf   : > { %7936 = vmatprep.subr.bf16.mxu1 %v9319_v8  ;;  %v14591_v8 = vld [vmem:[#allocation56_spill] sm:$0xff] }
 0x4c0   : > { %7844 = vmatpush1.bf16.msra.mxu0 %v9300_v53  ;;  %v9078_v53 = vcombine.low %v14588_v4, %v14587_v3  ;;  %v14599_v3 = vld [vmem:[#allocation317_spill] sm:$0xff]  ;;  %v14600_v4 = vld [vmem:[#allocation310_spill] sm:$0xff] }
 0x4c1   : > { %7895 = vmatprep.subr.bf16.mxu0 %v9063_v51  ;;  %7887 = vmatmul.mubr.bf16.vlgmr.msra.gmra.mrb[4].mxu1 %v11955_v59  ;;  %v9095_v51 = vcombine.high %v14592_v28, %v14591_v8  ;;  %v9367_v60 = vcombine.high %v14600_v4, %v14599_v3 }
 0x4c2   : > { %7937 = vmatpush1.bf16.msra.mxu1 %v9318_v10  ;;  %7968 = vmatprep.mubr.bf16.mxu1 %v11857_v50  ;;  %v9350_v10 = vcombine.low %v14596_v5, %v14595_v2  ;;  %v14602_v2 = vld [vmem:[#allocation77_spill] sm:$0xff]  ;;  %v14604_v5 = vld [vmem:[#allocation324_spill] sm:$0xff] }
 0x4c3   : > { %7846 = vmatmul.mubr.bf16.vlgmr.msra.gmra.mrb[4].mxu0 %v11951_v13  ;;  %7938 = vmatprep.subr.bf16.mxu1 %v9335_v14  ;;  %v14597_v14 = vld [vmem:[#allocation70_spill] sm:$0xff] }
 0x4c4   : > { %7896 = vmatpush1.bf16.msra.mxu0 %v9062_v9  ;;  %7927 = vmatprep.mubr.bf16.mxu0 %v11855_v17  ;;  %v9094_v9 = vcombine.low %v14593_v1, %v14591_v8  ;;  %v14601_v1 = vld [vmem:[#allocation84_spill] sm:$0xff]  ;;  %v14609_v8 = vld [vmem:[#allocation338_spill] sm:$0xff] }
 0x4c5   : > { %7897 = vmatprep.subr.bf16.mxu0 %v9079_v0  ;;  %v14598_v0 = vld [vmem:[#allocation63_spill] sm:$0xff] }
 0x4c6   : > { %7939 = vmatpush1.bf16.msra.mxu1 %v9334_v47  ;;  %v9111_v28 = vcombine.high %v14598_v0, %v14597_v14  ;;  %v9366_v47 = vcombine.low %v14600_v4, %v14599_v3  ;;  %v14606_v3 = vld [vmem:[#allocation92_spill] sm:$0xff] }
 0x4c7   : > { %7940 = vmatprep.subr.bf16.mxu1 %v9351_v7  ;;  %v14603_v7 = vld [vmem:[#allocation331_spill] sm:$0xff] }
 0x4c8   : > { %7898 = vmatpush1.bf16.msra.mxu0 %v9078_v53  ;;  %v9110_v53 = vcombine.low %v14598_v0, %v14597_v14  ;;  %v9383_v6 = vcombine.high %v14604_v5, %v14603_v7  ;;  %v14605_v0 = vld [vmem:[#allocation99_spill] sm:$0xff] }
 0x4c9   : > { %7899 = vmatprep.subr.bf16.mxu0 %v9095_v51  ;;  %v9127_v51 = vcombine.high %v14602_v2, %v14601_v1 }
 0x4ca   : > { %7941 = vmatpush1.bf16.msra.mxu1 %v9350_v10  ;;  %v9382_v10 = vcombine.low %v14604_v5, %v14603_v7  ;;  %v14613_v5 = vld [vmem:[#allocation354_spill] sm:$0xff] }
 0x4cb   : > { %7942 = vmatprep.subr.bf16.mxu1 %v9367_v60  ;;  %v14607_v60 = vld [vmem:[#allocation346_spill] sm:$0xff] }
 0x4cc   : > { %7900 = vmatpush1.bf16.msra.mxu0 %v9094_v9  ;;  %v9126_v9 = vcombine.low %v14602_v2, %v14601_v1  ;;  %v14608_v4 = vmov %v14607_v60  ;;  %v9399_v11 = vcombine.high %v14609_v8, %v14607_v60  ;;  %v14610_v1 = vld [vmem:[#allocation115_spill] sm:$0xff] }
 0x4cd   : > { %7901 = vmatprep.subr.bf16.mxu0 %v9111_v28  ;;  %v9143_v28 = vcombine.high %v14606_v3, %v14605_v0  ;;  %v14611_v2 = vld [vmem:[#allocation107_spill] sm:$0xff] }
 0x4ce   : > { %7943 = vmatpush1.bf16.msra.mxu1 %v9366_v47  ;;  %v9398_v47 = vcombine.low %v14609_v8, %v14608_v4  ;;  %v14614_v60 = vld [vmem:[#allocation131_spill] sm:$0xff]  ;;  %v14618_v4 = vld [vmem:[#allocation370_spill] sm:$0xff] }
 0x4cf   : > { %7944 = vmatprep.subr.bf16.mxu1 %v9383_v6  ;;  %v14612_v6 = vld [vmem:[#allocation362_spill] sm:$0xff] }
 0x4d0   : > { %7902 = vmatpush1.bf16.msra.mxu0 %v9110_v53  ;;  %v9142_v53 = vcombine.low %v14606_v3, %v14605_v0  ;;  %v9415_v7 = vcombine.high %v14613_v5, %v14612_v6  ;;  %v14615_v0 = vmov %v14614_v60  ;;  %v14616_v3 = vld [vmem:[#allocation123_spill] sm:$0xff] }
 0x4d1   : > { %7903 = vmatprep.subr.bf16.mxu0 %v9127_v51  ;;  %v9159_v51 = vcombine.high %v14611_v2, %v14610_v1 }
 0x4d2   : > { %7945 = vmatpush1.bf16.msra.mxu1 %v9382_v10  ;;  %v9414_v10 = vcombine.low %v14613_v5, %v14612_v6  ;;  %v14622_v5 = vld [vmem:[#allocation386_spill] sm:$0xff] }
 0x4d3   : > { %7946 = vmatprep.subr.bf16.mxu1 %v9399_v11  ;;  %v14617_v11 = vld [vmem:[#allocation378_spill] sm:$0xff] }
 0x4d4   : > { %7904 = vmatpush1.bf16.msra.mxu0 %v9126_v9  ;;  %v9158_v9 = vcombine.low %v14611_v2, %v14610_v1  ;;  %v9431_v8 = vcombine.high %v14618_v4, %v14617_v11  ;;  %v14619_v1 = vld [vmem:[#allocation147_spill] sm:$0xff] }
 0x4d5   : > { %7905 = vmatprep.subr.bf16.mxu0 %v9143_v28  ;;  %v9175_v28 = vcombine.high %v14616_v3, %v14614_v60  ;;  %v14620_v2 = vld [vmem:[#allocation139_spill] sm:$0xff] }
 0x4d6   : > { %7947 = vmatpush1.bf16.msra.mxu1 %v9398_v47  ;;  %v9430_v47 = vcombine.low %v14618_v4, %v14617_v11  ;;  %v14623_v60 = vld [vmem:[#allocation163_spill] sm:$0xff]  ;;  %v14627_v4 = vld [vmem:[#allocation402_spill] sm:$0xff] }
 0x4d7   : > { %7948 = vmatprep.subr.bf16.mxu1 %v9415_v7  ;;  %v14621_v7 = vld [vmem:[#allocation394_spill] sm:$0xff] }
 0x4d8   : > { %7906 = vmatpush1.bf16.msra.mxu0 %v9142_v53  ;;  %v9174_v53 = vcombine.low %v14616_v3, %v14615_v0  ;;  %v9447_v6 = vcombine.high %v14622_v5, %v14621_v7  ;;  %v14624_v0 = vmov %v14623_v60  ;;  %v14625_v3 = vld [vmem:[#allocation155_spill] sm:$0xff] }
 0x4d9   : > { %7907 = vmatprep.subr.bf16.mxu0 %v9159_v51  ;;  %v9191_v51 = vcombine.high %v14620_v2, %v14619_v1 }
 0x4da   : > { %7949 = vmatpush1.bf16.msra.mxu1 %v9414_v10  ;;  %v9446_v10 = vcombine.low %v14622_v5, %v14621_v7  ;;  %v14631_v5 = vld [vmem:[#allocation418_spill] sm:$0xff] }
 0x4db   : > { %7950 = vmatprep.subr.bf16.mxu1 %v9431_v8  ;;  %v14626_v8 = vld [vmem:[#allocation410_spill] sm:$0xff] }
 0x4dc   : > { %7908 = vmatpush1.bf16.msra.mxu0 %v9158_v9  ;;  %v9190_v9 = vcombine.low %v14620_v2, %v14619_v1  ;;  %v9463_v11 = vcombine.high %v14627_v4, %v14626_v8  ;;  %v14628_v1 = vld [vmem:[#allocation179_spill] sm:$0xff] }
 0x4dd   : > { %7909 = vmatprep.subr.bf16.mxu0 %v9175_v28  ;;  %v9207_v28 = vcombine.high %v14625_v3, %v14623_v60  ;;  %v14629_v2 = vld [vmem:[#allocation171_spill] sm:$0xff] }
 0x4de   : > { %7951 = vmatpush1.bf16.msra.mxu1 %v9430_v47  ;;  %v9462_v47 = vcombine.low %v14627_v4, %v14626_v8  ;;  %v14632_v60 = vld [vmem:[#allocation195_spill] sm:$0xff]  ;;  %v14636_v4 = vld [vmem:[#allocation434_spill] sm:$0xff] }
 0x4df   : > { %7952 = vmatprep.subr.bf16.mxu1 %v9447_v6  ;;  %v14630_v6 = vld [vmem:[#allocation426_spill] sm:$0xff] }
 0x4e0   : > { %7910 = vmatpush1.bf16.msra.mxu0 %v9174_v53  ;;  %v9206_v53 = vcombine.low %v14625_v3, %v14624_v0  ;;  %v9479_v7 = vcombine.high %v14631_v5, %v14630_v6  ;;  %v14633_v0 = vmov %v14632_v60  ;;  %v14634_v3 = vld [vmem:[#allocation187_spill] sm:$0xff] }
 0x4e1   : > { %7911 = vmatprep.subr.bf16.mxu0 %v9191_v51  ;;  %v9223_v51 = vcombine.high %v14629_v2, %v14628_v1 }
 0x4e2   : > { %7953 = vmatpush1.bf16.msra.mxu1 %v9446_v10  ;;  %v9478_v10 = vcombine.low %v14631_v5, %v14630_v6  ;;  %v14640_v5 = vld [vmem:[#allocation450_spill] sm:$0xff] }
 0x4e3   : > { %7954 = vmatprep.subr.bf16.mxu1 %v9463_v11  ;;  %v14635_v11 = vld [vmem:[#allocation442_spill] sm:$0xff] }
 0x4e4   : > { %7912 = vmatpush1.bf16.msra.mxu0 %v9190_v9  ;;  %v9222_v9 = vcombine.low %v14629_v2, %v14628_v1  ;;  %v9495_v8 = vcombine.high %v14636_v4, %v14635_v11  ;;  %v14637_v1 = vld [vmem:[#allocation211_spill] sm:$0xff] }
 0x4e5   : > { %7913 = vmatprep.subr.bf16.mxu0 %v9207_v28  ;;  %v9239_v28 = vcombine.high %v14634_v3, %v14632_v60  ;;  %v14638_v2 = vld [vmem:[#allocation203_spill] sm:$0xff] }
 0x4e6   : > { %7955 = vmatpush1.bf16.msra.mxu1 %v9462_v47  ;;  %v9494_v47 = vcombine.low %v14636_v4, %v14635_v11  ;;  %v14641_v60 = vld [vmem:[#allocation227_spill] sm:$0xff]  ;;  %v14645_v4 = vld [vmem:[#allocation466_spill] sm:$0xff] }
 0x4e7   : > { %7956 = vmatprep.subr.bf16.mxu1 %v9479_v7  ;;  %v14639_v7 = vld [vmem:[#allocation458_spill] sm:$0xff] }
 0x4e8   : > { %7914 = vmatpush1.bf16.msra.mxu0 %v9206_v53  ;;  %v9238_v53 = vcombine.low %v14634_v3, %v14633_v0  ;;  %v9511_v6 = vcombine.high %v14640_v5, %v14639_v7  ;;  %v14642_v0 = vmov %v14641_v60  ;;  %v14643_v3 = vld [vmem:[#allocation219_spill] sm:$0xff] }
 0x4e9   : > { %7915 = vmatprep.subr.bf16.mxu0 %v9223_v51  ;;  %v9255_v51 = vcombine.high %v14638_v2, %v14637_v1 }
 0x4ea   : > { %7957 = vmatpush1.bf16.msra.mxu1 %v9478_v10  ;;  %v9510_v10 = vcombine.low %v14640_v5, %v14639_v7  ;;  %v14649_v5 = vld [vmem:[#allocation482_spill] sm:$0xff] }
 0x4eb   : > { %7958 = vmatprep.subr.bf16.mxu1 %v9495_v8  ;;  %v14644_v8 = vld [vmem:[#allocation474_spill] sm:$0xff] }
 0x4ec   : > { %7916 = vmatpush1.bf16.msra.mxu0 %v9222_v9  ;;  %v9254_v9 = vcombine.low %v14638_v2, %v14637_v1  ;;  %v9527_v11 = vcombine.high %v14645_v4, %v14644_v8  ;;  %v14646_v1 = vld [vmem:[#allocation243_spill] sm:$0xff] }
 0x4ed   : > { %7917 = vmatprep.subr.bf16.mxu0 %v9239_v28  ;;  %v9271_v28 = vcombine.high %v14643_v3, %v14641_v60  ;;  %v14647_v2 = vld [vmem:[#allocation235_spill] sm:$0xff] }
 0x4ee   : > { %7959 = vmatpush1.bf16.msra.mxu1 %v9494_v47  ;;  %v9526_v47 = vcombine.low %v14645_v4, %v14644_v8  ;;  %v14650_v60 = vld [vmem:[#allocation259_spill] sm:$0xff]  ;;  %v14654_v4 = vld [vmem:[#allocation498_spill] sm:$0xff] }
 0x4ef   : > { %7960 = vmatprep.subr.bf16.mxu1 %v9511_v6  ;;  %v14648_v6 = vld [vmem:[#allocation490_spill] sm:$0xff] }
 0x4f0   : > { %7918 = vmatpush1.bf16.msra.mxu0 %v9238_v53  ;;  %v9270_v53 = vcombine.low %v14643_v3, %v14642_v0  ;;  %v9543_v7 = vcombine.high %v14649_v5, %v14648_v6  ;;  %v14651_v0 = vmov %v14650_v60  ;;  %v14652_v3 = vld [vmem:[#allocation251_spill] sm:$0xff] }
 0x4f1   : > { %7919 = vmatprep.subr.bf16.mxu0 %v9255_v51  ;;  %v9287_v51 = vcombine.high %v14647_v2, %v14646_v1 }
 0x4f2   : > { %7961 = vmatpush1.bf16.msra.mxu1 %v9510_v10  ;;  %v9542_v10 = vcombine.low %v14649_v5, %v14648_v6  ;;  %v14658_v5 = vld [vmem:[#allocation268_spill] sm:$0xff] }
 0x4f3   : > { %7962 = vmatprep.subr.bf16.mxu1 %v9527_v11  ;;  %v14653_v11 = vld [vmem:[#allocation506_spill] sm:$0xff] }
 0x4f4   : > { %7920 = vmatpush1.bf16.msra.mxu0 %v9254_v9  ;;  %v9286_v9 = vcombine.low %v14647_v2, %v14646_v1  ;;  %v9559_v8 = vcombine.high %v14654_v4, %v14653_v11  ;;  %v14655_v1 = vld [vmem:[#allocation27_spill] sm:$0xff] }
 0x4f5   : > { %7921 = vmatprep.subr.bf16.mxu0 %v9271_v28  ;;  %v9303_v28 = vcombine.high %v14652_v3, %v14650_v60  ;;  %v14656_v2 = vld [vmem:[#allocation19_spill] sm:$0xff] }
 0x4f6   : > { %7963 = vmatpush1.bf16.msra.mxu1 %v9526_v47  ;;  %v9558_v47 = vcombine.low %v14654_v4, %v14653_v11  ;;  %v14659_v60 = vld [vmem:[#allocation43_spill] sm:$0xff]  ;;  %v14663_v4 = vld [vmem:[#allocation282_spill] sm:$0xff] }
 0x4f7   : > { %7964 = vmatprep.subr.bf16.mxu1 %v9543_v7  ;;  %v14657_v7 = vld [vmem:[#allocation275_spill] sm:$0xff] }
 0x4f8   : > { %7922 = vmatpush1.bf16.msra.mxu0 %v9270_v53  ;;  %v9302_v53 = vcombine.low %v14652_v3, %v14651_v0  ;;  %v9321_v6 = vcombine.high %v14658_v5, %v14657_v7  ;;  %v14660_v0 = vmov %v14659_v60  ;;  %v14661_v3 = vld [vmem:[#allocation35_spill] sm:$0xff] }
 0x4f9   : > { %7923 = vmatprep.subr.bf16.mxu0 %v9287_v51  ;;  %v9065_v51 = vcombine.high %v14656_v2, %v14655_v1 }
 0x4fa   : > { %7965 = vmatpush1.bf16.msra.mxu1 %v9542_v10  ;;  %v9320_v10 = vcombine.low %v14658_v5, %v14657_v7  ;;  %v14668_v5 = vld [vmem:[#allocation296_spill] sm:$0xff] }
 0x4fb   : > { %7966 = vmatprep.subr.bf16.mxu1 %v9559_v8  ;;  %v14662_v8 = vld [vmem:[#allocation289_spill] sm:$0xff] }
 0x4fc   : > { %7924 = vmatpush1.bf16.msra.mxu0 %v9286_v9  ;;  %v9064_v9 = vcombine.low %v14656_v2, %v14655_v1  ;;  %v9337_v11 = vcombine.high %v14663_v4, %v14662_v8  ;;  %v14667_v2 = vld [vmem:[#allocation304_spill] sm:$0xff] }
 0x4fd   : > { %7925 = vmatprep.subr.bf16.mxu0 %v9303_v28  ;;  %v9081_v28 = vcombine.high %v14661_v3, %v14659_v60  ;;  %v9353_v7 = vcombine.high %v14668_v5, %v14667_v2 }
 0x4fe   : > { %7967 = vmatpush1.bf16.msra.mxu1 %v9558_v47  ;;  %v9336_v47 = vcombine.low %v14663_v4, %v14662_v8  ;;  %v14673_v4 = vld [vmem:[#allocation311_spill] sm:$0xff] }
 0x4ff   : > { %8018 = vmatprep.subr.bf16.mxu1 %v9321_v6  ;;  %v14664_v6 = vld [vmem:[#allocation57_spill] sm:$0xff] }
 0x500   : > { %7926 = vmatpush1.bf16.msra.mxu0 %v9302_v53  ;;  %v9080_v53 = vcombine.low %v14661_v3, %v14660_v0  ;;  %v14672_v3 = vld [vmem:[#allocation318_spill] sm:$0xff] }
 0x501   : > { %7977 = vmatprep.subr.bf16.mxu0 %v9065_v51  ;;  %7969 = vmatmul.mubr.bf16.vlgmr.msra.gmra.mrb[8].mxu1 %v11955_v59  ;;  %v14665_v51 = vld [vmem:[#allocation50_spill] sm:$0xff]  ;;  %v9369_v8 = vcombine.high %v14673_v4, %v14672_v3 }
 0x502   : > { %8019 = vmatpush1.bf16.msra.mxu1 %v9320_v10  ;;  %v14666_v1 = vmov %v14665_v51  ;;  %v9097_v60 = vcombine.high %v14665_v51, %v14664_v6  ;;  %8050 = vmatprep.mubr.bf16.mxu1 %v11857_v50  ;;  %v9352_v10 = vcombine.low %v14668_v5, %v14667_v2  ;;  %v14675_v2 = vld [vmem:[#allocation78_spill] sm:$0xff]  ;;  %v14677_v5 = vld [vmem:[#allocation325_spill] sm:$0xff] }
 0x503   : > { %7928 = vmatmul.mubr.bf16.vlgmr.msra.gmra.mrb[8].mxu0 %v11951_v13  ;;  %8020 = vmatprep.subr.bf16.mxu1 %v9337_v11  ;;  %v14669_v11 = vld [vmem:[#allocation71_spill] sm:$0xff] }
 0x504   : > { %7978 = vmatpush1.bf16.msra.mxu0 %v9064_v9  ;;  %8009 = vmatprep.mubr.bf16.mxu0 %v11855_v17  ;;  %v9096_v9 = vcombine.low %v14666_v1, %v14664_v6  ;;  %v14674_v1 = vld [vmem:[#allocation85_spill] sm:$0xff] }
 0x505   : > { %7979 = vmatprep.subr.bf16.mxu0 %v9081_v28  ;;  %v14670_v28 = vld [vmem:[#allocation64_spill] sm:$0xff] }
 0x506   : > { %8021 = vmatpush1.bf16.msra.mxu1 %v9336_v47  ;;  %v14671_v0 = vmov %v14670_v28  ;;  %v9113_v51 = vcombine.high %v14670_v28, %v14669_v11  ;;  %v9368_v47 = vcombine.low %v14673_v4, %v14672_v3  ;;  %v14678_v28 = vld [vmem:[#allocation100_spill] sm:$0xff]  ;;  %v14680_v3 = vld [vmem:[#allocation93_spill] sm:$0xff]  ;;  %v14682_v4 = vld [vmem:[#allocation339_spill] sm:$0xff] }
 0x507   : > { %8022 = vmatprep.subr.bf16.mxu1 %v9353_v7  ;;  %v14676_v7 = vld [vmem:[#allocation332_spill] sm:$0xff] }
 0x508   : > { %7980 = vmatpush1.bf16.msra.mxu0 %v9080_v53  ;;  %v9112_v53 = vcombine.low %v14671_v0, %v14669_v11  ;;  %v9385_v6 = vcombine.high %v14677_v5, %v14676_v7  ;;  %v14679_v0 = vmov %v14678_v28 }
 0x509   : > { %7981 = vmatprep.subr.bf16.mxu0 %v9097_v60  ;;  %v9129_v60 = vcombine.high %v14675_v2, %v14674_v1 }
 0x50a   : > { %8023 = vmatpush1.bf16.msra.mxu1 %v9352_v10  ;;  %v9384_v10 = vcombine.low %v14677_v5, %v14676_v7  ;;  %v14686_v5 = vld [vmem:[#allocation355_spill] sm:$0xff] }
 0x50b   : > { %8024 = vmatprep.subr.bf16.mxu1 %v9369_v8  ;;  %v14681_v8 = vld [vmem:[#allocation347_spill] sm:$0xff] }
 0x50c   : > { %7982 = vmatpush1.bf16.msra.mxu0 %v9096_v9  ;;  %v9128_v9 = vcombine.low %v14675_v2, %v14674_v1  ;;  %v9401_v11 = vcombine.high %v14682_v4, %v14681_v8  ;;  %v14683_v1 = vld [vmem:[#allocation116_spill] sm:$0xff] }
 0x50d   : > { %7983 = vmatprep.subr.bf16.mxu0 %v9113_v51  ;;  %v9145_v51 = vcombine.high %v14680_v3, %v14678_v28  ;;  %v14684_v2 = vld [vmem:[#allocation108_spill] sm:$0xff] }
 0x50e   : > { %8025 = vmatpush1.bf16.msra.mxu1 %v9368_v47  ;;  %v9400_v47 = vcombine.low %v14682_v4, %v14681_v8  ;;  %v14687_v28 = vld [vmem:[#allocation132_spill] sm:$0xff]  ;;  %v14691_v4 = vld [vmem:[#allocation371_spill] sm:$0xff] }
 0x50f   : > { %8026 = vmatprep.subr.bf16.mxu1 %v9385_v6  ;;  %v14685_v6 = vld [vmem:[#allocation363_spill] sm:$0xff] }
 0x510   : > { %7984 = vmatpush1.bf16.msra.mxu0 %v9112_v53  ;;  %v9144_v53 = vcombine.low %v14680_v3, %v14679_v0  ;;  %v9417_v7 = vcombine.high %v14686_v5, %v14685_v6  ;;  %v14688_v0 = vmov %v14687_v28  ;;  %v14689_v3 = vld [vmem:[#allocation124_spill] sm:$0xff] }
 0x511   : > { %7985 = vmatprep.subr.bf16.mxu0 %v9129_v60  ;;  %v9161_v60 = vcombine.high %v14684_v2, %v14683_v1 }
 0x512   : > { %8027 = vmatpush1.bf16.msra.mxu1 %v9384_v10  ;;  %v9416_v10 = vcombine.low %v14686_v5, %v14685_v6  ;;  %v14695_v5 = vld [vmem:[#allocation387_spill] sm:$0xff] }
 0x513   : > { %8028 = vmatprep.subr.bf16.mxu1 %v9401_v11  ;;  %v14690_v11 = vld [vmem:[#allocation379_spill] sm:$0xff] }
 0x514   : > { %7986 = vmatpush1.bf16.msra.mxu0 %v9128_v9  ;;  %v9160_v9 = vcombine.low %v14684_v2, %v14683_v1  ;;  %v9433_v8 = vcombine.high %v14691_v4, %v14690_v11  ;;  %v14692_v1 = vld [vmem:[#allocation148_spill] sm:$0xff] }
 0x515   : > { %7987 = vmatprep.subr.bf16.mxu0 %v9145_v51  ;;  %v9177_v51 = vcombine.high %v14689_v3, %v14687_v28  ;;  %v14693_v2 = vld [vmem:[#allocation140_spill] sm:$0xff] }
 0x516   : > { %8029 = vmatpush1.bf16.msra.mxu1 %v9400_v47  ;;  %v9432_v47 = vcombine.low %v14691_v4, %v14690_v11  ;;  %v14696_v28 = vld [vmem:[#allocation164_spill] sm:$0xff]  ;;  %v14700_v4 = vld [vmem:[#allocation403_spill] sm:$0xff] }
 0x517   : > { %8030 = vmatprep.subr.bf16.mxu1 %v9417_v7  ;;  %v14694_v7 = vld [vmem:[#allocation395_spill] sm:$0xff] }
 0x518   : > { %7988 = vmatpush1.bf16.msra.mxu0 %v9144_v53  ;;  %v9176_v53 = vcombine.low %v14689_v3, %v14688_v0  ;;  %v9449_v6 = vcombine.high %v14695_v5, %v14694_v7  ;;  %v14697_v0 = vmov %v14696_v28  ;;  %v14698_v3 = vld [vmem:[#allocation156_spill] sm:$0xff] }
 0x519   : > { %7989 = vmatprep.subr.bf16.mxu0 %v9161_v60  ;;  %v9193_v60 = vcombine.high %v14693_v2, %v14692_v1 }
 0x51a   : > { %8031 = vmatpush1.bf16.msra.mxu1 %v9416_v10  ;;  %v9448_v10 = vcombine.low %v14695_v5, %v14694_v7  ;;  %v14704_v5 = vld [vmem:[#allocation419_spill] sm:$0xff] }
 0x51b   : > { %8032 = vmatprep.subr.bf16.mxu1 %v9433_v8  ;;  %v14699_v8 = vld [vmem:[#allocation411_spill] sm:$0xff] }
 0x51c   : > { %7990 = vmatpush1.bf16.msra.mxu0 %v9160_v9  ;;  %v9192_v9 = vcombine.low %v14693_v2, %v14692_v1  ;;  %v9465_v11 = vcombine.high %v14700_v4, %v14699_v8  ;;  %v14701_v1 = vld [vmem:[#allocation180_spill] sm:$0xff] }
 0x51d   : > { %7991 = vmatprep.subr.bf16.mxu0 %v9177_v51  ;;  %v9209_v51 = vcombine.high %v14698_v3, %v14696_v28  ;;  %v14702_v2 = vld [vmem:[#allocation172_spill] sm:$0xff] }
 0x51e   : > { %8033 = vmatpush1.bf16.msra.mxu1 %v9432_v47  ;;  %v9464_v47 = vcombine.low %v14700_v4, %v14699_v8  ;;  %v14705_v28 = vld [vmem:[#allocation196_spill] sm:$0xff]  ;;  %v14709_v4 = vld [vmem:[#allocation435_spill] sm:$0xff] }
 0x51f   : > { %8034 = vmatprep.subr.bf16.mxu1 %v9449_v6  ;;  %v14703_v6 = vld [vmem:[#allocation427_spill] sm:$0xff] }
 0x520   : > { %7992 = vmatpush1.bf16.msra.mxu0 %v9176_v53  ;;  %v9208_v53 = vcombine.low %v14698_v3, %v14697_v0  ;;  %v9481_v7 = vcombine.high %v14704_v5, %v14703_v6  ;;  %v14706_v0 = vmov %v14705_v28  ;;  %v14707_v3 = vld [vmem:[#allocation188_spill] sm:$0xff] }
 0x521   : > { %7993 = vmatprep.subr.bf16.mxu0 %v9193_v60  ;;  %v9225_v60 = vcombine.high %v14702_v2, %v14701_v1 }
 0x522   : > { %8035 = vmatpush1.bf16.msra.mxu1 %v9448_v10  ;;  %v9480_v10 = vcombine.low %v14704_v5, %v14703_v6  ;;  %v14713_v5 = vld [vmem:[#allocation451_spill] sm:$0xff] }
 0x523   : > { %8036 = vmatprep.subr.bf16.mxu1 %v9465_v11  ;;  %v14708_v11 = vld [vmem:[#allocation443_spill] sm:$0xff] }
 0x524   : > { %7994 = vmatpush1.bf16.msra.mxu0 %v9192_v9  ;;  %v9224_v9 = vcombine.low %v14702_v2, %v14701_v1  ;;  %v9497_v8 = vcombine.high %v14709_v4, %v14708_v11  ;;  %v14710_v1 = vld [vmem:[#allocation212_spill] sm:$0xff] }
 0x525   : > { %7995 = vmatprep.subr.bf16.mxu0 %v9209_v51  ;;  %v9241_v51 = vcombine.high %v14707_v3, %v14705_v28  ;;  %v14711_v2 = vld [vmem:[#allocation204_spill] sm:$0xff] }
 0x526   : > { %8037 = vmatpush1.bf16.msra.mxu1 %v9464_v47  ;;  %v9496_v47 = vcombine.low %v14709_v4, %v14708_v11  ;;  %v14714_v28 = vld [vmem:[#allocation228_spill] sm:$0xff]  ;;  %v14718_v4 = vld [vmem:[#allocation467_spill] sm:$0xff] }
 0x527   : > { %8038 = vmatprep.subr.bf16.mxu1 %v9481_v7  ;;  %v14712_v7 = vld [vmem:[#allocation459_spill] sm:$0xff] }
 0x528   : > { %7996 = vmatpush1.bf16.msra.mxu0 %v9208_v53  ;;  %v9240_v53 = vcombine.low %v14707_v3, %v14706_v0  ;;  %v9513_v6 = vcombine.high %v14713_v5, %v14712_v7  ;;  %v14715_v0 = vmov %v14714_v28  ;;  %v14716_v3 = vld [vmem:[#allocation220_spill] sm:$0xff] }
 0x529   : > { %7997 = vmatprep.subr.bf16.mxu0 %v9225_v60  ;;  %v9257_v60 = vcombine.high %v14711_v2, %v14710_v1 }
 0x52a   : > { %8039 = vmatpush1.bf16.msra.mxu1 %v9480_v10  ;;  %v9512_v10 = vcombine.low %v14713_v5, %v14712_v7  ;;  %v14722_v5 = vld [vmem:[#allocation483_spill] sm:$0xff] }
 0x52b   : > { %8040 = vmatprep.subr.bf16.mxu1 %v9497_v8  ;;  %v14717_v8 = vld [vmem:[#allocation475_spill] sm:$0xff] }
 0x52c   : > { %7998 = vmatpush1.bf16.msra.mxu0 %v9224_v9  ;;  %v9256_v9 = vcombine.low %v14711_v2, %v14710_v1  ;;  %v9529_v11 = vcombine.high %v14718_v4, %v14717_v8  ;;  %v14719_v1 = vld [vmem:[#allocation244_spill] sm:$0xff] }
 0x52d   : > { %7999 = vmatprep.subr.bf16.mxu0 %v9241_v51  ;;  %v9273_v51 = vcombine.high %v14716_v3, %v14714_v28  ;;  %v14720_v2 = vld [vmem:[#allocation236_spill] sm:$0xff] }
 0x52e   : > { %8041 = vmatpush1.bf16.msra.mxu1 %v9496_v47  ;;  %v9528_v47 = vcombine.low %v14718_v4, %v14717_v8  ;;  %v14723_v28 = vld [vmem:[#allocation260_spill] sm:$0xff]  ;;  %v14727_v4 = vld [vmem:[#allocation499_spill] sm:$0xff] }
 0x52f   : > { %8042 = vmatprep.subr.bf16.mxu1 %v9513_v6  ;;  %v14721_v6 = vld [vmem:[#allocation491_spill] sm:$0xff] }
 0x530   : > { %8000 = vmatpush1.bf16.msra.mxu0 %v9240_v53  ;;  %v9272_v53 = vcombine.low %v14716_v3, %v14715_v0  ;;  %v9545_v7 = vcombine.high %v14722_v5, %v14721_v6  ;;  %v14724_v0 = vmov %v14723_v28  ;;  %v14725_v3 = vld [vmem:[#allocation252_spill] sm:$0xff] }
 0x531   : > { %8001 = vmatprep.subr.bf16.mxu0 %v9257_v60  ;;  %v9289_v60 = vcombine.high %v14720_v2, %v14719_v1 }
 0x532   : > { %8043 = vmatpush1.bf16.msra.mxu1 %v9512_v10  ;;  %v9544_v10 = vcombine.low %v14722_v5, %v14721_v6  ;;  %v14731_v5 = vld [vmem:[#allocation269_spill] sm:$0xff] }
 0x533   : > { %8044 = vmatprep.subr.bf16.mxu1 %v9529_v11  ;;  %v14726_v11 = vld [vmem:[#allocation507_spill] sm:$0xff] }
 0x534   : > { %8002 = vmatpush1.bf16.msra.mxu0 %v9256_v9  ;;  %v9288_v9 = vcombine.low %v14720_v2, %v14719_v1  ;;  %v9561_v8 = vcombine.high %v14727_v4, %v14726_v11  ;;  %v14728_v1 = vld [vmem:[#allocation28_spill] sm:$0xff] }
 0x535   : > { %8003 = vmatprep.subr.bf16.mxu0 %v9273_v51  ;;  %v9305_v51 = vcombine.high %v14725_v3, %v14723_v28  ;;  %v14729_v2 = vld [vmem:[#allocation20_spill] sm:$0xff] }
 0x536   : > { %8045 = vmatpush1.bf16.msra.mxu1 %v9528_v47  ;;  %v9560_v47 = vcombine.low %v14727_v4, %v14726_v11  ;;  %v14732_v28 = vld [vmem:[#allocation44_spill] sm:$0xff]  ;;  %v14736_v4 = vld [vmem:[#allocation283_spill] sm:$0xff] }
 0x537   : > { %8046 = vmatprep.subr.bf16.mxu1 %v9545_v7  ;;  %v14730_v7 = vld [vmem:[#allocation276_spill] sm:$0xff] }
 0x538   : > { %8004 = vmatpush1.bf16.msra.mxu0 %v9272_v53  ;;  %v9304_v53 = vcombine.low %v14725_v3, %v14724_v0  ;;  %v9323_v6 = vcombine.high %v14731_v5, %v14730_v7  ;;  %v14733_v0 = vmov %v14732_v28  ;;  %v14734_v3 = vld [vmem:[#allocation36_spill] sm:$0xff] }
 0x539   : > { %8005 = vmatprep.subr.bf16.mxu0 %v9289_v60  ;;  %v9067_v60 = vcombine.high %v14729_v2, %v14728_v1 }
 0x53a   : > { %8047 = vmatpush1.bf16.msra.mxu1 %v9544_v10  ;;  %v9322_v10 = vcombine.low %v14731_v5, %v14730_v7  ;;  %v14741_v5 = vld [vmem:[#allocation297_spill] sm:$0xff] }
 0x53b   : > { %8048 = vmatprep.subr.bf16.mxu1 %v9561_v8  ;;  %v14735_v8 = vld [vmem:[#allocation290_spill] sm:$0xff] }
 0x53c   : > { %8006 = vmatpush1.bf16.msra.mxu0 %v9288_v9  ;;  %v9066_v9 = vcombine.low %v14729_v2, %v14728_v1  ;;  %v9339_v11 = vcombine.high %v14736_v4, %v14735_v8  ;;  %v14740_v2 = vld [vmem:[#allocation305_spill] sm:$0xff] }
 0x53d   : > { %8007 = vmatprep.subr.bf16.mxu0 %v9305_v51  ;;  %v9083_v51 = vcombine.high %v14734_v3, %v14732_v28  ;;  %v9355_v7 = vcombine.high %v14741_v5, %v14740_v2 }
 0x53e   : > { %8049 = vmatpush1.bf16.msra.mxu1 %v9560_v47  ;;  %v9338_v47 = vcombine.low %v14736_v4, %v14735_v8  ;;  %v14746_v4 = vld [vmem:[#allocation312_spill] sm:$0xff] }
 0x53f   : > { %8100 = vmatprep.subr.bf16.mxu1 %v9323_v6  ;;  %v14737_v6 = vld [vmem:[#allocation58_spill] sm:$0xff] }
 0x540   : > { %8008 = vmatpush1.bf16.msra.mxu0 %v9304_v53  ;;  %v9082_v53 = vcombine.low %v14734_v3, %v14733_v0  ;;  %v14745_v3 = vld [vmem:[#allocation319_spill] sm:$0xff] }
 0x541   : > { %8059 = vmatprep.subr.bf16.mxu0 %v9067_v60  ;;  %8051 = vmatmul.mubr.bf16.vlgmr.msra.gmra.mrb[12].mxu1 %v11955_v59  ;;  %v14738_v60 = vld [vmem:[#allocation51_spill] sm:$0xff]  ;;  %v9371_v8 = vcombine.high %v14746_v4, %v14745_v3 }
 0x542   : > { %8101 = vmatpush1.bf16.msra.mxu1 %v9322_v10  ;;  %v14739_v1 = vmov %v14738_v60  ;;  %v9099_v28 = vcombine.high %v14738_v60, %v14737_v6  ;;  %8132 = vmatprep.mubr.bf16.mxu1 %v11857_v50  ;;  %v9354_v10 = vcombine.low %v14741_v5, %v14740_v2  ;;  %v14748_v2 = vld [vmem:[#allocation79_spill] sm:$0xff]  ;;  %v14750_v5 = vld [vmem:[#allocation326_spill] sm:$0xff] }
 0x543   : > { %8010 = vmatmul.mubr.bf16.vlgmr.msra.gmra.mrb[12].mxu0 %v11951_v13  ;;  %8102 = vmatprep.subr.bf16.mxu1 %v9339_v11  ;;  %v14742_v11 = vld [vmem:[#allocation72_spill] sm:$0xff] }
 0x544   : > { %8060 = vmatpush1.bf16.msra.mxu0 %v9066_v9  ;;  %8091 = vmatprep.mubr.bf16.mxu0 %v11855_v17  ;;  %v9098_v9 = vcombine.low %v14739_v1, %v14737_v6  ;;  %v14747_v1 = vld [vmem:[#allocation86_spill] sm:$0xff] }
 0x545   : > { %8061 = vmatprep.subr.bf16.mxu0 %v9083_v51  ;;  %v14743_v51 = vld [vmem:[#allocation65_spill] sm:$0xff] }
 0x546   : > { %8103 = vmatpush1.bf16.msra.mxu1 %v9338_v47  ;;  %v14744_v0 = vmov %v14743_v51  ;;  %v9115_v60 = vcombine.high %v14743_v51, %v14742_v11  ;;  %v9370_v47 = vcombine.low %v14746_v4, %v14745_v3  ;;  %v14751_v51 = vld [vmem:[#allocation101_spill] sm:$0xff]  ;;  %v14753_v3 = vld [vmem:[#allocation94_spill] sm:$0xff]  ;;  %v14755_v4 = vld [vmem:[#allocation340_spill] sm:$0xff] }
 0x547   : > { %8104 = vmatprep.subr.bf16.mxu1 %v9355_v7  ;;  %v14749_v7 = vld [vmem:[#allocation333_spill] sm:$0xff] }
 0x548   : > { %8062 = vmatpush1.bf16.msra.mxu0 %v9082_v53  ;;  %v9114_v53 = vcombine.low %v14744_v0, %v14742_v11  ;;  %v9387_v6 = vcombine.high %v14750_v5, %v14749_v7  ;;  %v14752_v0 = vmov %v14751_v51 }
 0x549   : > { %8063 = vmatprep.subr.bf16.mxu0 %v9099_v28  ;;  %v9131_v28 = vcombine.high %v14748_v2, %v14747_v1 }
 0x54a   : > { %8105 = vmatpush1.bf16.msra.mxu1 %v9354_v10  ;;  %v9386_v10 = vcombine.low %v14750_v5, %v14749_v7  ;;  %v14759_v5 = vld [vmem:[#allocation356_spill] sm:$0xff] }
 0x54b   : > { %8106 = vmatprep.subr.bf16.mxu1 %v9371_v8  ;;  %v14754_v8 = vld [vmem:[#allocation348_spill] sm:$0xff] }
 0x54c   : > { %8064 = vmatpush1.bf16.msra.mxu0 %v9098_v9  ;;  %v9130_v9 = vcombine.low %v14748_v2, %v14747_v1  ;;  %v9403_v11 = vcombine.high %v14755_v4, %v14754_v8  ;;  %v14756_v1 = vld [vmem:[#allocation117_spill] sm:$0xff] }
 0x54d   : > { %8065 = vmatprep.subr.bf16.mxu0 %v9115_v60  ;;  %v9147_v60 = vcombine.high %v14753_v3, %v14751_v51  ;;  %v14757_v2 = vld [vmem:[#allocation109_spill] sm:$0xff] }
 0x54e   : > { %8107 = vmatpush1.bf16.msra.mxu1 %v9370_v47  ;;  %v9402_v47 = vcombine.low %v14755_v4, %v14754_v8 }
 0x54f   : > { %8108 = vmatprep.subr.bf16.mxu1 %v9387_v6  ;;  %v14758_v6 = vld [vmem:[#allocation364_spill] sm:$0xff] }
 0x550   : > { %8066 = vmatpush1.bf16.msra.mxu0 %v9114_v53  ;;  %v9146_v53 = vcombine.low %v14753_v3, %v14752_v0  ;;  %v9419_v7 = vcombine.high %v14759_v5, %v14758_v6 }
 0x551   : > { %8067 = vmatprep.subr.bf16.mxu0 %v9131_v28  ;;  %v9163_v28 = vcombine.high %v14757_v2, %v14756_v1 }
 0x552   : > { %8109 = vmatpush1.bf16.msra.mxu1 %v9386_v10 }
 0x553   : > { %8110 = vmatprep.subr.bf16.mxu1 %v9403_v11  ;;  %v9162_v11 = vcombine.low %v14757_v2, %v14756_v1  ;;  %v14771_v2 = vld [vmem:[#allocation157_spill] sm:$0xff] }
 0x554   : > { %8068 = vmatpush1.bf16.msra.mxu0 %v9130_v9  ;;  %v7806_v14 = vpop.f32.mrb[0].mxu1 }
 0x555   : > { %8069 = vmatprep.subr.bf16.mxu0 %v9147_v60  ;;  %v7808_v10 = vpop.f32.mrb[1].mxu1  ;;  %v9418_v60 = vcombine.low %v14759_v5, %v14758_v6  ;;  %v14773_v5 = vld [vmem:[#allocation404_spill] sm:$0xff] }
 0x556   : > { %v7765_v51 = vpop.f32.mrb[0].mxu0  ;;  %v7810_v3 = vpop.f32.mrb[2].mxu1  ;;  %8111 = vmatpush1.bf16.msra.mxu1 %v9402_v47  ;;  %v14768_v47 = vld [vmem:[#allocation388_spill] sm:$0xff] }
 0x557   : > { %v12405_v15 = vadd.f32 %v7806_v14, %v7765_v51  ;;  %v7767_v9 = vpop.f32.mrb[1].mxu0  ;;  %v7811_v8 = vpop.f32.mrb[3].mxu1  ;;  %8112 = vmatprep.subr.bf16.mxu1 %v9419_v7  ;;  %v14760_v14 = vld [vmem:[#allocation133_spill] sm:$0xff]  ;;  %v14767_v7 = vld [vmem:[#allocation396_spill] sm:$0xff] }
 0x558   : > { %v12407_v16 = vadd.f32 %v7808_v10, %v7767_v9  ;;  %v7769_v0 = vpop.f32.mrb[2].mxu0  ;;  %8070 = vmatpush1.bf16.msra.mxu0 %v9146_v53  ;;  %v14761_v51 = vld [vmem:[#allocation125_spill] sm:$0xff]  ;;  %v14764_v9 = vld [vmem:[#allocation372_spill] sm:$0xff] }
 0x559   : > { %v7770_v4 = vpop.f32.mrb[3].mxu0  ;;  %8071 = vmatprep.subr.bf16.mxu0 %v9163_v28  ;;  %v14762_v18 = vmov %v14761_v51  ;;  %v9179_v19 = vcombine.high %v14761_v51, %v14760_v14  ;;  %v9435_v10 = vcombine.high %v14764_v9, %v14763_v20  ;;  %v9434_v0 = vcombine.low %v14764_v9, %v14763_v20  ;;  %v14766_v8 = vld [vmem:[#allocation141_spill] sm:$0xff]  ;;  %v14778_v9 = vld [vmem:[#allocation420_spill] sm:$0xff] }
 0x55a   : > { %8113 = vmatpush1.bf16.msra.mxu1 %v9418_v60  ;;  %v9178_v3 = vcombine.low %v14762_v18, %v14760_v14  ;;  %v14765_v4 = vld [vmem:[#allocation149_spill] sm:$0xff]  ;;  %v9451_v28 = vcombine.high %v14768_v47, %v14767_v7  ;;  %v9450_v60 = vcombine.low %v14768_v47, %v14767_v7 }
 0x55b   : > { %8114 = vmatprep.subr.bf16.mxu1 %v9435_v10  ;;  %v9195_v53 = vcombine.high %v14766_v8, %v14765_v4  ;;  %v14769_v51 = vld [vmem:[#allocation165_spill] sm:$0xff]  ;;  %v14772_v10 = vld [vmem:[#allocation412_spill] sm:$0xff] }
 0x55c   : > { %8072 = vmatpush1.bf16.msra.mxu0 %v9162_v11  ;;  %v9194_v11 = vcombine.low %v14766_v8, %v14765_v4  ;;  %v14770_v1 = vmov %v14769_v51  ;;  %v9467_v6 = vcombine.high %v14773_v5, %v14772_v10  ;;  %v14774_v4 = vld [vmem:[#allocation181_spill] sm:$0xff] }
 0x55d   : > { %8073 = vmatprep.subr.bf16.mxu0 %v9179_v19  ;;  %v9211_v19 = vcombine.high %v14771_v2, %v14769_v51  ;;  %v14775_v7 = vld [vmem:[#allocation173_spill] sm:$0xff] }
 0x55e   : > { %8115 = vmatpush1.bf16.msra.mxu1 %v9434_v0  ;;  %v9466_v0 = vcombine.low %v14773_v5, %v14772_v10  ;;  %v14779_v51 = vld [vmem:[#allocation197_spill] sm:$0xff]  ;;  %v14783_v5 = vld [vmem:[#allocation436_spill] sm:$0xff] }
 0x55f   : > { %8116 = vmatprep.subr.bf16.mxu1 %v9451_v28  ;;  %v14776_v28 = vld [vmem:[#allocation428_spill] sm:$0xff] }
 0x560   : > { %8074 = vmatpush1.bf16.msra.mxu0 %v9178_v3  ;;  %v9210_v3 = vcombine.low %v14771_v2, %v14770_v1  ;;  %v14777_v8 = vmov %v14776_v28  ;;  %v9483_v14 = vcombine.high %v14778_v9, %v14776_v28  ;;  %v14780_v1 = vmov %v14779_v51  ;;  %v14781_v2 = vld [vmem:[#allocation189_spill] sm:$0xff] }
 0x561   : > { %8075 = vmatprep.subr.bf16.mxu0 %v9195_v53  ;;  %v9227_v53 = vcombine.high %v14775_v7, %v14774_v4  ;;  %v14784_v28 = vld [vmem:[#allocation213_spill] sm:$0xff] }
 0x562   : > { %8117 = vmatpush1.bf16.msra.mxu1 %v9450_v60  ;;  %v9482_v60 = vcombine.low %v14778_v9, %v14777_v8  ;;  %v14788_v8 = vld [vmem:[#allocation452_spill] sm:$0xff] }
 0x563   : > { %8118 = vmatprep.subr.bf16.mxu1 %v9467_v6  ;;  %v14782_v6 = vld [vmem:[#allocation444_spill] sm:$0xff] }
 0x564   : > { %8076 = vmatpush1.bf16.msra.mxu0 %v9194_v11  ;;  %v9226_v11 = vcombine.low %v14775_v7, %v14774_v4  ;;  %v9499_v10 = vcombine.high %v14783_v5, %v14782_v6  ;;  %v14785_v4 = vmov %v14784_v28  ;;  %v14786_v7 = vld [vmem:[#allocation205_spill] sm:$0xff] }
 0x565   : > { %8077 = vmatprep.subr.bf16.mxu0 %v9211_v19  ;;  %v9243_v19 = vcombine.high %v14781_v2, %v14779_v51  ;;  %v14789_v51 = vld [vmem:[#allocation229_spill] sm:$0xff] }
 0x566   : > { %8119 = vmatpush1.bf16.msra.mxu1 %v9466_v0  ;;  %v9498_v0 = vcombine.low %v14783_v5, %v14782_v6  ;;  %v14793_v5 = vld [vmem:[#allocation468_spill] sm:$0xff] }
 0x567   : > { %8120 = vmatprep.subr.bf16.mxu1 %v9483_v14  ;;  %v14787_v14 = vld [vmem:[#allocation460_spill] sm:$0xff] }
 0x568   : > { %8078 = vmatpush1.bf16.msra.mxu0 %v9210_v3  ;;  %v9242_v3 = vcombine.low %v14781_v2, %v14780_v1  ;;  %v9515_v9 = vcombine.high %v14788_v8, %v14787_v14  ;;  %v14790_v1 = vmov %v14789_v51  ;;  %v14791_v2 = vld [vmem:[#allocation221_spill] sm:$0xff] }
 0x569   : > { %8079 = vmatprep.subr.bf16.mxu0 %v9227_v53  ;;  %v9259_v53 = vcombine.high %v14786_v7, %v14784_v28  ;;  %v14794_v28 = vld [vmem:[#allocation245_spill] sm:$0xff] }
 0x56a   : > { %8121 = vmatpush1.bf16.msra.mxu1 %v9482_v60  ;;  %v9514_v60 = vcombine.low %v14788_v8, %v14787_v14  ;;  %v14798_v8 = vld [vmem:[#allocation484_spill] sm:$0xff] }
 0x56b   : > { %8122 = vmatprep.subr.bf16.mxu1 %v9499_v10  ;;  %v14792_v10 = vld [vmem:[#allocation476_spill] sm:$0xff] }
 0x56c   : > { %8080 = vmatpush1.bf16.msra.mxu0 %v9226_v11  ;;  %v9258_v11 = vcombine.low %v14786_v7, %v14785_v4  ;;  %v9531_v6 = vcombine.high %v14793_v5, %v14792_v10  ;;  %v14795_v4 = vmov %v14794_v28  ;;  %v14796_v7 = vld [vmem:[#allocation237_spill] sm:$0xff] }
 0x56d   : > { %8081 = vmatprep.subr.bf16.mxu0 %v9243_v19  ;;  %v9275_v19 = vcombine.high %v14791_v2, %v14789_v51  ;;  %v14799_v51 = vld [vmem:[#allocation261_spill] sm:$0xff] }
 0x56e   : > { %8123 = vmatpush1.bf16.msra.mxu1 %v9498_v0  ;;  %v9530_v0 = vcombine.low %v14793_v5, %v14792_v10  ;;  %v14803_v5 = vld [vmem:[#allocation500_spill] sm:$0xff] }
 0x56f   : > { %8124 = vmatprep.subr.bf16.mxu1 %v9515_v9  ;;  %v14797_v9 = vld [vmem:[#allocation492_spill] sm:$0xff] }
 0x570   : > { %8082 = vmatpush1.bf16.msra.mxu0 %v9242_v3  ;;  %v9274_v3 = vcombine.low %v14791_v2, %v14790_v1  ;;  %v9547_v14 = vcombine.high %v14798_v8, %v14797_v9  ;;  %v14800_v1 = vmov %v14799_v51  ;;  %v14801_v2 = vld [vmem:[#allocation253_spill] sm:$0xff] }
 0x571   : > { %8083 = vmatprep.subr.bf16.mxu0 %v9259_v53  ;;  %v9291_v53 = vcombine.high %v14796_v7, %v14794_v28  ;;  %v14804_v28 = vld [vmem:[#allocation29_spill] sm:$0xff] }
 0x572   : > { %8125 = vmatpush1.bf16.msra.mxu1 %v9514_v60  ;;  %v9546_v60 = vcombine.low %v14798_v8, %v14797_v9  ;;  %v14808_v8 = vld [vmem:[#allocation270_spill] sm:$0xff] }
 0x573   : > { %8126 = vmatprep.subr.bf16.mxu1 %v9531_v6  ;;  %v14802_v6 = vld [vmem:[#allocation508_spill] sm:$0xff] }
 0x574   : > { %8084 = vmatpush1.bf16.msra.mxu0 %v9258_v11  ;;  %v9290_v11 = vcombine.low %v14796_v7, %v14795_v4  ;;  %v9563_v10 = vcombine.high %v14803_v5, %v14802_v6  ;;  %v14805_v4 = vmov %v14804_v28  ;;  %v14806_v7 = vld [vmem:[#allocation21_spill] sm:$0xff] }
 0x575   : > { %8085 = vmatprep.subr.bf16.mxu0 %v9275_v19  ;;  %v9307_v19 = vcombine.high %v14801_v2, %v14799_v51  ;;  %v14809_v51 = vld [vmem:[#allocation45_spill] sm:$0xff] }
 0x576   : > { %8127 = vmatpush1.bf16.msra.mxu1 %v9530_v0  ;;  %v9562_v0 = vcombine.low %v14803_v5, %v14802_v6  ;;  %v14813_v5 = vld [vmem:[#allocation284_spill] sm:$0xff] }
 0x577   : > { %8128 = vmatprep.subr.bf16.mxu1 %v9547_v14  ;;  %v14807_v14 = vld [vmem:[#allocation277_spill] sm:$0xff] }
 0x578   : > { %8086 = vmatpush1.bf16.msra.mxu0 %v9274_v3  ;;  %v9306_v3 = vcombine.low %v14801_v2, %v14800_v1  ;;  %v9325_v9 = vcombine.high %v14808_v8, %v14807_v14  ;;  %v14810_v1 = vmov %v14809_v51  ;;  %v14811_v2 = vld [vmem:[#allocation37_spill] sm:$0xff] }
 0x579   : > { %8087 = vmatprep.subr.bf16.mxu0 %v9291_v53  ;;  %v9069_v53 = vcombine.high %v14806_v7, %v14804_v28  ;;  %v14815_v28 = vld [vmem:[#allocation52_spill] sm:$0xff] }
 0x57a   : > { %8129 = vmatpush1.bf16.msra.mxu1 %v9546_v60  ;;  %v9324_v60 = vcombine.low %v14808_v8, %v14807_v14  ;;  %v14819_v8 = vld [vmem:[#allocation298_spill] sm:$0xff] }
 0x57b   : > { %8130 = vmatprep.subr.bf16.mxu1 %v9563_v10  ;;  %v14812_v10 = vld [vmem:[#allocation291_spill] sm:$0xff] }
 0x57c   : > { %8088 = vmatpush1.bf16.msra.mxu0 %v9290_v11  ;;  %v9068_v11 = vcombine.low %v14806_v7, %v14805_v4  ;;  %v9341_v6 = vcombine.high %v14813_v5, %v14812_v10  ;;  %v14816_v4 = vmov %v14815_v28 }
 0x57d   : > { %8089 = vmatprep.subr.bf16.mxu0 %v9307_v19  ;;  %v9085_v19 = vcombine.high %v14811_v2, %v14809_v51  ;;  %v14817_v51 = vld [vmem:[#allocation306_spill] sm:$0xff] }
 0x57e   : > { %8131 = vmatpush1.bf16.msra.mxu1 %v9562_v0  ;;  %v9340_v0 = vcombine.low %v14813_v5, %v14812_v10  ;;  %v14818_v7 = vmov %v14817_v51  ;;  %v9357_v14 = vcombine.high %v14819_v8, %v14817_v51  ;;  %v14825_v5 = vld [vmem:[#allocation80_spill] sm:$0xff] }
 0x57f   : > { %8182 = vmatprep.subr.bf16.mxu1 %v9325_v9  ;;  %v14814_v9 = vld [vmem:[#allocation59_spill] sm:$0xff] }
 0x580   : > { %8090 = vmatpush1.bf16.msra.mxu0 %v9306_v3  ;;  %v9084_v3 = vcombine.low %v14811_v2, %v14810_v1  ;;  %v14822_v1 = vld [vmem:[#allocation320_spill] sm:$0xff]  ;;  %v14823_v2 = vld [vmem:[#allocation313_spill] sm:$0xff] }
 0x581   : > { %8141 = vmatprep.subr.bf16.mxu0 %v9069_v53  ;;  %8133 = vmatmul.mubr.bf16.vlgmr.msra.gmra.mrb[16].mxu1 %v11955_v59  ;;  %v9101_v53 = vcombine.high %v14815_v28, %v14814_v9  ;;  %v9373_v51 = vcombine.high %v14823_v2, %v14822_v1 }
 0x582   : > { %8183 = vmatpush1.bf16.msra.mxu1 %v9324_v60  ;;  %8214 = vmatprep.mubr.bf16.mxu1 %v11857_v50  ;;  %v9356_v60 = vcombine.low %v14819_v8, %v14818_v7  ;;  %v14827_v7 = vld [vmem:[#allocation327_spill] sm:$0xff] }
 0x583   : > { %8092 = vmatmul.mubr.bf16.vlgmr.msra.gmra.mrb[16].mxu0 %v11951_v13  ;;  %8184 = vmatprep.subr.bf16.mxu1 %v9341_v6  ;;  %v14820_v6 = vld [vmem:[#allocation73_spill] sm:$0xff] }
 0x584   : > { %8142 = vmatpush1.bf16.msra.mxu0 %v9068_v11  ;;  %8173 = vmatprep.mubr.bf16.mxu0 %v11855_v17  ;;  %v9100_v11 = vcombine.low %v14816_v4, %v14814_v9  ;;  %v14824_v4 = vld [vmem:[#allocation87_spill] sm:$0xff]  ;;  %v14832_v9 = vld [vmem:[#allocation341_spill] sm:$0xff] }
 0x585   : > { %8143 = vmatprep.subr.bf16.mxu0 %v9085_v19  ;;  %v14821_v19 = vld [vmem:[#allocation66_spill] sm:$0xff] }
 0x586   : > { %8185 = vmatpush1.bf16.msra.mxu1 %v9340_v0  ;;  %v9117_v28 = vcombine.high %v14821_v19, %v14820_v6  ;;  %v9372_v0 = vcombine.low %v14823_v2, %v14822_v1  ;;  %v14829_v1 = vld [vmem:[#allocation95_spill] sm:$0xff] }
 0x587   : > { %8186 = vmatprep.subr.bf16.mxu1 %v9357_v14  ;;  %v14826_v14 = vld [vmem:[#allocation334_spill] sm:$0xff] }
 0x588   : > { %8144 = vmatpush1.bf16.msra.mxu0 %v9084_v3  ;;  %v9116_v3 = vcombine.low %v14821_v19, %v14820_v6  ;;  %v9389_v8 = vcombine.high %v14827_v7, %v14826_v14  ;;  %v14828_v6 = vld [vmem:[#allocation102_spill] sm:$0xff] }
 0x589   : > { %8145 = vmatprep.subr.bf16.mxu0 %v9101_v53  ;;  %v9133_v53 = vcombine.high %v14825_v5, %v14824_v4 }
 0x58a   : > { %8187 = vmatpush1.bf16.msra.mxu1 %v9356_v60  ;;  %v9388_v60 = vcombine.low %v14827_v7, %v14826_v14  ;;  %v14836_v7 = vld [vmem:[#allocation357_spill] sm:$0xff] }
 0x58b   : > { %8188 = vmatprep.subr.bf16.mxu1 %v9373_v51  ;;  %v14830_v51 = vld [vmem:[#allocation349_spill] sm:$0xff] }
 0x58c   : > { %8146 = vmatpush1.bf16.msra.mxu0 %v9100_v11  ;;  %v9132_v11 = vcombine.low %v14825_v5, %v14824_v4  ;;  %v14831_v2 = vmov %v14830_v51  ;;  %v9405_v10 = vcombine.high %v14832_v9, %v14830_v51  ;;  %v14833_v4 = vld [vmem:[#allocation118_spill] sm:$0xff] }
 0x58d   : > { %8147 = vmatprep.subr.bf16.mxu0 %v9117_v28  ;;  %v9149_v28 = vcombine.high %v14829_v1, %v14828_v6  ;;  %v14834_v5 = vld [vmem:[#allocation110_spill] sm:$0xff] }
 0x58e   : > { %8189 = vmatpush1.bf16.msra.mxu1 %v9372_v0  ;;  %v9404_v0 = vcombine.low %v14832_v9, %v14831_v2 }
 0x58f   : > { %8190 = vmatprep.subr.bf16.mxu1 %v9389_v8  ;;  %v14835_v8 = vld [vmem:[#allocation365_spill] sm:$0xff] }
 0x590   : > { %8148 = vmatpush1.bf16.msra.mxu0 %v9116_v3  ;;  %v9148_v3 = vcombine.low %v14829_v1, %v14828_v6  ;;  %v9421_v14 = vcombine.high %v14836_v7, %v14835_v8 }
 0x591   : > { %8149 = vmatprep.subr.bf16.mxu0 %v9133_v53  ;;  %v9165_v53 = vcombine.high %v14834_v5, %v14833_v4 }
 0x592   : > { %8191 = vmatpush1.bf16.msra.mxu1 %v9388_v60 }
 0x593   : > { %8192 = vmatprep.subr.bf16.mxu1 %v9405_v10  ;;  %v9164_v10 = vcombine.low %v14834_v5, %v14833_v4  ;;  %v14845_v4 = vld [vmem:[#allocation166_spill] sm:$0xff] }
 0x594   : > { %8150 = vmatpush1.bf16.msra.mxu0 %v9132_v11  ;;  %v7888_v19 = vpop.f32.mrb[4].mxu1  ;;  %v14846_v5 = vld [vmem:[#allocation158_spill] sm:$0xff] }
 0x595   : > { %8151 = vmatprep.subr.bf16.mxu0 %v9149_v28  ;;  %v7890_v60 = vpop.f32.mrb[5].mxu1  ;;  %v9420_v28 = vcombine.low %v14836_v7, %v14835_v8  ;;  %v14849_v8 = vld [vmem:[#allocation405_spill] sm:$0xff] }
 0x596   : > { %v7847_v18 = vpop.f32.mrb[4].mxu0  ;;  %v7892_v6 = vpop.f32.mrb[6].mxu1  ;;  %8193 = vmatpush1.bf16.msra.mxu1 %v9404_v0  ;;  %v14844_v0 = vld [vmem:[#allocation389_spill] sm:$0xff] }
 0x597   : > { %v12541_v20 = vadd.f32 %v7888_v19, %v7847_v18  ;;  %v7849_v11 = vpop.f32.mrb[5].mxu0  ;;  %v7893_v9 = vpop.f32.mrb[7].mxu1  ;;  %8194 = vmatprep.subr.bf16.mxu1 %v9421_v14  ;;  %v14837_v18 = vld [vmem:[#allocation134_spill] sm:$0xff]  ;;  %v14843_v14 = vld [vmem:[#allocation397_spill] sm:$0xff] }
 0x598   : > { %v12543_v51 = vadd.f32 %v7890_v60, %v7849_v11  ;;  %v7851_v1 = vpop.f32.mrb[6].mxu0  ;;  %8152 = vmatpush1.bf16.msra.mxu0 %v9148_v3  ;;  %v14838_v19 = vld [vmem:[#allocation126_spill] sm:$0xff]  ;;  %v14840_v11 = vld [vmem:[#allocation373_spill] sm:$0xff] }
 0x599   : > { %v7852_v2 = vpop.f32.mrb[7].mxu0  ;;  %8153 = vmatprep.subr.bf16.mxu0 %v9165_v53  ;;  %v9181_v21 = vcombine.high %v14838_v19, %v14837_v18  ;;  %v9437_v60 = vcombine.high %v14840_v11, %v14839_v22  ;;  %v9180_v1 = vcombine.low %v14838_v19, %v14837_v18  ;;  %v9436_v6 = vcombine.low %v14840_v11, %v14839_v22  ;;  %v14842_v9 = vld [vmem:[#allocation142_spill] sm:$0xff] }
 0x59a   : > { %8195 = vmatpush1.bf16.msra.mxu1 %v9420_v28  ;;  %v14841_v2 = vld [vmem:[#allocation150_spill] sm:$0xff]  ;;  %v9453_v53 = vcombine.high %v14844_v0, %v14843_v14  ;;  %v9452_v28 = vcombine.low %v14844_v0, %v14843_v14  ;;  %v14854_v14 = vld [vmem:[#allocation421_spill] sm:$0xff] }
 0x59b   : > { %8196 = vmatprep.subr.bf16.mxu1 %v9437_v60  ;;  %v9197_v3 = vcombine.high %v14842_v9, %v14841_v2  ;;  %v14847_v60 = vld [vmem:[#allocation413_spill] sm:$0xff]  ;;  %v14851_v0 = vld [vmem:[#allocation174_spill] sm:$0xff] }
 0x59c   : > { %8154 = vmatpush1.bf16.msra.mxu0 %v9164_v10  ;;  %v9196_v10 = vcombine.low %v14842_v9, %v14841_v2  ;;  %v14848_v7 = vmov %v14847_v60  ;;  %v9469_v11 = vcombine.high %v14849_v8, %v14847_v60  ;;  %v14850_v2 = vld [vmem:[#allocation182_spill] sm:$0xff] }
 0x59d   : > { %8155 = vmatprep.subr.bf16.mxu0 %v9181_v21  ;;  %v9213_v21 = vcombine.high %v14846_v5, %v14845_v4  ;;  %v14855_v60 = vld [vmem:[#allocation198_spill] sm:$0xff] }
 0x59e   : > { %8197 = vmatpush1.bf16.msra.mxu1 %v9436_v6  ;;  %v9468_v6 = vcombine.low %v14849_v8, %v14848_v7  ;;  %v14859_v7 = vld [vmem:[#allocation437_spill] sm:$0xff] }
 0x59f   : > { %8198 = vmatprep.subr.bf16.mxu1 %v9453_v53  ;;  %v14852_v53 = vld [vmem:[#allocation429_spill] sm:$0xff] }
 0x5a0   : > { %8156 = vmatpush1.bf16.msra.mxu0 %v9180_v1  ;;  %v9212_v1 = vcombine.low %v14846_v5, %v14845_v4  ;;  %v14853_v9 = vmov %v14852_v53  ;;  %v9485_v18 = vcombine.high %v14854_v14, %v14852_v53  ;;  %v14856_v4 = vmov %v14855_v60  ;;  %v14857_v5 = vld [vmem:[#allocation190_spill] sm:$0xff] }
 0x5a1   : > { %8157 = vmatprep.subr.bf16.mxu0 %v9197_v3  ;;  %v9229_v3 = vcombine.high %v14851_v0, %v14850_v2  ;;  %v14860_v53 = vld [vmem:[#allocation214_spill] sm:$0xff] }
 0x5a2   : > { %8199 = vmatpush1.bf16.msra.mxu1 %v9452_v28  ;;  %v9484_v28 = vcombine.low %v14854_v14, %v14853_v9  ;;  %v14864_v9 = vld [vmem:[#allocation453_spill] sm:$0xff] }
 0x5a3   : > { %8200 = vmatprep.subr.bf16.mxu1 %v9469_v11  ;;  %v14858_v11 = vld [vmem:[#allocation445_spill] sm:$0xff] }
 0x5a4   : > { %8158 = vmatpush1.bf16.msra.mxu0 %v9196_v10  ;;  %v9228_v10 = vcombine.low %v14851_v0, %v14850_v2  ;;  %v9501_v8 = vcombine.high %v14859_v7, %v14858_v11  ;;  %v14861_v0 = vmov %v14860_v53  ;;  %v14862_v2 = vld [vmem:[#allocation206_spill] sm:$0xff] }
 0x5a5   : > { %8159 = vmatprep.subr.bf16.mxu0 %v9213_v21  ;;  %v9245_v21 = vcombine.high %v14857_v5, %v14855_v60  ;;  %v14865_v60 = vld [vmem:[#allocation230_spill] sm:$0xff] }
 0x5a6   : > { %8201 = vmatpush1.bf16.msra.mxu1 %v9468_v6  ;;  %v9500_v6 = vcombine.low %v14859_v7, %v14858_v11  ;;  %v14869_v7 = vld [vmem:[#allocation469_spill] sm:$0xff] }
 0x5a7   : > { %8202 = vmatprep.subr.bf16.mxu1 %v9485_v18  ;;  %v14863_v18 = vld [vmem:[#allocation461_spill] sm:$0xff] }
 0x5a8   : > { %8160 = vmatpush1.bf16.msra.mxu0 %v9212_v1  ;;  %v9244_v1 = vcombine.low %v14857_v5, %v14856_v4  ;;  %v9517_v14 = vcombine.high %v14864_v9, %v14863_v18  ;;  %v14866_v4 = vmov %v14865_v60  ;;  %v14867_v5 = vld [vmem:[#allocation222_spill] sm:$0xff] }
 0x5a9   : > { %8161 = vmatprep.subr.bf16.mxu0 %v9229_v3  ;;  %v9261_v3 = vcombine.high %v14862_v2, %v14860_v53  ;;  %v14870_v53 = vld [vmem:[#allocation246_spill] sm:$0xff] }
 0x5aa   : > { %8203 = vmatpush1.bf16.msra.mxu1 %v9484_v28  ;;  %v9516_v28 = vcombine.low %v14864_v9, %v14863_v18  ;;  %v14874_v9 = vld [vmem:[#allocation485_spill] sm:$0xff] }
 0x5ab   : > { %8204 = vmatprep.subr.bf16.mxu1 %v9501_v8  ;;  %v14868_v8 = vld [vmem:[#allocation477_spill] sm:$0xff] }
 0x5ac   : > { %8162 = vmatpush1.bf16.msra.mxu0 %v9228_v10  ;;  %v9260_v10 = vcombine.low %v14862_v2, %v14861_v0  ;;  %v9533_v11 = vcombine.high %v14869_v7, %v14868_v8  ;;  %v14871_v0 = vmov %v14870_v53  ;;  %v14872_v2 = vld [vmem:[#allocation238_spill] sm:$0xff] }
 0x5ad   : > { %8163 = vmatprep.subr.bf16.mxu0 %v9245_v21  ;;  %v9277_v21 = vcombine.high %v14867_v5, %v14865_v60  ;;  %v14875_v60 = vld [vmem:[#allocation262_spill] sm:$0xff] }
 0x5ae   : > { %8205 = vmatpush1.bf16.msra.mxu1 %v9500_v6  ;;  %v9532_v6 = vcombine.low %v14869_v7, %v14868_v8  ;;  %v14879_v7 = vld [vmem:[#allocation501_spill] sm:$0xff] }
 0x5af   : > { %8206 = vmatprep.subr.bf16.mxu1 %v9517_v14  ;;  %v14873_v14 = vld [vmem:[#allocation493_spill] sm:$0xff] }
 0x5b0   : > { %8164 = vmatpush1.bf16.msra.mxu0 %v9244_v1  ;;  %v9276_v1 = vcombine.low %v14867_v5, %v14866_v4  ;;  %v9549_v18 = vcombine.high %v14874_v9, %v14873_v14  ;;  %v14876_v4 = vmov %v14875_v60  ;;  %v14877_v5 = vld [vmem:[#allocation254_spill] sm:$0xff] }
 0x5b1   : > { %8165 = vmatprep.subr.bf16.mxu0 %v9261_v3  ;;  %v9293_v3 = vcombine.high %v14872_v2, %v14870_v53  ;;  %v14880_v53 = vld [vmem:[#allocation30_spill] sm:$0xff] }
 0x5b2   : > { %8207 = vmatpush1.bf16.msra.mxu1 %v9516_v28  ;;  %v9548_v28 = vcombine.low %v14874_v9, %v14873_v14  ;;  %v14884_v9 = vld [vmem:[#allocation271_spill] sm:$0xff] }
 0x5b3   : > { %8208 = vmatprep.subr.bf16.mxu1 %v9533_v11  ;;  %v14878_v11 = vld [vmem:[#allocation509_spill] sm:$0xff] }
 0x5b4   : > { %8166 = vmatpush1.bf16.msra.mxu0 %v9260_v10  ;;  %v9292_v10 = vcombine.low %v14872_v2, %v14871_v0  ;;  %v9565_v8 = vcombine.high %v14879_v7, %v14878_v11  ;;  %v14881_v0 = vmov %v14880_v53  ;;  %v14882_v2 = vld [vmem:[#allocation22_spill] sm:$0xff] }
 0x5b5   : > { %8167 = vmatprep.subr.bf16.mxu0 %v9277_v21  ;;  %v9309_v21 = vcombine.high %v14877_v5, %v14875_v60  ;;  %v14885_v60 = vld [vmem:[#allocation46_spill] sm:$0xff] }
 0x5b6   : > { %8209 = vmatpush1.bf16.msra.mxu1 %v9532_v6  ;;  %v9564_v6 = vcombine.low %v14879_v7, %v14878_v11  ;;  %v14889_v7 = vld [vmem:[#allocation285_spill] sm:$0xff] }
 0x5b7   : > { %8210 = vmatprep.subr.bf16.mxu1 %v9549_v18  ;;  %v14883_v18 = vld [vmem:[#allocation278_spill] sm:$0xff] }
 0x5b8   : > { %8168 = vmatpush1.bf16.msra.mxu0 %v9276_v1  ;;  %v9308_v1 = vcombine.low %v14877_v5, %v14876_v4  ;;  %v9327_v14 = vcombine.high %v14884_v9, %v14883_v18  ;;  %v14886_v4 = vmov %v14885_v60  ;;  %v14887_v5 = vld [vmem:[#allocation38_spill] sm:$0xff] }
 0x5b9   : > { %8169 = vmatprep.subr.bf16.mxu0 %v9293_v3  ;;  %v9071_v3 = vcombine.high %v14882_v2, %v14880_v53  ;;  %v14891_v53 = vld [vmem:[#allocation53_spill] sm:$0xff] }
 0x5ba   : > { %8211 = vmatpush1.bf16.msra.mxu1 %v9548_v28  ;;  %v9326_v28 = vcombine.low %v14884_v9, %v14883_v18 }
 0x5bb   : > { %8212 = vmatprep.subr.bf16.mxu1 %v9565_v8  ;;  %v14888_v8 = vld [vmem:[#allocation292_spill] sm:$0xff] }
 0x5bc   : > { %8170 = vmatpush1.bf16.msra.mxu0 %v9292_v10  ;;  %v9070_v10 = vcombine.low %v14882_v2, %v14881_v0  ;;  %v9343_v11 = vcombine.high %v14889_v7, %v14888_v8  ;;  %v14893_v0 = vld [vmem:[#allocation307_spill] sm:$0xff] }
 0x5bd   : > { %8171 = vmatprep.subr.bf16.mxu0 %v9309_v21  ;;  %v9087_v21 = vcombine.high %v14887_v5, %v14885_v60  ;;  %v14894_v2 = vld [vmem:[#allocation299_spill] sm:$0xff] }
 0x5be   : > { %8213 = vmatpush1.bf16.msra.mxu1 %v9564_v6  ;;  %v9342_v6 = vcombine.low %v14889_v7, %v14888_v8  ;;  %v9359_v9 = vcombine.high %v14894_v2, %v14893_v0 }
 0x5bf   : > { %8264 = vmatprep.subr.bf16.mxu1 %v9327_v14  ;;  %v14890_v14 = vld [vmem:[#allocation60_spill] sm:$0xff] }
 0x5c0   : > { %8172 = vmatpush1.bf16.msra.mxu0 %v9308_v1  ;;  %v9086_v1 = vcombine.low %v14887_v5, %v14886_v4  ;;  %v9103_v60 = vcombine.high %v14891_v53, %v14890_v14  ;;  %v14897_v4 = vld [vmem:[#allocation321_spill] sm:$0xff]  ;;  %v14898_v5 = vld [vmem:[#allocation314_spill] sm:$0xff] }
 0x5c1   : > { %8223 = vmatprep.subr.bf16.mxu0 %v9071_v3  ;;  %8215 = vmatmul.mubr.bf16.vlgmr.msra.gmra.mrb[20].mxu1 %v11955_v59  ;;  %v14892_v3 = vmov %v14891_v53  ;;  %v9375_v7 = vcombine.high %v14898_v5, %v14897_v4 }
 0x5c2   : > { %8265 = vmatpush1.bf16.msra.mxu1 %v9326_v28  ;;  %8296 = vmatprep.mubr.bf16.mxu1 %v11857_v50  ;;  %v9358_v28 = vcombine.low %v14894_v2, %v14893_v0  ;;  %v14900_v0 = vld [vmem:[#allocation81_spill] sm:$0xff]  ;;  %v14902_v2 = vld [vmem:[#allocation328_spill] sm:$0xff] }
 0x5c3   : > { %8174 = vmatmul.mubr.bf16.vlgmr.msra.gmra.mrb[20].mxu0 %v11951_v13  ;;  %8266 = vmatprep.subr.bf16.mxu1 %v9343_v11  ;;  %v14895_v11 = vld [vmem:[#allocation74_spill] sm:$0xff] }
 0x5c4   : > { %8224 = vmatpush1.bf16.msra.mxu0 %v9070_v10  ;;  %8255 = vmatprep.mubr.bf16.mxu0 %v11855_v17  ;;  %v9102_v10 = vcombine.low %v14892_v3, %v14890_v14  ;;  %v14899_v3 = vld [vmem:[#allocation88_spill] sm:$0xff] }
 0x5c5   : > { %8225 = vmatprep.subr.bf16.mxu0 %v9087_v21  ;;  %v14896_v21 = vld [vmem:[#allocation67_spill] sm:$0xff] }
 0x5c6   : > { %8267 = vmatpush1.bf16.msra.mxu1 %v9342_v6  ;;  %v9119_v53 = vcombine.high %v14896_v21, %v14895_v11  ;;  %v9374_v6 = vcombine.low %v14898_v5, %v14897_v4  ;;  %v14904_v4 = vld [vmem:[#allocation96_spill] sm:$0xff]  ;;  %v14906_v5 = vld [vmem:[#allocation342_spill] sm:$0xff] }
 0x5c7   : > { %8268 = vmatprep.subr.bf16.mxu1 %v9359_v9  ;;  %v14901_v9 = vld [vmem:[#allocation335_spill] sm:$0xff] }
 0x5c8   : > { %8226 = vmatpush1.bf16.msra.mxu0 %v9086_v1  ;;  %v9118_v1 = vcombine.low %v14896_v21, %v14895_v11  ;;  %v9391_v8 = vcombine.high %v14902_v2, %v14901_v9  ;;  %v14903_v11 = vld [vmem:[#allocation103_spill] sm:$0xff] }
 0x5c9   : > { %8227 = vmatprep.subr.bf16.mxu0 %v9103_v60  ;;  %v9135_v60 = vcombine.high %v14900_v0, %v14899_v3 }
 0x5ca   : > { %8269 = vmatpush1.bf16.msra.mxu1 %v9358_v28  ;;  %v9390_v28 = vcombine.low %v14902_v2, %v14901_v9  ;;  %v14908_v2 = vld [vmem:[#allocation111_spill] sm:$0xff] }
 0x5cb   : > { %8270 = vmatprep.subr.bf16.mxu1 %v9375_v7  ;;  %v14905_v7 = vld [vmem:[#allocation350_spill] sm:$0xff] }
 0x5cc   : > { %8228 = vmatpush1.bf16.msra.mxu0 %v9102_v10  ;;  %v9134_v10 = vcombine.low %v14900_v0, %v14899_v3  ;;  %v9407_v14 = vcombine.high %v14906_v5, %v14905_v7  ;;  %v14907_v0 = vld [vmem:[#allocation119_spill] sm:$0xff]  ;;  %v14910_v3 = vld [vmem:[#allocation358_spill] sm:$0xff] }
 0x5cd   : > { %8229 = vmatprep.subr.bf16.mxu0 %v9119_v53  ;;  %v9151_v53 = vcombine.high %v14904_v4, %v14903_v11 }
 0x5ce   : > { %8271 = vmatpush1.bf16.msra.mxu1 %v9374_v6  ;;  %v9406_v6 = vcombine.low %v14906_v5, %v14905_v7 }
 0x5cf   : > { %8272 = vmatprep.subr.bf16.mxu1 %v9391_v8  ;;  %v14909_v8 = vld [vmem:[#allocation366_spill] sm:$0xff] }
 0x5d0   : > { %8230 = vmatpush1.bf16.msra.mxu0 %v9118_v1  ;;  %v9150_v1 = vcombine.low %v14904_v4, %v14903_v11  ;;  %v9423_v9 = vcombine.high %v14910_v3, %v14909_v8 }
 0x5d1   : > { %8231 = vmatprep.subr.bf16.mxu0 %v9135_v60  ;;  %v9167_v60 = vcombine.high %v14908_v2, %v14907_v0 }
 0x5d2   : > { %8273 = vmatpush1.bf16.msra.mxu1 %v9390_v28 }
 0x5d3   : > { %8274 = vmatprep.subr.bf16.mxu1 %v9407_v14  ;;  %v9166_v14 = vcombine.low %v14908_v2, %v14907_v0  ;;  %v14919_v0 = vld [vmem:[#allocation167_spill] sm:$0xff] }
 0x5d4   : > { %8232 = vmatpush1.bf16.msra.mxu0 %v9134_v10  ;;  %v7970_v19 = vpop.f32.mrb[8].mxu1  ;;  %v14920_v2 = vld [vmem:[#allocation159_spill] sm:$0xff] }
 0x5d5   : > { %8233 = vmatprep.subr.bf16.mxu0 %v9151_v53  ;;  %v7972_v28 = vpop.f32.mrb[9].mxu1  ;;  %v9422_v53 = vcombine.low %v14910_v3, %v14909_v8  ;;  %v14923_v8 = vld [vmem:[#allocation406_spill] sm:$0xff] }
 0x5d6   : > { %v7929_v18 = vpop.f32.mrb[8].mxu0  ;;  %v7974_v11 = vpop.f32.mrb[10].mxu1  ;;  %8275 = vmatpush1.bf16.msra.mxu1 %v9406_v6  ;;  %v14918_v6 = vld [vmem:[#allocation390_spill] sm:$0xff] }
 0x5d7   : > { %v12677_v21 = vadd.f32 %v7970_v19, %v7929_v18  ;;  %v7931_v10 = vpop.f32.mrb[9].mxu0  ;;  %v7975_v7 = vpop.f32.mrb[11].mxu1  ;;  %8276 = vmatprep.subr.bf16.mxu1 %v9423_v9  ;;  %v14911_v19 = vld [vmem:[#allocation135_spill] sm:$0xff]  ;;  %v14917_v9 = vld [vmem:[#allocation398_spill] sm:$0xff] }
 0x5d8   : > { %v12679_v22 = vadd.f32 %v7972_v28, %v7931_v10  ;;  %v7933_v4 = vpop.f32.mrb[10].mxu0  ;;  %8234 = vmatpush1.bf16.msra.mxu0 %v9150_v1  ;;  %v14912_v18 = vld [vmem:[#allocation127_spill] sm:$0xff]  ;;  %v14914_v10 = vld [vmem:[#allocation374_spill] sm:$0xff] }
 0x5d9   : > { %v7934_v5 = vpop.f32.mrb[11].mxu0  ;;  %8235 = vmatprep.subr.bf16.mxu0 %v9167_v60  ;;  %v9183_v23 = vcombine.high %v14912_v18, %v14911_v19  ;;  %v9439_v28 = vcombine.high %v14914_v10, %v14913_v24  ;;  %v9182_v4 = vcombine.low %v14912_v18, %v14911_v19  ;;  %v9438_v11 = vcombine.low %v14914_v10, %v14913_v24  ;;  %v14916_v7 = vld [vmem:[#allocation143_spill] sm:$0xff] }
 0x5da   : > { %8277 = vmatpush1.bf16.msra.mxu1 %v9422_v53  ;;  %v14915_v5 = vld [vmem:[#allocation151_spill] sm:$0xff]  ;;  %v9455_v60 = vcombine.high %v14918_v6, %v14917_v9  ;;  %v9454_v53 = vcombine.low %v14918_v6, %v14917_v9  ;;  %v14928_v9 = vld [vmem:[#allocation422_spill] sm:$0xff] }
 0x5db   : > { %8278 = vmatprep.subr.bf16.mxu1 %v9439_v28  ;;  %v9199_v1 = vcombine.high %v14916_v7, %v14915_v5  ;;  %v14921_v28 = vld [vmem:[#allocation414_spill] sm:$0xff]  ;;  %v14925_v6 = vld [vmem:[#allocation175_spill] sm:$0xff] }
 0x5dc   : > { %8236 = vmatpush1.bf16.msra.mxu0 %v9166_v14  ;;  %v9198_v14 = vcombine.low %v14916_v7, %v14915_v5  ;;  %v14922_v3 = vmov %v14921_v28  ;;  %v9471_v10 = vcombine.high %v14923_v8, %v14921_v28  ;;  %v14924_v5 = vld [vmem:[#allocation183_spill] sm:$0xff] }
 0x5dd   : > { %8237 = vmatprep.subr.bf16.mxu0 %v9183_v23  ;;  %v9215_v23 = vcombine.high %v14920_v2, %v14919_v0  ;;  %v14929_v28 = vld [vmem:[#allocation199_spill] sm:$0xff] }
 0x5de   : > { %8279 = vmatpush1.bf16.msra.mxu1 %v9438_v11  ;;  %v9470_v11 = vcombine.low %v14923_v8, %v14922_v3  ;;  %v14933_v3 = vld [vmem:[#allocation438_spill] sm:$0xff]  ;;  %v14987_v24 = vld [vmem:[#allocation383_spill] sm:$0xff] }
 0x5df   : > { %8280 = vmatprep.subr.bf16.mxu1 %v9455_v60  ;;  %v14926_v60 = vld [vmem:[#allocation430_spill] sm:$0xff] }
 0x5e0   : > { %8238 = vmatpush1.bf16.msra.mxu0 %v9182_v4  ;;  %v9214_v4 = vcombine.low %v14920_v2, %v14919_v0  ;;  %v14927_v7 = vmov %v14926_v60  ;;  %v9487_v18 = vcombine.high %v14928_v9, %v14926_v60  ;;  %v14930_v0 = vmov %v14929_v28  ;;  %v14931_v2 = vld [vmem:[#allocation191_spill] sm:$0xff] }
 0x5e1   : > { %8239 = vmatprep.subr.bf16.mxu0 %v9199_v1  ;;  %v9231_v1 = vcombine.high %v14925_v6, %v14924_v5  ;;  %v14934_v60 = vld [vmem:[#allocation215_spill] sm:$0xff] }
 0x5e2   : > { %8281 = vmatpush1.bf16.msra.mxu1 %v9454_v53  ;;  %v9486_v53 = vcombine.low %v14928_v9, %v14927_v7  ;;  %v14938_v7 = vld [vmem:[#allocation454_spill] sm:$0xff] }
 0x5e3   : > { %8282 = vmatprep.subr.bf16.mxu1 %v9471_v10  ;;  %v14932_v10 = vld [vmem:[#allocation446_spill] sm:$0xff] }
 0x5e4   : > { %8240 = vmatpush1.bf16.msra.mxu0 %v9198_v14  ;;  %v9230_v14 = vcombine.low %v14925_v6, %v14924_v5  ;;  %v9503_v8 = vcombine.high %v14933_v3, %v14932_v10  ;;  %v14935_v5 = vmov %v14934_v60  ;;  %v14936_v6 = vld [vmem:[#allocation207_spill] sm:$0xff] }
 0x5e5   : > { %8241 = vmatprep.subr.bf16.mxu0 %v9215_v23  ;;  %v9247_v23 = vcombine.high %v14931_v2, %v14929_v28  ;;  %v14939_v28 = vld [vmem:[#allocation231_spill] sm:$0xff] }
 0x5e6   : > { %8283 = vmatpush1.bf16.msra.mxu1 %v9470_v11  ;;  %v9502_v11 = vcombine.low %v14933_v3, %v14932_v10  ;;  %v14943_v3 = vld [vmem:[#allocation470_spill] sm:$0xff] }
 0x5e7   : > { %8284 = vmatprep.subr.bf16.mxu1 %v9487_v18  ;;  %v14937_v18 = vld [vmem:[#allocation462_spill] sm:$0xff] }
 0x5e8   : > { %8242 = vmatpush1.bf16.msra.mxu0 %v9214_v4  ;;  %v9246_v4 = vcombine.low %v14931_v2, %v14930_v0  ;;  %v9519_v9 = vcombine.high %v14938_v7, %v14937_v18  ;;  %v14940_v0 = vmov %v14939_v28  ;;  %v14941_v2 = vld [vmem:[#allocation223_spill] sm:$0xff] }
 0x5e9   : > { %8243 = vmatprep.subr.bf16.mxu0 %v9231_v1  ;;  %v9263_v1 = vcombine.high %v14936_v6, %v14934_v60  ;;  %v14944_v60 = vld [vmem:[#allocation247_spill] sm:$0xff] }
 0x5ea   : > { %8285 = vmatpush1.bf16.msra.mxu1 %v9486_v53  ;;  %v9518_v53 = vcombine.low %v14938_v7, %v14937_v18  ;;  %v14948_v7 = vld [vmem:[#allocation486_spill] sm:$0xff] }
 0x5eb   : > { %8286 = vmatprep.subr.bf16.mxu1 %v9503_v8  ;;  %v14942_v8 = vld [vmem:[#allocation478_spill] sm:$0xff] }
 0x5ec   : > { %8244 = vmatpush1.bf16.msra.mxu0 %v9230_v14  ;;  %v9262_v14 = vcombine.low %v14936_v6, %v14935_v5  ;;  %v9535_v10 = vcombine.high %v14943_v3, %v14942_v8  ;;  %v14945_v5 = vmov %v14944_v60  ;;  %v14946_v6 = vld [vmem:[#allocation239_spill] sm:$0xff] }
 0x5ed   : > { %8245 = vmatprep.subr.bf16.mxu0 %v9247_v23  ;;  %v9279_v23 = vcombine.high %v14941_v2, %v14939_v28  ;;  %v14949_v28 = vld [vmem:[#allocation263_spill] sm:$0xff] }
 0x5ee   : > { %8287 = vmatpush1.bf16.msra.mxu1 %v9502_v11  ;;  %v9534_v11 = vcombine.low %v14943_v3, %v14942_v8  ;;  %v14953_v3 = vld [vmem:[#allocation502_spill] sm:$0xff] }
 0x5ef   : > { %8288 = vmatprep.subr.bf16.mxu1 %v9519_v9  ;;  %v14947_v9 = vld [vmem:[#allocation494_spill] sm:$0xff] }
 0x5f0   : > { %8246 = vmatpush1.bf16.msra.mxu0 %v9246_v4  ;;  %v9278_v4 = vcombine.low %v14941_v2, %v14940_v0  ;;  %v9551_v18 = vcombine.high %v14948_v7, %v14947_v9  ;;  %v14950_v0 = vmov %v14949_v28  ;;  %v14951_v2 = vld [vmem:[#allocation255_spill] sm:$0xff] }
 0x5f1   : > { %8247 = vmatprep.subr.bf16.mxu0 %v9263_v1  ;;  %v9295_v1 = vcombine.high %v14946_v6, %v14944_v60  ;;  %v14954_v60 = vld [vmem:[#allocation31_spill] sm:$0xff] }
 0x5f2   : > { %8289 = vmatpush1.bf16.msra.mxu1 %v9518_v53  ;;  %v9550_v53 = vcombine.low %v14948_v7, %v14947_v9  ;;  %v14958_v7 = vld [vmem:[#allocation272_spill] sm:$0xff] }
 0x5f3   : > { %8290 = vmatprep.subr.bf16.mxu1 %v9535_v10  ;;  %v14952_v10 = vld [vmem:[#allocation510_spill] sm:$0xff] }
 0x5f4   : > { %8248 = vmatpush1.bf16.msra.mxu0 %v9262_v14  ;;  %v9294_v14 = vcombine.low %v14946_v6, %v14945_v5  ;;  %v9567_v8 = vcombine.high %v14953_v3, %v14952_v10  ;;  %v14955_v5 = vmov %v14954_v60  ;;  %v14956_v6 = vld [vmem:[#allocation23_spill] sm:$0xff] }
 0x5f5   : > { %8249 = vmatprep.subr.bf16.mxu0 %v9279_v23  ;;  %v9311_v23 = vcombine.high %v14951_v2, %v14949_v28  ;;  %v14959_v28 = vld [vmem:[#allocation47_spill] sm:$0xff] }
 0x5f6   : > { %8291 = vmatpush1.bf16.msra.mxu1 %v9534_v11  ;;  %v9566_v11 = vcombine.low %v14953_v3, %v14952_v10  ;;  %v14963_v3 = vld [vmem:[#allocation286_spill] sm:$0xff] }
 0x5f7   : > { %8292 = vmatprep.subr.bf16.mxu1 %v9551_v18  ;;  %v14957_v18 = vld [vmem:[#allocation279_spill] sm:$0xff] }
 0x5f8   : > { %8250 = vmatpush1.bf16.msra.mxu0 %v9278_v4  ;;  %v9310_v4 = vcombine.low %v14951_v2, %v14950_v0  ;;  %v9329_v9 = vcombine.high %v14958_v7, %v14957_v18  ;;  %v14960_v0 = vmov %v14959_v28  ;;  %v14961_v2 = vld [vmem:[#allocation39_spill] sm:$0xff] }
 0x5f9   : > { %8251 = vmatprep.subr.bf16.mxu0 %v9295_v1  ;;  %v9073_v1 = vcombine.high %v14956_v6, %v14954_v60  ;;  %v14965_v60 = vld [vmem:[#allocation54_spill] sm:$0xff] }
 0x5fa   : > { %8293 = vmatpush1.bf16.msra.mxu1 %v9550_v53  ;;  %v9328_v53 = vcombine.low %v14958_v7, %v14957_v18 }
 0x5fb   : > { %8294 = vmatprep.subr.bf16.mxu1 %v9567_v8  ;;  %v14962_v8 = vld [vmem:[#allocation293_spill] sm:$0xff] }
 0x5fc   : > { %8252 = vmatpush1.bf16.msra.mxu0 %v9294_v14  ;;  %v9072_v14 = vcombine.low %v14956_v6, %v14955_v5  ;;  %v9345_v10 = vcombine.high %v14963_v3, %v14962_v8  ;;  %v14967_v5 = vld [vmem:[#allocation308_spill] sm:$0xff] }
 0x5fd   : > { %8253 = vmatprep.subr.bf16.mxu0 %v9311_v23  ;;  %v9089_v23 = vcombine.high %v14961_v2, %v14959_v28  ;;  %v14968_v6 = vld [vmem:[#allocation300_spill] sm:$0xff] }
 0x5fe   : > { %8295 = vmatpush1.bf16.msra.mxu1 %v9566_v11  ;;  %v9344_v11 = vcombine.low %v14963_v3, %v14962_v8  ;;  %v9361_v7 = vcombine.high %v14968_v6, %v14967_v5 }
 0x5ff   : > { %8346 = vmatprep.subr.bf16.mxu1 %v9329_v9  ;;  %v14964_v9 = vld [vmem:[#allocation61_spill] sm:$0xff] }
 0x600   : > { %8254 = vmatpush1.bf16.msra.mxu0 %v9310_v4  ;;  %v9088_v4 = vcombine.low %v14961_v2, %v14960_v0  ;;  %v9105_v28 = vcombine.high %v14965_v60, %v14964_v9  ;;  %v14971_v0 = vld [vmem:[#allocation322_spill] sm:$0xff]  ;;  %v14972_v2 = vld [vmem:[#allocation315_spill] sm:$0xff] }
 0x601   : > { %8305 = vmatprep.subr.bf16.mxu0 %v9073_v1  ;;  %8297 = vmatmul.mubr.bf16.vlgmr.msra.gmra.mrb[24].mxu1 %v11955_v59  ;;  %v14966_v1 = vmov %v14965_v60  ;;  %v9377_v3 = vcombine.high %v14972_v2, %v14971_v0 }
 0x602   : > { %8347 = vmatpush1.bf16.msra.mxu1 %v9328_v53  ;;  %8378 = vmatprep.mubr.bf16.mxu1 %v11857_v50  ;;  %v9360_v53 = vcombine.low %v14968_v6, %v14967_v5  ;;  %v9376_v50 = vcombine.low %v14972_v2, %v14971_v0  ;;  %v14977_v6 = vld [vmem:[#allocation104_spill] sm:$0xff]  ;;  %v14978_v0 = vld [vmem:[#allocation97_spill] sm:$0xff]  ;;  %v14980_v2 = vld [vmem:[#allocation343_spill] sm:$0xff] }
 0x603   : > { %8256 = vmatmul.mubr.bf16.vlgmr.msra.gmra.mrb[24].mxu0 %v11951_v13  ;;  %8348 = vmatprep.subr.bf16.mxu1 %v9345_v10  ;;  %v14969_v10 = vld [vmem:[#allocation75_spill] sm:$0xff] }
 0x604   : > { %8306 = vmatpush1.bf16.msra.mxu0 %v9072_v14  ;;  %8337 = vmatprep.mubr.bf16.mxu0 %v11855_v17  ;;  %v9104_v14 = vcombine.low %v14966_v1, %v14964_v9  ;;  %v14976_v1 = vld [vmem:[#allocation329_spill] sm:$0xff] }
 0x605   : > { %8307 = vmatprep.subr.bf16.mxu0 %v9089_v23  ;;  %v14970_v23 = vld [vmem:[#allocation68_spill] sm:$0xff] }
 0x606   : > { %8349 = vmatpush1.bf16.msra.mxu1 %v9344_v11  ;;  %v9121_v60 = vcombine.high %v14970_v23, %v14969_v10  ;;  %v9120_v17 = vcombine.low %v14970_v23, %v14969_v10  ;;  %v14974_v11 = vld [vmem:[#allocation82_spill] sm:$0xff] }
 0x607   : > { %8350 = vmatprep.subr.bf16.mxu1 %v9361_v7  ;;  %v14975_v7 = vld [vmem:[#allocation336_spill] sm:$0xff] }
 0x608   : > { %8308 = vmatpush1.bf16.msra.mxu0 %v9088_v4  ;;  %v14973_v4 = vld [vmem:[#allocation89_spill] sm:$0xff]  ;;  %v9393_v5 = vcombine.high %v14976_v1, %v14975_v7 }
 0x609   : > { %8309 = vmatprep.subr.bf16.mxu0 %v9105_v28  ;;  %v9137_v28 = vcombine.high %v14974_v11, %v14973_v4 }
 0x60a   : > { %8351 = vmatpush1.bf16.msra.mxu1 %v9360_v53  ;;  %v9392_v53 = vcombine.low %v14976_v1, %v14975_v7  ;;  %v14982_v1 = vld [vmem:[#allocation112_spill] sm:$0xff]  ;;  %v14984_v7 = vld [vmem:[#allocation359_spill] sm:$0xff] }
 0x60b   : > { %8352 = vmatprep.subr.bf16.mxu1 %v9377_v3  ;;  %v14979_v3 = vld [vmem:[#allocation351_spill] sm:$0xff] }
 0x60c   : > { %8310 = vmatpush1.bf16.msra.mxu0 %v9104_v14  ;;  %v9136_v14 = vcombine.low %v14974_v11, %v14973_v4  ;;  %v9409_v8 = vcombine.high %v14980_v2, %v14979_v3  ;;  %v14981_v4 = vld [vmem:[#allocation120_spill] sm:$0xff] }
 0x60d   : > { %8311 = vmatprep.subr.bf16.mxu0 %v9121_v60  ;;  %v9153_v60 = vcombine.high %v14978_v0, %v14977_v6 }
 0x60e   : > { %8353 = vmatpush1.bf16.msra.mxu1 %v9376_v50  ;;  %v9408_v50 = vcombine.low %v14980_v2, %v14979_v3 }
 0x60f   : > { %8354 = vmatprep.subr.bf16.mxu1 %v9393_v5  ;;  %v14983_v5 = vld [vmem:[#allocation367_spill] sm:$0xff] }
 0x610   : > { %8312 = vmatpush1.bf16.msra.mxu0 %v9120_v17  ;;  %v9152_v17 = vcombine.low %v14978_v0, %v14977_v6  ;;  %v9425_v9 = vcombine.high %v14984_v7, %v14983_v5 }
 0x611   : > { %8313 = vmatprep.subr.bf16.mxu0 %v9137_v28  ;;  %v9169_v28 = vcombine.high %v14982_v1, %v14981_v4 }
 0x612   : > { %8355 = vmatpush1.bf16.msra.mxu1 %v9392_v53 }
 0x613   : > { %8356 = vmatprep.subr.bf16.mxu1 %v9409_v8  ;;  %v9168_v8 = vcombine.low %v14982_v1, %v14981_v4  ;;  %v14993_v1 = vld [vmem:[#allocation168_spill] sm:$0xff] }
 0x614   : > { %8314 = vmatpush1.bf16.msra.mxu0 %v9136_v14  ;;  %v8052_v11 = vpop.f32.mrb[12].mxu1  ;;  %v14994_v4 = vld [vmem:[#allocation160_spill] sm:$0xff] }
 0x615   : > { %8315 = vmatprep.subr.bf16.mxu0 %v9153_v60  ;;  %v8054_v53 = vpop.f32.mrb[13].mxu1  ;;  %v9424_v60 = vcombine.low %v14984_v7, %v14983_v5  ;;  %v14997_v7 = vld [vmem:[#allocation407_spill] sm:$0xff] }
 0x616   : > { %v8011_v10 = vpop.f32.mrb[12].mxu0  ;;  %v8056_v6 = vpop.f32.mrb[14].mxu1  ;;  %8357 = vmatpush1.bf16.msra.mxu1 %v9408_v50  ;;  %v14992_v50 = vld [vmem:[#allocation391_spill] sm:$0xff] }
 0x617   : > { %v12813_v18 = vadd.f32 %v8052_v11, %v8011_v10  ;;  %v8013_v14 = vpop.f32.mrb[13].mxu0  ;;  %v8057_v3 = vpop.f32.mrb[15].mxu1  ;;  %8358 = vmatprep.subr.bf16.mxu1 %v9425_v9  ;;  %v14985_v10 = vld [vmem:[#allocation136_spill] sm:$0xff]  ;;  %v14991_v9 = vld [vmem:[#allocation399_spill] sm:$0xff] }
 0x618   : > { %v12815_v19 = vadd.f32 %v8054_v53, %v8013_v14  ;;  %v8015_v0 = vpop.f32.mrb[14].mxu0  ;;  %8316 = vmatpush1.bf16.msra.mxu0 %v9152_v17  ;;  %v14986_v11 = vld [vmem:[#allocation128_spill] sm:$0xff]  ;;  %v14988_v14 = vld [vmem:[#allocation375_spill] sm:$0xff] }
 0x619   : > { %v8016_v2 = vpop.f32.mrb[15].mxu0  ;;  %8317 = vmatprep.subr.bf16.mxu0 %v9169_v28  ;;  %v9185_v23 = vcombine.high %v14986_v11, %v14985_v10  ;;  %v9441_v53 = vcombine.high %v14988_v14, %v14987_v24  ;;  %v9184_v0 = vcombine.low %v14986_v11, %v14985_v10  ;;  %v9440_v6 = vcombine.low %v14988_v14, %v14987_v24  ;;  %v14990_v3 = vld [vmem:[#allocation144_spill] sm:$0xff]  ;;  %v15002_v11 = vld [vmem:[#allocation423_spill] sm:$0xff] }
 0x61a   : > { %8359 = vmatpush1.bf16.msra.mxu1 %v9424_v60  ;;  %v14989_v2 = vld [vmem:[#allocation152_spill] sm:$0xff]  ;;  %v9457_v28 = vcombine.high %v14992_v50, %v14991_v9  ;;  %v9456_v60 = vcombine.low %v14992_v50, %v14991_v9 }
 0x61b   : > { %8360 = vmatprep.subr.bf16.mxu1 %v9441_v53  ;;  %v9201_v17 = vcombine.high %v14990_v3, %v14989_v2  ;;  %v14995_v53 = vld [vmem:[#allocation415_spill] sm:$0xff] }
 0x61c   : > { %8318 = vmatpush1.bf16.msra.mxu0 %v9168_v8  ;;  %v9200_v8 = vcombine.low %v14990_v3, %v14989_v2  ;;  %v14996_v5 = vmov %v14995_v53  ;;  %v9473_v10 = vcombine.high %v14997_v7, %v14995_v53  ;;  %v14998_v2 = vld [vmem:[#allocation184_spill] sm:$0xff] }
 0x61d   : > { %8319 = vmatprep.subr.bf16.mxu0 %v9185_v23  ;;  %v9217_v23 = vcombine.high %v14994_v4, %v14993_v1  ;;  %v14999_v3 = vld [vmem:[#allocation176_spill] sm:$0xff] }
 0x61e   : > { %8361 = vmatpush1.bf16.msra.mxu1 %v9440_v6  ;;  %v9472_v6 = vcombine.low %v14997_v7, %v14996_v5  ;;  %v15003_v53 = vld [vmem:[#allocation200_spill] sm:$0xff]  ;;  %v15007_v5 = vld [vmem:[#allocation439_spill] sm:$0xff] }
 0x61f   : > { %8362 = vmatprep.subr.bf16.mxu1 %v9457_v28  ;;  %v15000_v28 = vld [vmem:[#allocation431_spill] sm:$0xff] }
 0x620   : > { %8320 = vmatpush1.bf16.msra.mxu0 %v9184_v0  ;;  %v9216_v0 = vcombine.low %v14994_v4, %v14993_v1  ;;  %v15001_v9 = vmov %v15000_v28  ;;  %v9489_v14 = vcombine.high %v15002_v11, %v15000_v28  ;;  %v15004_v1 = vmov %v15003_v53  ;;  %v15005_v4 = vld [vmem:[#allocation192_spill] sm:$0xff] }
 0x621   : > { %8321 = vmatprep.subr.bf16.mxu0 %v9201_v17  ;;  %v9233_v17 = vcombine.high %v14999_v3, %v14998_v2  ;;  %v15008_v28 = vld [vmem:[#allocation216_spill] sm:$0xff] }
 0x622   : > { %8363 = vmatpush1.bf16.msra.mxu1 %v9456_v60  ;;  %v9488_v60 = vcombine.low %v15002_v11, %v15001_v9  ;;  %v15012_v9 = vld [vmem:[#allocation455_spill] sm:$0xff] }
 0x623   : > { %8364 = vmatprep.subr.bf16.mxu1 %v9473_v10  ;;  %v15006_v10 = vld [vmem:[#allocation447_spill] sm:$0xff] }
 0x624   : > { %8322 = vmatpush1.bf16.msra.mxu0 %v9200_v8  ;;  %v9232_v8 = vcombine.low %v14999_v3, %v14998_v2  ;;  %v9505_v7 = vcombine.high %v15007_v5, %v15006_v10  ;;  %v15009_v2 = vmov %v15008_v28  ;;  %v15010_v3 = vld [vmem:[#allocation208_spill] sm:$0xff] }
 0x625   : > { %8323 = vmatprep.subr.bf16.mxu0 %v9217_v23  ;;  %v9249_v23 = vcombine.high %v15005_v4, %v15003_v53  ;;  %v15013_v53 = vld [vmem:[#allocation232_spill] sm:$0xff] }
 0x626   : > { %8365 = vmatpush1.bf16.msra.mxu1 %v9472_v6  ;;  %v9504_v6 = vcombine.low %v15007_v5, %v15006_v10  ;;  %v15017_v5 = vld [vmem:[#allocation471_spill] sm:$0xff] }
 0x627   : > { %8366 = vmatprep.subr.bf16.mxu1 %v9489_v14  ;;  %v15011_v14 = vld [vmem:[#allocation463_spill] sm:$0xff] }
 0x628   : > { %8324 = vmatpush1.bf16.msra.mxu0 %v9216_v0  ;;  %v9248_v0 = vcombine.low %v15005_v4, %v15004_v1  ;;  %v9521_v11 = vcombine.high %v15012_v9, %v15011_v14  ;;  %v15014_v1 = vmov %v15013_v53  ;;  %v15015_v4 = vld [vmem:[#allocation224_spill] sm:$0xff] }
 0x629   : > { %8325 = vmatprep.subr.bf16.mxu0 %v9233_v17  ;;  %v9265_v17 = vcombine.high %v15010_v3, %v15008_v28  ;;  %v15018_v28 = vld [vmem:[#allocation248_spill] sm:$0xff] }
 0x62a   : > { %8367 = vmatpush1.bf16.msra.mxu1 %v9488_v60  ;;  %v9520_v60 = vcombine.low %v15012_v9, %v15011_v14  ;;  %v15022_v9 = vld [vmem:[#allocation487_spill] sm:$0xff] }
 0x62b   : > { %8368 = vmatprep.subr.bf16.mxu1 %v9505_v7  ;;  %v15016_v7 = vld [vmem:[#allocation479_spill] sm:$0xff] }
 0x62c   : > { %8326 = vmatpush1.bf16.msra.mxu0 %v9232_v8  ;;  %v9264_v8 = vcombine.low %v15010_v3, %v15009_v2  ;;  %v9537_v10 = vcombine.high %v15017_v5, %v15016_v7  ;;  %v15019_v2 = vmov %v15018_v28  ;;  %v15021_v3 = vld [vmem:[#allocation495_spill] sm:$0xff] }
 0x62d   : > { %8327 = vmatprep.subr.bf16.mxu0 %v9249_v23  ;;  %v9281_v23 = vcombine.high %v15015_v4, %v15013_v53  ;;  %v9553_v53 = vcombine.high %v15022_v9, %v15021_v3 }
 0x62e   : > { %8369 = vmatpush1.bf16.msra.mxu1 %v9504_v6  ;;  %v9536_v6 = vcombine.low %v15017_v5, %v15016_v7  ;;  %v15026_v5 = vld [vmem:[#allocation503_spill] sm:$0xff] }
 0x62f   : > { %8370 = vmatprep.subr.bf16.mxu1 %v9521_v11 }
 0x630   : > { %8328 = vmatpush1.bf16.msra.mxu0 %v9248_v0  ;;  %v9280_v0 = vcombine.low %v15015_v4, %v15014_v1  ;;  %v15023_v1 = vld [vmem:[#allocation264_spill] sm:$0xff] }
 0x631   : > { %8329 = vmatprep.subr.bf16.mxu0 %v9265_v17  ;;  %v15020_v17 = vld [vmem:[#allocation240_spill] sm:$0xff] }
 0x632   : > { %8371 = vmatpush1.bf16.msra.mxu1 %v9520_v60  ;;  %v9297_v11 = vcombine.high %v15020_v17, %v15018_v28  ;;  %v9552_v60 = vcombine.low %v15022_v9, %v15021_v3  ;;  %v15024_v4 = vld [vmem:[#allocation256_spill] sm:$0xff]  ;;  %v5155_v28 = vld [vmem:[%s12896_s14 + $0x20] sm:$0xff] }
 0x633   : > { %8372 = vmatprep.subr.bf16.mxu1 %v9537_v10  ;;  %v15025_v10 = vld [vmem:[#allocation511_spill] sm:$0xff]  ;;  %v5159_v3 = vld [vmem:[%s12896_s14 + $0x40] sm:$0xff] }
 0x634   : > { %8330 = vmatpush1.bf16.msra.mxu0 %v9264_v8  ;;  %v9296_v8 = vcombine.low %v15020_v17, %v15019_v2  ;;  %v9569_v7 = vcombine.high %v15026_v5, %v15025_v10 }
 0x635   : > { %8331 = vmatprep.subr.bf16.mxu0 %v9281_v23  ;;  %v9313_v23 = vcombine.high %v15024_v4, %v15023_v1 }
 0x636   : > { %8373 = vmatpush1.bf16.msra.mxu1 %v9536_v6  ;;  %v9568_v6 = vcombine.low %v15026_v5, %v15025_v10 }
 0x637   : > { %8374 = vmatprep.subr.bf16.mxu1 %v9553_v53  ;;  %v5151_v53 = vld [vmem:[%s12896_s14] sm:$0xff] }
 0x638   : > { %8332 = vmatpush1.bf16.msra.mxu0 %v9280_v0  ;;  %v9312_v0 = vcombine.low %v15024_v4, %v15023_v1 }
 0x639   : > { %8333 = vmatprep.subr.bf16.mxu0 %v9297_v11  ;;  %v5156_v11 = vld [vmem:[%s12896_s14 + $0x28] sm:$0xff] }
 0x63a   : > { %8375 = vmatpush1.bf16.msra.mxu1 %v9552_v60  ;;  %v8392_v60 = vadd.f32 %v12679_v22, %v5156_v11 }
 0x63b   : > { %8376 = vmatprep.subr.bf16.mxu1 %v9569_v7  ;;  %v8391_v7 = vadd.f32 %v12677_v21, %v5155_v28  ;;  %v5160_v28 = vld [vmem:[%s12896_s14 + $0x48] sm:$0xff] }
 0x63c   : > { %8334 = vmatpush1.bf16.msra.mxu0 %v9296_v8  ;;  %v5152_v8 = vld [vmem:[%s12896_s14 + $0x8] sm:$0xff] }
 0x63d   : > { %8335 = vmatprep.subr.bf16.mxu0 %v9313_v23  ;;  %v8419_v23 = vmul.f32 0.5, %v8391_v7 }
 0x63e   : > { %8377 = vmatpush1.bf16.msra.mxu1 %v9568_v6 }
 0x63f   : > { %9958 = vtanh.f32 %v8419_v23 }
 0x640   : > { %8336 = vmatpush1.bf16.msra.mxu0 %v9312_v0  ;;  %v8420_v0 = vmul.f32 0.5, %v8392_v60 }
 0x641   : > { %8379 = vmatmul.mubr.bf16.vlgmr.msra.gmra.mrb[28].mxu1 %v11955_v59  ;;  %v8388_v59 = vadd.f32 %v12407_v16, %v5152_v8 }
 0x642   : > { %9960 = vtanh.f32 %v8420_v0 }
 0x643   : > { %8338 = vmatmul.mubr.bf16.vlgmr.msra.gmra.mrb[28].mxu0 %v11951_v13  ;;  %v8387_v13 = vadd.f32 %v12405_v15, %v5151_v53  ;;  %v8404_v1 = vmul.f32 0.5, %v8388_v59 }
 0x645   : > { %v8403_v6 = vmul.f32 0.5, %v8387_v13 }
 0x647   : > { %9962 = vtanh.f32 %v8403_v6 }
 0x648   : > { %9964 = vtanh.f32 %v8404_v1 }
 0x649   : > { %v9959_v60 = vpop.eup %9958 }
 0x64a   : > { %v8427_v23 = vadd.f32 1.0, %v9959_v60  ;;  %v5154_v60 = vld [vmem:[%s12896_s14 + $0x18] sm:$0xff] }
 0x64c   : > { %v9961_v13 = vpop.eup %9960 }
 0x64d   : > { %v8428_v0 = vadd.f32 1.0, %v9961_v13 }
 0x64f   : > { %v8432_v6 = vmul.f32 0.5, %v8428_v0 }
 0x651   : > { %v9963_v59 = vpop.eup %9962 }
 0x652   : > { %v9965_v1 = vpop.eup %9964 }
 0x654   : > { %v8134_v4 = vpop.f32.mrb[16].mxu1 }
 0x655   : > { %v8136_v22 = vpop.f32.mrb[17].mxu1 }
 0x656   : > { %v8093_v2 = vpop.f32.mrb[16].mxu0  ;;  %v8138_v15 = vpop.f32.mrb[18].mxu1 }
 0x657   : > { %v8135_v5 = vadd.f32 %v8134_v4, %v8093_v2  ;;  %v8095_v21 = vpop.f32.mrb[17].mxu0  ;;  %v8139_v8 = vpop.f32.mrb[19].mxu1  ;;  %v8411_v4 = vadd.f32 1.0, %v9963_v59  ;;  %v8412_v2 = vadd.f32 1.0, %v9965_v1  ;;  %v8456_v15 = vmul.f32 %v10162_v12, %v8432_v6 }
 0x658   : > { %v8137_v11 = vadd.f32 %v8136_v22, %v8095_v21  ;;  %v8097_v9 = vpop.f32.mrb[18].mxu0  ;;  %v5158_v8 = vld [vmem:[%s12896_s14 + $0x38] sm:$0xff] }
 0x659   : > { %v8395_v53 = vadd.f32 %v8135_v5, %v5159_v3  ;;  %v8098_v16 = vpop.f32.mrb[19].mxu0  ;;  %v8431_v9 = vmul.f32 0.5, %v8427_v23  ;;  %v8415_v5 = vmul.f32 0.5, %v8411_v4  ;;  %v8416_v21 = vmul.f32 0.5, %v8412_v2 }
 0x65a   : > { %v8396_v7 = vadd.f32 %v8137_v11, %v5160_v28  ;;  %v5157_v16 = vld [vmem:[%s12896_s14 + $0x30] sm:$0xff]  ;;  %v8394_v59 = vadd.f32 %v12815_v19, %v5158_v8  ;;  %v8390_v23 = vadd.f32 %v12543_v51, %v5154_v60 }
 0x65b   : > { %9966 = vtanh.f32 %v8395_v53  ;;  %v8455_v22 = vmul.f32 %v10166_v55, %v8431_v9  ;;  %v8393_v13 = vadd.f32 %v12813_v18, %v5157_v16 }
 0x65c   : > { %9968 = vtanh.f32 %v8396_v7  ;;  %v5153_v7 = vld [vmem:[%s12896_s14 + $0x10] sm:$0xff]  ;;  %v8422_v4 = vmul.f32 0.5, %v8394_v59  ;;  %v8406_v9 = vmul.f32 0.5, %v8390_v23 }
 0x65d   : > { %v8389_v1 = vadd.f32 %v12541_v20, %v5153_v7  ;;  %v8421_v0 = vmul.f32 0.5, %v8393_v13 }
 0x65f   : > { %v8405_v2 = vmul.f32 0.5, %v8389_v1  ;;  %9970 = vtanh.f32 %v8421_v0 }
 0x660   : > { %9972 = vtanh.f32 %v8422_v4 }
 0x661   : > { %9974 = vtanh.f32 %v8405_v2 }
 0x662   : > { %9976 = vtanh.f32 %v8406_v9 }
 0x665   : > { %v9967_v3 = vpop.eup %9966 }
 0x666   : > { %v9969_v28 = vpop.eup %9968  ;;  %v8459_v11 = vmul.f32 %v9967_v3, %v8415_v5  ;;  %v5161_v5 = vld [vmem:[%s12896_s14 + $0x50] sm:$0xff] }
 0x667   : > { %v8460_v53 = vmul.f32 %v9969_v28, %v8416_v21  ;;  %v5162_v28 = vld [vmem:[%s12896_s14 + $0x58] sm:$0xff] }
 0x668   : > { %v12910_v55 = vadd.f32 %v8459_v11, %v8455_v22  }
 0x669   : > { %v12912_v12 = vadd.f32 %v8460_v53, %v8456_v15   ;;  %v9971_v8 = vpop.eup %9970 }
 0x66a   : > { %v9973_v7 = vpop.eup %9972  ;;  %v8429_v59 = vadd.f32 1.0, %v9971_v8 }
 0x66b   : > { %v9975_v60 = vpop.eup %9974  ;;  %v8430_v1 = vadd.f32 1.0, %v9973_v7 }
 0x66c   : > { %v9977_v13 = vpop.eup %9976  ;;  %v8413_v23 = vadd.f32 1.0, %v9975_v60  ;;  %v8433_v4 = vmul.f32 0.5, %v8429_v59 }
 0x66d   : > { %v8414_v0 = vadd.f32 1.0, %v9977_v13  ;;  %v8434_v2 = vmul.f32 0.5, %v8430_v1 }
 0x66e   : > { %v8417_v9 = vmul.f32 0.5, %v8413_v23 }
 0x694   : > { %v8216_v3 = vpop.f32.mrb[20].mxu1 }
 0x695   : > { %v8218_v19 = vpop.f32.mrb[21].mxu1 }
 0x696   : > { %v8175_v6 = vpop.f32.mrb[20].mxu0  ;;  %v8220_v20 = vpop.f32.mrb[22].mxu1 }
 0x697   : > { %v8217_v21 = vadd.f32 %v8216_v3, %v8175_v6  ;;  %v8177_v18 = vpop.f32.mrb[21].mxu0  ;;  %v8221_v53 = vpop.f32.mrb[23].mxu1 }
 0x698   : > { %v8219_v22 = vadd.f32 %v8218_v19, %v8177_v18  ;;  %v8179_v11 = vpop.f32.mrb[22].mxu0  ;;  %v5164_v53 = vld [vmem:[%s12896_s14 + $0x68] sm:$0xff] }
 0x699   : > { %v8397_v15 = vadd.f32 %v8217_v21, %v5161_v5  ;;  %v8180_v51 = vpop.f32.mrb[23].mxu0  ;;  %v8418_v5 = vmul.f32 0.5, %v8414_v0  ;;  %v8457_v21 = vmul.f32 %v10158_v49, %v8433_v4  ;;  %v5163_v11 = vld [vmem:[%s12896_s14 + $0x60] sm:$0xff] }
 0x69a   : > { %v8398_v16 = vadd.f32 %v8219_v22, %v5162_v28  ;;  %v8458_v28 = vmul.f32 %v10154_v37, %v8434_v2 }
 0x69b   : > { %9978 = vtanh.f32 %v8397_v15 }
 0x69c   : > { %9980 = vtanh.f32 %v8398_v16 }
 0x6a5   : > { %v9979_v6 = vpop.eup %9978 }
 0x6a6   : > { %v9981_v3 = vpop.eup %9980  ;;  %v8461_v18 = vmul.f32 %v9979_v6, %v8417_v9 }
 0x6a7   : > { %v8462_v19 = vmul.f32 %v9981_v3, %v8418_v5 }
 0x6a8   : > { %v12926_v49 = vadd.f32 %v8461_v18, %v8457_v21  }
 0x6a9   : > { %v8466_v37 = vadd.f32 %v8462_v19, %v8458_v28  }
 0x6d4   : > { %v8298_v20 = vpop.f32.mrb[24].mxu1 }
 0x6d5   : > { %v8300_v16 = vpop.f32.mrb[25].mxu1 }
 0x6d6   : > { %v8257_v22 = vpop.f32.mrb[24].mxu0  ;;  %v8302_v60 = vpop.f32.mrb[26].mxu1 }
 0x6d7   : > { %v8299_v15 = vadd.f32 %v8298_v20, %v8257_v22  ;;  %v8259_v51 = vpop.f32.mrb[25].mxu0  ;;  %v8303_v1 = vpop.f32.mrb[27].mxu1  ;;  %v5165_v20 = vld [vmem:[%s12896_s14 + $0x70] sm:$0xff] }
 0x6d8   : > { %v8301_v8 = vadd.f32 %v8300_v16, %v8259_v51  ;;  %v8261_v7 = vpop.f32.mrb[26].mxu0  ;;  %v5166_v16 = vld [vmem:[%s12896_s14 + $0x78] sm:$0xff] }
 0x6d9   : > { %v8399_v13 = vadd.f32 %v8299_v15, %v5163_v11  ;;  %v8262_v59 = vpop.f32.mrb[27].mxu0 }
 0x6da   : > { %v8400_v23 = vadd.f32 %v8301_v8, %v5164_v53 }
 0x6db   : > { %v8439_v0 = vmul.f32 0.5, %v8399_v13 }
 0x6dc   : > { %v8440_v4 = vmul.f32 0.5, %v8400_v23 }
 0x6dd   : > { %9982 = vtanh.f32 %v8439_v0 }
 0x6de   : > { %9984 = vtanh.f32 %v8440_v4 }
 0x6df   : > { %9986 = vtanh.f32 %v12910_v55 }
 0x6e0   : > { %9988 = vtanh.f32 %v12912_v12 }
 0x6e7   : > { %v9983_v2 = vpop.eup %9982 }
 0x6e8   : > { %v9985_v9 = vpop.eup %9984  ;;  %v8447_v6 = vadd.f32 1.0, %v9983_v2 }
 0x6e9   : > { %v8448_v5 = vadd.f32 1.0, %v9985_v9  ;;  %v9987_v21 = vpop.eup %9986 }
 0x6ea   : > { %v8451_v3 = vmul.f32 0.5, %v8447_v6  ;;  %v9989_v28 = vpop.eup %9988 }
 0x6eb   : > { %v8452_v18 = vmul.f32 0.5, %v8448_v5 }
 0x6ec   : > { %v8471_v19 = vmul.f32 %v9987_v21, %v8451_v3  }
 0x6ed   : > { %v8472_v22 = vmul.f32 %v9989_v28, %v8452_v18  }
 0x6ee   :  { %8475 = vst [vmem:[#allocation11] sm:$0xff] (%p5133_p4), %v8471_v19 }
 0x6ef   :  { %8476 = vst [vmem:[#allocation11 + $0x8] sm:$0xff] (%p5133_p4), %v8472_v22 }
 0x714   : > { %v8380_v15 = vpop.f32.mrb[28].mxu1 }
 0x715   : > { %v8382_v8 = vpop.f32.mrb[29].mxu1 }
 0x716   : > { %v8339_v11 = vpop.f32.mrb[28].mxu0  ;;  %v8384_v13 = vpop.f32.mrb[30].mxu1 }
 0x717   : > { %v8381_v51 = vadd.f32 %v8380_v15, %v8339_v11  ;;  %v8341_v53 = vpop.f32.mrb[29].mxu0  ;;  %v8385_v23 = vpop.f32.mrb[31].mxu1 }
 0x718   : > { %v8383_v7 = vadd.f32 %v8382_v8, %v8341_v53  ;;  %v8343_v60 = vpop.f32.mrb[30].mxu0 }
 0x719   : > { %v8401_v59 = vadd.f32 %v8381_v51, %v5165_v20  ;;  %v8344_v1 = vpop.f32.mrb[31].mxu0  ;;  %v15029_v60 = vmov %v8472_v22 }
 0x71a   : > { %v8402_v0 = vadd.f32 %v8383_v7, %v5166_v16 }
 0x71b   : > { %v8441_v4 = vmul.f32 0.5, %v8401_v59 }
 0x71c   : > { %v8442_v2 = vmul.f32 0.5, %v8402_v0 }
 0x71d   : > { %9990 = vtanh.f32 %v8441_v4 }
 0x71e   : > { %9992 = vtanh.f32 %v8442_v2 }
 0x71f   : > { %9994 = vtanh.f32 %v12926_v49 }
 0x720   : > { %9996 = vtanh.f32 %v8466_v37 }
 0x727   : > { %v9991_v9 = vpop.eup %9990 }
 0x728   : > { %v9993_v6 = vpop.eup %9992  ;;  %v8449_v5 = vadd.f32 1.0, %v9991_v9 }
 0x729   : > { %v8450_v3 = vadd.f32 1.0, %v9993_v6  ;;  %v9995_v18 = vpop.eup %9994  ;;  %5135 = sbr.rel (!%p5133_p4) target bundleno = 1084 (0x43c), region = 60 }
 0x72a   : > { %v8453_v21 = vmul.f32 0.5, %v8449_v5  ;;  %v9997_v11 = vpop.eup %9996 }
 0x72b   : > { %v8454_v28 = vmul.f32 0.5, %v8450_v3 }
 0x72c   : > { %v8473_v15 = vmul.f32 %v9995_v18, %v8453_v21  }
 0x72d   : > { %v8474_v20 = vmul.f32 %v9997_v11, %v8454_v28   ;;  %v15030_v28 = vmov %v8471_v19 }
 0x72e   : > { %v15028_v53 = vmov %v8473_v15  ;;  %8477 = vst [vmem:[#allocation11 + $0x10] sm:$0xff] (%p5133_p4), %v8473_v15 }
 0x72f   : > { %v15027_v51 = vmov %v8474_v20  ;;  %8478 = vst [vmem:[#allocation11 + $0x18] sm:$0xff] (%p5133_p4), %v8474_v20 }
 0x730   :  { %10097 = shalt.err (!%p10094_p9)
}
 0x731   :  { %s10098_s20 = scalar_lea.hbm %s12973_s4, 512 }
 0x732   :  { %p10099_p10 = scmp.ne.s32.totalorder %s12973_s4, %s10098_s20  ;;  %p10102_p11 = scmp.lt.u32.totalorder %s10098_s20, %s12973_s4 }
 0x734   :  { %p10104_p12 = pnand %p10102_p11, %p10099_p10 }
 0x736   :  { %10107 = shalt.err (!%p10104_p12)
}
 0x737   :  { %8488 = dma.vmem_to_hbm [thread:$0]  %s8486_s16, 512, %s12973_s4, [#allocation5]  }
 0x738   :  { %10150 = dma.done.wait [#allocation5], 512  }
 0x739   :  { %10151 = vsyncadd [#allocation5], 4294966784 }
 0x73a   :  { %8492 = vsyncpa [#allocation4], 1 }
 0x73b   :  { %8493 = vsyncpa [#allocation7], 1 }
 0x73c   :  { %8494 = vsyncpa [#allocation10], 1 }
 0x73d   :  { %8495 = vsyncpa [#allocation5], 1 }

</bundles_post_ra>
